<compile_context>
chip_gen: v6e
topology: v6e:2x2x1
jax: 0.10.0
libtpu: 0.0.40
codegen_flags: <defaults>
</compile_context>

<pallas_src>
import math
import numpy as np
import jax
import jax.numpy as jnp
from jax.experimental import pallas as pl
from jax.experimental.pallas import tpu as pltpu

# ---- configuration (ImplicitNet(d_in=3, dims=[64,64,64,64], skip_in=(2,),
#                                  geometric_init=True, radius_init=1, beta=100, multires=6)) ----
D_IN = 3
HIDDEN = [64, 64, 64, 64]
SKIP_IN = (2,)
MULTIRES = 6
BETA = 100.0
RADIUS_INIT = 1.0
EMB_DIM = D_IN + 2 * D_IN * MULTIRES      # 39 (identity + sin/cos per frequency)
CURRENT_SCALE = 3                          # equivalent of net.set_mask(3)

DIMS = [EMB_DIM] + HIDDEN + [1]
NUM_LAYERS = len(DIMS)
INV_SQRT2 = 1.0 / math.sqrt(2.0)
SOFTPLUS_THRESHOLD = 20.0                  # PyTorch nn.Softplus default threshold

H_SKIP = DIMS[2] - DIMS[0]                 # hidden width entering the skip concat (25)
N_TRIG = 2 * D_IN * MULTIRES               # 36 sin/cos features
PE_ROWS = 40                               # 36 trig features padded to 40 (mult of 8)
HID = 64
PACK_OUT = 2 * HID                         # 128 packed outputs [layer-0 | layer-2 skip]


# ------------------------------ parameter init ------------------------------
def init_params(key):
    """Deterministic re-implementation of the geometric init (weights stored as (in, out))."""
    params = []
    for layer in range(NUM_LAYERS - 1):
        in_dim = DIMS[layer]
        if layer + 1 in SKIP_IN:
            out_dim = DIMS[layer + 1] - DIMS[0]
        else:
            out_dim = DIMS[layer + 1]
        key, wk = jax.random.split(key)
        if layer == NUM_LAYERS - 2:
            mean = math.sqrt(math.pi) / math.sqrt(in_dim)
            w = mean + 1e-4 * jax.random.normal(wk, (in_dim, out_dim), jnp.float32)
            b = jnp.full((1, out_dim), -RADIUS_INIT, jnp.float32)
        elif layer == 0:
            std = math.sqrt(2.0) / math.sqrt(out_dim)
            w = jnp.zeros((in_dim, out_dim), jnp.float32)
            w = w.at[:3, :].set(std * jax.random.normal(wk, (3, out_dim), jnp.float32))
            b = jnp.zeros((1, out_dim), jnp.float32)
        elif layer in SKIP_IN:
            std = math.sqrt(2.0) / math.sqrt(out_dim)
            w = std * jax.random.normal(wk, (in_dim, out_dim), jnp.float32)
            w = w.at[-(DIMS[0] - 3):, :].set(0.0)
            b = jnp.zeros((1, out_dim), jnp.float32)
        else:
            std = math.sqrt(2.0) / math.sqrt(out_dim)
            w = std * jax.random.normal(wk, (in_dim, out_dim), jnp.float32)
            b = jnp.zeros((1, out_dim), jnp.float32)
        params.append((w, b))
    return params


def pe_constants():
    """S (3, 36) and phase (1, 36) so that sin(S^T x + phase) gives
    [sin(2^0 x), cos(2^0 x), sin(2^1 x), cos(2^1 x), ...] (NeRF embedder order)."""
    S = np.zeros((D_IN, N_TRIG), np.float32)
    P = np.zeros((1, N_TRIG), np.float32)
    for i in range(MULTIRES):
        f = float(2.0 ** i)
        for j in range(D_IN):
            S[j, 2 * D_IN * i + j] = f                       # sin slot
            S[j, 2 * D_IN * i + D_IN + j] = f                # cos slot
            P[0, 2 * D_IN * i + D_IN + j] = np.pi / 2.0      # cos(z) = sin(z + pi/2)
    return jnp.asarray(S), jnp.asarray(P)


# --------------------------------- kernel ----------------------------------
def _softplus(z, interior_dtype=jnp.float32):
    """PyTorch Softplus(beta=100): (1/beta)*log(1+exp(beta*z)), linear above threshold.
    exp/log (the EUP-heavy part) optionally run in bf16 (v6e/v7x EUP bf16 path);
    the compare, select and linear branch stay in f32.  Interior value is bounded
    by ~0.2, so bf16 error < ~1e-3 (well inside the bf16 path tolerance)."""
    t = BETA * z                                                    # f32
    safe = jnp.minimum(t, SOFTPLUS_THRESHOLD).astype(interior_dtype)
    interior = jnp.log(1.0 + jnp.exp(safe)).astype(jnp.float32) * (1.0 / BETA)
    return jnp.where(t > SOFTPLUS_THRESHOLD, z, interior)


def make_kernel(compute_dtype, eup_dtype):
    cd = compute_dtype
    f32 = jnp.float32

    def kernel(x_ref, wpack_ref, whid_ref, c_ref, out_ref):
        # x_ref: (3, TN) f32 -- points on the 128-lane axis.
        x0 = x_ref[0:1, :]                                     # (1, TN)
        x1 = x_ref[1:2, :]
        x2 = x_ref[2:3, :]

        # --- positional-encoding angles via VPU outer-product FMAs (no K=3 matmul) ---
        ang = (c_ref[0:PE_ROWS, 0:1]
               + c_ref[0:PE_ROWS, 1:2] * x0
               + c_ref[0:PE_ROWS, 2:3] * x1
               + c_ref[0:PE_ROWS, 3:4] * x2)                   # (40, TN); rows 36:40 == 0
        trig = jnp.sin(ang)                                    # (40, TN) f32, EUP

        # --- identity-input contributions (mask & 1/sqrt(2) folded into the columns):
        #     rows 0:64   -> layer-0 preactivation part
        #     rows 64:128 -> layer-2 skip-input part
        ident = (c_ref[:, 4:5] * x0
                 + c_ref[:, 5:6] * x1
                 + c_ref[:, 6:7] * x2)                         # (128, TN) f32

        # --- packed trig matmul: (128, 40) @ (40, TN) -> 128 lane-dense output rows ---
        mm1 = jnp.dot(wpack_ref[...], trig.astype(cd),
                      preferred_element_type=f32) + ident      # (128, TN)

        h0 = _softplus(mm1[0:HID, :] + c_ref[0:HID, 7:8], eup_dtype)      # layer 0
        skip2 = mm1[HID:PACK_OUT, :]                           # (emb*mask) @ w2_emb / sqrt(2)

        # --- layer 1 (true width 25, zero-padded rows; padding is killed below by the
        #     zero columns of the padded w2h^T) ---
        h1 = _softplus(jnp.dot(whid_ref[0:64, :], h0.astype(cd),
                               preferred_element_type=f32) + c_ref[0:HID, 8:9], eup_dtype)

        # --- layer 2 (skip): cat([h1, emb], -1)/sqrt(2) folded into w2h^T/sqrt(2) + skip2 ---
        h2 = _softplus(jnp.dot(whid_ref[64:128, :], h1.astype(cd),
                               preferred_element_type=f32) + skip2 + c_ref[0:HID, 9:10],
                       eup_dtype)

        # --- layer 3 ---
        h3 = _softplus(jnp.dot(whid_ref[128:192, :], h2.astype(cd),
                               preferred_element_type=f32) + c_ref[0:HID, 10:11], eup_dtype)

        # --- layer 4 (output): (1, 64) @ (64, TN) -> lane-dense (1, TN); no RHS transpose ---
        row = jnp.dot(whid_ref[192:193, :], h3.astype(cd), preferred_element_type=f32)
        out_ref[...] = row + c_ref[0:1, 11:12]                 # + output bias

    return kernel


# ---------------------------- weight packing (wrapper glue) -----------------
def pack_params(params, mask, compute_dtype):
    (w0, b0), (w1, b1), (w2, b2), (w3, b3), (w4, b4) = params
    m_id = mask[:3].reshape(3, 1)          # identity-feature mask entries
    m_tr = mask[3:].reshape(N_TRIG, 1)     # trig-feature mask entries

    w0i = w0[:3] * m_id                    # (3, 64)   layer-0 identity path
    w0t = w0[3:] * m_tr                    # (36, 64)  layer-0 trig path

    w2h = w2[:H_SKIP] * INV_SQRT2          # (25, 64)  layer-2 hidden part (pre-scaled)
    w2e = w2[H_SKIP:]                      # (39, 64)  layer-2 embedded-input part
    w2i = w2e[:3] * m_id * INV_SQRT2       # (3, 64)
    w2t = w2e[3:] * m_tr * INV_SQRT2       # (36, 64)

    # packed trig weights, transposed: rows = [layer-0 outs | layer-2-skip outs],
    # cols = 36 trig features padded to 40  ->  (128, 40)
    wpackT = jnp.zeros((PACK_OUT, PE_ROWS), jnp.float32)
    wpackT = wpackT.at[0:HID, 0:N_TRIG].set(w0t.T)
    wpackT = wpackT.at[HID:PACK_OUT, 0:N_TRIG].set(w2t.T)
    wpackT = wpackT.astype(compute_dtype)

    # hidden-layer weight slab, transposed (outputs on sublanes, inputs on lanes) -> (200, 64)
    whidT = jnp.zeros((200, HID), jnp.float32)
    whidT = whidT.at[0:H_SKIP, :].set(w1.T)            # layer 1 (25 output rows, rest zero)
    whidT = whidT.at[64:128, 0:H_SKIP].set(w2h.T)      # layer 2 hidden part (zero cols kill the
    #                                                     softplus(0) padding rows of h1)
    whidT = whidT.at[128:192, :].set(w3.T)             # layer 3
    whidT = whidT.at[192, :].set(w4[:, 0])             # layer 4 as a (1, 64) row
    whidT = whidT.astype(compute_dtype)

    # f32 constants: PE tables, identity-path weight columns, bias columns -> (128, 16)
    S, P = pe_constants()
    c = jnp.zeros((128, 16), jnp.float32)
    c = c.at[0:N_TRIG, 0].set(P[0])                    # phase column
    c = c.at[0:N_TRIG, 1].set(S[0])                    # S columns (per x coordinate)
    c = c.at[0:N_TRIG, 2].set(S[1])
    c = c.at[0:N_TRIG, 3].set(S[2])
    c = c.at[0:HID, 4].set(w0i[0]); c = c.at[HID:PACK_OUT, 4].set(w2i[0])
    c = c.at[0:HID, 5].set(w0i[1]); c = c.at[HID:PACK_OUT, 5].set(w2i[1])
    c = c.at[0:HID, 6].set(w0i[2]); c = c.at[HID:PACK_OUT, 6].set(w2i[2])
    c = c.at[0:HID, 7].set(b0[0])
    c = c.at[0:H_SKIP, 8].set(b1[0])
    c = c.at[0:HID, 9].set(b2[0])
    c = c.at[0:HID, 10].set(b3[0])
    c = c.at[0, 11].set(b4[0, 0])
    return wpackT, whidT, c


# --------------------------------- wrapper ----------------------------------
def implicit_net_forward(x, params, mask, tile_n=2048, compute_dtype=jnp.bfloat16,
                         vmem_limit_bytes=None):
    """x: (N, 3) points.  tile_n: point tile per grid step (sweep 512-4096; keep the grid
    >= 4 steps on v7x so each TensorCore pipelines >= 2 steps).  compute_dtype: matmul
    input dtype (bf16 = MXU-native on v6e/v7x); on v5e use jnp.float32 (no bf16 VPU/EUP).
    vmem_limit_bytes: optional override of the scoped-VMEM default for very large tiles."""
    N = x.shape[0]
    # Demo keeps N a multiple of the point tile; a real workload would pad the tail
    # tile with zeros and slice the output back to N.
    assert N % tile_n == 0 and tile_n % 128 == 0
    num_tiles = N // tile_n

    wpackT, whidT, cconst = pack_params(params, mask, compute_dtype)
    eup_dtype = (jnp.bfloat16 if jnp.dtype(compute_dtype) == jnp.dtype(jnp.bfloat16)
                 else jnp.float32)
    kernel = make_kernel(compute_dtype, eup_dtype)

    xT = x.T                               # (3, N): points on the 128-lane axis

    cp_kwargs = dict(dimension_semantics=("parallel",))
    if vmem_limit_bytes is not None:
        cp_kwargs["vmem_limit_bytes"] = vmem_limit_bytes

    out = pl.pallas_call(
        kernel,
        out_shape=jax.ShapeDtypeStruct((1, N), jnp.float32),
        grid=(num_tiles,),
        in_specs=[
            pl.BlockSpec((D_IN, tile_n), lambda i: (0, i)),
            pl.BlockSpec(wpackT.shape, lambda i: (0, 0)),
            pl.BlockSpec(whidT.shape, lambda i: (0, 0)),
            pl.BlockSpec(cconst.shape, lambda i: (0, 0)),
        ],
        out_specs=pl.BlockSpec((1, tile_n), lambda i: (0, i)),
        compiler_params=pltpu.CompilerParams(**cp_kwargs),
    )(xT, wpackT, whidT, cconst)

    return out.reshape(N, 1)


# ---------------------------- pure-JAX reference ----------------------------
def reference_forward(x, params, mask):
    feats = [x]
    for i in range(MULTIRES):
        f = 2.0 ** i
        feats.append(jnp.sin(f * x))
        feats.append(jnp.cos(f * x))
    emb = jnp.concatenate(feats, axis=-1) * mask[None, :]
    h = emb
    for layer in range(NUM_LAYERS - 1):
        w, b = params[layer]
        if layer in SKIP_IN:
            h = jnp.concatenate([h, emb], axis=-1) / np.sqrt(2)
        h = h @ w + b
        if layer < NUM_LAYERS - 2:
            h = _softplus(h)
    return h


# ----------------------------------- main -----------------------------------
if __name__ == "__main__":
    key = jax.random.PRNGKey(0)
    kx, kp = jax.random.split(key)

    N = 2048
    TILE_N = 512                                   # 4 grid steps: >= 2 per v7x TensorCore
    x = jax.random.normal(kx, (N, D_IN), jnp.float32)
    params = init_params(kp)

    # mask as set by set_mask(CURRENT_SCALE): first 3 + 6*scale entries are 1
    mask = jnp.zeros((EMB_DIM,), jnp.float32).at[:3 + 6 * CURRENT_SCALE].set(1.0)

    ref = reference_forward(x, params, mask)

    # exact-structure check (f32 matmuls, f32 softplus): must match the reference tightly
    out_f32 = jax.block_until_ready(
        implicit_net_forward(x, params, mask, tile_n=TILE_N, compute_dtype=jnp.float32))
    assert out_f32.shape == (N, 1) and out_f32.dtype == jnp.float32
    err_f32 = float(jnp.max(jnp.abs(out_f32 - ref)))
    assert jnp.allclose(out_f32, ref, rtol=1e-4, atol=1e-4), f"f32 max abs err {err_f32}"

    # performance config (bf16 MXU inputs + bf16 EUP softplus interior) -- looser tolerance
    out_bf16 = jax.block_until_ready(
        implicit_net_forward(x, params, mask, tile_n=TILE_N, compute_dtype=jnp.bfloat16))
    assert out_bf16.shape == (N, 1) and out_bf16.dtype == jnp.float32
    err_bf16 = float(jnp.max(jnp.abs(out_bf16 - ref)))
    assert jnp.allclose(out_bf16, ref, rtol=5e-2, atol=5e-2), f"bf16 max abs err {err_bf16}"

    print("KERNEL_OK")
</pallas_src>

<mosaic_0001>
module attributes {stable_mosaic.version = 11 : i64} {
  func.func @kernel(%arg0: i32, %arg1: memref<3x512xf32, #tpu.memory_space<vmem>>, %arg2: memref<128x40xf32, #tpu.memory_space<vmem>>, %arg3: memref<200x64xf32, #tpu.memory_space<vmem>>, %arg4: memref<128x16xf32, #tpu.memory_space<vmem>>, %arg5: memref<1x512xf32, #tpu.memory_space<vmem>>) attributes {dimension_semantics = [#tpu.dimension_semantics<parallel>], iteration_bounds = array<i64: 4>, scalar_prefetch = 0 : i64, scratch_operands = 0 : i64, tpu.core_type = #tpu.core_type<tc>, window_params = [{transform_indices = @transform_0, window_bounds = array<i64: 3, 512>}, {pipeline_mode = #tpu.pipeline_mode<synchronous>, transform_indices = @transform_1, window_bounds = array<i64: 128, 40>}, {pipeline_mode = #tpu.pipeline_mode<synchronous>, transform_indices = @transform_2, window_bounds = array<i64: 200, 64>}, {pipeline_mode = #tpu.pipeline_mode<synchronous>, transform_indices = @transform_3, window_bounds = array<i64: 128, 16>}, {transform_indices = @transform_4, window_bounds = array<i64: 1, 512>}]} {
    %c0 = arith.constant 0 : index
    %c0_0 = arith.constant 0 : index
    %0 = vector.load %arg1[%c0, %c0_0] : memref<3x512xf32, #tpu.memory_space<vmem>>, vector<1x512xf32>
    %c1 = arith.constant 1 : index
    %c0_1 = arith.constant 0 : index
    %1 = vector.load %arg1[%c1, %c0_1] : memref<3x512xf32, #tpu.memory_space<vmem>>, vector<1x512xf32>
    %c2 = arith.constant 2 : index
    %c0_2 = arith.constant 0 : index
    %2 = vector.load %arg1[%c2, %c0_2] : memref<3x512xf32, #tpu.memory_space<vmem>>, vector<1x512xf32>
    %c0_3 = arith.constant 0 : index
    %c0_4 = arith.constant 0 : index
    %3 = vector.load %arg4[%c0_3, %c0_4] : memref<128x16xf32, #tpu.memory_space<vmem>>, vector<40x1xf32>
    %c0_5 = arith.constant 0 : index
    %c1_6 = arith.constant 1 : index
    %4 = vector.load %arg4[%c0_5, %c1_6] : memref<128x16xf32, #tpu.memory_space<vmem>>, vector<40x1xf32>
    %5 = vector.broadcast %4 : vector<40x1xf32> to vector<40x512xf32>
    %6 = vector.broadcast %0 : vector<1x512xf32> to vector<40x512xf32>
    %7 = arith.mulf %5, %6 : vector<40x512xf32>
    %8 = vector.broadcast %3 : vector<40x1xf32> to vector<40x512xf32>
    %9 = arith.addf %8, %7 : vector<40x512xf32>
    %c0_7 = arith.constant 0 : index
    %c2_8 = arith.constant 2 : index
    %10 = vector.load %arg4[%c0_7, %c2_8] : memref<128x16xf32, #tpu.memory_space<vmem>>, vector<40x1xf32>
    %11 = vector.broadcast %10 : vector<40x1xf32> to vector<40x512xf32>
    %12 = vector.broadcast %1 : vector<1x512xf32> to vector<40x512xf32>
    %13 = arith.mulf %11, %12 : vector<40x512xf32>
    %14 = arith.addf %9, %13 : vector<40x512xf32>
    %c0_9 = arith.constant 0 : index
    %c3 = arith.constant 3 : index
    %15 = vector.load %arg4[%c0_9, %c3] : memref<128x16xf32, #tpu.memory_space<vmem>>, vector<40x1xf32>
    %16 = vector.broadcast %15 : vector<40x1xf32> to vector<40x512xf32>
    %17 = vector.broadcast %2 : vector<1x512xf32> to vector<40x512xf32>
    %18 = arith.mulf %16, %17 : vector<40x512xf32>
    %19 = arith.addf %14, %18 : vector<40x512xf32>
    %20 = math.sin %19 : vector<40x512xf32>
    %c0_10 = arith.constant 0 : index
    %c4 = arith.constant 4 : index
    %21 = vector.load %arg4[%c0_10, %c4] : memref<128x16xf32, #tpu.memory_space<vmem>>, vector<128x1xf32>
    %22 = vector.broadcast %21 : vector<128x1xf32> to vector<128x512xf32>
    %23 = vector.broadcast %0 : vector<1x512xf32> to vector<128x512xf32>
    %24 = arith.mulf %22, %23 : vector<128x512xf32>
    %c0_11 = arith.constant 0 : index
    %c5 = arith.constant 5 : index
    %25 = vector.load %arg4[%c0_11, %c5] : memref<128x16xf32, #tpu.memory_space<vmem>>, vector<128x1xf32>
    %26 = vector.broadcast %25 : vector<128x1xf32> to vector<128x512xf32>
    %27 = vector.broadcast %1 : vector<1x512xf32> to vector<128x512xf32>
    %28 = arith.mulf %26, %27 : vector<128x512xf32>
    %29 = arith.addf %24, %28 : vector<128x512xf32>
    %c0_12 = arith.constant 0 : index
    %c6 = arith.constant 6 : index
    %30 = vector.load %arg4[%c0_12, %c6] : memref<128x16xf32, #tpu.memory_space<vmem>>, vector<128x1xf32>
    %31 = vector.broadcast %30 : vector<128x1xf32> to vector<128x512xf32>
    %32 = vector.broadcast %2 : vector<1x512xf32> to vector<128x512xf32>
    %33 = arith.mulf %31, %32 : vector<128x512xf32>
    %34 = arith.addf %29, %33 : vector<128x512xf32>
    %c0_13 = arith.constant 0 : index
    %c0_14 = arith.constant 0 : index
    %35 = vector.load %arg2[%c0_13, %c0_14] : memref<128x40xf32, #tpu.memory_space<vmem>>, vector<128x40xf32>
    %cst = arith.constant dense<0.000000e+00> : vector<128x512xf32>
    %36 = tpu.matmul %35, %20, %cst {dimension_numbers = #tpu.dot_dimension_numbers<[1], [0], [0], [1], [0, 0, 1, 1], [], []>} : vector<128x40xf32>, vector<40x512xf32>, vector<128x512xf32> -> vector<128x512xf32>
    %37 = arith.addf %36, %34 : vector<128x512xf32>
    %38 = vector.extract_strided_slice %37 {offsets = [0, 0], sizes = [64, 512], strides = [1, 1]} : vector<128x512xf32> to vector<64x512xf32>
    %c0_15 = arith.constant 0 : index
    %c7 = arith.constant 7 : index
    %39 = vector.load %arg4[%c0_15, %c7] : memref<128x16xf32, #tpu.memory_space<vmem>>, vector<64x1xf32>
    %40 = vector.broadcast %39 : vector<64x1xf32> to vector<64x512xf32>
    %41 = arith.addf %38, %40 : vector<64x512xf32>
    %cst_16 = arith.constant 1.000000e+02 : f32
    %42 = vector.broadcast %cst_16 : f32 to vector<64x512xf32>
    %43 = arith.mulf %42, %41 : vector<64x512xf32>
    %cst_17 = arith.constant 2.000000e+01 : f32
    %44 = vector.broadcast %cst_17 : f32 to vector<64x512xf32>
    %45 = arith.minimumf %43, %44 : vector<64x512xf32>
    %46 = math.exp %45 : vector<64x512xf32>
    %cst_18 = arith.constant 1.000000e+00 : f32
    %47 = vector.broadcast %cst_18 : f32 to vector<64x512xf32>
    %48 = arith.addf %47, %46 : vector<64x512xf32>
    %49 = math.log %48 : vector<64x512xf32>
    %cst_19 = arith.constant 0.00999999977 : f32
    %50 = vector.broadcast %cst_19 : f32 to vector<64x512xf32>
    %51 = arith.mulf %49, %50 : vector<64x512xf32>
    %cst_20 = arith.constant 2.000000e+01 : f32
    %52 = vector.broadcast %cst_20 : f32 to vector<64x512xf32>
    %53 = arith.cmpf ogt, %43, %52 : vector<64x512xf32>
    %54 = arith.select %53, %41, %51 : vector<64x512xi1>, vector<64x512xf32>
    %55 = vector.extract_strided_slice %37 {offsets = [64, 0], sizes = [64, 512], strides = [1, 1]} : vector<128x512xf32> to vector<64x512xf32>
    %c0_21 = arith.constant 0 : index
    %c0_22 = arith.constant 0 : index
    %56 = vector.load %arg3[%c0_21, %c0_22] : memref<200x64xf32, #tpu.memory_space<vmem>>, vector<64x64xf32>
    %cst_23 = arith.constant dense<0.000000e+00> : vector<64x512xf32>
    %57 = tpu.matmul %56, %54, %cst_23 {dimension_numbers = #tpu.dot_dimension_numbers<[1], [0], [0], [1], [0, 0, 1, 1], [], []>} : vector<64x64xf32>, vector<64x512xf32>, vector<64x512xf32> -> vector<64x512xf32>
    %c0_24 = arith.constant 0 : index
    %c8 = arith.constant 8 : index
    %58 = vector.load %arg4[%c0_24, %c8] : memref<128x16xf32, #tpu.memory_space<vmem>>, vector<64x1xf32>
    %59 = vector.broadcast %58 : vector<64x1xf32> to vector<64x512xf32>
    %60 = arith.addf %57, %59 : vector<64x512xf32>
    %cst_25 = arith.constant 1.000000e+02 : f32
    %61 = vector.broadcast %cst_25 : f32 to vector<64x512xf32>
    %62 = arith.mulf %61, %60 : vector<64x512xf32>
    %cst_26 = arith.constant 2.000000e+01 : f32
    %63 = vector.broadcast %cst_26 : f32 to vector<64x512xf32>
    %64 = arith.minimumf %62, %63 : vector<64x512xf32>
    %65 = math.exp %64 : vector<64x512xf32>
    %cst_27 = arith.constant 1.000000e+00 : f32
    %66 = vector.broadcast %cst_27 : f32 to vector<64x512xf32>
    %67 = arith.addf %66, %65 : vector<64x512xf32>
    %68 = math.log %67 : vector<64x512xf32>
    %cst_28 = arith.constant 0.00999999977 : f32
    %69 = vector.broadcast %cst_28 : f32 to vector<64x512xf32>
    %70 = arith.mulf %68, %69 : vector<64x512xf32>
    %cst_29 = arith.constant 2.000000e+01 : f32
    %71 = vector.broadcast %cst_29 : f32 to vector<64x512xf32>
    %72 = arith.cmpf ogt, %62, %71 : vector<64x512xf32>
    %73 = arith.select %72, %60, %70 : vector<64x512xi1>, vector<64x512xf32>
    %c64 = arith.constant 64 : index
    %c0_30 = arith.constant 0 : index
    %74 = vector.load %arg3[%c64, %c0_30] : memref<200x64xf32, #tpu.memory_space<vmem>>, vector<64x64xf32>
    %cst_31 = arith.constant dense<0.000000e+00> : vector<64x512xf32>
    %75 = tpu.matmul %74, %73, %cst_31 {dimension_numbers = #tpu.dot_dimension_numbers<[1], [0], [0], [1], [0, 0, 1, 1], [], []>} : vector<64x64xf32>, vector<64x512xf32>, vector<64x512xf32> -> vector<64x512xf32>
    %76 = arith.addf %75, %55 : vector<64x512xf32>
    %c0_32 = arith.constant 0 : index
    %c9 = arith.constant 9 : index
    %77 = vector.load %arg4[%c0_32, %c9] : memref<128x16xf32, #tpu.memory_space<vmem>>, vector<64x1xf32>
    %78 = vector.broadcast %77 : vector<64x1xf32> to vector<64x512xf32>
    %79 = arith.addf %76, %78 : vector<64x512xf32>
    %cst_33 = arith.constant 1.000000e+02 : f32
    %80 = vector.broadcast %cst_33 : f32 to vector<64x512xf32>
    %81 = arith.mulf %80, %79 : vector<64x512xf32>
    %cst_34 = arith.constant 2.000000e+01 : f32
    %82 = vector.broadcast %cst_34 : f32 to vector<64x512xf32>
    %83 = arith.minimumf %81, %82 : vector<64x512xf32>
    %84 = math.exp %83 : vector<64x512xf32>
    %cst_35 = arith.constant 1.000000e+00 : f32
    %85 = vector.broadcast %cst_35 : f32 to vector<64x512xf32>
    %86 = arith.addf %85, %84 : vector<64x512xf32>
    %87 = math.log %86 : vector<64x512xf32>
    %cst_36 = arith.constant 0.00999999977 : f32
    %88 = vector.broadcast %cst_36 : f32 to vector<64x512xf32>
    %89 = arith.mulf %87, %88 : vector<64x512xf32>
    %cst_37 = arith.constant 2.000000e+01 : f32
    %90 = vector.broadcast %cst_37 : f32 to vector<64x512xf32>
    %91 = arith.cmpf ogt, %81, %90 : vector<64x512xf32>
    %92 = arith.select %91, %79, %89 : vector<64x512xi1>, vector<64x512xf32>
    %c128 = arith.constant 128 : index
    %c0_38 = arith.constant 0 : index
    %93 = vector.load %arg3[%c128, %c0_38] : memref<200x64xf32, #tpu.memory_space<vmem>>, vector<64x64xf32>
    %cst_39 = arith.constant dense<0.000000e+00> : vector<64x512xf32>
    %94 = tpu.matmul %93, %92, %cst_39 {dimension_numbers = #tpu.dot_dimension_numbers<[1], [0], [0], [1], [0, 0, 1, 1], [], []>} : vector<64x64xf32>, vector<64x512xf32>, vector<64x512xf32> -> vector<64x512xf32>
    %c0_40 = arith.constant 0 : index
    %c10 = arith.constant 10 : index
    %95 = vector.load %arg4[%c0_40, %c10] : memref<128x16xf32, #tpu.memory_space<vmem>>, vector<64x1xf32>
    %96 = vector.broadcast %95 : vector<64x1xf32> to vector<64x512xf32>
    %97 = arith.addf %94, %96 : vector<64x512xf32>
    %cst_41 = arith.constant 1.000000e+02 : f32
    %98 = vector.broadcast %cst_41 : f32 to vector<64x512xf32>
    %99 = arith.mulf %98, %97 : vector<64x512xf32>
    %cst_42 = arith.constant 2.000000e+01 : f32
    %100 = vector.broadcast %cst_42 : f32 to vector<64x512xf32>
    %101 = arith.minimumf %99, %100 : vector<64x512xf32>
    %102 = math.exp %101 : vector<64x512xf32>
    %cst_43 = arith.constant 1.000000e+00 : f32
    %103 = vector.broadcast %cst_43 : f32 to vector<64x512xf32>
    %104 = arith.addf %103, %102 : vector<64x512xf32>
    %105 = math.log %104 : vector<64x512xf32>
    %cst_44 = arith.constant 0.00999999977 : f32
    %106 = vector.broadcast %cst_44 : f32 to vector<64x512xf32>
    %107 = arith.mulf %105, %106 : vector<64x512xf32>
    %cst_45 = arith.constant 2.000000e+01 : f32
    %108 = vector.broadcast %cst_45 : f32 to vector<64x512xf32>
    %109 = arith.cmpf ogt, %99, %108 : vector<64x512xf32>
    %110 = arith.select %109, %97, %107 : vector<64x512xi1>, vector<64x512xf32>
    %c192 = arith.constant 192 : index
    %c0_46 = arith.constant 0 : index
    %111 = vector.load %arg3[%c192, %c0_46] : memref<200x64xf32, #tpu.memory_space<vmem>>, vector<1x64xf32>
    %cst_47 = arith.constant dense<0.000000e+00> : vector<1x512xf32>
    %112 = tpu.matmul %111, %110, %cst_47 {dimension_numbers = #tpu.dot_dimension_numbers<[1], [0], [0], [1], [0, 0, 1, 1], [], []>} : vector<1x64xf32>, vector<64x512xf32>, vector<1x512xf32> -> vector<1x512xf32>
    %c0_48 = arith.constant 0 : index
    %c11 = arith.constant 11 : index
    %113 = vector.load %arg4[%c0_48, %c11] : memref<128x16xf32, #tpu.memory_space<vmem>>, vector<1x1xf32>
    %114 = vector.broadcast %113 : vector<1x1xf32> to vector<1x512xf32>
    %115 = arith.addf %112, %114 : vector<1x512xf32>
    %c0_49 = arith.constant 0 : index
    %c0_50 = arith.constant 0 : index
    %116 = vector.load %arg5[%c0_49, %c0_50] : memref<1x512xf32, #tpu.memory_space<vmem>>, vector<1x512xf32>
    tpu.vector_store %arg5[%c0_49, %c0_50], %115 {strides = array<i32>} : memref<1x512xf32, #tpu.memory_space<vmem>>, vector<1x512xf32>,
    return
  }
  func.func @transform_0(%arg0: i32) -> (i32, i32) {
    %c0_i32 = arith.constant 0 : i32
    %c0_i32_0 = arith.constant 0 : i32
    return %c0_i32, %arg0 : i32, i32
  }
  func.func @transform_1(%arg0: i32) -> (i32, i32) {
    %c0_i32 = arith.constant 0 : i32
    %c0_i32_0 = arith.constant 0 : i32
    %c0_i32_1 = arith.constant 0 : i32
    return %c0_i32, %c0_i32_0 : i32, i32
  }
  func.func @transform_2(%arg0: i32) -> (i32, i32) {
    %c0_i32 = arith.constant 0 : i32
    %c0_i32_0 = arith.constant 0 : i32
    %c0_i32_1 = arith.constant 0 : i32
    return %c0_i32, %c0_i32_0 : i32, i32
  }
  func.func @transform_3(%arg0: i32) -> (i32, i32) {
    %c0_i32 = arith.constant 0 : i32
    %c0_i32_0 = arith.constant 0 : i32
    %c0_i32_1 = arith.constant 0 : i32
    return %c0_i32, %c0_i32_0 : i32, i32
  }
  func.func @transform_4(%arg0: i32) -> (i32, i32) {
    %c0_i32 = arith.constant 0 : i32
    %c0_i32_0 = arith.constant 0 : i32
    return %c0_i32, %arg0 : i32, i32
  }
}

</mosaic_0001>

<bundles_post_ra>
// kernel: tpu_custom_call.1
= control target key start
LH: loop header
LB: loop body
LE: loop exit
PB: predicated region body
PF: predicated region fallthrough
CT: control target
= control target key end

     0   :  { %9 = vsyncpa [#allocation3], 0  ;;  %s12766_s0 = inlined_call_operand.vmem [shape: f32[3,2048], index: 0, kind: input, shape index: {}]   ;;  %s12767_s1 = inlined_call_operand.vmem [shape: f32[128,40], index: 1, kind: input, shape index: {}]   ;;  %s12768_s2 = inlined_call_operand.vmem [shape: f32[200,64], index: 2, kind: input, shape index: {}]   ;;  %s12769_s3 = inlined_call_operand.vmem [shape: f32[128,16], index: 3, kind: input, shape index: {}]   ;;  %s12770_s4 = inlined_call_operand.hbm [shape: f32[1,2048], index: 4, kind: output, shape index: {}]  }
   0x1   :  { %11 = vsyncpa [#allocation3 + $0x1], 0  ;;  %s7112_s15 = smov 0   ;;  %s7114_s16 = smov 0  }
   0x2   :  { %s7116_s17 = smov 0   ;;  %s7118_s18 = smov 0  }
   0x3 LB: > { %s7133_s19 = sadd.s32 4294967295, %s7064_s18   ;;  %s6011_s20 = sadd.s32 4294967294, %s7064_s18   ;;  %s7064_s18 = sphi %s7118_s18, %s13712_s18   ;;  %s7060_s17 = sphi %s7116_s17, %s13711_s17   ;;  %s7056_s16 = sphi %s7114_s16, %s13710_s16   ;;  %s7052_s15 = sphi %s7112_s15, %s13709_s15  }
   0x4   : > { %s7137_s21 = sadd.s32 1, %s7064_s18   ;;  %s113_s22 = sadd.s32 1, %s7060_s17 }
   0x5   : > { %s110_s23 = ssub.s32 %s7064_s18, %s7137_s21  ;;  %p123_p0 = scmp.ne.s32.totalorder %s7060_s17, %s7056_s16 }
   0x6   : > { %p111_p1 = scmp.eq.s32.totalorder %s110_s23, 0  ;;  %p124_p2 = scmp.eq.s32.totalorder %s7133_s19, 3 }
   0x7   : > { %p129_p3 = scmp.ne.s32.totalorder %s7056_s16, %s7052_s15  ;;  %p130_p4 = scmp.eq.s32.totalorder %s6011_s20, 3 }
   0x8   : > { %s7148_s24 = scalar_select %p111_p1, %s7060_s17, %s113_s22  }
   0x9   : > { %p7150_p5 = por %p124_p2, %p123_p0  ;;  %p7154_p6 = por %p130_p4, %p129_p3 }
   0xa   : > { %p6014_p7 = scmp.ge.s32.totalorder %s7064_s18, 1  ;;  %p166_p8 = scmp.lt.s32.totalorder %s7064_s18, 5 }
   0xc   : > { %p167_p9 = pnand %p6014_p7, %p166_p8 }
   0xe   : > { %170 = sbr.rel (%p167_p9) target bundleno = 2155 (0x86b), region = 36 }
  0x13   : > { %v208_v0 = vld [vmem:[%s12769_s3 + $0x20] sm:$0xff]  ;;  %v207_v1 = vld [vmem:[%s12769_s3 + $0x18] sm:$0xff]  ;;  %v7066_v2 = vmov 2   ;;  %v7067_v3 = vmov 0   ;;  %v206_v4 = vld [vmem:[%s12769_s3 + $0x10] sm:$0xff]  ;;  %v7068_v5 = vmov 1   ;;  %v12771_v11 = vlaneseq }
  0x14   : > { %6330 = vset.pattern.permute.xlu0 %v7066_v2  ;;  %6327 = vset.pattern.permute.xlu1 %v7067_v3  ;;  %v7069_v6 = vmov 3   ;;  %v205_v7 = vld [vmem:[%s12769_s3 + $0x8] sm:$0xff]  ;;  %v204_v8 = vld [vmem:[%s12769_s3] sm:$0xff]  ;;  %s6016_s11 = sshll.u32 %s7133_s19, 2  ;;  %s189_s28 = sand.u32 1, %s7056_s16  }
  0x15   : > { %292 = vperm.xlu1 %6327, %v208_v0   ;;  %328 = vperm.xlu0 %6330, %v207_v1   ;;  %p193_p10 = scmp.lt.s32.totalorder %s6016_s11, 15  ;;  %v7181_v13 = vshrl.u32 %v12771_v11, 7  ;;  %s6015_s29 = sshll.u32 %s189_s28, 2 }
  0x16   : > { %s6187_s30 = sshll.u32 %s7133_s19, 6  ;;  %s191_s5 = scalar_lea.vmem [#allocation2], %s6015_s29 }
  0x17   : > { %s13714_s11 = smov (!%p193_p10, %s6016_s11), 15  ;;  %13057 = vst [vmem:[#allocation5_spill] sm:$0xff] %v7181_v13  ;;  %v245_v15 = vsub.s32 2, %v7181_v13  ;;  %v237_v32 = vsub.s32 0, %v7181_v13  ;;  %v241_v34 = vsub.s32 1, %v7181_v13  ;;  %v249_v36 = vsub.s32 3, %v7181_v13  ;;  %s5950_s9 = scalar_lea.hbm %s12770_s4, %s6187_s30 }
  0x18   : > { %s6017_s12 = sshll.u32 %s13714_s11, 2  ;;  %s5952_s6 = sshll.u32 %s191_s5, 4  ;;  %s5953_s6 = int_to_ptr.vmem [resolvable:$true] %s5952_s6 }
  0x19   : > { %6328 = vset.pattern.permute.xlu1 %v7066_v2  ;;  %6333 = vset.pattern.permute.xlu0 %v7067_v3  ;;  %s196_s20 = scalar_lea.vmem %s12766_s0, %s6017_s12  ;;  %s5938_s10 = scalar_lea.sflag [#allocation3], %s189_s28 }
  0x1a   : > { %332 = vperm.xlu1 %6328, %v208_v0   ;;  %284 = vperm.xlu0 %6333, %v206_v4   ;;  %v6018_v17 = vld [vmem:[%s196_s20 + $0x1] ss:$4 sm:$0xf]  ;;  %v199_v18 = vld [vmem:[%s196_s20] ss:$4 sm:$0xf] }
  0x1b   : > { %v7189_v20 = vrot.slane %v6018_v17, %v245_v15  ;;  %v7191_v21 = vrot.slane %v199_v18, %v245_v15  ;;  %v7207_v35 = vrot.slane %v199_v18, %v237_v32  ;;  %v7210_v37 = vrot.slane %v199_v18, %v241_v34  ;;  %v6019_v38 = vld [vmem:[%s196_s20 + $0x2] ss:$4 sm:$0xf]  ;;  %s7004_s11 = scalar_lea.vmem %s5953_s6, 64  ;;  %s7086_s12 = smov [#allocation2]  }
  0x1c   : > { %v7212_v39 = vrot.slane %v199_v18, %v249_v36  ;;  %v7215_v43 = vrot.slane %v6019_v38, %v245_v15  ;;  %v7217_v44 = vrot.slane %v6018_v17, %v237_v32  ;;  %v7224_v50 = vrot.slane %v6018_v17, %v241_v34  ;;  %p7005_p11 = scmp.ne.s32.totalorder %s5953_s6, %s7004_s11  ;;  %s7008_s19 = sshll.u32 %s7086_s12, 4  ;;  %s7009_s19 = int_to_ptr.vmem [resolvable:$false] %s7008_s19 }
  0x1d   : > { %13058 = vst [vmem:[#allocation6_spill] sm:$0xff] %v7189_v20  ;;  %13059 = vst [vmem:[#allocation7_spill] sm:$0xff] %v7191_v21  ;;  %v7226_v51 = vrot.slane %v6018_v17, %v249_v36  ;;  %v7228_v54 = vrot.slane %v6019_v38, %v237_v32  ;;  %v7236_v63 = vrot.slane %v6019_v38, %v241_v34  ;;  %s7010_s13 = scalar_lea.vmem %s7009_s19, 128  ;;  %p7011_p0 = scmp.lt.s32.totalorder %s5953_s6, %s7009_s19 }
  0x1e   : > { %6329 = vset.pattern.permute.xlu1 %v7067_v3  ;;  %6334 = vset.pattern.permute.xlu0 %v7068_v5  ;;  %13060 = vst [vmem:[#allocation8_spill] sm:$0xff] %v7207_v35  ;;  %13061 = vst [vmem:[#allocation9_spill] sm:$0xff] %v7210_v37  ;;  %p7006_p12 = pnand %p7005_p11, %p7150_p5  ;;  %p7012_p1 = scmp.lt.s32.totalorder %s7010_s13, %s7004_s11 }
  0x1f   : > { %288 = vperm.xlu1 %6329, %v207_v1   ;;  %231 = vperm.xlu0 %6334, %v208_v0   ;;  %13062 = vst [vmem:[#allocation10_spill] sm:$0xff] %v7212_v39  ;;  %13063 = vst [vmem:[#allocation11_spill] sm:$0xff] %v7215_v43 }
  0x20   : > { %13064 = vst [vmem:[#allocation12_spill] sm:$0xff] %v7217_v44  ;;  %13065 = vst [vmem:[#allocation13_spill] sm:$0xff] %v7224_v50  ;;  %p7007_p13 = pneg %p7006_p12  ;;  %p7013_p2 = por %p7012_p1, %p7011_p0 }
  0x21   : > { %13066 = vst [vmem:[#allocation14_spill] sm:$0xff] %v7226_v51  ;;  %13067 = vst [vmem:[#allocation15_spill] sm:$0xff] %v7228_v54 }
  0x22   : > { %13069 = vst [vmem:[#allocation17_spill] sm:$0xff] %v7236_v63  ;;  %p7014_p3 = pnand %p7013_p2, %p7007_p13 }
  0x23   : > { %6331 = vset.pattern.permute.xlu1 %v7069_v6  ;;  %226 = vperm.xlu0 %6334, %v207_v1  }
  0x24   : > { %413 = vperm.xlu1 %6331, %v208_v0   ;;  %v7238_v0 = vrot.slane %v6019_v38, %v249_v36 }
  0x26   : > { %13070 = vst [vmem:[#allocation18_spill] sm:$0xff] %v7238_v0 }
  0x27   : > { %221 = vperm.xlu0 %6334, %v206_v4  }
  0x28   : > { %6332 = vset.pattern.permute.xlu1 %v7068_v5 }
  0x29   : > { %216 = vperm.xlu1 %6332, %v205_v7  }
  0x2b   : > { %211 = vperm.xlu0 %6334, %v204_v8  }
  0x2d   : > { %6335 = vset.pattern.permute.xlu1 %v7066_v2 }
  0x2e   : > { %324 = vperm.xlu1 %6335, %v206_v4  }
  0x2f   : > { %6339 = vset.pattern.permute.xlu0 %v7069_v6 }
  0x30   : > { %405 = vperm.xlu0 %6339, %v206_v4  }
  0x32   : > { %6336 = vset.pattern.permute.xlu1 %v7069_v6 }
  0x33   : > { %409 = vperm.xlu1 %6336, %v207_v1  }
  0x34   : > { %401 = vperm.xlu0 %6339, %v205_v7  }
  0x37   : > { %6337 = vset.pattern.permute.xlu1 %v7067_v3 }
  0x38   : > { %280 = vperm.xlu1 %6337, %v205_v7  }
  0x3c   : > { %6338 = vset.pattern.permute.xlu1 %v7066_v2 }
  0x3d   : > { %320 = vperm.xlu1 %6338, %v205_v7  }
  0x41   : > { %6340 = vset.pattern.permute.xlu1 %v7067_v3 }
  0x42   : > { %276 = vperm.xlu1 %6340, %v204_v8  }
  0x46   : > { %6341 = vset.pattern.permute.xlu1 %v7066_v2 }
  0x47   : > { %316 = vperm.xlu1 %6341, %v204_v8  }
  0x4b   : > { %6342 = vset.pattern.permute.xlu1 %v7069_v6 }
  0x4c   : > { %397 = vperm.xlu1 %6342, %v204_v8  }
  0x90   : > { %v293_v9 = vpop.permute.xlu1 %292  ;;  %v7176_v10 = vpop.permute.xlu0 %328 }
  0x91   : > { %v370_v23 = vmul.f32 %v7189_v20, %v7176_v10  ;;  %v368_v38 = vmul.f32 %v7217_v44, %v7176_v10 }
  0x95   : > { %v7178_v12 = vpop.permute.xlu0 %284  ;;  %v333_v14 = vpop.permute.xlu1 %332 }
  0x96   : > { %v372_v57 = vmul.f32 %v7217_v44, %v333_v14  ;;  %v373_v1 = vmul.f32 %v7224_v50, %v333_v14  ;;  %v374_v2 = vmul.f32 %v7189_v20, %v333_v14  ;;  %v375_v3 = vmul.f32 %v7226_v51, %v333_v14 }
  0x9a   : > { %v232_v16 = vpop.permute.xlu0 %231  ;;  %v7187_v19 = vpop.permute.xlu1 %288 }
  0x9b   : > { %v271_v41 = vmul.f32 %v7207_v35, %v232_v16  ;;  %v272_v45 = vmul.f32 %v7210_v37, %v232_v16  ;;  %v273_v47 = vmul.f32 %v7191_v21, %v232_v16  ;;  %v274_v48 = vmul.f32 %v7212_v39, %v232_v16 }
  0x9d   : > { %v311_v52 = vadd.f32 %v293_v9, %v271_v41  ;;  %v312_v58 = vadd.f32 %v293_v9, %v272_v45  ;;  %v313_v61 = vadd.f32 %v293_v9, %v273_v47  ;;  %v314_v62 = vadd.f32 %v293_v9, %v274_v48 }
  0x9e   : > { %v227_v22 = vpop.permute.xlu0 %226 }
  0x9f   : > { %v269_v24 = vmul.f32 %v7191_v21, %v227_v22  ;;  %v414_v26 = vpop.permute.xlu1 %413  ;;  %v392_v4 = vadd.f32 %v372_v57, %v311_v52  ;;  %v393_v9 = vadd.f32 %v373_v1, %v312_v58  ;;  %v267_v15 = vmul.f32 %v7207_v35, %v227_v22 }
  0xa0   : > { %v394_v18 = vadd.f32 %v374_v2, %v313_v61  ;;  %v268_v14 = vmul.f32 %v7210_v37, %v227_v22 }
  0xa1   : > { %v309_v25 = vadd.f32 %v7187_v19, %v269_v24  ;;  %v270_v24 = vmul.f32 %v7212_v39, %v227_v22 }
  0xa2   : > { %v222_v27 = vpop.permute.xlu0 %221  ;;  %v308_v47 = vadd.f32 %v7187_v19, %v268_v14 }
  0xa3   : > { %v7197_v28 = vadd.f32 %v370_v23, %v309_v25  ;;  %v265_v29 = vmul.f32 %v7191_v21, %v222_v27  ;;  %v263_v55 = vmul.f32 %v7207_v35, %v222_v27  ;;  %v264_v56 = vmul.f32 %v7210_v37, %v222_v27 }
  0xa4   : > { %v7201_v31 = vpop.permute.xlu1 %216  ;;  %v266_v59 = vmul.f32 %v7212_v39, %v222_v27  ;;  %v395_v23 = vadd.f32 %v375_v3, %v314_v62  ;;  %v453_v25 = vmul.f32 %v7228_v54, %v414_v26  ;;  %v454_v27 = vmul.f32 %v7236_v63, %v414_v26 }
  0xa5   : > { %v305_v30 = vadd.f32 %v7178_v12, %v265_v29  ;;  %v303_v5 = vadd.f32 %v7178_v12, %v263_v55  ;;  %v304_v6 = vadd.f32 %v7178_v12, %v264_v56  ;;  %v455_v29 = vmul.f32 %v7215_v43, %v414_v26 }
  0xa6   : > { %v7204_v33 = vpop.permute.xlu0 %211  ;;  %v306_v16 = vadd.f32 %v7178_v12, %v266_v59  ;;  %v310_v48 = vadd.f32 %v7187_v19, %v270_v24  ;;  %v7270_v52 = vadd.f32 %v454_v27, %v393_v9 }
  0xa8   : > { %v2248_v3 = vand.u32 2139095040, %v7270_v52 }
  0xa9   : > { %v325_v40 = vpop.permute.xlu1 %324 }
  0xaa   : > { %v366_v46 = vmul.f32 %v7189_v20, %v325_v40  ;;  %v364_v7 = vmul.f32 %v7217_v44, %v325_v40  ;;  %v365_v8 = vmul.f32 %v7224_v50, %v325_v40  ;;  %v367_v17 = vmul.f32 %v7226_v51, %v325_v40 }
  0xab   : > { %v406_v42 = vpop.permute.xlu0 %405  ;;  %v307_v40 = vadd.f32 %v7187_v19, %v267_v15  ;;  %v2249_v14 = vshrl.u32 %v2248_v3, 23 }
  0xac   : > { %v447_v49 = vmul.f32 %v7215_v43, %v406_v42  ;;  %v386_v53 = vadd.f32 %v366_v46, %v305_v30  ;;  %v456_v30 = vmul.f32 %v7238_v0, %v414_v26  ;;  %v384_v32 = vadd.f32 %v364_v7, %v303_v5 }
  0xad   : > { %v385_v34 = vadd.f32 %v365_v8, %v304_v6  ;;  %v445_v12 = vmul.f32 %v7228_v54, %v406_v42  ;;  %v446_v36 = vmul.f32 %v7236_v63, %v406_v42  ;;  %v387_v22 = vadd.f32 %v367_v17, %v306_v16 }
  0xae   : > { %v7234_v60 = vadd.f32 %v447_v49, %v386_v53  ;;  %v448_v41 = vmul.f32 %v7238_v0, %v406_v42  ;;  %v410_v45 = vpop.permute.xlu1 %409  ;;  %v369_v46 = vmul.f32 %v7224_v50, %v7176_v10  ;;  %v371_v26 = vmul.f32 %v7226_v51, %v7176_v10 }
  0xaf   : > { %v7268_v49 = vadd.f32 %v453_v25, %v392_v4  ;;  %v7272_v53 = vadd.f32 %v455_v29, %v394_v18  ;;  %v7274_v55 = vadd.f32 %v456_v30, %v395_v23  ;;  %v7276_v42 = vadd.f32 %v445_v12, %v384_v32 }
  0xb0   : > { %13068 = vst [vmem:[#allocation16_spill] sm:$0xff] %v7234_v60  ;;  %v7278_v56 = vadd.f32 %v446_v36, %v385_v34  ;;  %v449_v57 = vmul.f32 %v7228_v54, %v410_v45  ;;  %v450_v10 = vmul.f32 %v7236_v63, %v410_v45  ;;  %v388_v58 = vadd.f32 %v368_v38, %v307_v40 }
  0xb1   : > { %13071 = vst [vmem:[#allocation19_spill] sm:$0xff] %v7276_v42  ;;  %v7282_v59 = vadd.f32 %v448_v41, %v387_v22  ;;  %v389_v19 = vadd.f32 %v369_v46, %v308_v47  ;;  %v391_v61 = vadd.f32 %v371_v26, %v310_v48  ;;  %v451_v62 = vmul.f32 %v7215_v43, %v410_v45 }
  0xb2   : > { %13072 = vst [vmem:[#allocation20_spill] sm:$0xff] %v7278_v56  ;;  %v452_v1 = vmul.f32 %v7238_v0, %v410_v45  ;;  %v2144_v2 = vand.u32 2139095040, %v7268_v49  ;;  %v2352_v4 = vand.u32 2139095040, %v7272_v53  ;;  %v2456_v5 = vand.u32 2139095040, %v7274_v55 }
  0xb3   : > { %13073 = vst [vmem:[#allocation21_spill] sm:$0xff] %v7282_v59  ;;  %v1312_v6 = vand.u32 2139095040, %v7276_v42  ;;  %v1416_v7 = vand.u32 2139095040, %v7278_v56  ;;  %v7292_v8 = vadd.f32 %v449_v57, %v388_v58  ;;  %v7294_v9 = vadd.f32 %v450_v10, %v389_v19 }
  0xb4   : > { %v1520_v15 = vand.u32 2139095040, %v7234_v60  ;;  %v1624_v16 = vand.u32 2139095040, %v7282_v59  ;;  %v7299_v17 = vadd.f32 %v451_v62, %v7197_v28  ;;  %v7301_v18 = vadd.f32 %v452_v1, %v391_v61 }
  0xb5   : > { %13074 = vst [vmem:[#allocation22_spill] sm:$0xff] %v7292_v8  ;;  %v2145_v23 = vshrl.u32 %v2144_v2, 23  ;;  %v2353_v24 = vshrl.u32 %v2352_v4, 23  ;;  %v2457_v25 = vshrl.u32 %v2456_v5, 23  ;;  %v1313_v27 = vshrl.u32 %v1312_v6, 23 }
  0xb6   : > { %13075 = vst [vmem:[#allocation23_spill] sm:$0xff] %v7299_v17  ;;  %v1417_v29 = vshrl.u32 %v1416_v7, 23  ;;  %v1728_v30 = vand.u32 2139095040, %v7292_v8  ;;  %v1832_v32 = vand.u32 2139095040, %v7294_v9  ;;  %v1521_v34 = vshrl.u32 %v1520_v15, 23 }
  0xb7   : > { %v1625_v12 = vshrl.u32 %v1624_v16, 23  ;;  %v1936_v36 = vand.u32 2139095040, %v7299_v17  ;;  %v2040_v38 = vand.u32 2139095040, %v7301_v18  ;;  %v6084_v28 = vadd.s32 4294967169, %v2145_v23 }
  0xb8   : > { %v6088_v40 = vadd.s32 4294967169, %v2249_v14  ;;  %v6092_v22 = vadd.s32 4294967169, %v2353_v24  ;;  %v6096_v41 = vadd.s32 4294967169, %v2457_v25  ;;  %v6052_v45 = vadd.s32 4294967169, %v1313_v27 }
  0xb9   : > { %v6056_v46 = vadd.s32 4294967169, %v1417_v29  ;;  %v1729_v26 = vshrl.u32 %v1728_v30, 23  ;;  %v1833_v47 = vshrl.u32 %v1832_v32, 23  ;;  %v6060_v48 = vadd.s32 4294967169, %v1521_v34 }
  0xba   : > { %v6064_v57 = vadd.s32 4294967169, %v1625_v12  ;;  %v7309_v10 = vmul.f32 %v7207_v35, %v7201_v31  ;;  %v7313_v58 = vmul.f32 %v7210_v37, %v7201_v31  ;;  %v1937_v19 = vshrl.u32 %v1936_v36, 23 }
  0xbb   : > { %v2041_v61 = vshrl.u32 %v2040_v38, 23  ;;  %v2151_v62 = vadd.s32 1, %v6084_v28  ;;  %v2255_v1 = vadd.s32 1, %v6088_v40  ;;  %v2359_v2 = vadd.s32 1, %v6092_v22 }
  0xbc   : > { %v2463_v3 = vadd.s32 1, %v6096_v41  ;;  %v1319_v4 = vadd.s32 1, %v6052_v45  ;;  %v1423_v5 = vadd.s32 1, %v6056_v46  ;;  %v6068_v6 = vadd.s32 4294967169, %v1729_v26 }
  0xbd   : > { %v6072_v7 = vadd.s32 4294967169, %v1833_v47  ;;  %v7317_v15 = vmul.f32 %v7191_v21, %v7201_v31  ;;  %v7321_v16 = vmul.f32 %v7212_v39, %v7201_v31  ;;  %v1527_v23 = vadd.s32 1, %v6060_v48 }
  0xbe   : > { %v1631_v14 = vadd.s32 1, %v6064_v57  ;;  %v7325_v24 = vmul.f32 %v7207_v35, %v7204_v33  ;;  %v7329_v25 = vmul.f32 %v7210_v37, %v7204_v33  ;;  %v6076_v27 = vadd.s32 4294967169, %v1937_v19  ;;  %v281_v19 = vpop.permute.xlu1 %280 }
  0xbf   : > { %v6080_v29 = vadd.s32 4294967169, %v2041_v61  ;;  %vm2152_vm0 = vcmp.gt.s32.totalorder %v2151_v62, 0  ;;  %vm2256_vm1 = vcmp.gt.s32.totalorder %v2255_v1, 0  ;;  %vm2360_vm2 = vcmp.gt.s32.totalorder %v2359_v2, 0 }
  0xc0   : > { %vm2464_vm3 = vcmp.gt.s32.totalorder %v2463_v3, 0  ;;  %vm1320_vm4 = vcmp.gt.s32.totalorder %v1319_v4, 0  ;;  %vm1424_vm5 = vcmp.gt.s32.totalorder %v1423_v5, 0  ;;  %v1735_v31 = vadd.s32 1, %v6068_v6 }
  0xc1   : > { %v1839_v30 = vadd.s32 1, %v6072_v7  ;;  %v7333_v32 = vmul.f32 %v7191_v21, %v7204_v33  ;;  %v7337_v34 = vmul.f32 %v7212_v39, %v7204_v33  ;;  %vm1528_vm6 = vcmp.gt.s32.totalorder %v1527_v23, 0 }
  0xc2   : > { %vm1632_vm7 = vcmp.gt.s32.totalorder %v1631_v14, 0  ;;  %v2153_v12 = vsel %vm2152_vm0, %v2151_v62, 0  ;;  %v2257_v36 = vsel %vm2256_vm1, %v2255_v1, 0  ;;  %v1943_v38 = vadd.s32 1, %v6076_v27 }
  0xc3   : > { %v2047_v28 = vadd.s32 1, %v6080_v29  ;;  %v2361_v40 = vsel %vm2360_vm2, %v2359_v2, 0  ;;  %v2465_v22 = vsel %vm2464_vm3, %v2463_v3, 0  ;;  %v1321_v41 = vsel %vm1320_vm4, %v1319_v4, 0 }
  0xc4   : > { %v1425_v45 = vsel %vm1424_vm5, %v1423_v5, 0  ;;  %v1529_v46 = vsel %vm1528_vm6, %v1527_v23, 0  ;;  %v1633_v26 = vsel %vm1632_vm7, %v1631_v14, 0  ;;  %vm1736_vm8 = vcmp.gt.s32.totalorder %v1735_v31, 0 }
  0xc5   : > { %vm1840_vm9 = vcmp.gt.s32.totalorder %v1839_v30, 0  ;;  %v7339_v47 = vshrl.u32 %v2153_v12, 5  ;;  %v7341_v48 = vand.u32 31, %v2153_v12  ;;  %v7343_v33 = vshrl.u32 %v2257_v36, 5 }
  0xc6   : > { %v7345_v57 = vand.u32 31, %v2257_v36  ;;  %v7347_v61 = vand.u32 31, %v1321_v41  ;;  %v7349_v62 = vand.u32 31, %v1425_v45  ;;  %vm1944_vm10 = vcmp.gt.s32.totalorder %v1943_v38, 0 }
  0xc7   : > { %vm2048_vm11 = vcmp.gt.s32.totalorder %v2047_v28, 0  ;;  %v7351_v1 = vand.u32 31, %v1529_v46  ;;  %v7353_v2 = vand.u32 31, %v1633_v26  ;;  %v1737_v3 = vsel %vm1736_vm8, %v1735_v31, 0 }
  0xc8   : > { %13076 = vst [vmem:[#allocation24_spill] sm:$0xff] %v7347_v61  ;;  %13077 = vst [vmem:[#allocation25_spill] sm:$0xff] %v7349_v62  ;;  %v1841_v4 = vsel %vm1840_vm9, %v1839_v30, 0  ;;  %v7355_v5 = vshrl.u32 %v2361_v40, 5  ;;  %v7357_v6 = vand.u32 31, %v2361_v40  ;;  %v7359_v7 = vshrl.u32 %v2465_v22, 5 }
  0xc9   : > { %13078 = vst [vmem:[#allocation26_spill] sm:$0xff] %v7351_v1  ;;  %13079 = vst [vmem:[#allocation27_spill] sm:$0xff] %v7353_v2  ;;  %v7361_v23 = vand.u32 31, %v2465_v22  ;;  %v7363_v14 = vshrl.u32 %v1321_v41, 5  ;;  %v7365_v27 = vshrl.u32 %v1425_v45, 5  ;;  %v1945_v29 = vsel %vm1944_vm10, %v1943_v38, 0 }
  0xca   : > { %v2049_v12 = vsel %vm2048_vm11, %v2047_v28, 0  ;;  %v7367_v36 = vshrl.u32 %v1529_v46, 5  ;;  %v7369_v11 = vshrl.u32 %v1633_v26, 5  ;;  %v7371_v31 = vand.u32 31, %v1737_v3  ;;  %v321_v28 = vpop.permute.xlu1 %320 }
  0xcb   : > { %13080 = vst [vmem:[#allocation28_spill] sm:$0xff] %v7363_v14  ;;  %13081 = vst [vmem:[#allocation29_spill] sm:$0xff] %v7365_v27  ;;  %v7373_v30 = vand.u32 31, %v1841_v4  ;;  %v7376_v40 = vsub.s32 32, %v7347_v61  ;;  %v7379_v22 = vsub.s32 32, %v7349_v62  ;;  %v7382_v41 = vsub.s32 32, %v7351_v1 }
  0xcc   : > { %13082 = vst [vmem:[#allocation30_spill] sm:$0xff] %v7367_v36  ;;  %13083 = vst [vmem:[#allocation31_spill] sm:$0xff] %v7369_v11  ;;  %v7385_v38 = vsub.s32 32, %v7353_v2  ;;  %v7387_v45 = vshrl.u32 %v1737_v3, 5  ;;  %v7389_v46 = vand.u32 31, %v1945_v29  ;;  %v7391_v26 = vand.u32 31, %v2049_v12 }
  0xcd   : > { %13084 = vst [vmem:[#allocation32_spill] sm:$0xff] %v7371_v31  ;;  %13085 = vst [vmem:[#allocation33_spill] sm:$0xff] %v7376_v40  ;;  %v2260_v13 = vsub.s32 32, %v7345_v57  ;;  %v7394_v39 = vshrl.u32 %v1841_v4, 5  ;;  %v299_v21 = vadd.f32 %v281_v19, %v7309_v10  ;;  %v300_v37 = vadd.f32 %v281_v19, %v7313_v58 }
  0xce   : > { %13086 = vst [vmem:[#allocation34_spill] sm:$0xff] %v7379_v22  ;;  %13087 = vst [vmem:[#allocation35_spill] sm:$0xff] %v7382_v41  ;;  %v7400_v36 = vsub.s32 32, %v7371_v31  ;;  %v7403_v3 = vsub.s32 32, %v7373_v30  ;;  %v7405_v41 = vshrl.u32 %v1945_v29, 5  ;;  %v360_v1 = vmul.f32 %v7217_v44, %v321_v28  ;;  %v402_v29 = vpop.permute.xlu0 %401 }
  0xcf   : > { %13088 = vst [vmem:[#allocation36_spill] sm:$0xff] %v7385_v38  ;;  %13089 = vst [vmem:[#allocation37_spill] sm:$0xff] %v7387_v45  ;;  %v7408_v60 = vshrl.u32 %v2049_v12, 5  ;;  %v301_v4 = vadd.f32 %v281_v19, %v7317_v15  ;;  %v302_v10 = vadd.f32 %v281_v19, %v7321_v16  ;;  %v361_v58 = vmul.f32 %v7224_v50, %v321_v28 }
  0xd0   : > { %13090 = vst [vmem:[#allocation38_spill] sm:$0xff] %v7389_v46  ;;  %13091 = vst [vmem:[#allocation39_spill] sm:$0xff] %v7400_v36  ;;  %v7414_v35 = vsub.s32 32, %v7389_v46  ;;  %v7417_v14 = vsub.s32 32, %v7391_v26  ;;  %v362_v61 = vmul.f32 %v7189_v20, %v321_v28  ;;  %v12811_v40 = vmov 2475754826  }
  0xd1   : > { %13092 = vst [vmem:[#allocation40_spill] sm:$0xff] %v7405_v41  ;;  %13093 = vst [vmem:[#allocation41_spill] sm:$0xff] %v7408_v60  ;;  %v2263_v42 = vshrl.u32 %v12811_v40, %v2260_v13  ;;  %v363_v12 = vmul.f32 %v7226_v51, %v321_v28  ;;  %v13095_v15 = vand.u32 2147483647, %v7270_v52  ;;  %v12807_v16 = vmov 683565275  }
  0xd2   : > { %13094 = vst [vmem:[#allocation42_spill] sm:$0xff] %v7414_v35  ;;  %v2262_v19 = vshll.u32 %v12807_v16, %v7345_v57  ;;  %v12815_v2 = vmov 2131351028   ;;  %v380_v59 = vadd.f32 %v360_v1, %v299_v21  ;;  %v2265_v27 = vshll.u32 %v12811_v40, %v7345_v57 }
  0xd3   : > { %v2252_v11 = vand.u32 8388607, %v13095_v15  ;;  %v2266_v38 = vshrl.u32 %v12815_v2, %v2260_v13  ;;  %v2268_v62 = vshll.u32 %v12815_v2, %v7345_v57  ;;  %v12834_v22 = vmov 2102212464  }
  0xd4   : > { %v2269_v28 = vshrl.u32 %v12834_v22, %v2260_v13  ;;  %v381_v56 = vadd.f32 %v361_v58, %v300_v37  ;;  %v441_v15 = vmul.f32 %v7228_v54, %v402_v29  ;;  %v442_v41 = vmul.f32 %v7236_v63, %v402_v29 }
  0xd5   : > { %v2264_v35 = vor.u32 %v2263_v42, %v2262_v19  ;;  %v2267_v16 = vor.u32 %v2266_v38, %v2265_v27  ;;  %v2271_v21 = vshll.u32 %v12834_v22, %v7345_v57  ;;  %v12849_v1 = vmov 920167782  }
  0xd6   : > { %v2270_v46 = vor.u32 %v2269_v28, %v2268_v62  ;;  %v2272_v40 = vshrl.u32 %v12849_v1, %v2260_v13  ;;  %v7437_v17 = vadd.f32 %v362_v61, %v301_v4  ;;  %v2253_v2 = vor.u32 8388608, %v2252_v11 }
  0xd7   : > { %v2274_v45 = vshll.u32 %v12849_v1, %v7345_v57  ;;  %v12821_v37 = vmov 1326507024   ;;  %v13096_v31 = vmov 683565275   ;;  %vm2277_vm12 = vcmp.lt.s32.totalorder %v7343_v33, 1 }
  0xd8   : > { %v2275_v58 = vshrl.u32 %v12821_v37, %v2260_v13  ;;  %v2261_v36 = vshrl.u32 %v13096_v31, %v2260_v13  ;;  %v2273_v42 = vor.u32 %v2272_v40, %v2271_v21  ;;  %vm2278_vm13 = vcmp.lt.s32.totalorder %v7343_v33, 2  ;;  %v7449_v40 = vpop.permute.xlu1 %276 }
  0xd9   : > { %vm2279_vm14 = vcmp.lt.s32.totalorder %v7343_v33, 3  ;;  %vm2280_vm15 = vcmp.lt.s32.totalorder %v7343_v33, 4  ;;  %v2285_v61 = vsel %vm2277_vm12, %v2264_v35, %v2267_v16  ;;  %v2289_v57 = vsel %vm2277_vm12, %v2267_v16, %v2270_v46 }
  0xda   : > { %v2276_v62 = vor.u32 %v2275_v58, %v2274_v45  ;;  %v2281_v11 = vsel %vm2277_vm12, %v2261_v36, %v2264_v35  ;;  %v2282_v27 = vsel %vm2280_vm15, %v2270_v46, 2102212464  ;;  %v2286_v38 = vsel %vm2280_vm15, %v2273_v42, 920167782 }
  0xdb   : > { %v2283_v4 = vsel %vm2279_vm14, %v2267_v16, %v2282_v27  ;;  %v2287_v19 = vsel %vm2279_vm14, %v2270_v46, %v2286_v38  ;;  %v2293_v37 = vshll.u32 %v2253_v2, 8  ;;  %v7447_v13 = vadd.f32 %v363_v12, %v302_v10 }
  0xdc   : > { %v2290_v28 = vsel %vm2280_vm15, %v2276_v62, 1326507024  ;;  %v2288_v45 = vsel %vm2278_vm13, %v2285_v61, %v2287_v19  ;;  %v12823_v58 = vand.u32 2147483647, %v7274_v55  ;;  %v2284_v35 = vsel %vm2278_vm13, %v2281_v11, %v2283_v4 }
  0xdd   : > { %v2291_v21 = vsel %vm2279_vm14, %v2273_v42, %v2290_v28  ;;  %v7458_v16 = vmul.u32.u64.low %v2293_v37, %v2288_v45  ;;  %v7459_v46 = vmul.u32.u64.high %v2293_v37, %v2288_v45, %v7458_v16  ;;  %v443_v2 = vmul.f32 %v7215_v43, %v402_v29 }
  0xde   : > { %v2292_v36 = vsel %vm2278_vm13, %v2289_v57, %v2291_v21  ;;  %v444_v10 = vmul.f32 %v7238_v0, %v402_v29  ;;  %v7467_v42 = vadd.f32 %v441_v15, %v380_v59  ;;  %v7469_v61 = vadd.f32 %v442_v41, %v381_v56 }
  0xdf   : > { %v7464_v12 = vmul.u32.u64.low %v2293_v37, %v2292_v36  ;;  %v7465_v62 = vmul.u32.u64.high %v2293_v37, %v2292_v36, %v7464_v12  ;;  %v7473_v11 = vadd.f32 %v7449_v40, %v7325_v24  ;;  %v2468_v33 = vsub.s32 32, %v7361_v23 }
  0xe0   : > { %v2300_v27 = vmul.u32 %v2293_v37, %v2284_v35  ;;  %v2460_v38 = vand.u32 8388607, %v12823_v58  ;;  %v2470_v29 = vshll.u32 %v13096_v31, %v7361_v23  ;;  %v13097_v57 = vmov 2475754826  }
  0xe1   : > { %v2473_v4 = vshll.u32 %v13097_v57, %v7361_v23  ;;  %v2303_v59 = vadd.s32 1, %v7459_v46  ;;  %v2471_v56 = vshrl.u32 %v13097_v57, %v2468_v33  ;;  %v13098_v41 = vmov 2131351028  }
  0xe2   : > { %v2476_v24 = vshll.u32 %v13098_v41, %v7361_v23  ;;  %v2479_v15 = vshll.u32 %v12834_v22, %v7361_v23  ;;  %vm2302_vm0 = vc.u32 %v7465_v62, %v7458_v16  ;;  %v2474_v37 = vshrl.u32 %v13098_v41, %v2468_v33 }
  0xe3   : > { %v2477_v19 = vshrl.u32 %v12834_v22, %v2468_v33  ;;  %v2482_v28 = vshll.u32 %v12849_v1, %v7361_v23  ;;  %v2304_v45 = vsel %vm2302_vm0, %v2303_v59, %v7459_v46  ;;  %v2472_v21 = vor.u32 %v2471_v56, %v2470_v29 }
  0xe4   : > { %v2480_v35 = vshrl.u32 %v12849_v1, %v2468_v33  ;;  %v13099_v36 = vmov 1326507024   ;;  %v2305_v58 = vadd.s32 %v2304_v45, %v2300_v27  ;;  %v2475_v0 = vor.u32 %v2474_v37, %v2473_v4  ;;  %v7521_v37 = vpop.permute.xlu1 %316 }
  0xe5   : > { %v2483_v12 = vshrl.u32 %v13099_v36, %v2468_v33  ;;  %v2478_v43 = vor.u32 %v2477_v19, %v2476_v24  ;;  %vm2485_vm1 = vcmp.lt.s32.totalorder %v7359_v7, 1  ;;  %v2461_v63 = vor.u32 8388608, %v2460_v38 }
  0xe6   : > { %v2469_v54 = vshrl.u32 %v13096_v31, %v2468_v33  ;;  %v2481_v8 = vor.u32 %v2480_v35, %v2479_v15  ;;  %v2306_v60 = vadd.s32 536870912, %v2305_v58  ;;  %vm2487_vm2 = vcmp.lt.s32.totalorder %v7359_v7, 3 }
  0xe7   : > { %v2484_v22 = vor.u32 %v2483_v12, %v2482_v28  ;;  %vm2488_vm3 = vcmp.lt.s32.totalorder %v7359_v7, 4  ;;  %v2493_v23 = vsel %vm2485_vm1, %v2472_v21, %v2475_v0  ;;  %v2497_v27 = vsel %vm2485_vm1, %v2475_v0, %v2478_v43 }
  0xe8   : > { %v2490_v46 = vsel %vm2488_vm3, %v2478_v43, 2102212464  ;;  %v2494_v29 = vsel %vm2488_vm3, %v2481_v8, 920167782  ;;  %v2307_v59 = vshrl.u32 %v2306_v60, 30  ;;  %vm2486_vm4 = vcmp.lt.s32.totalorder %v7359_v7, 2 }
  0xe9   : > { %v2498_v4 = vsel %vm2488_vm3, %v2484_v22, 1326507024  ;;  %v2495_v33 = vsel %vm2487_vm2, %v2478_v43, %v2494_v29  ;;  %v7512_v56 = vadd.f32 %v7449_v40, %v7329_v25  ;;  %v2501_v22 = vshll.u32 %v2461_v63, 8 }
  0xea   : > { %v2499_v38 = vsel %vm2487_vm2, %v2481_v8, %v2498_v4  ;;  %v2496_v24 = vsel %vm2486_vm4, %v2493_v23, %v2495_v33  ;;  %v7519_v60 = vadd.f32 %v443_v2, %v7437_v17  ;;  %v2308_v43 = vshll.u32 %v2307_v59, 30 }
  0xeb   : > { %v2500_v15 = vsel %vm2486_vm4, %v2497_v27, %v2499_v38  ;;  %v2489_v8 = vsel %vm2485_vm1, %v2469_v54, %v2472_v21  ;;  %v2491_v25 = vsel %vm2487_vm2, %v2475_v0, %v2490_v46  ;;  %v7535_v63 = vadd.f32 %v444_v10, %v7447_v13 }
  0xec   : > { %v7527_v19 = vmul.u32.u64.low %v2501_v22, %v2500_v15  ;;  %v7528_v28 = vmul.u32.u64.high %v2501_v22, %v2500_v15, %v7527_v19  ;;  %v7530_v45 = vmul.u32.u64.low %v2501_v22, %v2496_v24  ;;  %v7531_v35 = vmul.u32.u64.high %v2501_v22, %v2496_v24, %v7530_v45 }
  0xed   : > { %v7539_v17 = vadd.f32 %v7449_v40, %v7333_v32  ;;  %v7543_v54 = vadd.f32 %v7449_v40, %v7337_v34  ;;  %v7545_v2 = vsub.s32 %v2305_v58, %v2308_v43  ;;  %v7551_v12 = vmul.f32 %v7217_v44, %v7521_v37 }
  0xee   : > { %v12837_v13 = vand.u32 2147483647, %v7268_v49  ;;  %v2331_v32 = vsub.s32 4, %v2307_v59  ;;  %v2492_v23 = vsel %vm2486_vm4, %v2489_v8, %v2491_v25  ;;  %v2156_v34 = vsub.s32 32, %v7341_v48 }
  0xef   : > { %13100 = vst [vmem:[#allocation43_spill] sm:$0xff] %v7539_v17  ;;  %13101 = vst [vmem:[#allocation44_spill] sm:$0xff] %v7543_v54  ;;  %v2311_v10 = vsub.s32 0, %v7545_v2  ;;  %v7561_v58 = vmul.f32 %v7224_v50, %v7521_v37  ;;  %vm2510_vm5 = vc.u32 %v7528_v28, %v7530_v45  ;;  %v2511_v46 = vadd.s32 1, %v7531_v35 }
  0xf0   : > { %v7569_v27 = vmul.f32 %v7189_v20, %v7521_v37  ;;  %vm2247_vm6 = vcmp.lt.s32.totalorder %v7270_v52, 0  ;;  %v2301_v4 = vadd.s32 %v7458_v16, %v7465_v62  ;;  %v2508_v33 = vmul.u32 %v2501_v22, %v2492_v23 }
  0xf1   : > { %v6089_v7 = vmin.u32 %v2311_v10, %v7545_v2  ;;  %v2512_v38 = vsel %vm2510_vm5, %v2511_v46, %v7531_v35  ;;  %v2148_v24 = vand.u32 8388607, %v12837_v13  ;;  %v7580_v43 = vsel %vm2247_vm6, %v2331_v32, %v2307_v59 }
  0xf2   : > { %13102 = vst [vmem:[#allocation45_spill] sm:$0xff] %v7569_v27  ;;  %v2159_v8 = vshrl.u32 %v13097_v57, %v2156_v34  ;;  %v2162_v25 = vshrl.u32 %v13098_v41, %v2156_v34  ;;  %v2513_v19 = vadd.s32 %v2512_v38, %v2508_v33  ;;  %v2158_v10 = vshll.u32 %v13096_v31, %v7341_v48 }
  0xf3   : > { %v2313_v15 = vclz %v6089_v7  ;;  %v2161_v16 = vshll.u32 %v13097_v57, %v7341_v48  ;;  %v13103_v62 = vmov 2102212464   ;;  %v2168_v59 = vshrl.u32 %v12849_v1, %v2156_v34 }
  0xf4   : > { %v2165_v22 = vshrl.u32 %v13103_v62, %v2156_v34  ;;  %v2167_v23 = vshll.u32 %v13103_v62, %v7341_v48  ;;  %v2171_v32 = vshrl.u32 %v13099_v36, %v2156_v34  ;;  %v13104_v46 = vand.u32 2147483647, %v7270_v52 }
  0xf5   : > { %v6090_v35 = vadd.s32 4294967294, %v2313_v15  ;;  %v2514_v33 = vadd.s32 536870912, %v2513_v19  ;;  %v2149_v38 = vor.u32 8388608, %v2148_v24  ;;  %v2164_v29 = vshll.u32 %v13098_v41, %v7341_v48 }
  0xf6   : > { %vm7595_vm7 = vcmp.le.f32.partialorder %v13104_v46, 0.7853982  ;;  %v2170_v15 = vshll.u32 %v12849_v1, %v7341_v48  ;;  %v2160_v40 = vor.u32 %v2159_v8, %v2158_v10  ;;  %v2163_v13 = vor.u32 %v2162_v25, %v2161_v16 }
  0xf7   : > { %vm6091_vm8 = vcmp.lt.s32.totalorder %v6090_v35, 0  ;;  %v2169_v21 = vor.u32 %v2168_v59, %v2167_v23  ;;  %v7603_v20 = vshrl.u32 %v2514_v33, 30  ;;  %v2166_v50 = vor.u32 %v2165_v22, %v2164_v29 }
  0xf8   : > { %v2316_v0 = vsel %vm6091_vm8, 0, %v6090_v35  ;;  %v2172_v46 = vor.u32 %v2171_v32, %v2170_v15  ;;  %v2157_v27 = vshrl.u32 %v13096_v31, %v2156_v34  ;;  %vm2173_vm9 = vcmp.lt.s32.totalorder %v7339_v47, 1 }
  0xf9   : > { %v2317_v44 = vsub.s32 32, %v2316_v0  ;;  %v2321_v54 = vsub.s32 4294967266, %v2316_v0  ;;  %v2318_v24 = vshll.u32 %v7545_v2, %v2316_v0  ;;  %v2516_v17 = vshll.u32 %v7603_v20, 30 }
  0xfa   : > { %vm2175_vm10 = vcmp.lt.s32.totalorder %v7339_v47, 3  ;;  %vm2176_vm11 = vcmp.lt.s32.totalorder %v7339_v47, 4  ;;  %v2181_v29 = vsel %vm2173_vm9, %v2160_v40, %v2163_v13  ;;  %v2185_v2 = vsel %vm2173_vm9, %v2163_v13, %v2166_v50 }
  0xfb   : > { %v2319_v48 = vshrl.u32 %v2301_v4, %v2317_v44  ;;  %v2322_v8 = vadd.s32 127, %v2321_v54  ;;  %v2182_v25 = vsel %vm2176_vm11, %v2169_v21, 920167782  ;;  %v7613_v10 = vsub.s32 %v2513_v19, %v2516_v17 }
  0xfc   : > { %v2183_v34 = vsel %vm2175_vm10, %v2166_v50, %v2182_v25  ;;  %v2186_v0 = vsel %vm2176_vm11, %v2172_v46, 1326507024  ;;  %vm2174_vm12 = vcmp.lt.s32.totalorder %v7339_v47, 2  ;;  %v2178_v35 = vsel %vm2176_vm11, %v2166_v50, 2102212464 }
  0xfd   : > { %v2320_v16 = vor.u32 %v2319_v48, %v2318_v24  ;;  %v2323_v22 = vshll.u32 %v2322_v8, 23  ;;  %v2519_v44 = vsub.s32 0, %v7613_v10  ;;  %v2184_v54 = vsel %vm2174_vm12, %v2181_v29, %v2183_v34 }
  0xfe   : > { %v2187_v17 = vsel %vm2175_vm10, %v2169_v21, %v2186_v0  ;;  %v2189_v4 = vshll.u32 %v2149_v38, 8  ;;  %v2334_v23 = vsel %vm7595_vm7, 0, %v7580_v43  ;;  %v2177_v59 = vsel %vm2173_vm9, %v2157_v27, %v2160_v40 }
  0xff   : > { %v2324_v19 = vor.u32 4788187, %v2323_v22  ;;  %v2188_v50 = vsel %vm2174_vm12, %v2185_v2, %v2187_v17  ;;  %v6097_v32 = vmin.u32 %v2519_v44, %v7613_v10  ;;  %v2179_v33 = vsel %vm2175_vm10, %v2163_v13, %v2178_v35 }
 0x100   : > { %v7635_v15 = vmul.u32.u64.low %v2189_v4, %v2188_v50  ;;  %v7636_v46 = vmul.u32.u64.high %v2189_v4, %v2188_v50, %v7635_v15  ;;  %v2327_v38 = vcvt.s32.f32 %v2320_v16  ;;  %v13107_v43 = vand.u32 2139095040, %v7467_v42 }
 0x101   : > { %v2325_v21 = vand.u32 2147483647, %v2324_v19  ;;  %v7638_v24 = vmul.u32.u64.low %v2189_v4, %v2184_v54  ;;  %v7639_v48 = vmul.u32.u64.high %v2189_v4, %v2184_v54, %v7638_v24  ;;  %v13108_v27 = vand.u32 2139095040, %v7469_v61 }
 0x102   : > { %v7644_v40 = vshrl.u32 %v13107_v43, 23  ;;  %v7652_v13 = vmul.f32 %v7226_v51, %v7521_v37  ;;  %v2521_v29 = vclz %v6097_v32  ;;  %v2180_v34 = vsel %vm2174_vm12, %v2177_v59, %v2179_v33 }
 0x103   : > { %v7648_v8 = vshrl.u32 %v13108_v27, 23  ;;  %v2328_v25 = vmul.f32 %v2327_v38, %v2325_v21  ;;  %v2349_v2 = vand.u32 2147483647, %v7272_v53  ;;  %v7658_v0 = vsub.s32 32, %v7357_v6 }
 0x104   : > { %v2338_v16 = vadd.s32 3, %v2334_v23  ;;  %vm2455_vm13 = vcmp.lt.s32.totalorder %v7274_v55, 0  ;;  %v6098_v22 = vadd.s32 4294967294, %v2521_v29  ;;  %vm2198_vm14 = vc.u32 %v7636_v46, %v7638_v24 }
 0x105   : > { %v2329_v35 = vxor.u32 2147483648, %v2328_v25  ;;  %v2509_v37 = vadd.s32 %v7530_v45, %v7528_v28  ;;  %v2539_v44 = vsub.s32 4, %v7603_v20  ;;  %v2199_v47 = vadd.s32 1, %v7639_v48 }
 0x106   : > { %vm6099_vm15 = vcmp.lt.s32.totalorder %v6098_v22, 0  ;;  %v2196_v54 = vmul.u32 %v2189_v4, %v2180_v34  ;;  %v2366_v17 = vshll.u32 %v13096_v31, %v7357_v6  ;;  %v2367_v19 = vshrl.u32 %v13097_v57, %v7658_v0 }
 0x107   : > { %v2330_v23 = vsel %vm2247_vm6, %v2329_v35, %v2328_v25  ;;  %v2524_v59 = vsel %vm6099_vm15, 0, %v6098_v22  ;;  %v2200_v50 = vsel %vm2198_vm14, %v2199_v47, %v7639_v48  ;;  %v2356_v28 = vand.u32 8388607, %v2349_v2 }
 0x108   : > { %v2333_v45 = vsel %vm7595_vm7, %v7270_v52, %v2330_v23  ;;  %v2525_v4 = vsub.s32 32, %v2524_v59  ;;  %v2529_v32 = vsub.s32 4294967266, %v2524_v59  ;;  %v2369_v33 = vshll.u32 %v13097_v57, %v7357_v6 }
 0x109   : > { %6394 = vcosq.f32 %v2333_v45  ;;  %v13109_v15 = vand.u32 2147483647, %v7274_v55  ;;  %v2526_v38 = vshll.u32 %v7613_v10, %v2524_v59  ;;  %v2201_v48 = vadd.s32 %v2200_v50, %v2196_v54 }
 0x10a   : > { %v2370_v43 = vshrl.u32 %v13098_v41, %v7658_v0  ;;  %6396 = vsinq.f32 %v2333_v45  ;;  %v2527_v7 = vshrl.u32 %v2509_v37, %v2525_v4  ;;  %v2530_v27 = vadd.s32 127, %v2529_v32 }
 0x10b   : > { %vm7683_vm0 = vcmp.le.f32.partialorder %v13109_v15, 0.7853982  ;;  %v2368_v29 = vor.u32 %v2367_v19, %v2366_v17  ;;  %v2202_v25 = vadd.s32 536870912, %v2201_v48  ;;  %v2372_v22 = vshll.u32 %v13098_v41, %v7357_v6 }
 0x10c   : > { %v2371_v34 = vor.u32 %v2370_v43, %v2369_v33  ;;  %v2373_v35 = vshrl.u32 %v13103_v62, %v7658_v0  ;;  %v2528_v47 = vor.u32 %v2527_v7, %v2526_v38  ;;  %v2531_v23 = vshll.u32 %v2530_v27, 23 }
 0x10d   : > { %v2375_v10 = vshll.u32 %v13103_v62, %v7357_v6  ;;  %v2376_v54 = vshrl.u32 %v12849_v1, %v7658_v0  ;;  %v2339_v59 = vand.u32 3, %v2338_v16  ;;  %v2540_v37 = vsel %vm2455_vm13, %v2539_v44, %v7603_v20 }
 0x10e   : > { %v2203_v17 = vshrl.u32 %v2202_v25, 30  ;;  %v2379_v19 = vshrl.u32 %v13099_v36, %v7658_v0  ;;  %v2532_v50 = vor.u32 4788187, %v2531_v23  ;;  %v2374_v45 = vor.u32 %v2373_v35, %v2372_v22 }
 0x10f   : > { %v2377_v4 = vor.u32 %v2376_v54, %v2375_v10  ;;  %v2378_v32 = vshll.u32 %v12849_v1, %v7357_v6  ;;  %v2535_v33 = vcvt.s32.f32 %v2528_v47  ;;  %v2357_v38 = vor.u32 8388608, %v2356_v28 }
 0x110   : > { %v2204_v15 = vshll.u32 %v2203_v17, 30  ;;  %vm2381_vm1 = vcmp.lt.s32.totalorder %v7355_v5, 1  ;;  %v2533_v16 = vand.u32 2147483647, %v2532_v50  ;;  %vm2143_vm2 = vcmp.lt.s32.totalorder %v7268_v49, 0 }
 0x111   : > { %v2380_v43 = vor.u32 %v2379_v19, %v2378_v32  ;;  %vm2384_vm3 = vcmp.lt.s32.totalorder %v7355_v5, 4  ;;  %v2389_v20 = vsel %vm2381_vm1, %v2368_v29, %v2371_v34  ;;  %vm2341_vm4 = vcmp.eq.s32.totalorder %v2339_v59, 0 }
 0x112   : > { %v7710_v44 = vsub.s32 %v2201_v48, %v2204_v15  ;;  %vm2383_vm5 = vcmp.lt.s32.totalorder %v7355_v5, 3  ;;  %v2390_v6 = vsel %vm2384_vm3, %v2377_v4, 920167782  ;;  %vm2340_vm6 = vcmp.lt.s32.totalorder %v2339_v59, 2 }
 0x113   : > { %v2536_v28 = vmul.f32 %v2535_v33, %v2533_v16  ;;  %v2542_v7 = vsel %vm7683_vm0, 0, %v2540_v37  ;;  %vm2382_vm7 = vcmp.lt.s32.totalorder %v7355_v5, 2  ;;  %v2391_v27 = vsel %vm2383_vm5, %v2374_v45, %v2390_v6 }
 0x114   : > { %vm2337_vm8 = vweird.f32 %v7270_v52  ;;  %v2207_v48 = vsub.s32 0, %v7710_v44  ;;  %v2365_v25 = vshrl.u32 %v13096_v31, %v7658_v0  ;;  %v2386_v22 = vsel %vm2384_vm3, %v2374_v45, 2102212464 }
 0x115   : > { %v2392_v35 = vsel %vm2382_vm7, %v2389_v20, %v2391_v27  ;;  %v2537_v47 = vxor.u32 2147483648, %v2536_v28  ;;  %v2393_v23 = vsel %vm2381_vm1, %v2371_v34, %v2374_v45  ;;  %v2394_v10 = vsel %vm2384_vm3, %v2380_v43, 1326507024 }
 0x116   : > { %v2397_v54 = vshll.u32 %v2357_v38, 8  ;;  %v6085_v37 = vmin.u32 %v2207_v48, %v7710_v44  ;;  %v2227_v19 = vsub.s32 4, %v2203_v17  ;;  %v2385_v0 = vsel %vm2381_vm1, %v2365_v25, %v2368_v29  ;;  %v6395_v32 = vpop.eup %6394 }
 0x117   : > { %v2395_v50 = vsel %vm2383_vm5, %v2377_v4, %v2394_v10  ;;  %v2538_v33 = vsel %vm2455_vm13, %v2537_v47, %v2536_v28  ;;  %v2387_v45 = vsel %vm2383_vm5, %v2371_v34, %v2386_v22  ;;  %v6397_v38 = vpop.eup %6396  ;;  %v2345_v43 = vxor.u32 2147483648, %v6395_v32 }
 0x118   : > { %v7741_v15 = vmul.u32.u64.low %v2397_v54, %v2392_v35  ;;  %v7742_v16 = vmul.u32.u64.high %v2397_v54, %v2392_v35, %v7741_v15  ;;  %v2541_v29 = vsel %vm7683_vm0, %v7274_v55, %v2538_v33  ;;  %v2209_v20 = vclz %v6085_v37 }
 0x119   : > { %v2396_v4 = vsel %vm2382_vm7, %v2393_v23, %v2395_v50  ;;  %v2342_v6 = vxor.u32 2147483648, %v6397_v38  ;;  %vm2344_vm9 = vcmp.eq.s32.totalorder %v2339_v59, 2  ;;  %6398 = vcosq.f32 %v2541_v29 }
 0x11a   : > { %v2546_v28 = vadd.s32 3, %v2542_v7  ;;  %v2346_v27 = vsel %vm2344_vm9, %v2345_v43, %v6397_v38  ;;  %6400 = vsinq.f32 %v2541_v29  ;;  %v6086_v34 = vadd.s32 4294967294, %v2209_v20 }
 0x11b   : > { %v2228_v48 = vsel %vm2143_vm2, %v2227_v19, %v2203_v17  ;;  %v2343_v25 = vsel %vm2341_vm4, %v6395_v32, %v2342_v6  ;;  %v2388_v21 = vsel %vm2382_vm7, %v2385_v0, %v2387_v45  ;;  %v2407_v23 = vadd.s32 1, %v7742_v16 }
 0x11c   : > { %v7755_v22 = vmul.u32.u64.low %v2397_v54, %v2396_v4  ;;  %v7756_v35 = vmul.u32.u64.high %v2397_v54, %v2396_v4, %v7755_v22  ;;  %v2347_v47 = vsel %vm2340_vm6, %v2343_v25, %v2346_v27  ;;  %vm6087_vm10 = vcmp.lt.s32.totalorder %v6086_v34, 0 }
 0x11d   : > { %v1829_v7 = vand.u32 2147483647, %v7294_v9  ;;  %v7763_v10 = vadd.f32 %v7551_v12, %v7473_v11  ;;  %v2348_v17 = vsel %vm2337_vm8, nan, %v2347_v47  ;;  %v7767_v37 = vand.u32 3, %v2546_v28 }
 0x11e   : > { %v2212_v5 = vsel %vm6087_vm10, 0, %v6086_v34  ;;  %3188 = vmatprep.subr.mxu0 %v2348_v17  ;;  %v13112_v19 = vand.u32 2147483647, %v7268_v49  ;;  %v2197_v0 = vadd.s32 %v7638_v24, %v7636_v46  ;;  %v2404_v12 = vmul.u32 %v2397_v54, %v2388_v21 }
 0x11f   : > { %v2213_v50 = vsub.s32 32, %v2212_v5  ;;  %v2217_v32 = vsub.s32 4294967266, %v2212_v5  ;;  %v2214_v11 = vshll.u32 %v7710_v44, %v2212_v5  ;;  %vm2406_vm12 = vc.u32 %v7756_v35, %v7741_v15 }
 0x120   : > { %vm7771_vm11 = vcmp.le.f32.partialorder %v13112_v19, 0.7853982  ;;  %v2408_v38 = vsel %vm2406_vm12, %v2407_v23, %v7742_v16  ;;  %v7785_v43 = vand.u32 8388607, %v1829_v7  ;;  %vm2549_vm13 = vcmp.eq.s32.totalorder %v7767_v37, 0 }
 0x121   : > { %v2230_v52 = vsel %vm7771_vm11, 0, %v2228_v48  ;;  %v2215_v33 = vshrl.u32 %v2197_v0, %v2213_v50  ;;  %v2218_v45 = vadd.s32 127, %v2217_v32  ;;  %vm2552_vm14 = vcmp.eq.s32.totalorder %v7767_v37, 2 }
 0x122   : > { %v2409_v46 = vadd.s32 %v2408_v38, %v2404_v12  ;;  %v1847_v24 = vshrl.u32 %v13097_v57, %v7403_v3  ;;  %v1850_v44 = vshrl.u32 %v13098_v41, %v7403_v3  ;;  %vm2548_vm15 = vcmp.lt.s32.totalorder %v7767_v37, 2 }
 0x123   : > { %v2216_v54 = vor.u32 %v2215_v33, %v2214_v11  ;;  %v2219_v29 = vshll.u32 %v2218_v45, 23  ;;  %v2234_v16 = vadd.s32 3, %v2230_v52  ;;  %v1853_v20 = vshrl.u32 %v13103_v62, %v7403_v3 }
 0x124   : > { %vm2545_vm0 = vweird.f32 %v7274_v55  ;;  %vm2351_vm1 = vcmp.lt.s32.totalorder %v7272_v53, 0  ;;  %v2410_v4 = vadd.s32 536870912, %v2409_v46  ;;  %v1846_v6 = vshll.u32 %v13096_v31, %v7373_v30 }
 0x125   : > { %v1849_v28 = vshll.u32 %v13097_v57, %v7373_v30  ;;  %v1856_v27 = vshrl.u32 %v12849_v1, %v7403_v3  ;;  %v2220_v34 = vor.u32 4788187, %v2219_v29  ;;  %v1837_v48 = vor.u32 8388608, %v7785_v43 }
 0x126   : > { %v1845_v25 = vshrl.u32 %v13096_v31, %v7403_v3  ;;  %v1852_v21 = vshll.u32 %v13098_v41, %v7373_v30  ;;  %v2411_v22 = vshrl.u32 %v2410_v4, 30  ;;  %v1848_v47 = vor.u32 %v1847_v24, %v1846_v6  ;;  %v6399_v5 = vpop.eup %6398 }
 0x127   : > { %v1851_v23 = vor.u32 %v1850_v44, %v1849_v28  ;;  %v1855_v17 = vshll.u32 %v13103_v62, %v7373_v30  ;;  %v2221_v19 = vand.u32 2147483647, %v2220_v34  ;;  %v2223_v0 = vcvt.s32.f32 %v2216_v54  ;;  %v6401_v11 = vpop.eup %6400 }
 0x128   : > { %v1854_v50 = vor.u32 %v1853_v20, %v1852_v21  ;;  %v1859_v32 = vshrl.u32 %v13099_v36, %v7403_v3  ;;  %v2553_v52 = vxor.u32 2147483648, %v6399_v5  ;;  %v2412_v12 = vshll.u32 %v2411_v22, 30 }
 0x129   : > { %v1857_v33 = vor.u32 %v1856_v27, %v1855_v17  ;;  %v1858_v45 = vshll.u32 %v12849_v1, %v7373_v30  ;;  %v2550_v38 = vxor.u32 2147483648, %v6401_v11  ;;  %v2224_v43 = vmul.f32 %v2223_v0, %v2221_v19 }
 0x12a   : > { %v2435_v24 = vsub.s32 4, %v2411_v22  ;;  %vm1861_vm3 = vcmp.lt.s32.totalorder %v7394_v39, 1  ;;  %v2554_v44 = vsel %vm2552_vm14, %v2553_v52, %v6401_v11  ;;  %v7818_v54 = vsub.s32 %v2409_v46, %v2412_v12 }
 0x12b   : > { %vm1862_vm4 = vcmp.lt.s32.totalorder %v7394_v39, 2  ;;  %vm1863_vm5 = vcmp.lt.s32.totalorder %v7394_v39, 3  ;;  %v2551_v3 = vsel %vm2549_vm13, %v6399_v5, %v2550_v38  ;;  %v2225_v29 = vxor.u32 2147483648, %v2224_v43 }
 0x12c   : > { %v1860_v20 = vor.u32 %v1859_v32, %v1858_v45  ;;  %vm1864_vm6 = vcmp.lt.s32.totalorder %v7394_v39, 4  ;;  %v2555_v30 = vsel %vm2548_vm15, %v2551_v3, %v2554_v44  ;;  %v2415_v4 = vsub.s32 0, %v7818_v54 }
 0x12d   : > { %v1866_v46 = vsel %vm1864_vm6, %v1854_v50, 2102212464  ;;  %v1869_v6 = vsel %vm1861_vm3, %v1848_v47, %v1851_v23  ;;  %v2556_v28 = vsel %vm2545_vm0, nan, %v2555_v30  ;;  %v2226_v27 = vsel %vm2143_vm2, %v2225_v29, %v2224_v43 }
 0x12e   : > { %v2436_v34 = vsel %vm2351_vm1, %v2435_v24, %v2411_v22  ;;  %v1870_v37 = vsel %vm1864_vm6, %v1857_v33, 920167782  ;;  %3349 = vmatprep.subr.mxu1 %v2556_v28  ;;  %v2229_v21 = vsel %vm7771_vm11, %v7268_v49, %v2226_v27  ;;  %v6093_v17 = vmin.u32 %v2415_v4, %v7818_v54 }
 0x12f   : > { %v1871_v55 = vsel %vm1863_vm5, %v1854_v50, %v1870_v37  ;;  %v1873_v5 = vsel %vm1861_vm3, %v1851_v23, %v1854_v50  ;;  %6402 = vcosq.f32 %v2229_v21  ;;  %v1874_v19 = vsel %vm1864_vm6, %v1860_v20, 1326507024 }
 0x130   : > { %v1872_v22 = vsel %vm1862_vm4, %v1869_v6, %v1871_v55  ;;  %v1877_v0 = vshll.u32 %v1837_v48, 8  ;;  %6404 = vsinq.f32 %v2229_v21  ;;  %v2417_v32 = vclz %v6093_v17 }
 0x131   : > { %v1865_v59 = vsel %vm1861_vm3, %v1845_v25, %v1848_v47  ;;  %v1867_v11 = vsel %vm1863_vm5, %v1851_v23, %v1866_v46  ;;  %vm7858_vm2 = vcmp.le.f32.partialorder %v2349_v2, 0.7853982  ;;  %v1875_v52 = vsel %vm1863_vm5, %v1857_v33, %v1874_v19 }
 0x132   : > { %v7864_v12 = vmul.u32.u64.low %v1877_v0, %v1872_v22  ;;  %v7865_v45 = vmul.u32.u64.high %v1877_v0, %v1872_v22, %v7864_v12  ;;  %v7868_v48 = vand.u32 3, %v2234_v16  ;;  %v6094_v38 = vadd.s32 4294967294, %v2417_v32 }
 0x133   : > { %v2438_v25 = vsel %vm7858_vm2, 0, %v2436_v34  ;;  %v1876_v47 = vsel %vm1862_vm4, %v1873_v5, %v1875_v52  ;;  %v1868_v2 = vsel %vm1862_vm4, %v1865_v59, %v1867_v11  ;;  %v2037_v33 = vand.u32 2147483647, %v7301_v18 }
 0x134   : > { %v7876_v23 = vmul.u32.u64.low %v1877_v0, %v1876_v47  ;;  %v7877_v43 = vmul.u32.u64.high %v1877_v0, %v1876_v47, %v7876_v23  ;;  %v13117_v24 = vand.u32 2139095040, %v7519_v60  ;;  %v13118_v16 = vand.u32 2139095040, %v7535_v63 }
 0x135   : > { %v7890_v29 = vadd.f32 %v7561_v58, %v7512_v56  ;;  %vm6095_vm7 = vcmp.lt.s32.totalorder %v6094_v38, 0  ;;  %v2405_v39 = vadd.s32 %v7741_v15, %v7756_v35  ;;  %v7894_v30 = vadd.s32 3, %v2438_v25 }
 0x136   : > { %v7882_v44 = vshrl.u32 %v13117_v24, 23  ;;  %v7886_v3 = vshrl.u32 %v13118_v16, 23  ;;  %v2420_v20 = vsel %vm6095_vm7, 0, %v6094_v38  ;;  %v1887_v4 = vadd.s32 1, %v7865_v45 }
 0x137   : > { %vm2240_vm8 = vcmp.eq.s32.totalorder %v7868_v48, 2  ;;  %v2421_v46 = vsub.s32 32, %v2420_v20  ;;  %v2425_v6 = vsub.s32 4294967266, %v2420_v20  ;;  %v1884_v28 = vmul.u32 %v1877_v0, %v1868_v2 }
 0x138   : > { %v2053_v27 = vshrl.u32 %v13096_v31, %v7417_v14  ;;  %vm2237_vm9 = vcmp.eq.s32.totalorder %v7868_v48, 0  ;;  %v2422_v56 = vshll.u32 %v7818_v54, %v2420_v20  ;;  %vm1886_vm10 = vc.u32 %v7877_v43, %v7864_v12 }
 0x139   : > { %v2044_v58 = vand.u32 8388607, %v2037_v33  ;;  %v2055_v15 = vshrl.u32 %v13097_v57, %v7417_v14  ;;  %vm2236_vm11 = vcmp.lt.s32.totalorder %v7868_v48, 2  ;;  %v2423_v35 = vshrl.u32 %v2405_v39, %v2421_v46 }
 0x13a   : > { %v2426_v34 = vadd.s32 127, %v2425_v6  ;;  %v1888_v37 = vsel %vm1886_vm10, %v1887_v4, %v7865_v45  ;;  %v2058_v21 = vshrl.u32 %v13098_v41, %v7417_v14  ;;  %vm2233_vm12 = vweird.f32 %v7268_v49 }
 0x13b   : > { %v1889_v54 = vadd.s32 %v1888_v37, %v1884_v28  ;;  %v2054_v17 = vshll.u32 %v13096_v31, %v7391_v26  ;;  %v2057_v55 = vshll.u32 %v13097_v57, %v7391_v26  ;;  %v2061_v5 = vshrl.u32 %v13103_v62, %v7417_v14 }
 0x13c   : > { %v2424_v22 = vor.u32 %v2423_v35, %v2422_v56  ;;  %v2427_v19 = vshll.u32 %v2426_v34, 23  ;;  %vm1831_vm13 = vcmp.lt.s32.totalorder %v7294_v9, 0  ;;  %v2060_v0 = vshll.u32 %v13098_v41, %v7391_v26  ;;  %v6403_v38 = vpop.eup %6402  ;;  %v13119_v56 = vld [vmem:[#allocation41_spill] sm:$0xff] }
 0x13d   : > { %v2064_v32 = vshrl.u32 %v12849_v1, %v7417_v14  ;;  %v1890_v59 = vadd.s32 536870912, %v1889_v54  ;;  %v2045_v11 = vor.u32 8388608, %v2044_v58  ;;  %v2056_v52 = vor.u32 %v2055_v15, %v2054_v17  ;;  %v6405_v24 = vpop.eup %6404 }
 0x13e   : > { %v2063_v45 = vshll.u32 %v13103_v62, %v7391_v26  ;;  %v2428_v25 = vor.u32 4788187, %v2427_v19  ;;  %v2059_v47 = vor.u32 %v2058_v21, %v2057_v55  ;;  %v2062_v2 = vor.u32 %v2061_v5, %v2060_v0 }
 0x13f   : > { %v2067_v23 = vshrl.u32 %v13099_v36, %v7417_v14  ;;  %v2241_v16 = vxor.u32 2147483648, %v6403_v38  ;;  %v2431_v39 = vcvt.s32.f32 %v2424_v22  ;;  %v1891_v20 = vshrl.u32 %v1890_v59, 30 }
 0x140   : > { %v2066_v4 = vshll.u32 %v12849_v1, %v7391_v26  ;;  %v2238_v46 = vxor.u32 2147483648, %v6405_v24  ;;  %v2429_v6 = vand.u32 2147483647, %v2428_v25  ;;  %v2065_v28 = vor.u32 %v2064_v32, %v2063_v45 }
 0x141   : > { %vm2069_vm14 = vcmp.lt.s32.totalorder %v13119_v56, 1  ;;  %v2242_v58 = vsel %vm2240_vm8, %v2241_v16, %v6405_v24  ;;  %v1892_v15 = vshll.u32 %v1891_v20, 30  ;;  %v1915_v35 = vsub.s32 4, %v1891_v20 }
 0x142   : > { %vm2072_vm15 = vcmp.lt.s32.totalorder %v13119_v56, 4  ;;  %v2239_v14 = vsel %vm2237_vm9, %v6403_v38, %v2238_v46  ;;  %v2432_v34 = vmul.f32 %v2431_v39, %v2429_v6  ;;  %v2068_v37 = vor.u32 %v2067_v23, %v2066_v4  ;;  %v7981_v4 = vpop.permute.xlu1 %397 }
 0x143   : > { %v2074_v26 = vsel %vm2072_vm15, %v2062_v2, 2102212464  ;;  %v2243_v21 = vsel %vm2236_vm11, %v2239_v14, %v2242_v58  ;;  %v7940_v17 = vsub.s32 %v1889_v54, %v1892_v15  ;;  %vm2070_vm0 = vcmp.lt.s32.totalorder %v13119_v56, 2 }
 0x144   : > { %vm2071_vm3 = vcmp.lt.s32.totalorder %v13119_v56, 3  ;;  %v2244_v55 = vsel %vm2233_vm12, nan, %v2243_v21  ;;  %v2433_v5 = vxor.u32 2147483648, %v2432_v34  ;;  %v2073_v22 = vsel %vm2069_vm14, %v2053_v27, %v2056_v52 }
 0x145   : > { %v2077_v19 = vsel %vm2069_vm14, %v2056_v52, %v2059_v47  ;;  %3189 = vmatpush1.msra.mxu0 %v2244_v55  ;;  %v1895_v48 = vsub.s32 0, %v7940_v17  ;;  %v1916_v54 = vsel %vm1831_vm13, %v1915_v35, %v1891_v20  ;;  %v2075_v0 = vsel %vm2071_vm3, %v2059_v47, %v2074_v26  ;;  %v13121_v20 = vld [vmem:[#allocation45_spill] sm:$0xff]  ;;  %v13125_v26 = vld [vmem:[#allocation44_spill] sm:$0xff]  ;;  %v13126_v55 = vld [vmem:[#allocation15_spill] sm:$0xff] }
 0x146   : > { %v2078_v49 = vsel %vm2072_vm15, %v2065_v28, 920167782  ;;  %v2434_v32 = vsel %vm2351_vm1, %v2433_v5, %v2432_v34  ;;  %v2082_v59 = vsel %vm2072_vm15, %v2068_v37, 1326507024  ;;  %v2085_v52 = vshll.u32 %v2045_v11, 8  ;;  %v13120_v11 = vld [vmem:[#allocation43_spill] sm:$0xff] }
 0x147   : > { %v2079_v27 = vsel %vm2071_vm3, %v2062_v2, %v2078_v49  ;;  %v2437_v45 = vsel %vm7858_vm2, %v7272_v53, %v2434_v32  ;;  %v6073_v38 = vmin.u32 %v1895_v48, %v7940_v17  ;;  %v2081_v23 = vsel %vm2069_vm14, %v2059_v47, %v2062_v2  ;;  %v13127_v5 = vld [vmem:[#allocation17_spill] sm:$0xff] }
 0x148   : > { %v2080_v25 = vsel %vm2070_vm0, %v2077_v19, %v2079_v27  ;;  %6406 = vcosq.f32 %v2437_v45  ;;  %v2083_v24 = vsel %vm2071_vm3, %v2065_v28, %v2082_v59  ;;  %v7979_v50 = vadd.f32 %v13121_v20, %v13120_v11  ;;  %v13129_v59 = vld [vmem:[#allocation32_spill] sm:$0xff] }
 0x149   : > { %v7973_v16 = vmul.u32.u64.low %v2085_v52, %v2080_v25  ;;  %v7974_v39 = vmul.u32.u64.high %v2085_v52, %v2080_v25, %v7973_v16  ;;  %6408 = vsinq.f32 %v2437_v45  ;;  %vm7985_vm1 = vcmp.le.f32.partialorder %v1829_v7, 0.7853982  ;;  %v13124_v7 = vld [vmem:[#allocation22_spill] sm:$0xff] }
 0x14a   : > { %v1897_v47 = vclz %v6073_v38  ;;  %v7990_v2 = vand.u32 3, %v7894_v30  ;;  %v1918_v6 = vsel %vm7985_vm1, 0, %v1916_v54  ;;  %v2076_v28 = vsel %vm2070_vm0, %v2073_v22, %v2075_v0 }
 0x14b   : > { %v2084_v58 = vsel %vm2070_vm0, %v2081_v23, %v2083_v24  ;;  %v12845_v34 = vand.u32 2147483647, %v13124_v7  ;;  %v8003_v37 = vadd.s32 4294967169, %v7644_v40  ;;  %v8006_v30 = vadd.s32 4294967169, %v7648_v8 }
 0x14c   : > { %v6074_v15 = vadd.s32 4294967294, %v1897_v47  ;;  %v7998_v35 = vmul.u32.u64.low %v2085_v52, %v2084_v58  ;;  %v7999_v14 = vmul.u32.u64.high %v2085_v52, %v2084_v58, %v7998_v35  ;;  %v8010_v21 = vadd.f32 %v7652_v13, %v13125_v26  ;;  %v13128_v13 = vld [vmem:[#allocation39_spill] sm:$0xff] }
 0x14d   : > { %v8014_v56 = vmul.f32 %v13126_v55, %v7981_v4  ;;  %v8018_v22 = vmul.f32 %v13127_v5, %v7981_v4  ;;  %v1885_v19 = vadd.s32 %v7864_v12, %v7877_v43  ;;  %v2095_v40 = vadd.s32 1, %v7974_v39  ;;  %v13167_v55 = vld [vmem:[#allocation30_spill] sm:$0xff] }
 0x14e   : > { %vm6075_vm4 = vcmp.lt.s32.totalorder %v6074_v15, 0  ;;  %v8023_v48 = vadd.s32 3, %v1918_v6  ;;  %v2092_v54 = vmul.u32 %v2085_v52, %v2076_v28  ;;  %v1741_v0 = vshrl.u32 %v13096_v31, %v13128_v13 }
 0x14f   : > { %v1900_v8 = vsel %vm6075_vm4, 0, %v6074_v15  ;;  %vm2448_vm5 = vcmp.eq.s32.totalorder %v7990_v2, 2  ;;  %v8030_v27 = vand.u32 8388607, %v12845_v34  ;;  %v1742_v12 = vshll.u32 %v13096_v31, %v13129_v59  ;;  %v13138_v34 = vld [vmem:[#allocation40_spill] sm:$0xff] }
 0x150   : > { %v1901_v49 = vsub.s32 32, %v1900_v8  ;;  %v1905_v32 = vsub.s32 4294967266, %v1900_v8  ;;  %vm2445_vm6 = vcmp.eq.s32.totalorder %v7990_v2, 0  ;;  %v1902_v43 = vshll.u32 %v7940_v17, %v1900_v8 }
 0x151   : > { %vm2094_vm2 = vc.u32 %v7999_v14, %v7973_v16  ;;  %v1743_v52 = vshrl.u32 %v13097_v57, %v13128_v13  ;;  %v1746_v45 = vshrl.u32 %v13098_v41, %v13128_v13  ;;  %vm2444_vm7 = vcmp.lt.s32.totalorder %v7990_v2, 2 }
 0x152   : > { %v1903_v38 = vshrl.u32 %v1885_v19, %v1901_v49  ;;  %v1906_v25 = vadd.s32 127, %v1905_v32  ;;  %v2096_v23 = vsel %vm2094_vm2, %v2095_v40, %v7974_v39  ;;  %v1749_v24 = vshrl.u32 %v13103_v62, %v13128_v13 }
 0x153   : > { %vm2441_vm8 = vweird.f32 %v7272_v53  ;;  %v2097_v17 = vadd.s32 %v2096_v23, %v2092_v54  ;;  %v1745_v11 = vshll.u32 %v13097_v57, %v13129_v59  ;;  %v1748_v20 = vshll.u32 %v13098_v41, %v13129_v59 }
 0x154   : > { %v1752_v47 = vshrl.u32 %v12849_v1, %v13128_v13  ;;  %v1904_v6 = vor.u32 %v1903_v38, %v1902_v43  ;;  %v1907_v28 = vshll.u32 %v1906_v25, 23  ;;  %v1733_v58 = vor.u32 8388608, %v8030_v27  ;;  %v13130_v25 = vld [vmem:[#allocation37_spill] sm:$0xff] }
 0x155   : > { %v1751_v39 = vshll.u32 %v13103_v62, %v13129_v59  ;;  %vm2039_vm9 = vcmp.lt.s32.totalorder %v7301_v18, 0  ;;  %v2098_v15 = vadd.s32 536870912, %v2097_v17  ;;  %v1744_v35 = vor.u32 %v1743_v52, %v1742_v12  ;;  %v6407_v40 = vpop.eup %6406 }
 0x156   : > { %v1750_v26 = vor.u32 %v1749_v24, %v1748_v20  ;;  %v1755_v19 = vshrl.u32 %v13099_v36, %v13128_v13  ;;  %v1908_v8 = vor.u32 4788187, %v1907_v28  ;;  %v1747_v54 = vor.u32 %v1746_v45, %v1745_v11  ;;  %v6409_v43 = vpop.eup %6408 }
 0x157   : > { %v1753_v49 = vor.u32 %v1752_v47, %v1751_v39  ;;  %v1754_v32 = vshll.u32 %v12849_v1, %v13129_v59  ;;  %v2449_v27 = vxor.u32 2147483648, %v6407_v40  ;;  %v2099_v38 = vshrl.u32 %v2098_v15, 30 }
 0x158   : > { %vm1757_vm10 = vcmp.lt.s32.totalorder %v13130_v25, 1  ;;  %vm1758_vm11 = vcmp.lt.s32.totalorder %v13130_v25, 2  ;;  %v2446_v23 = vxor.u32 2147483648, %v6409_v43  ;;  %v1909_v12 = vand.u32 2147483647, %v1908_v8 }
 0x159   : > { %v1911_v52 = vcvt.s32.f32 %v1904_v6  ;;  %vm1760_vm12 = vcmp.lt.s32.totalorder %v13130_v25, 4  ;;  %v2450_v13 = vsel %vm2448_vm5, %v2449_v27, %v6409_v43  ;;  %v2100_v45 = vshll.u32 %v2099_v38, 30 }
 0x15a   : > { %v1756_v24 = vor.u32 %v1755_v19, %v1754_v32  ;;  %v1762_v59 = vsel %vm1760_vm12, %v1750_v26, 2102212464  ;;  %v2447_v11 = vsel %vm2445_vm6, %v6407_v40, %v2446_v23  ;;  %v2123_v47 = vsub.s32 4, %v2099_v38 }
 0x15b   : > { %v1912_v20 = vmul.f32 %v1911_v52, %v1909_v12  ;;  %v1766_v28 = vsel %vm1760_vm12, %v1753_v49, 920167782  ;;  %v2451_v6 = vsel %vm2444_vm7, %v2447_v11, %v2450_v13  ;;  %v8074_v39 = vsub.s32 %v2097_v17, %v2100_v45  ;;  %v13133_v11 = vld [vmem:[#allocation23_spill] sm:$0xff] }
 0x15c   : > { %vm1759_vm14 = vcmp.lt.s32.totalorder %v13130_v25, 3  ;;  %v1761_v15 = vsel %vm1757_vm10, %v1741_v0, %v1744_v35  ;;  %v2452_v19 = vsel %vm2441_vm8, nan, %v2451_v6  ;;  %v1765_v40 = vsel %vm1757_vm10, %v1744_v35, %v1747_v54 }
 0x15d   : > { %v1913_v8 = vxor.u32 2147483648, %v1912_v20  ;;  %v1767_v32 = vsel %vm1759_vm14, %v1750_v26, %v1766_v28  ;;  %3350 = vmatpush1.msra.mxu1 %v2452_v19  ;;  %v2103_v43 = vsub.s32 0, %v8074_v39  ;;  %v1763_v2 = vsel %vm1759_vm14, %v1747_v54, %v1762_v59 }
 0x15e   : > { %v1769_v17 = vsel %vm1757_vm10, %v1747_v54, %v1750_v26  ;;  %v1770_v27 = vsel %vm1760_vm12, %v1756_v24, 1326507024  ;;  %v2124_v53 = vsel %vm2039_vm9, %v2123_v47, %v2099_v38  ;;  %v1773_v12 = vshll.u32 %v1733_v58, 8 }
 0x15f   : > { %v1914_v0 = vsel %vm1831_vm13, %v1913_v8, %v1912_v20  ;;  %v1771_v23 = vsel %vm1759_vm14, %v1753_v49, %v1770_v27  ;;  %v6081_v52 = vmin.u32 %v2103_v43, %v8074_v39  ;;  %v1768_v26 = vsel %vm1758_vm11, %v1765_v40, %v1767_v32  ;;  %v13135_v8 = vld [vmem:[#allocation18_spill] sm:$0xff] }
 0x160   : > { %v1917_v35 = vsel %vm7985_vm1, %v7294_v9, %v1914_v0  ;;  %v1772_v54 = vsel %vm1758_vm11, %v1769_v17, %v1771_v23  ;;  %v8101_v13 = vadd.s32 4294967169, %v7882_v44  ;;  %vm8108_vm13 = vcmp.le.f32.partialorder %v2037_v33, 0.7853982  ;;  %v13134_v33 = vld [vmem:[#allocation11_spill] sm:$0xff]  ;;  %v13137_v17 = vld [vmem:[#allocation42_spill] sm:$0xff] }
 0x161   : > { %6410 = vcosq.f32 %v1917_v35  ;;  %v8103_v45 = vmul.u32.u64.low %v1773_v12, %v1772_v54  ;;  %v8104_v38 = vmul.u32.u64.high %v1773_v12, %v1772_v54, %v8103_v45  ;;  %v2105_v58 = vclz %v6081_v52 }
 0x162   : > { %6412 = vsinq.f32 %v1917_v35  ;;  %v1764_v49 = vsel %vm1758_vm11, %v1761_v15, %v1763_v2  ;;  %v2126_v24 = vsel %vm8108_vm13, 0, %v2124_v53  ;;  %v12844_v20 = vand.u32 2147483647, %v13133_v11  ;;  %v13136_v2 = vld [vmem:[#allocation38_spill] sm:$0xff] }
 0x163   : > { %v8116_v44 = vmul.u32.u64.low %v1773_v12, %v1768_v26  ;;  %v8117_v59 = vmul.u32.u64.high %v1773_v12, %v1768_v26, %v8116_v44  ;;  %v8122_v47 = vadd.s32 4294967169, %v7886_v3  ;;  %v8126_v28 = vmul.f32 %v13134_v33, %v7981_v4 }
 0x164   : > { %v8129_v6 = vand.u32 3, %v8023_v48  ;;  %v6082_v25 = vadd.s32 4294967294, %v2105_v58  ;;  %v8132_v15 = vadd.s32 1, %v8003_v37  ;;  %v8135_v19 = vadd.s32 1, %v8006_v30 }
 0x165   : > { %v8139_v40 = vmul.f32 %v13135_v8, %v7981_v4  ;;  %v2093_v3 = vadd.s32 %v7973_v16, %v7999_v14  ;;  %v8143_v32 = vadd.s32 3, %v2126_v24  ;;  %v1780_v43 = vmul.u32 %v1773_v12, %v1764_v49 }
 0x166   : > { %vm6083_vm15 = vcmp.lt.s32.totalorder %v6082_v25, 0  ;;  %vm1782_vm0 = vc.u32 %v8104_v38, %v8116_v44  ;;  %v1783_v37 = vadd.s32 1, %v8117_v59  ;;  %v8150_v30 = vand.u32 8388607, %v12844_v20 }
 0x167   : > { %v2108_v48 = vsel %vm6083_vm15, 0, %v6082_v25  ;;  %v1950_v4 = vshll.u32 %v13096_v31, %v13136_v2  ;;  %vm1928_vm3 = vcmp.eq.s32.totalorder %v8129_v6, 2  ;;  %v1951_v27 = vshrl.u32 %v13097_v57, %v13137_v17 }
 0x168   : > { %v2109_v16 = vsub.s32 32, %v2108_v48  ;;  %v2113_v14 = vsub.s32 4294967266, %v2108_v48  ;;  %v1954_v0 = vshrl.u32 %v13098_v41, %v13137_v17  ;;  %vm1925_vm1 = vcmp.eq.s32.totalorder %v8129_v6, 0 }
 0x169   : > { %v2110_v53 = vshll.u32 %v8074_v39, %v2108_v48  ;;  %v1784_v23 = vsel %vm1782_vm0, %v1783_v37, %v8117_v59  ;;  %v1957_v12 = vshrl.u32 %v13103_v62, %v13137_v17  ;;  %v1959_v35 = vshll.u32 %v13103_v62, %v13136_v2 }
 0x16a   : > { %vm1924_vm4 = vcmp.lt.s32.totalorder %v8129_v6, 2  ;;  %v2111_v52 = vshrl.u32 %v2093_v3, %v2109_v16  ;;  %v2114_v26 = vadd.s32 127, %v2113_v14  ;;  %v1785_v54 = vadd.s32 %v1784_v23, %v1780_v43 }
 0x16b   : > { %v1960_v45 = vshrl.u32 %v12849_v1, %v13137_v17  ;;  %vm1921_vm5 = vweird.f32 %v7294_v9  ;;  %v1941_v39 = vor.u32 8388608, %v8150_v30  ;;  %v1953_v58 = vshll.u32 %v13097_v57, %v13136_v2 }
 0x16c   : > { %v1956_v49 = vshll.u32 %v13098_v41, %v13136_v2  ;;  %v1963_v24 = vshrl.u32 %v13099_v36, %v13137_v17  ;;  %v2112_v59 = vor.u32 %v2111_v52, %v2110_v53  ;;  %v2115_v25 = vshll.u32 %v2114_v26, 23 }
 0x16d   : > { %v1786_v3 = vadd.s32 536870912, %v1785_v54  ;;  %v1961_v43 = vor.u32 %v1960_v45, %v1959_v35  ;;  %vm1727_vm6 = vcmp.lt.s32.totalorder %v13124_v7, 0  ;;  %v1952_v48 = vor.u32 %v1951_v27, %v1950_v4 }
 0x16e   : > { %v1955_v37 = vor.u32 %v1954_v0, %v1953_v58  ;;  %v1958_v16 = vor.u32 %v1957_v12, %v1956_v49  ;;  %v1962_v30 = vshll.u32 %v12849_v1, %v13136_v2  ;;  %v6411_v14 = vpop.eup %6410  ;;  %v2116_v23 = vor.u32 4788187, %v2115_v25 }
 0x16f   : > { %v1787_v20 = vshrl.u32 %v1786_v3, 30  ;;  %vm1965_vm2 = vcmp.lt.s32.totalorder %v13138_v34, 1  ;;  %vm1968_vm7 = vcmp.lt.s32.totalorder %v13138_v34, 4  ;;  %v6413_v8 = vpop.eup %6412  ;;  %v1929_v53 = vxor.u32 2147483648, %v6411_v14 }
 0x170   : > { %v1964_v52 = vor.u32 %v1963_v24, %v1962_v30  ;;  %vm1967_vm8 = vcmp.lt.s32.totalorder %v13138_v34, 3  ;;  %v1974_v4 = vsel %vm1968_vm7, %v1961_v43, 920167782  ;;  %v1926_v27 = vxor.u32 2147483648, %v6413_v8 }
 0x171   : > { %v2117_v0 = vand.u32 2147483647, %v2116_v23  ;;  %v2119_v12 = vcvt.s32.f32 %v2112_v59  ;;  %v1788_v35 = vshll.u32 %v1787_v20, 30  ;;  %v1930_v2 = vsel %vm1928_vm3, %v1929_v53, %v6413_v8 }
 0x172   : > { %v1970_v26 = vsel %vm1968_vm7, %v1958_v16, 2102212464  ;;  %v1973_v45 = vsel %vm1965_vm2, %v1952_v48, %v1955_v37  ;;  %v1975_v58 = vsel %vm1967_vm8, %v1958_v16, %v1974_v4  ;;  %v1927_v49 = vsel %vm1925_vm1, %v6411_v14, %v1926_v27 }
 0x173   : > { %v2120_v24 = vmul.f32 %v2119_v12, %v2117_v0  ;;  %v8195_v25 = vsub.s32 %v1785_v54, %v1788_v35  ;;  %v1811_v59 = vsub.s32 4, %v1787_v20  ;;  %v1931_v3 = vsel %vm1924_vm4, %v1927_v49, %v1930_v2 }
 0x174   : > { %v1949_v8 = vshrl.u32 %v13096_v31, %v13137_v17  ;;  %vm1966_vm10 = vcmp.lt.s32.totalorder %v13138_v34, 2  ;;  %v1977_v30 = vsel %vm1965_vm2, %v1955_v37, %v1958_v16  ;;  %v1932_v23 = vsel %vm1921_vm5, nan, %v1931_v3 }
 0x175   : > { %v2121_v53 = vxor.u32 2147483648, %v2120_v24  ;;  %v1791_v14 = vsub.s32 0, %v8195_v25  ;;  %v1976_v54 = vsel %vm1966_vm10, %v1973_v45, %v1975_v58  ;;  %3190 = vmatprep.subr.mxu0 %v1932_v23  ;;  %v1971_v17 = vsel %vm1967_vm8, %v1955_v37, %v1970_v26 }
 0x176   : > { %v1969_v6 = vsel %vm1965_vm2, %v1949_v8, %v1952_v48  ;;  %v1978_v4 = vsel %vm1968_vm7, %v1964_v52, 1326507024  ;;  %v1981_v16 = vshll.u32 %v1941_v39, 8  ;;  %v1812_v0 = vsel %vm1727_vm6, %v1811_v59, %v1787_v20 }
 0x177   : > { %v2122_v9 = vsel %vm2039_vm9, %v2121_v53, %v2120_v24  ;;  %v6069_v27 = vmin.u32 %v1791_v14, %v8195_v25  ;;  %v1979_v12 = vsel %vm1967_vm8, %v1961_v43, %v1978_v4  ;;  %v8233_v35 = vadd.f32 %v8014_v56, %v7763_v10  ;;  %v13142_v56 = vld [vmem:[#allocation20_spill] sm:$0xff] }
 0x178   : > { %v2125_v48 = vsel %vm8108_vm13, %v7301_v18, %v2122_v9  ;;  %v1980_v37 = vsel %vm1966_vm10, %v1977_v30, %v1979_v12  ;;  %v8227_v52 = vmul.u32.u64.low %v1981_v16, %v1976_v54  ;;  %v8228_v39 = vmul.u32.u64.high %v1981_v16, %v1976_v54, %v8227_v52 }
 0x179   : > { %v8237_v20 = vadd.f32 %v8018_v22, %v7890_v29  ;;  %6414 = vcosq.f32 %v2125_v48  ;;  %v1793_v43 = vclz %v6069_v27  ;;  %v13139_v46 = vand.u32 2147483647, %v13124_v7 }
 0x17a   : > { %6416 = vsinq.f32 %v2125_v48  ;;  %v8245_v26 = vmul.u32.u64.low %v1981_v16, %v1980_v37  ;;  %v8246_v45 = vmul.u32.u64.high %v1981_v16, %v1980_v37, %v8245_v26  ;;  %v1972_v29 = vsel %vm1966_vm10, %v1969_v6, %v1971_v17 }
 0x17b   : > { %vm8241_vm9 = vcmp.le.f32.partialorder %v13139_v46, 0.7853982  ;;  %v6070_v58 = vadd.s32 4294967294, %v1793_v43  ;;  %v1413_v22 = vand.u32 2147483647, %v13142_v56  ;;  %v8254_v49 = vadd.s32 1, %v8101_v13 }
 0x17c   : > { %v1814_v10 = vsel %vm8241_vm9, 0, %v1812_v0  ;;  %v8257_v24 = vadd.s32 1, %v8122_v47  ;;  %v8260_v59 = vand.u32 3, %v8143_v32  ;;  %v1991_v3 = vadd.s32 1, %v8228_v39 }
 0x17d   : > { %v8265_v8 = vadd.f32 %v8126_v28, %v7979_v50  ;;  %v8269_v34 = vadd.f32 %v8139_v40, %v8010_v21  ;;  %v1781_v13 = vadd.s32 %v8116_v44, %v8104_v38  ;;  %vm6071_vm11 = vcmp.lt.s32.totalorder %v6070_v58, 0  ;;  %v13143_v38 = vld [vmem:[#allocation34_spill] sm:$0xff]  ;;  %v13144_v40 = vld [vmem:[#allocation25_spill] sm:$0xff] }
 0x17e   : > { %v1796_v30 = vsel %vm6071_vm11, 0, %v6070_v58  ;;  %v8273_v47 = vadd.s32 3, %v1814_v10  ;;  %v1988_v23 = vmul.u32 %v1981_v16, %v1972_v29  ;;  %vm1990_vm12 = vc.u32 %v8246_v45, %v8227_v52 }
 0x17f   : > { %v1797_v32 = vsub.s32 32, %v1796_v30  ;;  %v1801_v53 = vsub.s32 4294967266, %v1796_v30  ;;  %v1992_v50 = vsel %vm1990_vm12, %v1991_v3, %v8228_v39  ;;  %v8280_v28 = vand.u32 8388607, %v1413_v22 }
 0x180   : > { %vm2136_vm14 = vcmp.eq.s32.totalorder %v8260_v59, 2  ;;  %v1993_v21 = vadd.s32 %v1992_v50, %v1988_v23  ;;  %v1429_v44 = vshrl.u32 %v13096_v31, %v13143_v38  ;;  %v1430_v14 = vshll.u32 %v13096_v31, %v13144_v40  ;;  %v13145_v50 = vld [vmem:[#allocation29_spill] sm:$0xff] }
 0x181   : > { %v1431_v54 = vshrl.u32 %v13097_v57, %v13143_v38  ;;  %vm2133_vm13 = vcmp.eq.s32.totalorder %v8260_v59, 0  ;;  %v1798_v6 = vshll.u32 %v8195_v25, %v1796_v30  ;;  %v1799_v17 = vshrl.u32 %v1781_v13, %v1797_v32 }
 0x182   : > { %v1802_v4 = vadd.s32 127, %v1801_v53  ;;  %v1434_v16 = vshrl.u32 %v13098_v41, %v13143_v38  ;;  %vm2132_vm15 = vcmp.lt.s32.totalorder %v8260_v59, 2  ;;  %v1994_v9 = vadd.s32 536870912, %v1993_v21 }
 0x183   : > { %v1437_v27 = vshrl.u32 %v13103_v62, %v13143_v38  ;;  %v1440_v0 = vshrl.u32 %v12849_v1, %v13143_v38  ;;  %v1443_v12 = vshrl.u32 %v13099_v36, %v13143_v38  ;;  %vm2129_vm0 = vweird.f32 %v7301_v18 }
 0x184   : > { %v1800_v25 = vor.u32 %v1799_v17, %v1798_v6  ;;  %v1803_v48 = vshll.u32 %v1802_v4, 23  ;;  %v1433_v37 = vshll.u32 %v13097_v57, %v13144_v40  ;;  %v1439_v39 = vshll.u32 %v13103_v62, %v13144_v40 }
 0x185   : > { %vm1935_vm3 = vcmp.lt.s32.totalorder %v13133_v11, 0  ;;  %v1995_v43 = vshrl.u32 %v1994_v9, 30  ;;  %v1421_v46 = vor.u32 8388608, %v8280_v28  ;;  %v1436_v26 = vshll.u32 %v13098_v41, %v13144_v40 }
 0x186   : > { %v1442_v58 = vshll.u32 %v12849_v1, %v13144_v40  ;;  %v1804_v10 = vor.u32 4788187, %v1803_v48  ;;  %v1432_v29 = vor.u32 %v1431_v54, %v1430_v14  ;;  %v1435_v3 = vor.u32 %v1434_v16, %v1433_v37  ;;  %v6415_v30 = vpop.eup %6414 }
 0x187   : > { %v1441_v13 = vor.u32 %v1440_v0, %v1439_v39  ;;  %v1996_v23 = vshll.u32 %v1995_v43, 30  ;;  %v1438_v32 = vor.u32 %v1437_v27, %v1436_v26  ;;  %vm1445_vm1 = vcmp.lt.s32.totalorder %v13145_v50, 1  ;;  %v6417_v38 = vpop.eup %6416 }
 0x188   : > { %v1444_v53 = vor.u32 %v1443_v12, %v1442_v58  ;;  %v2137_v6 = vxor.u32 2147483648, %v6415_v30  ;;  %v1805_v17 = vand.u32 2147483647, %v1804_v10  ;;  %v1807_v28 = vcvt.s32.f32 %v1800_v25 }
 0x189   : > { %vm1446_vm4 = vcmp.lt.s32.totalorder %v13145_v50, 2  ;;  %vm904_vm5 = vcmp.gt.s32.totalorder %v8132_v15, 0  ;;  %vm1008_vm2 = vcmp.gt.s32.totalorder %v8135_v19, 0  ;;  %v2134_v40 = vxor.u32 2147483648, %v6417_v38 }
 0x18a   : > { %v8315_v14 = vsub.s32 %v1993_v21, %v1996_v23  ;;  %vm1447_vm7 = vcmp.lt.s32.totalorder %v13145_v50, 3  ;;  %vm1448_vm8 = vcmp.lt.s32.totalorder %v13145_v50, 4  ;;  %v2138_v54 = vsel %vm2136_vm14, %v2137_v6, %v6417_v38 }
 0x18b   : > { %v1808_v4 = vmul.f32 %v1807_v28, %v1805_v17  ;;  %v2019_v16 = vsub.s32 4, %v1995_v43  ;;  %v1454_v9 = vsel %vm1448_vm8, %v1441_v13, 920167782  ;;  %v2135_v27 = vsel %vm2133_vm13, %v6415_v30, %v2134_v40 }
 0x18c   : > { %v1999_v0 = vsub.s32 0, %v8315_v14  ;;  %v1449_v21 = vsel %vm1445_vm1, %v1429_v44, %v1432_v29  ;;  %v1450_v12 = vsel %vm1448_vm8, %v1438_v32, 2102212464  ;;  %v2139_v25 = vsel %vm2132_vm15, %v2135_v27, %v2138_v54  ;;  %v13149_v27 = vld [vmem:[#allocation21_spill] sm:$0xff] }
 0x18d   : > { %v1809_v48 = vxor.u32 2147483648, %v1808_v4  ;;  %v1453_v37 = vsel %vm1445_vm1, %v1432_v29, %v1435_v3  ;;  %v1455_v39 = vsel %vm1447_vm7, %v1438_v32, %v1454_v9  ;;  %v2140_v26 = vsel %vm2129_vm0, nan, %v2139_v25 }
 0x18e   : > { %v6077_v58 = vmin.u32 %v1999_v0, %v8315_v14  ;;  %v1457_v44 = vsel %vm1445_vm1, %v1435_v3, %v1438_v32  ;;  %v1458_v10 = vsel %vm1448_vm8, %v1444_v53, 1326507024  ;;  %3351 = vmatprep.subr.mxu1 %v2140_v26  ;;  %v2020_v29 = vsel %vm1935_vm3, %v2019_v16, %v1995_v43  ;;  %v13150_v26 = vld [vmem:[#allocation36_spill] sm:$0xff] }
 0x18f   : > { %v1810_v59 = vsel %vm1727_vm6, %v1809_v48, %v1808_v4  ;;  %v1451_v30 = vsel %vm1447_vm7, %v1435_v3, %v1450_v12  ;;  %v1459_v18 = vsel %vm1447_vm7, %v1441_v13, %v1458_v10  ;;  %v1456_v53 = vsel %vm1446_vm4, %v1453_v37, %v1455_v39 }
 0x190   : > { %v1813_v23 = vsel %vm8241_vm9, %v13124_v7, %v1810_v59  ;;  %v2001_v32 = vclz %v6077_v58  ;;  %v1461_v38 = vshll.u32 %v1421_v46, 8  ;;  %v13146_v43 = vand.u32 2147483647, %v13133_v11 }
 0x191   : > { %6418 = vcosq.f32 %v1813_v23  ;;  %v1460_v3 = vsel %vm1446_vm4, %v1457_v44, %v1459_v18  ;;  %v1452_v40 = vsel %vm1446_vm4, %v1449_v21, %v1451_v30  ;;  %v8378_v9 = vand.u32 3, %v8273_v47 }
 0x192   : > { %vm8359_vm6 = vcmp.le.f32.partialorder %v13146_v43, 0.7853982  ;;  %6420 = vsinq.f32 %v1813_v23  ;;  %v6078_v2 = vadd.s32 4294967294, %v2001_v32  ;;  %v12846_v0 = vand.u32 2147483647, %v13149_v27 }
 0x193   : > { %v8365_v13 = vmul.u32.u64.low %v1461_v38, %v1460_v3  ;;  %v8366_v28 = vmul.u32.u64.high %v1461_v38, %v1460_v3, %v8365_v13  ;;  %v2022_v46 = vsel %vm8359_vm6, 0, %v2020_v29  ;;  %v8384_v12 = vsel %vm904_vm5, %v8132_v15, 0 }
 0x194   : > { %v8372_v54 = vmul.u32.u64.low %v1461_v38, %v1456_v53  ;;  %v8373_v4 = vmul.u32.u64.high %v1461_v38, %v1456_v53, %v8372_v54  ;;  %vm6079_vm10 = vcmp.lt.s32.totalorder %v6078_v2, 0  ;;  %v8389_v50 = vsel %vm1008_vm2, %v8135_v19, 0  ;;  %v13151_v53 = vld [vmem:[#allocation27_spill] sm:$0xff] }
 0x195   : > { %v1989_v21 = vadd.s32 %v8227_v52, %v8246_v45  ;;  %v2004_v25 = vsel %vm6079_vm10, 0, %v6078_v2  ;;  %v8393_v37 = vadd.s32 3, %v2022_v46  ;;  %v1468_v39 = vmul.u32 %v1461_v38, %v1452_v40 }
 0x196   : > { %v2005_v48 = vsub.s32 32, %v2004_v25  ;;  %v2009_v47 = vsub.s32 4294967266, %v2004_v25  ;;  %vm1470_vm9 = vc.u32 %v8366_v28, %v8372_v54  ;;  %v1471_v15 = vadd.s32 1, %v8373_v4 }
 0x197   : > { %v1637_v58 = vshrl.u32 %v13096_v31, %v13150_v26  ;;  %v1639_v19 = vshrl.u32 %v13097_v57, %v13150_v26  ;;  %vm1824_vm11 = vcmp.eq.s32.totalorder %v8378_v9, 2  ;;  %v2006_v52 = vshll.u32 %v8315_v14, %v2004_v25 }
 0x198   : > { %v2007_v45 = vshrl.u32 %v1989_v21, %v2005_v48  ;;  %v2010_v44 = vadd.s32 127, %v2009_v47  ;;  %v1628_v10 = vand.u32 8388607, %v12846_v0  ;;  %vm1821_vm12 = vcmp.eq.s32.totalorder %v8378_v9, 0 }
 0x199   : > { %v1472_v59 = vsel %vm1470_vm9, %v1471_v15, %v8373_v4  ;;  %v1642_v29 = vshrl.u32 %v13098_v41, %v13150_v26  ;;  %v1645_v30 = vshrl.u32 %v13103_v62, %v13150_v26  ;;  %v1648_v18 = vshrl.u32 %v12849_v1, %v13150_v26 }
 0x19a   : > { %vm1820_vm14 = vcmp.lt.s32.totalorder %v8378_v9, 2  ;;  %v2008_v14 = vor.u32 %v2007_v45, %v2006_v52  ;;  %v2011_v23 = vshll.u32 %v2010_v44, 23  ;;  %v1473_v32 = vadd.s32 %v1472_v59, %v1468_v39  ;;  %v13152_v59 = vld [vmem:[#allocation31_spill] sm:$0xff] }
 0x19b   : > { %v1647_v38 = vshll.u32 %v13103_v62, %v13151_v53  ;;  %vm1817_vm13 = vweird.f32 %v13124_v7  ;;  %v1638_v43 = vshll.u32 %v13096_v31, %v13151_v53  ;;  %v1641_v3 = vshll.u32 %v13097_v57, %v13151_v53 }
 0x19c   : > { %v1644_v2 = vshll.u32 %v13098_v41, %v13151_v53  ;;  %v1651_v13 = vshrl.u32 %v13099_v36, %v13150_v26  ;;  %v2012_v46 = vor.u32 4788187, %v2011_v23  ;;  %v1474_v40 = vadd.s32 536870912, %v1473_v32 }
 0x19d   : > { %v1629_v4 = vor.u32 8388608, %v1628_v10  ;;  %v1649_v21 = vor.u32 %v1648_v18, %v1647_v38  ;;  %v1640_v25 = vor.u32 %v1639_v19, %v1638_v43  ;;  %v1643_v48 = vor.u32 %v1642_v29, %v1641_v3 }
 0x19e   : > { %v1646_v47 = vor.u32 %v1645_v30, %v1644_v2  ;;  %v1650_v39 = vshll.u32 %v12849_v1, %v13151_v53  ;;  %v6419_v15 = vpop.eup %6418  ;;  %v2013_v52 = vand.u32 2147483647, %v2012_v46  ;;  %v2015_v45 = vcvt.s32.f32 %v2008_v14 }
 0x19f   : > { %v1475_v44 = vshrl.u32 %v1474_v40, 30  ;;  %vm1653_vm15 = vcmp.lt.s32.totalorder %v13152_v59, 1  ;;  %v6421_v16 = vpop.eup %6420  ;;  %v1825_v6 = vxor.u32 2147483648, %v6419_v15  ;;  %vm1654_vm0 = vcmp.lt.s32.totalorder %v13152_v59, 2 }
 0x1a0   : > { %v1652_v0 = vor.u32 %v1651_v13, %v1650_v39  ;;  %vm1656_vm1 = vcmp.lt.s32.totalorder %v13152_v59, 4  ;;  %vm1112_vm4 = vcmp.gt.s32.totalorder %v8254_v49, 0  ;;  %v1822_v26 = vxor.u32 2147483648, %v6421_v16 }
 0x1a1   : > { %v2016_v19 = vmul.f32 %v2015_v45, %v2013_v52  ;;  %v1476_v10 = vshll.u32 %v1475_v44, 30  ;;  %v1662_v29 = vsel %vm1656_vm1, %v1649_v21, 920167782  ;;  %v1826_v30 = vsel %vm1824_vm11, %v1825_v6, %v6421_v16 }
 0x1a2   : > { %vm1655_vm5 = vcmp.lt.s32.totalorder %v13152_v59, 3  ;;  %v1657_v18 = vsel %vm1653_vm15, %v1637_v58, %v1640_v25  ;;  %v1658_v14 = vsel %vm1656_vm1, %v1646_v47, 2102212464  ;;  %v1823_v23 = vsel %vm1821_vm12, %v6419_v15, %v1822_v26 }
 0x1a3   : > { %v2017_v53 = vxor.u32 2147483648, %v2016_v19  ;;  %v8443_v38 = vsub.s32 %v1473_v32, %v1476_v10  ;;  %v1661_v43 = vsel %vm1653_vm15, %v1640_v25, %v1643_v48  ;;  %v1827_v6 = vsel %vm1820_vm14, %v1823_v23, %v1826_v30  ;;  %v13155_v30 = vld [vmem:[#allocation19_spill] sm:$0xff] }
 0x1a4   : > { %v1663_v16 = vsel %vm1655_vm5, %v1646_v47, %v1662_v29  ;;  %v1665_v58 = vsel %vm1653_vm15, %v1643_v48, %v1646_v47  ;;  %v1666_v3 = vsel %vm1656_vm1, %v1652_v0, 1326507024  ;;  %v1828_v2 = vsel %vm1817_vm13, nan, %v1827_v6  ;;  %v13157_v6 = vld [vmem:[#allocation24_spill] sm:$0xff] }
 0x1a5   : > { %v2018_v32 = vsel %vm1935_vm3, %v2017_v53, %v2016_v19  ;;  %v1479_v13 = vsub.s32 0, %v8443_v38  ;;  %v1499_v46 = vsub.s32 4, %v1475_v44  ;;  %3191 = vmatpush1.msra.mxu0 %v1828_v2  ;;  %v1659_v40 = vsel %vm1655_vm5, %v1643_v48, %v1658_v14  ;;  %v13156_v53 = vld [vmem:[#allocation33_spill] sm:$0xff] }
 0x1a6   : > { %v2021_v9 = vsel %vm8359_vm6, %v13133_v11, %v2018_v32  ;;  %v1667_v0 = vsel %vm1655_vm5, %v1649_v21, %v1666_v3  ;;  %v1669_v25 = vshll.u32 %v1629_v4, 8  ;;  %v1664_v47 = vsel %vm1654_vm0, %v1661_v43, %v1663_v16 }
 0x1a7   : > { %6422 = vcosq.f32 %v2021_v9  ;;  %v6057_v7 = vmin.u32 %v1479_v13, %v8443_v38  ;;  %v1668_v39 = vsel %vm1654_vm0, %v1665_v58, %v1667_v0  ;;  %vm1415_vm3 = vcmp.lt.s32.totalorder %v13142_v56, 0 }
 0x1a8   : > { %6424 = vsinq.f32 %v2021_v9  ;;  %v8473_v17 = vmul.u32.u64.low %v1669_v25, %v1668_v39  ;;  %v8474_v15 = vmul.u32.u64.high %v1669_v25, %v1668_v39, %v8473_v17  ;;  %v8477_v48 = vshrl.u32 %v8384_v12, 5 }
 0x1a9   : > { %v8480_v4 = vand.u32 31, %v8384_v12  ;;  %v1481_v21 = vclz %v6057_v7  ;;  %v8484_v52 = vsel %vm1415_vm3, %v1499_v46, %v1475_v44  ;;  %v8487_v45 = vand.u32 3, %v8393_v37  ;;  %v13162_v12 = vld [vmem:[#allocation16_spill] sm:$0xff] }
 0x1aa   : > { %v1660_v26 = vsel %vm1654_vm0, %v1657_v18, %v1659_v40  ;;  %v8491_v19 = vmul.u32.u64.low %v1669_v25, %v1664_v47  ;;  %v8492_v10 = vmul.u32.u64.high %v1669_v25, %v1664_v47, %v8491_v19  ;;  %v8496_v29 = vshrl.u32 %v8389_v50, 5 }
 0x1ab   : > { %vm8500_vm2 = vcmp.le.f32.partialorder %v1413_v22, 0.7853982  ;;  %v6058_v44 = vadd.s32 4294967294, %v1481_v21  ;;  %v12847_v37 = vand.u32 2147483647, %v13155_v30  ;;  %v8506_v14 = vand.u32 31, %v8389_v50 }
 0x1ac   : > { %v8511_v59 = vsel %vm1112_vm4, %v8254_v49, 0  ;;  %v1469_v18 = vadd.s32 %v8372_v54, %v8366_v28  ;;  %v1502_v22 = vsel %vm8500_vm2, 0, %v8484_v52  ;;  %v1676_v23 = vmul.u32 %v1669_v25, %v1660_v26 }
 0x1ad   : > { %vm6059_vm7 = vcmp.lt.s32.totalorder %v6058_v44, 0  ;;  %vm1678_vm8 = vc.u32 %v8474_v15, %v8491_v19  ;;  %v8522_v50 = vshrl.u32 %v13096_v31, %v13156_v53  ;;  %vm2032_vm6 = vcmp.eq.s32.totalorder %v8487_v45, 2 }
 0x1ae   : > { %v1484_v49 = vsel %vm6059_vm7, 0, %v6058_v44  ;;  %v1679_v43 = vadd.s32 1, %v8492_v10  ;;  %v1326_v28 = vshll.u32 %v13096_v31, %v13157_v6  ;;  %v1327_v54 = vshrl.u32 %v13097_v57, %v13156_v53 }
 0x1af   : > { %vm2029_vm10 = vcmp.eq.s32.totalorder %v8487_v45, 0  ;;  %v1485_v16 = vsub.s32 32, %v1484_v49  ;;  %v1489_v58 = vsub.s32 4294967266, %v1484_v49  ;;  %v1316_v3 = vand.u32 8388607, %v12847_v37  ;;  %v13158_v37 = vld [vmem:[#allocation28_spill] sm:$0xff] }
 0x1b0   : > { %v1330_v2 = vshrl.u32 %v13098_v41, %v13156_v53  ;;  %vm2028_vm9 = vcmp.lt.s32.totalorder %v8487_v45, 2  ;;  %v1486_v32 = vshll.u32 %v8443_v38, %v1484_v49  ;;  %v1680_v13 = vsel %vm1678_vm8, %v1679_v43, %v8492_v10 }
 0x1b1   : > { %v1333_v46 = vshrl.u32 %v13103_v62, %v13156_v53  ;;  %v1336_v9 = vshrl.u32 %v12849_v1, %v13156_v53  ;;  %vm2025_vm11 = vweird.f32 %v13133_v11  ;;  %v1487_v40 = vshrl.u32 %v1469_v18, %v1485_v16 }
 0x1b2   : > { %v1490_v0 = vadd.s32 127, %v1489_v58  ;;  %v1681_v25 = vadd.s32 %v1680_v13, %v1676_v23  ;;  %v1335_v7 = vshll.u32 %v13103_v62, %v13157_v6  ;;  %v1328_v47 = vor.u32 %v1327_v54, %v1326_v28 }
 0x1b3   : > { %v1329_v38 = vshll.u32 %v13097_v57, %v13157_v6  ;;  %v1332_v39 = vshll.u32 %v13098_v41, %v13157_v6  ;;  %v1339_v17 = vshrl.u32 %v13099_v36, %v13156_v53  ;;  %v1488_v21 = vor.u32 %v1487_v40, %v1486_v32 }
 0x1b4   : > { %v1491_v26 = vshll.u32 %v1490_v0, 23  ;;  %vm1623_vm12 = vcmp.lt.s32.totalorder %v13149_v27, 0  ;;  %v1682_v10 = vadd.s32 536870912, %v1681_v25  ;;  %v1337_v44 = vor.u32 %v1336_v9, %v1335_v7  ;;  %v6423_v18 = vpop.eup %6422 }
 0x1b5   : > { %v1317_v23 = vor.u32 8388608, %v1316_v3  ;;  %v1331_v49 = vor.u32 %v1330_v2, %v1329_v38  ;;  %v1334_v43 = vor.u32 %v1333_v46, %v1332_v39  ;;  %v1338_v28 = vshll.u32 %v12849_v1, %v13157_v6  ;;  %v6425_v54 = vpop.eup %6424 }
 0x1b6   : > { %v2033_v16 = vxor.u32 2147483648, %v6423_v18  ;;  %v1492_v58 = vor.u32 4788187, %v1491_v26  ;;  %v1683_v13 = vshrl.u32 %v1682_v10, 30  ;;  %vm1341_vm14 = vcmp.lt.s32.totalorder %v13158_v37, 1 }
 0x1b7   : > { %vm1216_vm13 = vcmp.gt.s32.totalorder %v8257_v24, 0  ;;  %v2030_v53 = vxor.u32 2147483648, %v6425_v54  ;;  %v1495_v32 = vcvt.s32.f32 %v1488_v21  ;;  %v13159_v40 = vand.u32 2147483647, %v13149_v27 }
 0x1b8   : > { %v1340_v3 = vor.u32 %v1339_v17, %v1338_v28  ;;  %vm1344_vm0 = vcmp.lt.s32.totalorder %v13158_v37, 4  ;;  %v2034_v6 = vsel %vm2032_vm6, %v2033_v16, %v6425_v54  ;;  %v1493_v2 = vand.u32 2147483647, %v1492_v58 }
 0x1b9   : > { %vm8558_vm15 = vcmp.le.f32.partialorder %v13159_v40, 0.7853982  ;;  %v1684_v46 = vshll.u32 %v1683_v13, 30  ;;  %v1350_v0 = vsel %vm1344_vm0, %v1337_v44, 920167782  ;;  %v2031_v7 = vsel %vm2029_vm10, %v6423_v18, %v2030_v53 }
 0x1ba   : > { %v1707_v38 = vsub.s32 4, %v1683_v13  ;;  %vm1342_vm1 = vcmp.lt.s32.totalorder %v13158_v37, 2  ;;  %vm1343_vm4 = vcmp.lt.s32.totalorder %v13158_v37, 3  ;;  %v2035_v39 = vsel %vm2028_vm9, %v2031_v7, %v2034_v6 }
 0x1bb   : > { %v1496_v17 = vmul.f32 %v1495_v32, %v1493_v2  ;;  %v8573_v21 = vsub.s32 %v1681_v25, %v1684_v46  ;;  %v1346_v26 = vsel %vm1344_vm0, %v1334_v43, 2102212464  ;;  %v2036_v10 = vsel %vm2025_vm11, nan, %v2035_v39 }
 0x1bc   : > { %v1349_v18 = vsel %vm1341_vm14, %v1328_v47, %v1331_v49  ;;  %v1351_v28 = vsel %vm1343_vm4, %v1334_v43, %v1350_v0  ;;  %v1353_v54 = vsel %vm1341_vm14, %v1331_v49, %v1334_v43  ;;  %3352 = vmatpush1.msra.mxu1 %v2036_v10  ;;  %v1345_v16 = vsel %vm1341_vm14, %v8522_v50, %v1328_v47 }
 0x1bd   : > { %v1497_v45 = vxor.u32 2147483648, %v1496_v17  ;;  %v1687_v25 = vsub.s32 0, %v8573_v21  ;;  %v1354_v11 = vsel %vm1344_vm0, %v1340_v3, 1326507024  ;;  %v1708_v58 = vsel %vm1623_vm12, %v1707_v38, %v1683_v13 }
 0x1be   : > { %v1347_v53 = vsel %vm1343_vm4, %v1331_v49, %v1346_v26  ;;  %v1355_v43 = vsel %vm1343_vm4, %v1337_v44, %v1354_v11  ;;  %v1357_v32 = vshll.u32 %v1317_v23, 8  ;;  %v1352_v50 = vsel %vm1342_vm1, %v1349_v18, %v1351_v28 }
 0x1bf   : > { %v1498_v40 = vsel %vm1415_vm3, %v1497_v45, %v1496_v17  ;;  %v6065_v6 = vmin.u32 %v1687_v25, %v8573_v21  ;;  %v1356_v47 = vsel %vm1342_vm1, %v1353_v54, %v1355_v43  ;;  %v1506_v44 = vadd.s32 3, %v1502_v22 }
 0x1c0   : > { %v1501_v13 = vsel %vm8500_vm2, %v13142_v56, %v1498_v40  ;;  %v8611_v23 = vmul.u32.u64.low %v1357_v32, %v1356_v47  ;;  %v8612_v49 = vmul.u32.u64.high %v1357_v32, %v1356_v47, %v8611_v23  ;;  %v1710_v2 = vsel %vm8558_vm15, 0, %v1708_v58  ;;  %v13165_v58 = vld [vmem:[#allocation26_spill] sm:$0xff] }
 0x1c1   : > { %6426 = vcosq.f32 %v1501_v13  ;;  %v1689_v3 = vclz %v6065_v6  ;;  %v1348_v46 = vsel %vm1342_vm1, %v1345_v16, %v1347_v53  ;;  %v12848_v38 = vand.u32 2147483647, %v13162_v12 }
 0x1c2   : > { %6428 = vsinq.f32 %v1501_v13  ;;  %v8618_v0 = vmul.u32.u64.low %v1357_v32, %v1352_v50  ;;  %v8619_v7 = vmul.u32.u64.high %v1357_v32, %v1352_v50, %v8618_v0  ;;  %v8626_v52 = vsel %vm1216_vm13, %v8257_v24, 0 }
 0x1c3   : > { %v13163_v22 = vand.u32 2139095040, %v8233_v35  ;;  %v13164_v17 = vand.u32 2139095040, %v8237_v20  ;;  %v6066_v26 = vadd.s32 4294967294, %v1689_v3  ;;  %v8637_v10 = vsub.s32 32, %v8480_v4 }
 0x1c4   : > { %v8640_v18 = vsub.s32 32, %v8506_v14  ;;  %v8642_v28 = vand.u32 3, %v1506_v44  ;;  %v1677_v24 = vadd.s32 %v8491_v19, %v8474_v15  ;;  %v8646_v54 = vadd.s32 3, %v1710_v2  ;;  %v13166_v15 = vld [vmem:[#allocation35_spill] sm:$0xff] }
 0x1c5   : > { %v8630_v39 = vshrl.u32 %v13163_v22, 23  ;;  %v8634_v37 = vshrl.u32 %v13164_v17, 23  ;;  %vm6067_vm5 = vcmp.lt.s32.totalorder %v6066_v26, 0  ;;  %v1364_v45 = vmul.u32 %v1357_v32, %v1348_v46 }
 0x1c6   : > { %vm1366_vm3 = vc.u32 %v8612_v49, %v8618_v0  ;;  %v1692_v25 = vsel %vm6067_vm5, 0, %v6066_v26  ;;  %v1367_v16 = vadd.s32 1, %v8619_v7  ;;  %v8653_v11 = vand.u32 8388607, %v12848_v38 }
 0x1c7   : > { %v1534_v53 = vshll.u32 %v13096_v31, %v13165_v58  ;;  %v1693_v43 = vsub.s32 32, %v1692_v25  ;;  %v1697_v40 = vsub.s32 4294967266, %v1692_v25  ;;  %v1535_v19 = vshrl.u32 %v13097_v57, %v13166_v15 }
 0x1c8   : > { %v1538_v32 = vshrl.u32 %v13098_v41, %v13166_v15  ;;  %vm1512_vm2 = vcmp.eq.s32.totalorder %v8642_v28, 2  ;;  %v1694_v6 = vshll.u32 %v8573_v21, %v1692_v25  ;;  %v1368_v50 = vsel %vm1366_vm3, %v1367_v16, %v8619_v7 }
 0x1c9   : > { %v1541_v47 = vshrl.u32 %v13103_v62, %v13166_v15  ;;  %v1543_v13 = vshll.u32 %v13103_v62, %v13165_v58  ;;  %vm1509_vm7 = vcmp.eq.s32.totalorder %v8642_v28, 0  ;;  %v1695_v44 = vshrl.u32 %v1677_v24, %v1693_v43 }
 0x1ca   : > { %v1698_v23 = vadd.s32 127, %v1697_v40  ;;  %v1369_v3 = vadd.s32 %v1368_v50, %v1364_v45  ;;  %v1544_v2 = vshrl.u32 %v12849_v1, %v13166_v15  ;;  %vm1508_vm8 = vcmp.lt.s32.totalorder %v8642_v28, 2 }
 0x1cb   : > { %v1537_v21 = vshll.u32 %v13097_v57, %v13165_v58  ;;  %v1540_v46 = vshll.u32 %v13098_v41, %v13165_v58  ;;  %v1546_v7 = vshll.u32 %v12849_v1, %v13165_v58  ;;  %v1547_v22 = vshrl.u32 %v13099_v36, %v13166_v15 }
 0x1cc   : > { %vm1505_vm6 = vweird.f32 %v13142_v56  ;;  %v1696_v17 = vor.u32 %v1695_v44, %v1694_v6  ;;  %v1699_v26 = vshll.u32 %v1698_v23, 23  ;;  %vm1311_vm10 = vcmp.lt.s32.totalorder %v13155_v30, 0 }
 0x1cd   : > { %v1370_v24 = vadd.s32 536870912, %v1369_v3  ;;  %v1545_v45 = vor.u32 %v1544_v2, %v1543_v13  ;;  %v1525_v25 = vor.u32 8388608, %v8653_v11  ;;  %v1533_v16 = vshrl.u32 %v13096_v31, %v13166_v15 }
 0x1ce   : > { %v1536_v43 = vor.u32 %v1535_v19, %v1534_v53  ;;  %v1539_v40 = vor.u32 %v1538_v32, %v1537_v21  ;;  %v1700_v50 = vor.u32 4788187, %v1699_v26  ;;  %v1542_v38 = vor.u32 %v1541_v47, %v1540_v46  ;;  %v6427_v5 = vpop.eup %6426 }
 0x1cf   : > { %v1371_v58 = vshrl.u32 %v1370_v24, 30  ;;  %v1548_v1 = vor.u32 %v1547_v22, %v1546_v7  ;;  %v1703_v33 = vcvt.s32.f32 %v1696_v17  ;;  %vm1549_vm9 = vcmp.lt.s32.totalorder %v13167_v55, 1  ;;  %v6429_v6 = vpop.eup %6428 }
 0x1d0   : > { %vm1550_vm11 = vcmp.lt.s32.totalorder %v13167_v55, 2  ;;  %vm1552_vm14 = vcmp.lt.s32.totalorder %v13167_v55, 4  ;;  %v1513_v13 = vxor.u32 2147483648, %v6427_v5  ;;  %v1701_v11 = vand.u32 2147483647, %v1700_v50 }
 0x1d1   : > { %v1372_v44 = vshll.u32 %v1371_v58, 30  ;;  %v1558_v53 = vsel %vm1552_vm14, %v1545_v45, 920167782  ;;  %v1510_v15 = vxor.u32 2147483648, %v6429_v6  ;;  %v1395_v19 = vsub.s32 4, %v1371_v58 }
 0x1d2   : > { %vm1551_vm13 = vcmp.lt.s32.totalorder %v13167_v55, 3  ;;  %v1553_v32 = vsel %vm1549_vm9, %v1533_v16, %v1536_v43  ;;  %v1514_v47 = vsel %vm1512_vm2, %v1513_v13, %v6429_v6  ;;  %v1704_v23 = vmul.f32 %v1703_v33, %v1701_v11  ;;  %v8772_v55 = vld [vmem:[%s12769_s3 + $0x30] sm:$0xff] }
 0x1d3   : > { %v8695_v2 = vsub.s32 %v1369_v3, %v1372_v44  ;;  %v1562_v21 = vsel %vm1552_vm14, %v1548_v1, 1326507024  ;;  %v1511_v46 = vsel %vm1509_vm7, %v6427_v5, %v1510_v15  ;;  %v1557_v7 = vsel %vm1549_vm9, %v1536_v43, %v1539_v40 }
 0x1d4   : > { %v1559_v22 = vsel %vm1551_vm13, %v1542_v38, %v1558_v53  ;;  %v1561_v17 = vsel %vm1549_vm9, %v1539_v40, %v1542_v38  ;;  %v1515_v33 = vsel %vm1508_vm8, %v1511_v46, %v1514_v47  ;;  %v1705_v3 = vxor.u32 2147483648, %v1704_v23 }
 0x1d5   : > { %v1375_v26 = vsub.s32 0, %v8695_v2  ;;  %v1554_v1 = vsel %vm1552_vm14, %v1542_v38, 2102212464  ;;  %v1516_v5 = vsel %vm1505_vm6, nan, %v1515_v33  ;;  %v1396_v24 = vsel %vm1311_vm10, %v1395_v19, %v1371_v58  ;;  %v8751_v19 = vld [vmem:[%s12769_s3 + $0x38] sm:$0xff] }
 0x1d6   : > { %v1563_v16 = vsel %vm1551_vm13, %v1545_v45, %v1562_v21  ;;  %v1565_v43 = vshll.u32 %v1525_v25, 8  ;;  %3192 = vmatprep.subr.mxu0 %v1516_v5  ;;  %v1706_v28 = vsel %vm1623_vm12, %v1705_v3, %v1704_v23  ;;  %v1560_v6 = vsel %vm1550_vm11, %v1557_v7, %v1559_v22 }
 0x1d7   : > { %v6053_v50 = vmin.u32 %v1375_v26, %v8695_v2  ;;  %v1564_v56 = vsel %vm1550_vm11, %v1561_v17, %v1563_v16  ;;  %v1709_v38 = vsel %vm8558_vm15, %v13149_v27, %v1706_v28  ;;  %v1555_v45 = vsel %vm1551_vm13, %v1539_v40, %v1554_v1 }
 0x1d8   : > { %v8730_v25 = vmul.u32.u64.low %v1565_v43, %v1564_v56  ;;  %v8731_v58 = vmul.u32.u64.high %v1565_v43, %v1564_v56, %v8730_v25  ;;  %v8734_v13 = vshrl.u32 %v8511_v59, 5  ;;  %6430 = vcosq.f32 %v1709_v38 }
 0x1d9   : > { %v13168_v11 = vand.u32 2147483647, %v13155_v30  ;;  %v1377_v53 = vclz %v6053_v50  ;;  %6432 = vsinq.f32 %v1709_v38  ;;  %v1556_v23 = vsel %vm1550_vm11, %v1553_v32, %v1555_v45 }
 0x1da   : > { %v8744_v15 = vmul.u32.u64.low %v1565_v43, %v1560_v6  ;;  %v8745_v40 = vmul.u32.u64.high %v1565_v43, %v1560_v6, %v8744_v15  ;;  %v997_v21 = vand.u32 2147483647, %v7469_v61  ;;  %v8757_v46 = vand.u32 31, %v8511_v59 }
 0x1db   : > { %vm8738_vm12 = vcmp.le.f32.partialorder %v13168_v11, 0.7853982  ;;  %v6054_v47 = vadd.s32 4294967294, %v1377_v53  ;;  %v8760_v7 = vand.u32 31, %v8626_v52  ;;  %v8763_v22 = vadd.s32 4294967169, %v8634_v37 }
 0x1dc   : > { %v1398_v9 = vsel %vm8738_vm12, 0, %v1396_v24  ;;  %v8766_v17 = vand.u32 3, %v8646_v54  ;;  %v12851_v33 = vmov 5   ;;  %v1365_v59 = vadd.s32 %v8618_v0, %v8612_v49 }
 0x1dd   : > { %6343 = vset.pattern.permute.xlu1 %v12851_v33  ;;  %6345 = vset.pattern.permute.xlu0 %v12851_v33  ;;  %vm6055_vm15 = vcmp.lt.s32.totalorder %v6054_v47, 0  ;;  %v8777_v32 = vadd.s32 3, %v1398_v9  ;;  %vm1574_vm0 = vc.u32 %v8731_v58, %v8744_v15  ;;  %v1572_v54 = vmul.u32 %v1565_v43, %v1556_v23 }
 0x1de   : > { %2746 = vperm.xlu1 %6343, %v8751_v19   ;;  %2742 = vperm.xlu0 %6345, %v8772_v55   ;;  %v1380_v37 = vsel %vm6055_vm15, 0, %v6054_v47  ;;  %v1575_v3 = vadd.s32 1, %v8745_v40  ;;  %v8786_v5 = vand.u32 8388607, %v997_v21  ;;  %v1013_v49 = vshrl.u32 %v13096_v31, %v8640_v18 }
 0x1df   : > { %v1381_v26 = vsub.s32 32, %v1380_v37  ;;  %v1385_v1 = vsub.s32 4294967266, %v1380_v37  ;;  %vm1720_vm1 = vcmp.eq.s32.totalorder %v8766_v17, 2  ;;  %v1382_v0 = vshll.u32 %v8695_v2, %v1380_v37 }
 0x1e0   : > { %v1576_v24 = vsel %vm1574_vm0, %v1575_v3, %v8745_v40  ;;  %v1014_v16 = vshll.u32 %v13096_v31, %v8506_v14  ;;  %v1015_v43 = vshrl.u32 %v13097_v57, %v8640_v18  ;;  %vm1717_vm4 = vcmp.eq.s32.totalorder %v8766_v17, 0 }
 0x1e1   : > { %v1383_v28 = vshrl.u32 %v1365_v59, %v1381_v26  ;;  %v1386_v50 = vadd.s32 127, %v1385_v1  ;;  %v1577_v6 = vadd.s32 %v1576_v24, %v1572_v54  ;;  %v12853_v56 = vmov 4  }
 0x1e2   : > { %6344 = vset.pattern.permute.xlu1 %v12853_v56  ;;  %v1018_v38 = vshrl.u32 %v13098_v41, %v8640_v18  ;;  %vm1716_vm5 = vcmp.lt.s32.totalorder %v8766_v17, 2  ;;  %v1017_v2 = vshll.u32 %v13097_v57, %v8506_v14  ;;  %v1021_v45 = vshrl.u32 %v13103_v62, %v8640_v18 }
 0x1e3   : > { %2605 = vperm.xlu1 %6344, %v8772_v55   ;;  %v1023_v25 = vshll.u32 %v13103_v62, %v8506_v14  ;;  %v13171_v11 = vmov 920167782   ;;  %vm1713_vm3 = vweird.f32 %v13149_v27  ;;  %v1384_v9 = vor.u32 %v1383_v28, %v1382_v0 }
 0x1e4   : > { %v1024_v53 = vshrl.u32 %v13171_v11, %v8640_v18  ;;  %v1387_v40 = vshll.u32 %v1386_v50, 23  ;;  %vm1519_vm2 = vcmp.lt.s32.totalorder %v13162_v12, 0  ;;  %v1578_v47 = vadd.s32 536870912, %v1577_v6 }
 0x1e5   : > { %v1005_v23 = vor.u32 8388608, %v8786_v5  ;;  %v1016_v59 = vor.u32 %v1015_v43, %v1014_v16  ;;  %v1020_v37 = vshll.u32 %v13098_v41, %v8506_v14  ;;  %v1027_v3 = vshrl.u32 %v13099_v36, %v8640_v18  ;;  %v6431_v28 = vpop.eup %6430 }
 0x1e6   : > { %v1025_v54 = vor.u32 %v1024_v53, %v1023_v25  ;;  %v1388_v26 = vor.u32 4788187, %v1387_v40  ;;  %v1579_v1 = vshrl.u32 %v1578_v47, 30  ;;  %v1019_v24 = vor.u32 %v1018_v38, %v1017_v2  ;;  %v6433_v5 = vpop.eup %6432 }
 0x1e7   : > { %v1026_v0 = vshll.u32 %v13171_v11, %v8506_v14  ;;  %v1391_v50 = vcvt.s32.f32 %v1384_v9  ;;  %v1022_v33 = vor.u32 %v1021_v45, %v1020_v37  ;;  %vm1029_vm7 = vcmp.lt.s32.totalorder %v8496_v29, 1 }
 0x1e8   : > { %vm1030_vm8 = vcmp.lt.s32.totalorder %v8496_v29, 2  ;;  %v1721_v16 = vxor.u32 2147483648, %v6431_v28  ;;  %v1389_v43 = vand.u32 2147483647, %v1388_v26  ;;  %v1580_v25 = vshll.u32 %v1579_v1, 30 }
 0x1e9   : > { %vm1032_vm6 = vcmp.lt.s32.totalorder %v8496_v29, 4  ;;  %v1718_v18 = vxor.u32 2147483648, %v6433_v5  ;;  %v1603_v53 = vsub.s32 4, %v1579_v1  ;;  %v1028_v40 = vor.u32 %v1027_v3, %v1026_v0 }
 0x1ea   : > { %v1038_v38 = vsel %vm1032_vm6, %v1025_v54, 920167782  ;;  %v1722_v14 = vsel %vm1720_vm1, %v1721_v16, %v6433_v5  ;;  %v1392_v2 = vmul.f32 %v1391_v50, %v1389_v43  ;;  %v8827_v45 = vsub.s32 %v1577_v6, %v1580_v25 }
 0x1eb   : > { %vm1031_vm9 = vcmp.lt.s32.totalorder %v8496_v29, 3  ;;  %v1719_v9 = vsel %vm1717_vm4, %v6431_v28, %v1718_v18  ;;  %v1034_v47 = vsel %vm1032_vm6, %v1022_v33, 2102212464  ;;  %v1037_v37 = vsel %vm1029_vm7, %v1016_v59, %v1019_v24 }
 0x1ec   : > { %v1041_v3 = vsel %vm1029_vm7, %v1019_v24, %v1022_v33  ;;  %v1723_v26 = vsel %vm1716_vm5, %v1719_v9, %v1722_v14  ;;  %v1393_v0 = vxor.u32 2147483648, %v1392_v2  ;;  %v1583_v6 = vsub.s32 0, %v8827_v45 }
 0x1ed   : > { %v1039_v50 = vsel %vm1031_vm9, %v1022_v33, %v1038_v38  ;;  %v1724_v28 = vsel %vm1713_vm3, nan, %v1723_v26  ;;  %v1604_v5 = vsel %vm1519_vm2, %v1603_v53, %v1579_v1  ;;  %v1033_v16 = vsel %vm1029_vm7, %v1013_v49, %v1016_v59 }
 0x1ee   : > { %v1042_v43 = vsel %vm1032_vm6, %v1028_v40, 1326507024  ;;  %3353 = vmatprep.subr.mxu1 %v1724_v28  ;;  %v1394_v17 = vsel %vm1311_vm10, %v1393_v0, %v1392_v2  ;;  %v6061_v25 = vmin.u32 %v1583_v6, %v8827_v45  ;;  %v1035_v33 = vsel %vm1031_vm9, %v1019_v24, %v1034_v47 }
 0x1ef   : > { %v1043_v27 = vsel %vm1031_vm9, %v1025_v54, %v1042_v43  ;;  %v1397_v1 = vsel %vm8738_vm12, %v13155_v30, %v1394_v17  ;;  %v1040_v49 = vsel %vm1030_vm8, %v1037_v37, %v1039_v50  ;;  %v1045_v18 = vshll.u32 %v1005_v23, 8 }
 0x1f0   : > { %v1044_v59 = vsel %vm1030_vm8, %v1041_v3, %v1043_v27  ;;  %v1220_v53 = vsub.s32 32, %v8760_v7  ;;  %6434 = vcosq.f32 %v1397_v1  ;;  %v13172_v40 = vand.u32 2147483647, %v13162_v12 }
 0x1f1   : > { %v1585_v54 = vclz %v6061_v25  ;;  %6436 = vsinq.f32 %v1397_v1  ;;  %v8874_v38 = vmul.u32.u64.low %v1045_v18, %v1044_v59  ;;  %v8875_v14 = vmul.u32.u64.high %v1045_v18, %v1044_v59, %v8874_v38 }
 0x1f2   : > { %vm8868_vm10 = vcmp.le.f32.partialorder %v13172_v40, 0.7853982  ;;  %v1036_v23 = vsel %vm1030_vm8, %v1033_v16, %v1035_v33  ;;  %v8879_v9 = vmul.u32.u64.low %v1045_v18, %v1040_v49  ;;  %v8880_v47 = vmul.u32.u64.high %v1045_v18, %v1040_v49, %v8879_v9 }
 0x1f3   : > { %v1606_v44 = vsel %vm8868_vm10, 0, %v1604_v5  ;;  %v6062_v2 = vadd.s32 4294967294, %v1585_v54  ;;  %v8884_v37 = vshrl.u32 %v8626_v52, 5  ;;  %v8887_v3 = vadd.s32 4294967169, %v8630_v39  ;;  %v8902_v52 = vld [vmem:[%s12769_s3 + $0x28] sm:$0xff] }
 0x1f4   : > { %v8890_v26 = vand.u32 3, %v8777_v32  ;;  %v12855_v0 = vand.u32 2147483647, %v7535_v63  ;;  %v8894_v6 = vadd.s32 1, %v8763_v22  ;;  %v688_v29 = vand.u32 2139095040, %v8265_v8  ;;  %2738 = vperm.xlu0 %6345, %v8902_v52  }
 0x1f5   : > { %v1573_v50 = vadd.s32 %v8744_v15, %v8731_v58  ;;  %vm6063_vm11 = vcmp.lt.s32.totalorder %v6062_v2, 0  ;;  %v8904_v28 = vadd.s32 3, %v1606_v44  ;;  %v1052_v32 = vmul.u32 %v1045_v18, %v1036_v23 }
 0x1f6   : > { %v1588_v39 = vsel %vm6063_vm11, 0, %v6062_v2  ;;  %vm1054_vm14 = vc.u32 %v8875_v14, %v8879_v9  ;;  %v1055_v16 = vadd.s32 1, %v8880_v47  ;;  %v1221_v58 = vshrl.u32 %v13096_v31, %v1220_v53 }
 0x1f7   : > { %v1589_v22 = vsub.s32 32, %v1588_v39  ;;  %v1593_v5 = vsub.s32 4294967266, %v1588_v39  ;;  %vm1408_vm13 = vcmp.eq.s32.totalorder %v8890_v26, 2  ;;  %v1590_v15 = vshll.u32 %v8827_v45, %v1588_v39 }
 0x1f8   : > { %v1212_v43 = vand.u32 8388607, %v12855_v0  ;;  %v1223_v17 = vshrl.u32 %v13097_v57, %v1220_v53  ;;  %v1226_v25 = vshrl.u32 %v13098_v41, %v1220_v53  ;;  %vm1405_vm12 = vcmp.eq.s32.totalorder %v8890_v26, 0 }
 0x1f9   : > { %v1591_v33 = vshrl.u32 %v1573_v50, %v1589_v22  ;;  %v1594_v27 = vadd.s32 127, %v1593_v5  ;;  %v1056_v1 = vsel %vm1054_vm14, %v1055_v16, %v8880_v47  ;;  %v1229_v49 = vshrl.u32 %v13103_v62, %v1220_v53 }
 0x1fa   : > { %vm1404_vm15 = vcmp.lt.s32.totalorder %v8890_v26, 2  ;;  %v1057_v59 = vadd.s32 %v1056_v1, %v1052_v32  ;;  %v1222_v45 = vshll.u32 %v13096_v31, %v8760_v7  ;;  %v1228_v18 = vshll.u32 %v13098_v41, %v8760_v7 }
 0x1fb   : > { %v1232_v40 = vshrl.u32 %v13171_v11, %v1220_v53  ;;  %vm1401_vm0 = vweird.f32 %v13155_v30  ;;  %v1592_v54 = vor.u32 %v1591_v33, %v1590_v15  ;;  %v1595_v44 = vshll.u32 %v1594_v27, 23 }
 0x1fc   : > { %v1225_v38 = vshll.u32 %v13097_v57, %v8760_v7  ;;  %v1231_v2 = vshll.u32 %v13103_v62, %v8760_v7  ;;  %v1058_v23 = vadd.s32 536870912, %v1057_v59  ;;  %v1224_v47 = vor.u32 %v1223_v17, %v1222_v45 }
 0x1fd   : > { %v1230_v50 = vor.u32 %v1229_v49, %v1228_v18  ;;  %v1235_v39 = vshrl.u32 %v13099_v36, %v1220_v53  ;;  %v1596_v32 = vor.u32 4788187, %v1595_v44  ;;  %vm999_vm1 = vcmp.lt.s32.totalorder %v7469_v61, 0  ;;  %v6435_v1 = vpop.eup %6434 }
 0x1fe   : > { %v1213_v22 = vor.u32 8388608, %v1212_v43  ;;  %v1227_v5 = vor.u32 %v1226_v25, %v1225_v38  ;;  %v1233_v16 = vor.u32 %v1232_v40, %v1231_v2  ;;  %v1599_v15 = vcvt.s32.f32 %v1592_v54  ;;  %v6437_v56 = vpop.eup %6436 }
 0x1ff   : > { %v1059_v33 = vshrl.u32 %v1058_v23, 30  ;;  %v1234_v27 = vshll.u32 %v13171_v11, %v8760_v7  ;;  %vm1237_vm4 = vcmp.lt.s32.totalorder %v8884_v37, 1  ;;  %v1409_v0 = vxor.u32 2147483648, %v6435_v1 }
 0x200   : > { %v1597_v17 = vand.u32 2147483647, %v1596_v32  ;;  %vm1239_vm5 = vcmp.lt.s32.totalorder %v8884_v37, 3  ;;  %vm1240_vm3 = vcmp.lt.s32.totalorder %v8884_v37, 4  ;;  %v1406_v53 = vxor.u32 2147483648, %v6437_v56 }
 0x201   : > { %v1060_v49 = vshll.u32 %v1059_v33, 30  ;;  %v1236_v43 = vor.u32 %v1235_v39, %v1234_v27  ;;  %v1242_v25 = vsel %vm1240_vm3, %v1230_v50, 2102212464  ;;  %v1410_v45 = vsel %vm1408_vm13, %v1409_v0, %v6437_v56 }
 0x202   : > { %v1600_v18 = vmul.f32 %v1599_v15, %v1597_v17  ;;  %v1245_v7 = vsel %vm1237_vm4, %v1224_v47, %v1227_v5  ;;  %v1246_v40 = vsel %vm1240_vm3, %v1233_v16, 920167782  ;;  %v1407_v54 = vsel %vm1405_vm12, %v6435_v1, %v1406_v53 }
 0x203   : > { %v8948_v44 = vsub.s32 %v1057_v59, %v1060_v49  ;;  %v1083_v38 = vsub.s32 4, %v1059_v33  ;;  %v1247_v2 = vsel %vm1239_vm5, %v1230_v50, %v1246_v40  ;;  %v1411_v23 = vsel %vm1404_vm15, %v1407_v54, %v1410_v45 }
 0x204   : > { %v1601_v56 = vxor.u32 2147483648, %v1600_v18  ;;  %vm1238_vm7 = vcmp.lt.s32.totalorder %v8884_v37, 2  ;;  %v1241_v0 = vsel %vm1237_vm4, %v1221_v58, %v1224_v47  ;;  %v1412_v39 = vsel %vm1401_vm0, nan, %v1411_v23 }
 0x205   : > { %v1063_v32 = vsub.s32 0, %v8948_v44  ;;  %v1248_v59 = vsel %vm1238_vm7, %v1245_v7, %v1247_v2  ;;  %v1249_v1 = vsel %vm1237_vm4, %v1227_v5, %v1230_v50  ;;  %3193 = vmatpush1.msra.mxu0 %v1412_v39  ;;  %v1243_v15 = vsel %vm1239_vm5, %v1227_v5, %v1242_v25 }
 0x206   : > { %v1602_v26 = vsel %vm1519_vm2, %v1601_v56, %v1600_v18  ;;  %v1250_v58 = vsel %vm1240_vm3, %v1236_v43, 1326507024  ;;  %v1253_v30 = vshll.u32 %v1213_v22, 8  ;;  %v1084_v50 = vsel %vm999_vm1, %v1083_v38, %v1059_v33 }
 0x207   : > { %v1605_v47 = vsel %vm8868_vm10, %v13162_v12, %v1602_v26  ;;  %v6041_v27 = vmin.u32 %v1063_v32, %v8948_v44  ;;  %v1251_v17 = vsel %vm1239_vm5, %v1233_v16, %v1250_v58  ;;  %v8985_v22 = vsub.s32 32, %v8757_v46 }
 0x208   : > { %6438 = vcosq.f32 %v1605_v47  ;;  %v1252_v5 = vsel %vm1238_vm7, %v1249_v1, %v1251_v17  ;;  %v8980_v53 = vmul.u32.u64.low %v1253_v30, %v1248_v59  ;;  %v8981_v49 = vmul.u32.u64.high %v1253_v30, %v1248_v59, %v8980_v53 }
 0x209   : > { %v792_v24 = vand.u32 2139095040, %v8269_v34  ;;  %6440 = vsinq.f32 %v1605_v47  ;;  %v1065_v43 = vclz %v6041_v27  ;;  %vm592_vm2 = vcmp.gt.s32.totalorder %v8894_v6, 0 }
 0x20a   : > { %vm8991_vm8 = vcmp.le.f32.partialorder %v997_v21, 0.7853982  ;;  %v8995_v33 = vmul.u32.u64.low %v1253_v30, %v1252_v5  ;;  %v8996_v25 = vmul.u32.u64.high %v1253_v30, %v1252_v5, %v8995_v33  ;;  %v8999_v45 = vand.u32 3, %v8904_v28 }
 0x20b   : > { %v6042_v18 = vadd.s32 4294967294, %v1065_v43  ;;  %v1086_v7 = vsel %vm8991_vm8, 0, %v1084_v50  ;;  %v1244_v40 = vsel %vm1238_vm7, %v1241_v0, %v1243_v15  ;;  %v9006_v54 = vadd.s32 1, %v8887_v3 }
 0x20c   : > { %v9010_v21 = vshrl.u32 %v688_v29, 23  ;;  %v1263_v38 = vadd.s32 1, %v8981_v49  ;;  %v893_v2 = vand.u32 2147483647, %v7467_v42  ;;  %v9015_v28 = vsel %vm592_vm2, %v8894_v6, 0 }
 0x20d   : > { %v9017_v23 = vshrl.u32 %v792_v24, 23  ;;  %v1053_v37 = vadd.s32 %v8879_v9, %v8875_v14  ;;  %vm6043_vm6 = vcmp.lt.s32.totalorder %v6042_v18, 0  ;;  %v9021_v3 = vadd.s32 3, %v1086_v7 }
 0x20e   : > { %v1068_v56 = vsel %vm6043_vm6, 0, %v6042_v18  ;;  %v1260_v0 = vmul.u32 %v1253_v30, %v1244_v40  ;;  %vm1262_vm9 = vc.u32 %v8996_v25, %v8980_v53  ;;  %vm1616_vm10 = vcmp.eq.s32.totalorder %v8999_v45, 2 }
 0x20f   : > { %v1069_v29 = vsub.s32 32, %v1068_v56  ;;  %v1073_v39 = vsub.s32 4294967266, %v1068_v56  ;;  %v1264_v6 = vsel %vm1262_vm9, %v1263_v38, %v8981_v49  ;;  %v909_v32 = vshrl.u32 %v13096_v31, %v8637_v10 }
 0x210   : > { %vm1613_vm11 = vcmp.eq.s32.totalorder %v8999_v45, 0  ;;  %v1265_v14 = vadd.s32 %v1264_v6, %v1260_v0  ;;  %v9032_v9 = vand.u32 8388607, %v893_v2  ;;  %v911_v59 = vshrl.u32 %v13097_v57, %v8637_v10 }
 0x211   : > { %v914_v1 = vshrl.u32 %v13098_v41, %v8637_v10  ;;  %vm1612_vm14 = vcmp.lt.s32.totalorder %v8999_v45, 2  ;;  %v1070_v26 = vshll.u32 %v8948_v44, %v1068_v56  ;;  %v1071_v15 = vshrl.u32 %v1053_v37, %v1069_v29 }
 0x212   : > { %v1074_v58 = vadd.s32 127, %v1073_v39  ;;  %v917_v30 = vshrl.u32 %v13103_v62, %v8637_v10  ;;  %vm1609_vm13 = vweird.f32 %v13162_v12  ;;  %v1266_v47 = vadd.s32 536870912, %v1265_v14 }
 0x213   : > { %v910_v27 = vshll.u32 %v13096_v31, %v8480_v4  ;;  %v913_v50 = vshll.u32 %v13097_v57, %v8480_v4  ;;  %v920_v17 = vshrl.u32 %v13171_v11, %v8637_v10  ;;  %v1072_v5 = vor.u32 %v1071_v15, %v1070_v26 }
 0x214   : > { %v1075_v49 = vshll.u32 %v1074_v58, 23  ;;  %v916_v44 = vshll.u32 %v13098_v41, %v8480_v4  ;;  %v923_v24 = vshrl.u32 %v13099_v36, %v8637_v10  ;;  %vm1207_vm12 = vcmp.lt.s32.totalorder %v7535_v63, 0 }
 0x215   : > { %v1267_v43 = vshrl.u32 %v1266_v47, 30  ;;  %v901_v33 = vor.u32 8388608, %v9032_v9  ;;  %v912_v18 = vor.u32 %v911_v59, %v910_v27  ;;  %v919_v7 = vshll.u32 %v13103_v62, %v8480_v4  ;;  %v6439_v40 = vpop.eup %6438 }
 0x216   : > { %v1076_v38 = vor.u32 4788187, %v1075_v49  ;;  %v915_v37 = vor.u32 %v914_v1, %v913_v50  ;;  %v918_v56 = vor.u32 %v917_v30, %v916_v44  ;;  %v922_v0 = vshll.u32 %v13171_v11, %v8480_v4  ;;  %v6441_v29 = vpop.eup %6440 }
 0x217   : > { %v1617_v39 = vxor.u32 2147483648, %v6439_v40  ;;  %v1268_v6 = vshll.u32 %v1267_v43, 30  ;;  %v921_v10 = vor.u32 %v920_v17, %v919_v7  ;;  %vm925_vm15 = vcmp.lt.s32.totalorder %v8477_v48, 1 }
 0x218   : > { %v1614_v26 = vxor.u32 2147483648, %v6441_v29  ;;  %v1077_v15 = vand.u32 2147483647, %v1076_v38  ;;  %v1079_v9 = vcvt.s32.f32 %v1072_v5  ;;  %v924_v59 = vor.u32 %v923_v24, %v922_v0 }
 0x219   : > { %v1618_v58 = vsel %vm1616_vm10, %v1617_v39, %v6441_v29  ;;  %v9062_v47 = vsub.s32 %v1265_v14, %v1268_v6  ;;  %vm926_vm0 = vcmp.lt.s32.totalorder %v8477_v48, 2  ;;  %vm927_vm4 = vcmp.lt.s32.totalorder %v8477_v48, 3 }
 0x21a   : > { %v1615_v4 = vsel %vm1613_vm11, %v6439_v40, %v1614_v26  ;;  %v1080_v1 = vmul.f32 %v1079_v9, %v1077_v15  ;;  %v1291_v30 = vsub.s32 4, %v1267_v43  ;;  %vm928_vm5 = vcmp.lt.s32.totalorder %v8477_v48, 4 }
 0x21b   : > { %v1619_v27 = vsel %vm1612_vm14, %v1615_v4, %v1618_v58  ;;  %v1271_v50 = vsub.s32 0, %v9062_v47  ;;  %v930_v17 = vsel %vm928_vm5, %v918_v56, 2102212464  ;;  %v934_v5 = vsel %vm928_vm5, %v921_v10, 920167782 }
 0x21c   : > { %v1620_v14 = vsel %vm1609_vm13, nan, %v1619_v27  ;;  %v1081_v49 = vxor.u32 2147483648, %v1080_v1  ;;  %v933_v44 = vsel %vm925_vm15, %v912_v18, %v915_v37  ;;  %v935_v24 = vsel %vm927_vm4, %v918_v56, %v934_v5 }
 0x21d   : > { %3354 = vmatpush1.msra.mxu1 %v1620_v14  ;;  %v6049_v7 = vmin.u32 %v1271_v50, %v9062_v47  ;;  %v929_v45 = vsel %vm925_vm15, %v909_v32, %v912_v18  ;;  %v937_v40 = vsel %vm925_vm15, %v915_v37, %v918_v56  ;;  %v938_v38 = vsel %vm928_vm5, %v924_v59, 1326507024 }
 0x21e   : > { %v1082_v12 = vsel %vm999_vm1, %v1081_v49, %v1080_v1  ;;  %v1292_v0 = vsel %vm1207_vm12, %v1291_v30, %v1267_v43  ;;  %v931_v29 = vsel %vm927_vm4, %v915_v37, %v930_v17  ;;  %v939_v39 = vsel %vm927_vm4, %v921_v10, %v938_v38 }
 0x21f   : > { %v1085_v32 = vsel %vm8991_vm8, %v7469_v61, %v1082_v12  ;;  %v1273_v18 = vclz %v6049_v7  ;;  %v936_v56 = vsel %vm926_vm0, %v933_v44, %v935_v24  ;;  %v941_v6 = vshll.u32 %v901_v33, 8 }
 0x220   : > { %v6032_v26 = vadd.s32 4294967169, %v9017_v23  ;;  %6442 = vcosq.f32 %v1085_v32  ;;  %v13177_v43 = vand.u32 2147483647, %v7535_v63  ;;  %v940_v37 = vsel %vm926_vm0, %v937_v40, %v939_v39 }
 0x221   : > { %6444 = vsinq.f32 %v1085_v32  ;;  %v6050_v16 = vadd.s32 4294967294, %v1273_v18  ;;  %v9105_v10 = vmul.u32.u64.low %v941_v6, %v940_v37  ;;  %v9106_v9 = vmul.u32.u64.high %v941_v6, %v940_v37, %v9105_v10 }
 0x222   : > { %vm9099_vm1 = vcmp.le.f32.partialorder %v13177_v43, 0.7853982  ;;  %v932_v23 = vsel %vm926_vm0, %v929_v45, %v931_v29  ;;  %v9112_v59 = vmul.u32.u64.low %v941_v6, %v936_v56  ;;  %v9113_v58 = vmul.u32.u64.high %v941_v6, %v936_v56, %v9112_v59 }
 0x223   : > { %v1294_v33 = vsel %vm9099_vm1, 0, %v1292_v0  ;;  %v9117_v4 = vadd.s32 4294967169, %v9010_v21  ;;  %v9120_v1 = vand.u32 3, %v9021_v3  ;;  %vm6051_vm3 = vcmp.lt.s32.totalorder %v6050_v16, 0 }
 0x224   : > { %v1101_v30 = vand.u32 2147483647, %v7519_v60  ;;  %v9124_v27 = vand.u32 31, %v9015_v28  ;;  %v9126_v50 = vadd.s32 1, %v6032_v26  ;;  %v1261_v48 = vadd.s32 %v8980_v53, %v8996_v25 }
 0x225   : > { %v1276_v17 = vsel %vm6051_vm3, 0, %v6050_v16  ;;  %v9130_v49 = vadd.s32 3, %v1294_v33  ;;  %v948_v21 = vmul.u32 %v941_v6, %v932_v23  ;;  %vm950_vm7 = vc.u32 %v9106_v9, %v9112_v59 }
 0x226   : > { %v1277_v5 = vsub.s32 32, %v1276_v17  ;;  %v1281_v14 = vsub.s32 4294967266, %v1276_v17  ;;  %v951_v3 = vadd.s32 1, %v9113_v58  ;;  %v1117_v44 = vshrl.u32 %v13096_v31, %v8985_v22 }
 0x227   : > { %v1119_v24 = vshrl.u32 %v13097_v57, %v8985_v22  ;;  %vm1096_vm2 = vcmp.eq.s32.totalorder %v9120_v1, 2  ;;  %v1278_v53 = vshll.u32 %v9062_v47, %v1276_v17  ;;  %v9143_v45 = vand.u32 8388607, %v1101_v30 }
 0x228   : > { %v1279_v25 = vshrl.u32 %v1261_v48, %v1277_v5  ;;  %v1282_v7 = vadd.s32 127, %v1281_v14  ;;  %vm1093_vm8 = vcmp.eq.s32.totalorder %v9120_v1, 0  ;;  %v952_v40 = vsel %vm950_vm7, %v951_v3, %v9113_v58 }
 0x229   : > { %v1122_v38 = vshrl.u32 %v13098_v41, %v8985_v22  ;;  %v1125_v12 = vshrl.u32 %v13103_v62, %v8985_v22  ;;  %v1128_v0 = vshrl.u32 %v13171_v11, %v8985_v22  ;;  %vm1092_vm6 = vcmp.lt.s32.totalorder %v9120_v1, 2 }
 0x22a   : > { %v1280_v47 = vor.u32 %v1279_v25, %v1278_v53  ;;  %v1283_v29 = vshll.u32 %v1282_v7, 23  ;;  %v953_v39 = vadd.s32 %v952_v40, %v948_v21  ;;  %v1127_v32 = vshll.u32 %v13103_v62, %v8757_v46 }
 0x22b   : > { %vm1089_vm9 = vweird.f32 %v7469_v61  ;;  %v1118_v18 = vshll.u32 %v13096_v31, %v8757_v46  ;;  %v1121_v56 = vshll.u32 %v13097_v57, %v8757_v46  ;;  %v1124_v6 = vshll.u32 %v13098_v41, %v8757_v46 }
 0x22c   : > { %v1131_v26 = vshrl.u32 %v13099_v36, %v8985_v22  ;;  %v1284_v43 = vor.u32 4788187, %v1283_v29  ;;  %vm895_vm10 = vcmp.lt.s32.totalorder %v7467_v42, 0  ;;  %v954_v37 = vadd.s32 536870912, %v953_v39 }
 0x22d   : > { %v1109_v16 = vor.u32 8388608, %v9143_v45  ;;  %v1129_v10 = vor.u32 %v1128_v0, %v1127_v32  ;;  %vm800_vm11 = vcmp.gt.s32.totalorder %v9126_v50, 0  ;;  %v1120_v33 = vor.u32 %v1119_v24, %v1118_v18  ;;  %v6443_v17 = vpop.eup %6442 }
 0x22e   : > { %v1123_v23 = vor.u32 %v1122_v38, %v1121_v56  ;;  %v1126_v58 = vor.u32 %v1125_v12, %v1124_v6  ;;  %v1130_v48 = vshll.u32 %v13171_v11, %v8757_v46  ;;  %v1285_v5 = vand.u32 2147483647, %v1284_v43  ;;  %v6445_v22 = vpop.eup %6444 }
 0x22f   : > { %v1287_v14 = vcvt.s32.f32 %v1280_v47  ;;  %v955_v21 = vshrl.u32 %v954_v37, 30  ;;  %vm1133_vm14 = vcmp.lt.s32.totalorder %v8734_v13, 1  ;;  %v1097_v3 = vxor.u32 2147483648, %v6443_v17 }
 0x230   : > { %vm9173_vm13 = vcmp.le.f32.partialorder %v893_v2, 0.7853982  ;;  %v1132_v24 = vor.u32 %v1131_v26, %v1130_v48  ;;  %vm1134_vm15 = vcmp.lt.s32.totalorder %v8734_v13, 2  ;;  %vm1136_vm0 = vcmp.lt.s32.totalorder %v8734_v13, 4 }
 0x231   : > { %vm488_vm4 = vcmp.gt.s32.totalorder %v9006_v54, 0  ;;  %v1094_v46 = vxor.u32 2147483648, %v6445_v22  ;;  %v1288_v25 = vmul.f32 %v1287_v14, %v1285_v5  ;;  %v956_v7 = vshll.u32 %v955_v21, 30 }
 0x232   : > { %v1142_v45 = vsel %vm1136_vm0, %v1129_v10, 920167782  ;;  %v1098_v40 = vsel %vm1096_vm2, %v1097_v3, %v6445_v22  ;;  %v979_v2 = vsub.s32 4, %v955_v21  ;;  %vm1135_vm5 = vcmp.lt.s32.totalorder %v8734_v13, 3 }
 0x233   : > { %v1137_v38 = vsel %vm1133_vm14, %v1117_v44, %v1120_v33  ;;  %v1095_v12 = vsel %vm1093_vm8, %v6443_v17, %v1094_v46  ;;  %v1289_v0 = vxor.u32 2147483648, %v1288_v25  ;;  %v9189_v47 = vsub.s32 %v953_v39, %v956_v7 }
 0x234   : > { %v1141_v29 = vsel %vm1133_vm14, %v1120_v33, %v1123_v23  ;;  %v1099_v32 = vsel %vm1092_vm6, %v1095_v12, %v1098_v40  ;;  %v1143_v18 = vsel %vm1135_vm5, %v1126_v58, %v1142_v45  ;;  %v1145_v56 = vsel %vm1133_vm14, %v1123_v23, %v1126_v58 }
 0x235   : > { %v1146_v44 = vsel %vm1136_vm0, %v1132_v24, 1326507024  ;;  %v1100_v6 = vsel %vm1089_vm9, nan, %v1099_v32  ;;  %v1290_v39 = vsel %vm1207_vm12, %v1289_v0, %v1288_v25  ;;  %v959_v26 = vsub.s32 0, %v9189_v47 }
 0x236   : > { %v1138_v1 = vsel %vm1136_vm0, %v1126_v58, 2102212464  ;;  %3194 = vmatprep.subr.mxu0 %v1100_v6  ;;  %v1293_v43 = vsel %vm9099_vm1, %v7535_v63, %v1290_v39  ;;  %v980_v37 = vsel %vm895_vm10, %v979_v2, %v955_v21  ;;  %v1147_v61 = vsel %vm1135_vm5, %v1129_v10, %v1146_v44 }
 0x237   : > { %v1149_v33 = vshll.u32 %v1109_v16, 8  ;;  %6446 = vcosq.f32 %v1293_v43  ;;  %v6037_v48 = vmin.u32 %v959_v26, %v9189_v47  ;;  %v1144_v17 = vsel %vm1134_vm15, %v1141_v29, %v1143_v18 }
 0x238   : > { %v1148_v58 = vsel %vm1134_vm15, %v1145_v56, %v1147_v61  ;;  %6448 = vsinq.f32 %v1293_v43  ;;  %v1139_v15 = vsel %vm1135_vm5, %v1123_v23, %v1138_v1  ;;  %v9228_v16 = vsel %vm800_vm11, %v9126_v50, 0 }
 0x239   : > { %v9222_v5 = vmul.u32.u64.low %v1149_v33, %v1148_v58  ;;  %v9223_v14 = vmul.u32.u64.high %v1149_v33, %v1148_v58, %v9222_v5  ;;  %v9231_v10 = vand.u32 3, %v9130_v49  ;;  %v961_v21 = vclz %v6037_v48 }
 0x23a   : > { %v982_v22 = vsel %vm9173_vm13, 0, %v980_v37  ;;  %v9235_v3 = vmul.u32.u64.low %v1149_v33, %v1144_v17  ;;  %v9236_v24 = vmul.u32.u64.high %v1149_v33, %v1144_v17, %v9235_v3  ;;  %v581_v23 = vand.u32 2147483647, %v8237_v20 }
 0x23b   : > { %v596_v46 = vsub.s32 32, %v9124_v27  ;;  %v6038_v25 = vadd.s32 4294967294, %v961_v21  ;;  %v1140_v50 = vsel %vm1134_vm15, %v1137_v38, %v1139_v15  ;;  %v12856_v7 = vmov 6  }
 0x23c   : > { %6346 = vset.pattern.permute.xlu1 %v12856_v7  ;;  %v9247_v49 = vsel %vm488_vm4, %v9006_v54, 0  ;;  %v9250_v45 = vshrl.u32 %v9015_v28, 5  ;;  %v9253_v40 = vadd.s32 1, %v9117_v4  ;;  %v9256_v2 = vand.u32 31, %v9228_v16 }
 0x23d   : > { %2938 = vperm.xlu1 %6346, %v8751_v19   ;;  %v949_v13 = vadd.s32 %v9112_v59, %v9106_v9  ;;  %vm6039_vm12 = vcmp.lt.s32.totalorder %v6038_v25, 0  ;;  %v9261_v38 = vadd.s32 3, %v982_v22  ;;  %vm1158_vm1 = vc.u32 %v9223_v14, %v9235_v3 }
 0x23e   : > { %vm1304_vm3 = vcmp.eq.s32.totalorder %v9231_v10, 2  ;;  %v964_v54 = vsel %vm6039_vm12, 0, %v6038_v25  ;;  %v1156_v28 = vmul.u32 %v1149_v33, %v1140_v50  ;;  %v1159_v4 = vadd.s32 1, %v9236_v24 }
 0x23f   : > { %v9269_v12 = vand.u32 8388607, %v581_v23  ;;  %vm1301_vm7 = vcmp.eq.s32.totalorder %v9231_v10, 0  ;;  %v965_v19 = vsub.s32 32, %v964_v54  ;;  %v969_v9 = vsub.s32 4294967266, %v964_v54 }
 0x240   : > { %v597_v59 = vshrl.u32 %v13096_v31, %v596_v46  ;;  %v599_v0 = vshrl.u32 %v13097_v57, %v596_v46  ;;  %vm1300_vm2 = vcmp.lt.s32.totalorder %v9231_v10, 2  ;;  %v966_v29 = vshll.u32 %v9189_v47, %v964_v54 }
 0x241   : > { %v1160_v32 = vsel %vm1158_vm1, %v1159_v4, %v9236_v24  ;;  %v13182_v18 = vmov 4   ;;  %v602_v56 = vshrl.u32 %v13098_v41, %v596_v46  ;;  %v605_v44 = vshrl.u32 %v13103_v62, %v596_v46 }
 0x242   : > { %6347 = vset.pattern.permute.xlu1 %v13182_v18  ;;  %vm1297_vm8 = vweird.f32 %v7535_v63  ;;  %v967_v6 = vshrl.u32 %v949_v13, %v965_v19  ;;  %v970_v39 = vadd.s32 127, %v969_v9  ;;  %v1161_v26 = vadd.s32 %v1160_v32, %v1156_v28 }
 0x243   : > { %2600 = vperm.xlu1 %6347, %v8902_v52   ;;  %v608_v1 = vshrl.u32 %v13171_v11, %v596_v46  ;;  %v589_v43 = vor.u32 8388608, %v9269_v12  ;;  %v598_v47 = vshll.u32 %v13096_v31, %v9124_v27  ;;  %v601_v37 = vshll.u32 %v13097_v57, %v9124_v27 }
 0x244   : > { %v607_v61 = vshll.u32 %v13103_v62, %v9124_v27  ;;  %v968_v33 = vor.u32 %v967_v6, %v966_v29  ;;  %v971_v48 = vshll.u32 %v970_v39, 23  ;;  %v1162_v17 = vadd.s32 536870912, %v1161_v26  ;;  %v6447_v15 = vpop.eup %6446 }
 0x245   : > { %v604_v58 = vshll.u32 %v13098_v41, %v9124_v27  ;;  %v600_v5 = vor.u32 %v599_v0, %v598_v47  ;;  %v603_v21 = vor.u32 %v602_v56, %v601_v37  ;;  %v611_v24 = vshrl.u32 %v13099_v36, %v596_v46  ;;  %v6449_v25 = vpop.eup %6448 }
 0x246   : > { %v609_v22 = vor.u32 %v608_v1, %v607_v61  ;;  %v1305_v50 = vxor.u32 2147483648, %v6447_v15  ;;  %v972_v13 = vor.u32 4788187, %v971_v48  ;;  %v1163_v54 = vshrl.u32 %v1162_v17, 30 }
 0x247   : > { %v606_v28 = vor.u32 %v605_v44, %v604_v58  ;;  %6348 = vset.pattern.permute.xlu1 %v12856_v7  ;;  %v1302_v4 = vxor.u32 2147483648, %v6449_v25  ;;  %v610_v12 = vshll.u32 %v13171_v11, %v9124_v27  ;;  %vm613_vm6 = vcmp.lt.s32.totalorder %v9250_v45, 1 }
 0x248   : > { %vm616_vm9 = vcmp.lt.s32.totalorder %v9250_v45, 4  ;;  %2934 = vperm.xlu1 %6348, %v8772_v55   ;;  %v1306_v46 = vsel %vm1304_vm3, %v1305_v50, %v6449_v25  ;;  %v973_v19 = vand.u32 2147483647, %v972_v13  ;;  %v975_v9 = vcvt.s32.f32 %v968_v33 }
 0x249   : > { %v1164_v0 = vshll.u32 %v1163_v54, 30  ;;  %v1303_v29 = vsel %vm1301_vm7, %v6447_v15, %v1302_v4  ;;  %v612_v32 = vor.u32 %v611_v24, %v610_v12  ;;  %v621_v56 = vsel %vm613_vm6, %v600_v5, %v603_v21 }
 0x24a   : > { %v622_v27 = vsel %vm616_vm9, %v609_v22, 920167782  ;;  %v1307_v44 = vsel %vm1300_vm2, %v1303_v29, %v1306_v46  ;;  %v976_v55 = vmul.f32 %v975_v9, %v973_v19  ;;  %vm615_vm11 = vcmp.lt.s32.totalorder %v9250_v45, 3 }
 0x24b   : > { %v9309_v6 = vsub.s32 %v1161_v26, %v1164_v0  ;;  %v1308_v39 = vsel %vm1297_vm8, nan, %v1307_v44  ;;  %vm614_vm14 = vcmp.lt.s32.totalorder %v9250_v45, 2  ;;  %v618_v1 = vsel %vm616_vm9, %v606_v28, 2102212464 }
 0x24c   : > { %v623_v47 = vsel %vm615_vm11, %v606_v28, %v622_v27  ;;  %v13183_v37 = vmov 5   ;;  %3355 = vmatprep.subr.mxu1 %v1308_v39  ;;  %v977_v10 = vxor.u32 2147483648, %v976_v55  ;;  %v625_v63 = vsel %vm613_vm6, %v603_v21, %v606_v28 }
 0x24d   : > { %6349 = vset.pattern.permute.xlu1 %v13183_v37  ;;  %v1167_v26 = vsub.s32 0, %v9309_v6  ;;  %v624_v61 = vsel %vm614_vm14, %v621_v56, %v623_v47  ;;  %v1187_v33 = vsub.s32 4, %v1163_v54  ;;  %v617_v48 = vsel %vm613_vm6, %v597_v59, %v600_v5 }
 0x24e   : > { %v626_v17 = vsel %vm616_vm9, %v612_v32, 1326507024  ;;  %v629_v58 = vshll.u32 %v589_v43, 8  ;;  %v978_v15 = vsel %vm895_vm10, %v977_v10, %v976_v55  ;;  %v619_v25 = vsel %vm615_vm11, %v603_v21, %v618_v1 }
 0x24f   : > { %v6045_v24 = vmin.u32 %v1167_v26, %v9309_v6  ;;  %v627_v50 = vsel %vm615_vm11, %v609_v22, %v626_v17  ;;  %v981_v13 = vsel %vm9173_vm13, %v7467_v42, %v978_v15  ;;  %vm696_vm10 = vcmp.gt.s32.totalorder %v9253_v40, 0 }
 0x250   : > { %v628_v59 = vsel %vm614_vm14, %v625_v63, %v627_v50  ;;  %v9341_v5 = vmul.u32.u64.low %v629_v58, %v624_v61  ;;  %v9342_v43 = vmul.u32.u64.high %v629_v58, %v624_v61, %v9341_v5  ;;  %6450 = vcosq.f32 %v981_v13  ;;  %v9400_v61 = vld [vmem:[%s12769_s3 + $0x20] sm:$0xff] }
 0x251   : > { %vm1103_vm15 = vcmp.lt.s32.totalorder %v7519_v60, 0  ;;  %v1169_v21 = vclz %v6045_v24  ;;  %6452 = vsinq.f32 %v981_v13  ;;  %v804_v4 = vsub.s32 32, %v9256_v2  ;;  %2734 = vperm.xlu1 %6349, %v9400_v61  }
 0x252   : > { %v1188_v22 = vsel %vm1103_vm15, %v1187_v33, %v1163_v54  ;;  %v9349_v28 = vmul.u32.u64.low %v629_v58, %v628_v59  ;;  %v9350_v53 = vmul.u32.u64.high %v629_v58, %v628_v59, %v9349_v28  ;;  %v620_v46 = vsel %vm614_vm14, %v617_v48, %v619_v25 }
 0x253   : > { %v6046_v12 = vadd.s32 4294967294, %v1169_v21  ;;  %v9356_v19 = vand.u32 3, %v9261_v38  ;;  %vm9360_vm13 = vcmp.le.f32.partialorder %v1101_v30, 0.7853982  ;;  %v639_v54 = vadd.s32 1, %v9342_v43 }
 0x254   : > { %v789_v0 = vand.u32 2147483647, %v8269_v34  ;;  %v9367_v29 = vand.u32 31, %v9247_v49  ;;  %v9372_v45 = vsel %vm696_vm10, %v9253_v40, 0  ;;  %v1190_v38 = vsel %vm9360_vm13, 0, %v1188_v22 }
 0x255   : > { %vm6047_vm0 = vcmp.lt.s32.totalorder %v6046_v12, 0  ;;  %v9377_v30 = vshrl.u32 %v9228_v16, 5  ;;  %v636_v56 = vmul.u32 %v629_v58, %v620_v46  ;;  %vm638_vm4 = vc.u32 %v9350_v53, %v9341_v5  ;;  %6350 = vset.pattern.permute.xlu1 %v12856_v7 }
 0x256   : > { %v1172_v32 = vsel %vm6047_vm0, 0, %v6046_v12  ;;  %v1157_v27 = vadd.s32 %v9235_v3, %v9223_v14  ;;  %v640_v40 = vsel %vm638_vm4, %v639_v54, %v9342_v43  ;;  %vm992_vm5 = vcmp.eq.s32.totalorder %v9356_v19, 2  ;;  %2930 = vperm.xlu1 %6350, %v8902_v52  }
 0x257   : > { %v1173_v44 = vsub.s32 32, %v1172_v32  ;;  %v1177_v55 = vsub.s32 4294967266, %v1172_v32  ;;  %v9385_v39 = vadd.s32 3, %v1190_v38  ;;  %v641_v1 = vadd.s32 %v640_v40, %v636_v56 }
 0x258   : > { %v9389_v16 = vand.u32 8388607, %v789_v0  ;;  %v9392_v47 = vshrl.u32 %v13096_v31, %v804_v4  ;;  %vm989_vm12 = vcmp.eq.s32.totalorder %v9356_v19, 0  ;;  %v1174_v14 = vshll.u32 %v9309_v6, %v1172_v32 }
 0x259   : > { %v1175_v3 = vshrl.u32 %v1157_v27, %v1173_v44  ;;  %v1178_v10 = vadd.s32 127, %v1177_v55  ;;  %v807_v26 = vshrl.u32 %v13097_v57, %v804_v4  ;;  %vm988_vm1 = vcmp.lt.s32.totalorder %v9356_v19, 2 }
 0x25a   : > { %v642_v63 = vadd.s32 536870912, %v641_v1  ;;  %v810_v33 = vshrl.u32 %v13098_v41, %v804_v4  ;;  %v813_v48 = vshrl.u32 %v13103_v62, %v804_v4  ;;  %v816_v17 = vshrl.u32 %v13171_v11, %v804_v4  ;;  %6351 = vset.pattern.permute.xlu1 %v13183_v37 }
 0x25b   : > { %vm985_vm3 = vweird.f32 %v7467_v42  ;;  %v1176_v6 = vor.u32 %v1175_v3, %v1174_v14  ;;  %v1179_v58 = vshll.u32 %v1178_v10, 23  ;;  %v806_v15 = vshll.u32 %v13096_v31, %v9256_v2  ;;  %v9435_v10 = vld [vmem:[%s12769_s3 + $0x18] sm:$0xff] }
 0x25c   : > { %v815_v24 = vshll.u32 %v13103_v62, %v9256_v2  ;;  %v643_v25 = vshrl.u32 %v642_v63, 30  ;;  %v809_v50 = vshll.u32 %v13097_v57, %v9256_v2  ;;  %v812_v13 = vshll.u32 %v13098_v41, %v9256_v2  ;;  %2730 = vperm.xlu1 %6351, %v9435_v10  }
 0x25d   : > { %v819_v59 = vshrl.u32 %v13099_v36, %v804_v4  ;;  %v1180_v43 = vor.u32 4788187, %v1179_v58  ;;  %v797_v21 = vor.u32 8388608, %v9389_v16  ;;  %v808_v22 = vor.u32 %v807_v26, %v806_v15  ;;  %v6451_v12 = vpop.eup %6450 }
 0x25e   : > { %v817_v28 = vor.u32 %v816_v17, %v815_v24  ;;  %vm583_vm7 = vcmp.lt.s32.totalorder %v8237_v20, 0  ;;  %v644_v46 = vshll.u32 %v643_v25, 30  ;;  %v811_v54 = vor.u32 %v810_v33, %v809_v50  ;;  %v6453_v56 = vpop.eup %6452 }
 0x25f   : > { %v814_v38 = vor.u32 %v813_v48, %v812_v13  ;;  %v818_v32 = vshll.u32 %v13171_v11, %v9256_v2  ;;  %v993_v27 = vxor.u32 2147483648, %v6451_v12  ;;  %v1181_v44 = vand.u32 2147483647, %v1180_v43 }
 0x260   : > { %v1183_v4 = vcvt.s32.f32 %v1176_v6  ;;  %vm821_vm2 = vcmp.lt.s32.totalorder %v9377_v30, 1  ;;  %v990_v55 = vxor.u32 2147483648, %v6453_v56  ;;  %v9424_v40 = vsub.s32 %v641_v1, %v644_v46 }
 0x261   : > { %v820_v16 = vor.u32 %v819_v59, %v818_v32  ;;  %vm824_vm8 = vcmp.lt.s32.totalorder %v9377_v30, 4  ;;  %v994_v14 = vsel %vm992_vm5, %v993_v27, %v6453_v56  ;;  %vm823_vm6 = vcmp.lt.s32.totalorder %v9377_v30, 3 }
 0x262   : > { %v1184_v2 = vmul.f32 %v1183_v4, %v1181_v44  ;;  %v830_v3 = vsel %vm824_vm8, %v817_v28, 920167782  ;;  %v991_v52 = vsel %vm989_vm12, %v6451_v12, %v990_v55  ;;  %v647_v1 = vsub.s32 0, %v9424_v40 }
 0x263   : > { %v667_v26 = vsub.s32 4, %v643_v25  ;;  %v826_v63 = vsel %vm824_vm8, %v814_v38, 2102212464  ;;  %v995_v33 = vsel %vm988_vm1, %v991_v52, %v994_v14  ;;  %v829_v17 = vsel %vm821_vm2, %v808_v22, %v811_v54 }
 0x264   : > { %v1185_v48 = vxor.u32 2147483648, %v1184_v2  ;;  %v831_v6 = vsel %vm823_vm6, %v814_v38, %v830_v3  ;;  %v996_v58 = vsel %vm985_vm3, nan, %v995_v33  ;;  %v6025_v15 = vmin.u32 %v647_v1, %v9424_v40 }
 0x265   : > { %v833_v24 = vsel %vm821_vm2, %v811_v54, %v814_v38  ;;  %v834_v19 = vsel %vm824_vm8, %v820_v16, 1326507024  ;;  %3195 = vmatpush1.msra.mxu0 %v996_v58  ;;  %vm822_vm9 = vcmp.lt.s32.totalorder %v9377_v30, 2  ;;  %v825_v42 = vsel %vm821_vm2, %v9392_v47, %v808_v22 }
 0x266   : > { %v1186_v50 = vsel %vm1103_vm15, %v1185_v48, %v1184_v2  ;;  %v835_v13 = vsel %vm823_vm6, %v817_v28, %v834_v19  ;;  %v649_v43 = vclz %v6025_v15  ;;  %v832_v12 = vsel %vm822_vm9, %v829_v17, %v831_v6 }
 0x267   : > { %v1189_v59 = vsel %vm9360_vm13, %v7519_v60, %v1186_v50  ;;  %v837_v46 = vshll.u32 %v797_v21, 8  ;;  %v668_v38 = vsel %vm583_vm7, %v667_v26, %v643_v25  ;;  %v827_v32 = vsel %vm823_vm6, %v811_v54, %v826_v63  ;;  %v9520_v26 = vld [vmem:[%s12769_s3 + $0x10] sm:$0xff] }
 0x268   : > { %6454 = vcosq.f32 %v1189_v59  ;;  %v836_v47 = vsel %vm822_vm9, %v833_v24, %v835_v13  ;;  %v6026_v22 = vadd.s32 4294967294, %v649_v43  ;;  %v477_v21 = vand.u32 2147483647, %v8233_v35  ;;  %2726 = vperm.xlu0 %6345, %v9520_v26  }
 0x269   : > { %6456 = vsinq.f32 %v1189_v59  ;;  %v9476_v28 = vmul.u32.u64.low %v837_v46, %v836_v47  ;;  %v9477_v9 = vmul.u32.u64.high %v837_v46, %v836_v47, %v9476_v28  ;;  %v9485_v44 = vsub.s32 32, %v9367_v29 }
 0x26a   : > { %v9479_v56 = vmul.u32.u64.low %v837_v46, %v832_v12  ;;  %v9480_v27 = vmul.u32.u64.high %v837_v46, %v832_v12, %v9479_v56  ;;  %v9488_v25 = vand.u32 3, %v9385_v39  ;;  %vm6027_vm11 = vcmp.lt.s32.totalorder %v6026_v22, 0  ;;  %v9607_v39 = vld [vmem:[%s12769_s3 + $0x8] sm:$0xff] }
 0x26b   : > { %v828_v54 = vsel %vm822_vm9, %v825_v42, %v827_v32  ;;  %v12859_v4 = vmov 0.0   ;;  %v9495_v55 = vshrl.u32 %v9247_v49, 5  ;;  %v9498_v16 = vand.u32 31, %v9372_v45 }
 0x26c   : > { %3230 = vmatprep.mubr.f32.mxu0 %v12859_v4  ;;  %3391 = vmatprep.mubr.f32.mxu1 %v12859_v4  ;;  %vm9502_vm14 = vcmp.le.f32.partialorder %v581_v23, 0.7853982  ;;  %v652_v14 = vsel %vm6027_vm11, 0, %v6026_v22  ;;  %v637_v30 = vadd.s32 %v9341_v5, %v9350_v53  ;;  %v844_v49 = vmul.u32 %v837_v46, %v828_v54 }
 0x26d   : > { %v653_v2 = vsub.s32 32, %v652_v14  ;;  %v657_v3 = vsub.s32 4294967266, %v652_v14  ;;  %v670_v52 = vsel %vm9502_vm14, 0, %v668_v38  ;;  %vm846_vm10 = vc.u32 %v9477_v9, %v9479_v56  ;;  %6354 = vset.pattern.permute.xlu0 %v13182_v18 }
 0x26e   : > { %v847_v1 = vadd.s32 1, %v9480_v27  ;;  %v9515_v23 = vand.u32 8388607, %v477_v21  ;;  %vm1200_vm15 = vcmp.eq.s32.totalorder %v9488_v25, 2  ;;  %v654_v5 = vshll.u32 %v9424_v40, %v652_v14 }
 0x26f   : > { %v655_v53 = vshrl.u32 %v637_v30, %v653_v2  ;;  %v658_v63 = vadd.s32 127, %v657_v3  ;;  %v495_v33 = vshrl.u32 %v13097_v57, %v9485_v44  ;;  %vm1197_vm13 = vcmp.eq.s32.totalorder %v9488_v25, 0 }
 0x270   : > { %v9528_v48 = vadd.s32 3, %v670_v52  ;;  %v848_v17 = vsel %vm846_vm10, %v847_v1, %v9480_v27  ;;  %v498_v6 = vshrl.u32 %v13098_v41, %v9485_v44  ;;  %v501_v58 = vshrl.u32 %v13103_v62, %v9485_v44  ;;  %v6986_v27 = vld [vmem:[%s12769_s3 + $0x38] sm:$0xff] }
 0x271   : > { %vm1196_vm0 = vcmp.lt.s32.totalorder %v9488_v25, 2  ;;  %v656_v40 = vor.u32 %v655_v53, %v654_v5  ;;  %v659_v15 = vshll.u32 %v658_v63, 23  ;;  %v849_v24 = vadd.s32 %v848_v17, %v844_v49  ;;  %2610 = vperm.xlu0 %6354, %v6986_v27  }
 0x272   : > { %v494_v19 = vshll.u32 %v13096_v31, %v9367_v29  ;;  %vm1193_vm4 = vweird.f32 %v7519_v60  ;;  %v497_v50 = vshll.u32 %v13097_v57, %v9367_v29  ;;  %v500_v42 = vshll.u32 %v13098_v41, %v9367_v29 }
 0x273   : > { %v503_v13 = vshll.u32 %v13103_v62, %v9367_v29  ;;  %v504_v59 = vshrl.u32 %v13171_v11, %v9485_v44  ;;  %v660_v43 = vor.u32 4788187, %v659_v15  ;;  %v850_v12 = vadd.s32 536870912, %v849_v24 }
 0x274   : > { %v485_v46 = vor.u32 8388608, %v9515_v23  ;;  %v496_v38 = vor.u32 %v495_v33, %v494_v19  ;;  %v499_v32 = vor.u32 %v498_v6, %v497_v50  ;;  %v502_v47 = vor.u32 %v501_v58, %v500_v42 }
 0x275   : > { %v505_v22 = vor.u32 %v504_v59, %v503_v13  ;;  %v507_v28 = vshrl.u32 %v13099_v36, %v9485_v44  ;;  %v6455_v54 = vpop.eup %6454  ;;  %v661_v14 = vand.u32 2147483647, %v660_v43  ;;  %v663_v30 = vcvt.s32.f32 %v656_v40  ;;  %2595 = vperm.xlu0 %6354, %v9400_v61  }
 0x276   : > { %v9554_v2 = vshrl.u32 %v850_v12, 30  ;;  %vm512_vm5 = vcmp.lt.s32.totalorder %v9495_v55, 4  ;;  %v6457_v3 = vpop.eup %6456  ;;  %v1201_v52 = vxor.u32 2147483648, %v6455_v54  ;;  %v506_v49 = vshll.u32 %v13171_v11, %v9367_v29 }
 0x277   : > { %vm509_vm12 = vcmp.lt.s32.totalorder %v9495_v55, 1  ;;  %v518_v1 = vsel %vm512_vm5, %v505_v22, 920167782  ;;  %v1198_v23 = vxor.u32 2147483648, %v6457_v3  ;;  %v664_v5 = vmul.f32 %v663_v30, %v661_v14 }
 0x278   : > { %v852_v53 = vshll.u32 %v9554_v2, 30  ;;  %vm511_vm1 = vcmp.lt.s32.totalorder %v9495_v55, 3  ;;  %v1202_v63 = vsel %vm1200_vm15, %v1201_v52, %v6457_v3  ;;  %v508_v33 = vor.u32 %v507_v28, %v506_v49 }
 0x279   : > { %v517_v17 = vsel %vm509_vm12, %v496_v38, %v499_v32  ;;  %v519_v29 = vsel %vm511_vm1, %v502_v47, %v518_v1  ;;  %v1199_v6 = vsel %vm1197_vm13, %v6455_v54, %v1198_v23  ;;  %v665_v58 = vxor.u32 2147483648, %v664_v5  ;;  %2590 = vperm.xlu0 %6354, %v9435_v10  }
 0x27a   : > { %v9573_v40 = vsub.s32 %v849_v24, %v852_v53  ;;  %v493_v15 = vshrl.u32 %v13096_v31, %v9485_v44  ;;  %v1203_v19 = vsel %vm1196_vm0, %v1199_v6, %v1202_v63  ;;  %vm510_vm3 = vcmp.lt.s32.totalorder %v9495_v55, 2 }
 0x27b   : > { %v514_v50 = vsel %vm512_vm5, %v502_v47, 2102212464  ;;  %v521_v42 = vsel %vm509_vm12, %v499_v32, %v502_v47  ;;  %v1204_v13 = vsel %vm1193_vm4, nan, %v1203_v19  ;;  %v666_v24 = vsel %vm583_vm7, %v665_v58, %v664_v5 }
 0x27c   : > { %v855_v59 = vsub.s32 0, %v9573_v40  ;;  %v520_v44 = vsel %vm510_vm3, %v517_v17, %v519_v29  ;;  %3356 = vmatpush1.msra.mxu1 %v1204_v13  ;;  %v669_v25 = vsel %vm9502_vm14, %v8237_v20, %v666_v24  ;;  %v513_v43 = vsel %vm509_vm12, %v493_v15, %v496_v38 }
 0x27d   : > { %v522_v60 = vsel %vm512_vm5, %v508_v33, 1326507024  ;;  %v525_v12 = vshll.u32 %v485_v46, 8  ;;  %6458 = vcosq.f32 %v669_v25  ;;  %v515_v28 = vsel %vm511_vm1, %v499_v32, %v514_v50  ;;  %2580 = vperm.xlu0 %6354, %v9607_v39  }
 0x27e   : > { %v6033_v47 = vmin.u32 %v855_v59, %v9573_v40  ;;  %v523_v27 = vsel %vm511_vm1, %v505_v22, %v522_v60  ;;  %6460 = vsinq.f32 %v669_v25  ;;  %v9616_v30 = vand.u32 3, %v9528_v48 }
 0x27f   : > { %v524_v46 = vsel %vm510_vm3, %v521_v42, %v523_v27  ;;  %v9611_v38 = vmul.u32.u64.low %v525_v12, %v520_v44  ;;  %v9612_v54 = vmul.u32.u64.high %v525_v12, %v520_v44, %v9611_v38  ;;  %v516_v52 = vsel %vm510_vm3, %v513_v43, %v515_v28 }
 0x280   : > { %v857_v14 = vclz %v6033_v47  ;;  %v9618_v32 = vmul.u32.u64.low %v525_v12, %v524_v46  ;;  %v9619_v3 = vmul.u32.u64.high %v525_v12, %v524_v46, %v9618_v32  ;;  %v700_v49 = vsub.s32 32, %v9498_v16 }
 0x281   : > { %v535_v1 = vadd.s32 1, %v9612_v54  ;;  %v9627_v23 = vshrl.u32 %v9372_v45, 5  ;;  %v845_v48 = vadd.s32 %v9479_v56, %v9477_v9  ;;  %vm680_vm2 = vcmp.eq.s32.totalorder %v9616_v30, 2  ;;  %6357 = vset.pattern.permute.xlu0 %v12856_v7 }
 0x282   : > { %v6034_v22 = vadd.s32 4294967294, %v857_v14  ;;  %v532_v53 = vmul.u32 %v525_v12, %v516_v52  ;;  %vm534_vm8 = vc.u32 %v9619_v3, %v9611_v38  ;;  %v685_v55 = vand.u32 2147483647, %v8265_v8  ;;  %2926 = vperm.xlu0 %6357, %v9400_v61  }
 0x283   : > { %vm677_vm6 = vcmp.eq.s32.totalorder %v9616_v30, 0  ;;  %v875_v33 = vsub.s32 4, %v9554_v2  ;;  %v536_v9 = vsel %vm534_vm8, %v535_v1, %v9612_v54  ;;  %vm676_vm9 = vcmp.lt.s32.totalorder %v9616_v30, 2 }
 0x284   : > { %vm6035_vm7 = vcmp.lt.s32.totalorder %v6034_v22, 0  ;;  %v537_v56 = vadd.s32 %v536_v9, %v532_v53  ;;  %v9642_v17 = vshrl.u32 %v13096_v31, %v700_v49  ;;  %v702_v29 = vshll.u32 %v13096_v31, %v9498_v16 }
 0x285   : > { %v860_v5 = vsel %vm6035_vm7, 0, %v6034_v22  ;;  %v703_v6 = vshrl.u32 %v13097_v57, %v700_v49  ;;  %vm673_vm11 = vweird.f32 %v8237_v20  ;;  %v706_v50 = vshrl.u32 %v13098_v41, %v700_v49 }
 0x286   : > { %v861_v63 = vsub.s32 32, %v860_v5  ;;  %v865_v45 = vsub.s32 4294967266, %v860_v5  ;;  %v862_v58 = vshll.u32 %v9573_v40, %v860_v5  ;;  %v538_v42 = vadd.s32 536870912, %v537_v56  ;;  %2914 = vperm.xlu0 %6357, %v9607_v39  }
 0x287   : > { %v692_v13 = vand.u32 8388607, %v685_v55  ;;  %v709_v24 = vshrl.u32 %v13103_v62, %v700_v49  ;;  %v712_v59 = vshrl.u32 %v13171_v11, %v700_v49  ;;  %v705_v25 = vshll.u32 %v13097_v57, %v9498_v16  ;;  %v9737_v57 = vld [vmem:[%s12769_s3 + $0x28] sm:$0xff] }
 0x288   : > { %v863_v15 = vshrl.u32 %v845_v48, %v861_v63  ;;  %v866_v19 = vadd.s32 127, %v865_v45  ;;  %v715_v43 = vshrl.u32 %v13099_v36, %v700_v49  ;;  %vm791_vm14 = vcmp.lt.s32.totalorder %v8269_v34, 0 }
 0x289   : > { %v9659_v60 = vshrl.u32 %v538_v42, 30  ;;  %v704_v12 = vor.u32 %v703_v6, %v702_v29  ;;  %v708_v47 = vshll.u32 %v13098_v41, %v9498_v16  ;;  %v711_v28 = vshll.u32 %v13103_v62, %v9498_v16 }
 0x28a   : > { %v864_v44 = vor.u32 %v863_v15, %v862_v58  ;;  %v867_v31 = vshll.u32 %v866_v19, 23  ;;  %v6459_v40 = vpop.eup %6458  ;;  %vm9667_vm10 = vcmp.le.f32.partialorder %v789_v0, 0.7853982  ;;  %v707_v54 = vor.u32 %v706_v50, %v705_v25 }
 0x28b   : > { %v6461_v27 = vpop.eup %6460  ;;  %v681_v46 = vxor.u32 2147483648, %v6459_v40  ;;  %v714_v14 = vshll.u32 %v13171_v11, %v9498_v16  ;;  %v540_v22 = vshll.u32 %v9659_v60, 30  ;;  %v710_v41 = vor.u32 %v709_v24, %v708_v47 }
 0x28c   : > { %v868_v36 = vor.u32 4788187, %v867_v31  ;;  %v678_v32 = vxor.u32 2147483648, %v6461_v27  ;;  %v713_v52 = vor.u32 %v712_v59, %v711_v28  ;;  %v871_v1 = vcvt.s32.f32 %v864_v44 }
 0x28d   : > { %v682_v62 = vsel %vm680_vm2, %v681_v46, %v6461_v27  ;;  %v716_v48 = vor.u32 %v715_v43, %v714_v14  ;;  %v541_v5 = vsub.s32 %v537_v56, %v540_v22  ;;  %v693_v53 = vor.u32 8388608, %v692_v13 }
 0x28e   : > { %v869_v49 = vand.u32 2147483647, %v868_v36  ;;  %v679_v0 = vsel %vm677_vm6, %v6459_v40, %v678_v32  ;;  %vm717_vm15 = vcmp.lt.s32.totalorder %v9627_v23, 1  ;;  %vm719_vm13 = vcmp.lt.s32.totalorder %v9627_v23, 3 }
 0x28f   : > { %v683_v11 = vsel %vm676_vm9, %v679_v0, %v682_v62  ;;  %vm720_vm0 = vcmp.lt.s32.totalorder %v9627_v23, 4  ;;  %v543_v45 = vsub.s32 0, %v541_v5  ;;  %v725_v9 = vsel %vm717_vm15, %v704_v12, %v707_v54 }
 0x290   : > { %v872_v16 = vmul.f32 %v871_v1, %v869_v49  ;;  %v684_v63 = vsel %vm673_vm11, nan, %v683_v11  ;;  %v726_v29 = vsel %vm720_vm0, %v713_v52, 920167782  ;;  %v729_v30 = vsel %vm717_vm15, %v707_v54, %v710_v41 }
 0x291   : > { %3196 = vmatprep.subr.mxu0 %v684_v63  ;;  %v727_v6 = vsel %vm719_vm13, %v710_v41, %v726_v29  ;;  %v730_v58 = vsel %vm720_vm0, %v716_v48, 1326507024  ;;  %v6021_v15 = vmin.u32 %v543_v45, %v541_v5  ;;  %vm718_vm4 = vcmp.lt.s32.totalorder %v9627_v23, 2 }
 0x292   : > { %v873_v56 = vxor.u32 2147483648, %v872_v16  ;;  %v722_v19 = vsel %vm720_vm0, %v710_v41, 2102212464  ;;  %v731_v20 = vsel %vm719_vm13, %v713_v52, %v730_v58  ;;  %v728_v42 = vsel %vm718_vm4, %v725_v9, %v727_v6 }
 0x293   : > { %v732_v13 = vsel %vm718_vm4, %v729_v30, %v731_v20  ;;  %v733_v24 = vshll.u32 %v693_v53, 8  ;;  %v876_v59 = vsel %vm791_vm14, %v875_v33, %v9554_v2  ;;  %v545_v31 = vclz %v6021_v15  ;;  %v9723_v33 = vld [vmem:[%s12769_s3 + $0x38] sm:$0xff]  ;;  %v9761_v20 = vld [vmem:[%s12769_s3 + $0x30] sm:$0xff] }
 0x294   : > { %v874_v50 = vsel %vm791_vm14, %v873_v56, %v872_v16  ;;  %v721_v25 = vsel %vm717_vm15, %v9642_v17, %v704_v12  ;;  %v723_v43 = vsel %vm719_vm13, %v707_v54, %v722_v19  ;;  %v878_v17 = vsel %vm9667_vm10, 0, %v876_v59 }
 0x295   : > { %v877_v44 = vsel %vm9667_vm10, %v8269_v34, %v874_v50  ;;  %v9713_v40 = vmul.u32.u64.low %v733_v24, %v732_v13  ;;  %v9714_v47 = vmul.u32.u64.high %v733_v24, %v732_v13, %v9713_v40  ;;  %v6022_v28 = vadd.s32 4294967294, %v545_v31 }
 0x296   : > { %6462 = vcosq.f32 %v877_v44  ;;  %v9716_v27 = vmul.u32.u64.low %v733_v24, %v728_v42  ;;  %v9717_v2 = vmul.u32.u64.high %v733_v24, %v728_v42, %v9716_v27  ;;  %v724_v12 = vsel %vm718_vm4, %v721_v25, %v723_v43 }
 0x297   : > { %6464 = vsinq.f32 %v877_v44  ;;  %vm6023_vm5 = vcmp.lt.s32.totalorder %v6022_v28, 0  ;;  %v7080_v46 = vmov 7   ;;  %v533_v23 = vadd.s32 %v9611_v38, %v9619_v3 }
 0x298   : > { %6352 = vset.pattern.permute.xlu1 %v7080_v46  ;;  %6362 = vset.pattern.permute.xlu0 %v7080_v46  ;;  %v548_v36 = vsel %vm6023_vm5, 0, %v6022_v28  ;;  %vm742_vm12 = vc.u32 %v9714_v47, %v9716_v27  ;;  %v743_v32 = vadd.s32 1, %v9717_v2  ;;  %v882_v22 = vadd.s32 3, %v878_v17 }
 0x299   : > { %3533 = vperm.xlu1 %6352, %v9723_v33   ;;  %3523 = vperm.xlu0 %6362, %v9737_v57   ;;  %v549_v54 = vsub.s32 32, %v548_v36  ;;  %v553_v14 = vsub.s32 4294967266, %v548_v36  ;;  %v740_v41 = vmul.u32 %v733_v24, %v724_v12  ;;  %v550_v52 = vshll.u32 %v541_v5, %v548_v36  ;;  %v9750_v5 = vld [vmem:[%s12769_s3] sm:$0xff] }
 0x29a   : > { %v744_v1 = vsel %vm742_vm12, %v743_v32, %v9717_v2  ;;  %v883_v3 = vand.u32 3, %v882_v22  ;;  %vm881_vm7 = vweird.f32 %v8269_v34  ;;  %vm479_vm8 = vcmp.lt.s32.totalorder %v8233_v35, 0 }
 0x29b   : > { %v551_v62 = vshrl.u32 %v533_v23, %v549_v54  ;;  %v554_v49 = vadd.s32 127, %v553_v14  ;;  %v745_v48 = vadd.s32 %v744_v1, %v740_v41  ;;  %v563_v24 = vsub.s32 4, %v9659_v60 }
 0x29c   : > { %vm888_vm1 = vcmp.eq.s32.totalorder %v883_v3, 2  ;;  %vm885_vm3 = vcmp.eq.s32.totalorder %v883_v3, 0  ;;  %vm884_vm2 = vcmp.lt.s32.totalorder %v883_v3, 2  ;;  %vm9769_vm6 = vcmp.le.f32.partialorder %v477_v21, 0.7853982 }
 0x29d   : > { %6353 = vset.pattern.permute.xlu1 %v13182_v18  ;;  %3513 = vperm.xlu0 %6362, %v9435_v10   ;;  %v552_v0 = vor.u32 %v551_v62, %v550_v52  ;;  %v555_v53 = vshll.u32 %v554_v49, 23  ;;  %v746_v38 = vadd.s32 536870912, %v745_v48  ;;  %v564_v40 = vsel %vm479_vm8, %v563_v24, %v9659_v60 }
 0x29e   : > { %2585 = vperm.xlu1 %6353, %v9520_v26   ;;  %v566_v2 = vsel %vm9769_vm6, 0, %v564_v40  ;;  %v741_v36 = vadd.s32 %v9716_v27, %v9714_v47  ;;  %vm569_vm15 = vweird.f32 %v8233_v35  ;;  %vm3117_vm13 = vcmask 326656   ;;  %v3107_v40 = vld [vmem:[%s12767_s1 + $0x30] sm:$0xff] }
 0x29f   : > { %v556_v11 = vor.u32 4788187, %v555_v53  ;;  %v9752_v16 = vshrl.u32 %v746_v38, 30  ;;  %v559_v9 = vcvt.s32.f32 %v552_v0  ;;  %v570_v12 = vadd.s32 3, %v566_v2 }
 0x2a0   : > { %vm687_vm0 = vcmp.lt.s32.totalorder %v8265_v8, 0  ;;  %vm9798_vm4 = vcmp.le.f32.partialorder %v685_v55, 0.7853982 }
 0x2a1   : > { %3498 = vperm.xlu0 %6362, %v9750_v5   ;;  %v557_v45 = vand.u32 2147483647, %v556_v11  ;;  %v748_v6 = vshll.u32 %v9752_v16, 30  ;;  %v571_v22 = vand.u32 3, %v570_v12 }
 0x2a2   : > { %6355 = vset.pattern.permute.xlu1 %v12856_v7 }
 0x2a3   : > { %v6463_v63 = vpop.eup %6462  ;;  %2922 = vperm.xlu1 %6355, %v9435_v10   ;;  %v560_v58 = vmul.f32 %v559_v9, %v557_v45  ;;  %v749_v19 = vsub.s32 %v745_v48, %v748_v6  ;;  %vm576_vm11 = vcmp.eq.s32.totalorder %v571_v22, 2  ;;  %vm573_vm14 = vcmp.eq.s32.totalorder %v571_v22, 0 }
 0x2a4   : > { %v6465_v29 = vpop.eup %6464  ;;  %v889_v56 = vxor.u32 2147483648, %v6463_v63  ;;  %vm572_vm10 = vcmp.lt.s32.totalorder %v571_v22, 2 }
 0x2a5   : > { %v886_v30 = vxor.u32 2147483648, %v6465_v29  ;;  %v561_v42 = vxor.u32 2147483648, %v560_v58  ;;  %v751_v59 = vsub.s32 0, %v749_v19 }
 0x2a6   : > { %v890_v15 = vsel %vm888_vm1, %v889_v56, %v6465_v29  ;;  %v771_v29 = vsub.s32 4, %v9752_v16  ;;  %v13203_v56 = vld [vmem:[#allocation12_spill] sm:$0xff] }
 0x2a7   : > { %v887_v50 = vsel %vm885_vm3, %v6463_v63, %v886_v30  ;;  %6356 = vset.pattern.permute.xlu1 %v7080_v46  ;;  %v562_v25 = vsel %vm479_vm8, %v561_v42, %v560_v58  ;;  %v6029_v43 = vmin.u32 %v751_v59, %v749_v19  ;;  %v3101_v63 = vld [vmem:[%s12767_s1] sm:$0xff]  ;;  %v3102_v30 = vld [vmem:[%s12767_s1 + $0x8] sm:$0xff]  ;;  %v3103_v58 = vld [vmem:[%s12767_s1 + $0x10] sm:$0xff]  ;;  %vm777_vm3 = vweird.f32 %v8265_v8 }
 0x2a8   : > { %v891_v13 = vsel %vm884_vm2, %v887_v50, %v890_v15  ;;  %3528 = vperm.xlu1 %6356, %v9761_v20   ;;  %v565_v34 = vsel %vm9769_vm6, %v8233_v35, %v562_v25  ;;  %v772_v55 = vsel %vm687_vm0, %v771_v29, %v9752_v16  ;;  %v3104_v16 = vld [vmem:[%s12767_s1 + $0x18] sm:$0xff]  ;;  %v3105_v42 = vld [vmem:[%s12767_s1 + $0x20] sm:$0xff] }
 0x2a9   : > { %v892_v44 = vsel %vm881_vm7, nan, %v891_v13  ;;  %6466 = vcosq.f32 %v565_v34  ;;  %v753_v28 = vclz %v6029_v43  ;;  %v774_v15 = vsel %vm9798_vm4, 0, %v772_v55  ;;  %v13205_v55 = vld [vmem:[#allocation6_spill] sm:$0xff] }
 0x2aa   : > { %3357 = vmatprep.subr.mxu1 %v892_v44  ;;  %6468 = vsinq.f32 %v565_v34 }
 0x2ab   : > { %v6030_v21 = vadd.s32 4294967294, %v753_v28  ;;  %v9869_v28 = vpop.permute.xlu1 %2746 }
 0x2ac   : > { %6358 = vset.pattern.permute.xlu1 %v13183_v37 }
 0x2ad   : > { %2722 = vperm.xlu1 %6358, %v9607_v39   ;;  %vm6031_vm9 = vcmp.lt.s32.totalorder %v6030_v21, 0 }
 0x2ae   : > { %v756_v17 = vsel %vm6031_vm9, 0, %v6030_v21 }
 0x2af   : > { %v757_v23 = vsub.s32 32, %v756_v17  ;;  %v761_v54 = vsub.s32 4294967266, %v756_v17  ;;  %v758_v60 = vshll.u32 %v749_v19, %v756_v17  ;;  %v778_v19 = vadd.s32 3, %v774_v15  ;;  %v9871_v21 = vpop.permute.xlu1 %2605 }
 0x2b1   : > { %6359 = vset.pattern.permute.xlu1 %v12856_v7  ;;  %v759_v14 = vshrl.u32 %v741_v36, %v757_v23  ;;  %v762_v32 = vadd.s32 127, %v761_v54  ;;  %v779_v50 = vand.u32 3, %v778_v19 }
 0x2b2   : > { %2918 = vperm.xlu1 %6359, %v9520_v26  }
 0x2b3   : > { %v760_v41 = vor.u32 %v759_v14, %v758_v60  ;;  %v763_v52 = vshll.u32 %v762_v32, 23  ;;  %vm784_vm5 = vcmp.eq.s32.totalorder %v779_v50, 2  ;;  %vm781_vm12 = vcmp.eq.s32.totalorder %v779_v50, 0  ;;  %v2743_v32 = vpop.permute.xlu0 %2742 }
 0x2b4   : > { %vm780_vm1 = vcmp.lt.s32.totalorder %v779_v50, 2  ;;  %v7081_v60 = vmov 8   ;;  %v9997_v15 = vmul.f32 %v2743_v32, %v7226_v51 }
 0x2b5   : > { %v764_v49 = vor.u32 4788187, %v763_v52  ;;  %v767_v0 = vcvt.s32.f32 %v760_v41  ;;  %6367 = vset.pattern.permute.xlu0 %v7081_v60 }
 0x2b6   : > { %6360 = vset.pattern.permute.xlu1 %v13182_v18  ;;  %v6467_v62 = vpop.eup %6466  ;;  %3921 = vperm.xlu0 %6367, %v9761_v20   ;;  %v3112_v20 = vld [vmem:[%s12767_s1 + $0x58] sm:$0xff] }
 0x2b7   : > { %2575 = vperm.xlu1 %6360, %v9750_v5   ;;  %v6469_v1 = vpop.eup %6468  ;;  %v577_v47 = vxor.u32 2147483648, %v6467_v62  ;;  %v765_v48 = vand.u32 2147483647, %v764_v49  ;;  %v9895_v41 = vpop.permute.xlu0 %2738  ;;  %v9945_v49 = vld [vmem:[%s12769_s3 + $0x70] sm:$0xff] }
 0x2b8   : > { %v574_v27 = vxor.u32 2147483648, %v6469_v1  ;;  %v9873_v2 = vpop.permute.xlu1 %2938  ;;  %13198 = vst [vmem:[#allocation44_spill] sm:$0xff] %v9945_v49  ;;  %v10006_v50 = vmul.f32 %v9895_v41, %v13203_v56 }
 0x2b9   : > { %v578_v53 = vsel %vm576_vm11, %v577_v47, %v6469_v1  ;;  %v768_v3 = vmul.f32 %v767_v0, %v765_v48  ;;  %v3113_v47 = vld [vmem:[%s12767_s1 + $0x60] sm:$0xff] }
 0x2ba   : > { %v575_v38 = vsel %vm573_vm14, %v6467_v62, %v574_v27  ;;  %3909 = vperm.xlu0 %6367, %v9435_v10  }
 0x2bb   : > { %6361 = vset.pattern.permute.xlu1 %v13183_v37  ;;  %v579_v11 = vsel %vm572_vm10, %v575_v38, %v578_v53  ;;  %v769_v9 = vxor.u32 2147483648, %v768_v3  ;;  %v13199_v53 = vld [vmem:[#allocation8_spill] sm:$0xff] }
 0x2bc   : > { %2718 = vperm.xlu1 %6361, %v9750_v5   ;;  %v580_v45 = vsel %vm569_vm15, nan, %v579_v11  ;;  %v9972_v38 = vmul.f32 %v9871_v21, %v13199_v53 }
 0x2bd   : > { %3197 = vmatpush1.msra.mxu0 %v580_v45  ;;  %v770_v35 = vsel %vm687_vm0, %v769_v9, %v768_v3  ;;  %v13200_v3 = vld [vmem:[#allocation9_spill] sm:$0xff]  ;;  %v13202_v9 = vld [vmem:[#allocation10_spill] sm:$0xff] }
 0x2be   : > { %6100 = vmatmul.mubr.msk.f32.vlgmr.msra.gmra.mxu0 %vm3117_vm13, %v3101_v63  ;;  %v773_v6 = vsel %vm9798_vm4, %v8265_v8, %v770_v35  ;;  %v3108_v8 = vld [vmem:[%s12767_s1 + $0x38] sm:$0xff]  ;;  %v9875_v17 = vpop.permute.xlu1 %2600  ;;  %3901 = vperm.xlu0 %6367, %v9607_v39   ;;  %v9976_v11 = vmul.f32 %v9871_v21, %v13200_v3  ;;  %v9984_v29 = vmul.f32 %v9871_v21, %v13202_v9 }
 0x2bf   : > { %3236 = vmatprep.mubr.f32.mxu0 %v12859_v4  ;;  %6470 = vcosq.f32 %v773_v6  ;;  %v9988_v35 = vmul.f32 %v2743_v32, %v13203_v56 }
 0x2c0   : > { %6363 = vset.pattern.permute.xlu1 %v7080_v46  ;;  %6472 = vsinq.f32 %v773_v6  ;;  %v13204_v6 = vld [vmem:[#allocation13_spill] sm:$0xff] }
 0x2c1   : > { %3518 = vperm.xlu1 %6363, %v9400_v61  }
 0x2c2   : > { %6101 = vmatmul.mubr.msk.f32.gmra.mxu0 %vm3117_vm13, %v3102_v30  ;;  %6370 = vset.pattern.permute.xlu0 %v13183_v37 }
 0x2c3   : > { %3242 = vmatprep.mubr.f32.mxu0 %v12859_v4  ;;  %v9877_v12 = vpop.permute.xlu1 %2934  ;;  %2774 = vperm.xlu0 %6370, %v9945_v49  }
 0x2c5   : > { %6364 = vset.pattern.permute.xlu1 %v12856_v7 }
 0x2c6   : > { %2910 = vperm.xlu1 %6364, %v9750_v5   ;;  %6102 = vmatmul.mubr.msk.f32.gmra.mxu0 %vm3117_vm13, %v3103_v58 }
 0x2c7   : > { %3248 = vmatprep.mubr.f32.mxu0 %v12859_v4 }
 0x2ca   : > { %6365 = vset.pattern.permute.xlu1 %v7080_v46  ;;  %6103 = vmatmul.mubr.msk.f32.gmra.mxu0 %vm3117_vm13, %v3104_v16  ;;  %v3106_v46 = vld [vmem:[%s12767_s1 + $0x28] sm:$0xff] }
 0x2cb   : > { %3508 = vperm.xlu1 %6365, %v9520_v26   ;;  %3254 = vmatprep.mubr.f32.mxu0 %v12859_v4 }
 0x2cc   : > { %v6471_v13 = vpop.eup %6470  ;;  %v9879_v36 = vpop.permute.xlu1 %2734 }
 0x2cd   : > { %v6473_v24 = vpop.eup %6472  ;;  %v785_v59 = vxor.u32 2147483648, %v6471_v13 }
 0x2ce   : > { %6104 = vmatmul.mubr.msk.f32.gmra.mxu0 %vm3117_vm13, %v3105_v42  ;;  %v782_v44 = vxor.u32 2147483648, %v6473_v24 }
 0x2cf   : > { %3503 = vperm.xlu1 %6365, %v9607_v39   ;;  %3260 = vmatprep.mubr.f32.mxu0 %v12859_v4  ;;  %v786_v31 = vsel %vm784_vm5, %v785_v59, %v6473_v24  ;;  %v3111_v39 = vld [vmem:[%s12767_s1 + $0x50] sm:$0xff]  ;;  %v10020_v24 = vmul.f32 %v9875_v17, %v13199_v53  ;;  %v10024_v59 = vmul.f32 %v9875_v17, %v13200_v3 }
 0x2d0   : > { %v783_v25 = vsel %vm781_vm12, %v6471_v13, %v782_v44  ;;  %v10014_v13 = vmul.f32 %v9895_v41, %v13205_v55  ;;  %v10028_v44 = vmul.f32 %v9895_v41, %v7226_v51 }
 0x2d1   : > { %v787_v34 = vsel %vm780_vm1, %v783_v25, %v786_v31  ;;  %v9881_v23 = vpop.permute.xlu1 %2930  ;;  %v10038_v31 = vmul.f32 %v9875_v17, %v13202_v9  ;;  %v10042_v25 = vmul.f32 %v9879_v36, %v13203_v56 }
 0x2d2   : > { %6105 = vmatmul.mubr.msk.f32.gmra.mxu0 %vm3117_vm13, %v3106_v46  ;;  %v788_v43 = vsel %vm777_vm3, nan, %v787_v34  ;;  %v10046_v34 = vmul.f32 %v9879_v36, %v13204_v6 }
 0x2d3   : > { %3266 = vmatprep.mubr.f32.mxu0 %v12859_v4  ;;  %3358 = vmatpush1.msra.mxu1 %v788_v43  ;;  %v10050_v43 = vmul.f32 %v9879_v36, %v13205_v55 }
 0x2d4   : > { %6116 = vmatmul.mubr.msk.f32.vlgmr.msra.gmra.mxu1 %vm3117_vm13, %v3101_v63  ;;  %6366 = vset.pattern.permute.xlu1 %v7081_v60  ;;  %v13201_v63 = vld [vmem:[#allocation7_spill] sm:$0xff]  ;;  %v3115_v60 = vld [vmem:[%s12767_s1 + $0x70] sm:$0xff] }
 0x2d5   : > { %3397 = vmatprep.mubr.f32.mxu1 %v12859_v4  ;;  %3925 = vperm.xlu1 %6366, %v9723_v33   ;;  %v3109_v33 = vld [vmem:[%s12767_s1 + $0x40] sm:$0xff]  ;;  %v9980_v45 = vmul.f32 %v9871_v21, %v13201_v63 }
 0x2d6   : > { %6106 = vmatmul.mubr.msk.f32.gmra.mxu0 %vm3117_vm13, %v3107_v40 }
 0x2d7   : > { %3272 = vmatprep.mubr.f32.mxu0 %v12859_v4  ;;  %v9883_v54 = vpop.permute.xlu1 %2730 }
 0x2d8   : > { %6117 = vmatmul.mubr.msk.f32.gmra.mxu1 %vm3117_vm13, %v3102_v30  ;;  %v9991_v30 = vmul.f32 %v2743_v32, %v13204_v6 }
 0x2d9   : > { %3403 = vmatprep.mubr.f32.mxu1 %v12859_v4  ;;  %3917 = vperm.xlu1 %6366, %v9737_v57   ;;  %v9927_v57 = vld [vmem:[%s12769_s3 + $0x78] sm:$0xff] }
 0x2da   : > { %6107 = vmatmul.mubr.msk.f32.gmra.mxu0 %vm3117_vm13, %v3108_v8  ;;  %13197 = vst [vmem:[#allocation22_spill] sm:$0xff] %v9927_v57 }
 0x2db   : > { %3278 = vmatprep.mubr.f32.mxu0 %v12859_v4 }
 0x2dc   : > { %6118 = vmatmul.mubr.msk.f32.gmra.mxu1 %vm3117_vm13, %v3103_v58  ;;  %v9994_v58 = vmul.f32 %v2743_v32, %v13205_v55  ;;  %v10067_v32 = vmul.f32 %v9883_v54, %v13203_v56 }
 0x2dd   : > { %3409 = vmatprep.mubr.f32.mxu1 %v12859_v4  ;;  %3913 = vperm.xlu1 %6366, %v9400_v61   ;;  %v3110_v61 = vld [vmem:[%s12767_s1 + $0x48] sm:$0xff] }
 0x2de   : > { %6108 = vmatmul.mubr.msk.f32.gmra.mxu0 %vm3117_vm13, %v3109_v33  ;;  %13207 = vst [vmem:[#allocation32_spill] sm:$0xff] %v10067_v32  ;;  %v13223_v32 = vld [vmem:[#allocation18_spill] sm:$0xff] }
 0x2df   : > { %3284 = vmatprep.mubr.f32.mxu0 %v12859_v4 }
 0x2e0   : > { %6119 = vmatmul.mubr.msk.f32.gmra.mxu1 %vm3117_vm13, %v3104_v16  ;;  %v3114_v16 = vld [vmem:[%s12767_s1 + $0x68] sm:$0xff] }
 0x2e1   : > { %3415 = vmatprep.mubr.f32.mxu1 %v12859_v4  ;;  %3905 = vperm.xlu1 %6366, %v9520_v26  }
 0x2e2   : > { %6109 = vmatmul.mubr.msk.f32.gmra.mxu0 %vm3117_vm13, %v3110_v61 }
 0x2e3   : > { %v9911_v10 = vpop.permute.xlu0 %2726  ;;  %3290 = vmatprep.mubr.f32.mxu0 %v12859_v4 }
 0x2e4   : > { %6120 = vmatmul.mubr.msk.f32.gmra.mxu1 %vm3117_vm13, %v3105_v42  ;;  %v10010_v42 = vmul.f32 %v9895_v41, %v13204_v6  ;;  %v2811_v41 = vmul.f32 %v9869_v28, %v13205_v55 }
 0x2e5   : > { %3421 = vmatprep.mubr.f32.mxu1 %v12859_v4  ;;  %3897 = vperm.xlu1 %6366, %v9750_v5  }
 0x2e6   : > { %6110 = vmatmul.mubr.msk.f32.gmra.mxu0 %vm3117_vm13, %v3111_v39 }
 0x2e7   : > { %3296 = vmatprep.mubr.f32.mxu0 %v12859_v4 }
 0x2e8   : > { %6121 = vmatmul.mubr.msk.f32.gmra.mxu1 %vm3117_vm13, %v3106_v46  ;;  %v10034_v46 = vmul.f32 %v9875_v17, %v13201_v63  ;;  %v2809_v17 = vmul.f32 %v9869_v28, %v13203_v56 }
 0x2e9   : > { %3427 = vmatprep.mubr.f32.mxu1 %v12859_v4  ;;  %6368 = vset.pattern.permute.xlu1 %v13183_v37  ;;  %v3116_v37 = vld [vmem:[%s12767_s1 + $0x78] sm:$0xff] }
 0x2ea   : > { %2778 = vperm.xlu1 %6368, %v9927_v57   ;;  %6111 = vmatmul.mubr.msk.f32.gmra.mxu0 %vm3117_vm13, %v3112_v20 }
 0x2eb   : > { %3302 = vmatprep.mubr.f32.mxu0 %v12859_v4 }
 0x2ec   : > { %6122 = vmatmul.mubr.msk.f32.gmra.mxu1 %vm3117_vm13, %v3107_v40  ;;  %v9930_v5 = vpop.permute.xlu0 %2610  ;;  %v10054_v40 = vmul.f32 %v9879_v36, %v7226_v51 }
 0x2ed   : > { %3433 = vmatprep.mubr.f32.mxu1 %v12859_v4  ;;  %v2683_v36 = vmul.f32 %v9930_v5, %v13201_v63 }
 0x2ee   : > { %6369 = vset.pattern.permute.xlu1 %v13182_v18  ;;  %6112 = vmatmul.mubr.msk.f32.gmra.mxu0 %vm3117_vm13, %v3113_v47 }
 0x2ef   : > { %2645 = vperm.xlu1 %6369, %v9945_v49   ;;  %3308 = vmatprep.mubr.f32.mxu0 %v12859_v4  ;;  %v2875_v49 = vadd.f32 %v2811_v41, %v2683_v36  ;;  %v13217_v41 = vmov 0.0  }
 0x2f0   : > { %6123 = vmatmul.mubr.msk.f32.gmra.mxu1 %vm3117_vm13, %v3108_v8  ;;  %v9947_v1 = vpop.permute.xlu0 %2595  ;;  %v2681_v8 = vmul.f32 %v9930_v5, %v13199_v53 }
 0x2f1   : > { %3439 = vmatprep.mubr.f32.mxu1 %v12859_v4 }
 0x2f2   : > { %6113 = vmatmul.mubr.msk.f32.gmra.mxu0 %vm3117_vm13, %v3114_v16 }
 0x2f3   : > { %6371 = vset.pattern.permute.xlu1 %v12856_v7  ;;  %3314 = vmatprep.mubr.f32.mxu0 %v12859_v4  ;;  %v2684_v7 = vmul.f32 %v9930_v5, %v13202_v9 }
 0x2f4   : > { %6124 = vmatmul.mubr.msk.f32.gmra.mxu1 %vm3117_vm13, %v3109_v33  ;;  %v9964_v48 = vpop.permute.xlu0 %2590  ;;  %2970 = vperm.xlu1 %6371, %v9927_v57   ;;  %v10077_v33 = vmul.f32 %v9883_v54, %v13204_v6  ;;  %v13213_v57 = vld [vmem:[#allocation15_spill] sm:$0xff] }
 0x2f5   : > { %3445 = vmatprep.mubr.f32.mxu1 %v12859_v4 }
 0x2f6   : > { %6114 = vmatmul.mubr.msk.f32.gmra.mxu0 %vm3117_vm13, %v3115_v60  ;;  %13208 = vst [vmem:[#allocation37_spill] sm:$0xff] %v10077_v33 }
 0x2f7   : > { %3320 = vmatprep.mubr.f32.mxu0 %v12859_v4 }
 0x2f8   : > { %6125 = vmatmul.mubr.msk.f32.gmra.mxu1 %vm3117_vm13, %v3110_v61  ;;  %6372 = vset.pattern.permute.xlu1 %v13182_v18  ;;  %v9999_v19 = vpop.permute.xlu0 %2580  ;;  %v10081_v61 = vmul.f32 %v9883_v54, %v13205_v55  ;;  %v13214_v18 = vld [vmem:[#allocation11_spill] sm:$0xff] }
 0x2f9   : > { %3451 = vmatprep.mubr.f32.mxu1 %v12859_v4  ;;  %13206 = vst [vmem:[#allocation39_spill] sm:$0xff] %v9999_v19 }
 0x2fa   : > { %13209 = vst [vmem:[#allocation23_spill] sm:$0xff] %v10081_v61  ;;  %6115 = vmatmul.mubr.msk.f32.gmra.mxu0 %vm3117_vm13, %v3116_v37 }
 0x2fb   : > { %4017 = vmatprep.mubr.f32.mxu0 %v13217_v41 }
 0x2fc   : > { %6126 = vmatmul.mubr.msk.f32.gmra.mxu1 %vm3117_vm13, %v3111_v39  ;;  %v10085_v39 = vmul.f32 %v9883_v54, %v7226_v51  ;;  %v2682_v54 = vmul.f32 %v9930_v5, %v13200_v3  ;;  %v10122_v5 = vmul.f32 %v9911_v10, %v7226_v51 }
 0x2fd   : > { %3457 = vmatprep.mubr.f32.mxu1 %v12859_v4 }
 0x2fe   : > { %13210 = vst [vmem:[#allocation38_spill] sm:$0xff] %v10085_v39  ;;  %13215 = vst [vmem:[#allocation20_spill] sm:$0xff] %v10122_v5  ;;  %v10142_v5 = vmul.f32 %v9964_v48, %v13199_v53  ;;  %v10146_v39 = vmul.f32 %v9964_v48, %v13200_v3 }
 0x300   : > { %6127 = vmatmul.mubr.msk.f32.gmra.mxu1 %vm3117_vm13, %v3112_v20  ;;  %v10087_v20 = vpop.permute.xlu0 %2926  ;;  %13218 = vst [vmem:[#allocation25_spill] sm:$0xff] %v10146_v39  ;;  %v10166_v39 = vmul.f32 %v9873_v2, %v13223_v32 }
 0x301   : > { %3463 = vmatprep.mubr.f32.mxu1 %v12859_v4 }
 0x302   : > { %13224 = vst [vmem:[#allocation27_spill] sm:$0xff] %v10166_v39  ;;  %v10208_v39 = vadd.f32 %v9997_v15, %v9984_v29  ;;  %v2993_v29 = vmul.f32 %v9881_v23, %v13213_v57 }
 0x304   : > { %6128 = vmatmul.mubr.msk.f32.gmra.mxu1 %vm3117_vm13, %v3113_v47  ;;  %v10093_v47 = vmul.f32 %v9911_v10, %v13203_v56 }
 0x305   : > { %3469 = vmatprep.mubr.f32.mxu1 %v12859_v4 }
 0x308   : > { %6129 = vmatmul.mubr.msk.f32.gmra.mxu1 %vm3117_vm13, %v3114_v16  ;;  %v10097_v16 = vmul.f32 %v9911_v10, %v13204_v6 }
 0x309   : > { %3475 = vmatprep.mubr.f32.mxu1 %v12859_v4 }
 0x30a   : > { %13211 = vst [vmem:[#allocation42_spill] sm:$0xff] %v10097_v16 }
 0x30c   : > { %6130 = vmatmul.mubr.msk.f32.gmra.mxu1 %vm3117_vm13, %v3115_v60  ;;  %v10101_v60 = vmul.f32 %v9911_v10, %v13205_v55  ;;  %v3001_v55 = vmul.f32 %v9873_v2, %v13213_v57  ;;  %v10138_v10 = vmul.f32 %v9947_v1, %v13202_v9 }
 0x30d   : > { %3481 = vmatprep.mubr.f32.mxu1 %v12859_v4  ;;  %v2810_v4 = vmul.f32 %v9869_v28, %v13204_v6 }
 0x30e   : > { %13212 = vst [vmem:[#allocation40_spill] sm:$0xff] %v10101_v60  ;;  %v3003_v60 = vmul.f32 %v9873_v2, %v13214_v18 }
 0x30f   : > { %v2874_v33 = vadd.f32 %v2810_v4, %v2682_v54  ;;  %v2870_v4 = vadd.f32 %v9991_v30, %v9976_v11  ;;  %v10200_v54 = vadd.f32 %v9994_v58, %v9980_v45 }
 0x310   : > { %6131 = vmatmul.mubr.msk.f32.gmra.mxu1 %vm3117_vm13, %v3116_v37  ;;  %v2671_v37 = vmul.f32 %v9947_v1, %v13201_v63  ;;  %v10160_v61 = vadd.f32 %v3003_v60, %v2875_v49 }
 0x311   : > { %4130 = vmatprep.mubr.f32.mxu1 %v13217_v41  ;;  %v10154_v41 = vmul.f32 %v9964_v48, %v13202_v9 }
 0x312   : > { %13221 = vst [vmem:[#allocation21_spill] sm:$0xff] %v10160_v61 }
 0x314   : > { %v9885_v14 = vpop.permute.xlu1 %3533 }
 0x315   : > { %13194 = vst [vmem:[#allocation41_spill] sm:$0xff] %v9885_v14  ;;  %v2873_v14 = vadd.f32 %v2809_v17, %v2681_v8  ;;  %v2670_v8 = vmul.f32 %v9947_v1, %v13200_v3  ;;  %v10128_v17 = vpop.permute.xlu0 %2914 }
 0x317   : > { %v10158_v16 = vadd.f32 %v3001_v55, %v2873_v14 }
 0x319   : > { %v9891_v22 = vpop.permute.xlu1 %2585  ;;  %v10192_v30 = vpop.permute.xlu0 %3523 }
 0x31e   : > { %v9897_v52 = vpop.permute.xlu1 %2922 }
 0x31f   : > { %13195 = vst [vmem:[#allocation43_spill] sm:$0xff] %v9897_v52 }
 0x323   : > { %v9914_v26 = vpop.permute.xlu1 %3528 }
 0x324   : > { %13196 = vst [vmem:[#allocation45_spill] sm:$0xff] %v9914_v26  ;;  %v2812_v26 = vmul.f32 %v9869_v28, %v7226_v51  ;;  %v2669_v28 = vmul.f32 %v9947_v1, %v13199_v53  ;;  %v13220_v51 = vld [vmem:[#allocation17_spill] sm:$0xff] }
 0x325   : > { %v3002_v1 = vmul.f32 %v9873_v2, %v13220_v51  ;;  %v2998_v14 = vmul.f32 %v9877_v12, %v13220_v51 }
 0x326   : > { %v10162_v52 = vadd.f32 %v2812_v26, %v2684_v7  ;;  %v2657_v7 = vmul.f32 %v9999_v19, %v13199_v53  ;;  %v2658_v26 = vmul.f32 %v9999_v19, %v13200_v3 }
 0x327   : > { %v10196_v60 = vadd.f32 %v3002_v1, %v2874_v33  ;;  %v2865_v1 = vadd.f32 %v10006_v50, %v10020_v24  ;;  %v10220_v58 = vadd.f32 %v2998_v14, %v2870_v4  ;;  %v2995_v24 = vmul.f32 %v9881_v23, %v13214_v18 }
 0x328   : > { %v9939_v62 = vpop.permute.xlu1 %2722  ;;  %13222 = vst [vmem:[#allocation36_spill] sm:$0xff] %v10162_v52  ;;  %v10212_v52 = vmul.f32 %v9877_v12, %v13223_v32  ;;  %v2994_v4 = vmul.f32 %v9881_v23, %v13220_v51 }
 0x329   : > { %v2785_v33 = vmul.f32 %v9939_v62, %v13203_v56  ;;  %v2786_v15 = vmul.f32 %v9939_v62, %v13204_v6 }
 0x32b   : > { %v2849_v14 = vadd.f32 %v2785_v33, %v2657_v7  ;;  %v2978_v33 = vmul.f32 %v10128_v17, %v13220_v51 }
 0x32d   : > { %v9958_v27 = vpop.permute.xlu1 %2918 }
 0x332   : > { %v9968_v0 = vpop.permute.xlu1 %2575 }
 0x333   : > { %v2653_v2 = vmul.f32 %v9968_v0, %v13199_v53  ;;  %v2654_v11 = vmul.f32 %v9968_v0, %v13200_v3 }
 0x337   : > { %v10058_v21 = vpop.permute.xlu1 %2718 }
 0x338   : > { %v2781_v49 = vmul.f32 %v10058_v21, %v13203_v56 }
 0x33a   : > { %v2845_v61 = vadd.f32 %v2781_v49, %v2653_v2  ;;  %v2977_v2 = vmul.f32 %v10128_v17, %v13213_v57  ;;  %v2989_v49 = vmul.f32 %v10087_v20, %v13213_v57 }
 0x33c   : > { %v10130_v36 = vpop.permute.xlu1 %3518 }
 0x33d   : > { %13216 = vst [vmem:[#allocation34_spill] sm:$0xff] %v10130_v36  ;;  %v10150_v36 = vmul.f32 %v9964_v48, %v13201_v63  ;;  %v2997_v48 = vmul.f32 %v9877_v12, %v13213_v57 }
 0x33f   : > { %13219 = vst [vmem:[#allocation29_spill] sm:$0xff] %v10150_v36  ;;  %v2869_v36 = vadd.f32 %v9988_v35, %v9972_v38  ;;  %v10186_v38 = vmul.f32 %v9999_v19, %v13202_v9  ;;  %v2782_v35 = vmul.f32 %v10058_v21, %v13204_v6  ;;  %v10204_v19 = vmul.f32 %v9877_v12, %v13214_v18 }
 0x340   : > { %v2867_v12 = vadd.f32 %v10014_v13, %v10034_v46  ;;  %v10241_v13 = vadd.f32 %v10028_v44, %v10038_v31  ;;  %v10243_v46 = vpop.permute.xlu0 %3513  ;;  %v2990_v44 = vmul.f32 %v10087_v20, %v13220_v51  ;;  %v2661_v31 = vmul.f32 %v9891_v22, %v13199_v53  ;;  %v13237_v53 = vld [vmem:[#allocation38_spill] sm:$0xff] }
 0x341   : > { %v10194_v55 = vpop.permute.xlu1 %2910  ;;  %13225 = vst [vmem:[#allocation31_spill] sm:$0xff] %v10204_v19  ;;  %v10218_v45 = vadd.f32 %v2997_v48, %v2869_v36  ;;  %v2846_v56 = vadd.f32 %v2782_v35, %v2654_v11  ;;  %v2861_v36 = vadd.f32 %v10042_v25, %v2669_v28  ;;  %v2866_v48 = vadd.f32 %v10010_v42, %v10024_v59 }
 0x342   : > { %v2973_v19 = vmul.f32 %v10194_v55, %v13213_v57  ;;  %v2974_v50 = vmul.f32 %v10194_v55, %v13220_v51  ;;  %v2863_v25 = vadd.f32 %v10050_v43, %v2671_v37  ;;  %v2991_v42 = vmul.f32 %v10087_v20, %v13214_v18 }
 0x343   : > { %v2862_v59 = vadd.f32 %v10046_v34, %v2670_v8  ;;  %v2850_v35 = vadd.f32 %v2786_v15, %v2658_v26  ;;  %v10265_v37 = vadd.f32 %v2994_v4, %v2866_v48  ;;  %v10269_v34 = vmul.f32 %v9881_v23, %v13223_v32 }
 0x344   : > { %v3037_v28 = vadd.f32 %v2973_v19, %v2845_v61  ;;  %v3038_v11 = vadd.f32 %v2974_v50, %v2846_v56  ;;  %v10261_v19 = vadd.f32 %v2993_v29, %v2865_v1  ;;  %v10263_v61 = vadd.f32 %v2995_v24, %v2867_v12  ;;  %v10287_v50 = vpop.permute.xlu0 %3498 }
 0x345   : > { %v2662_v8 = vmul.f32 %v9891_v22, %v13200_v3  ;;  %v3041_v6 = vadd.f32 %v2977_v2, %v2849_v14  ;;  %v10275_v56 = vadd.f32 %v10054_v40, %v10138_v10  ;;  %v10279_v26 = vmul.f32 %v10087_v20, %v13223_v32  ;;  %v13227_v2 = vld [vmem:[#allocation43_spill] sm:$0xff] }
 0x346   : > { %v10257_v7 = vpop.permute.xlu1 %3508  ;;  %v10281_v12 = vadd.f32 %v2989_v49, %v2861_v36  ;;  %v10283_v15 = vadd.f32 %v2991_v42, %v2863_v25  ;;  %v10285_v23 = vadd.f32 %v2990_v44, %v2862_v59  ;;  %v3042_v48 = vadd.f32 %v2978_v33, %v2850_v35  ;;  %v13226_v36 = vld [vmem:[#allocation32_spill] sm:$0xff]  ;;  %v13228_v25 = vld [vmem:[#allocation29_spill] sm:$0xff]  ;;  %v13231_v33 = vld [vmem:[#allocation14_spill] sm:$0xff] }
 0x347   : > { %v2853_v4 = vadd.f32 %v10093_v47, %v2661_v31  ;;  %v2981_v40 = vmul.f32 %v9958_v27, %v13213_v57  ;;  %v2663_v20 = vmul.f32 %v9891_v22, %v13201_v63  ;;  %v2857_v14 = vadd.f32 %v13226_v36, %v10142_v5  ;;  %v13230_v47 = vld [vmem:[#allocation42_spill] sm:$0xff]  ;;  %v13234_v36 = vld [vmem:[#allocation37_spill] sm:$0xff] }
 0x348   : > { %v2985_v49 = vmul.f32 %v13227_v2, %v13213_v57  ;;  %v2854_v31 = vadd.f32 %v13230_v47, %v2662_v8  ;;  %v2987_v35 = vmul.f32 %v13227_v2, %v13214_v18  ;;  %v2664_v5 = vmul.f32 %v9891_v22, %v13202_v9  ;;  %v10324_v22 = vld [vmem:[%s12769_s3 + $0x68] sm:$0xff] }
 0x349   : > { %v3045_v47 = vadd.f32 %v2981_v40, %v2853_v4  ;;  %v2986_v57 = vmul.f32 %v13227_v2, %v13220_v51  ;;  %2640 = vperm.xlu1 %6372, %v10324_v22   ;;  %2770 = vperm.xlu0 %6370, %v10324_v22  }
 0x34a   : > { %v10300_v44 = vpop.permute.xlu1 %3503  ;;  %v3049_v40 = vadd.f32 %v2985_v49, %v2857_v14 }
 0x37e   : > { %v3232_v43 = vpop.f32.mrf.mxu0 }
 0x37f   : > { %v3233_v1 = vadd.f32 %v3232_v43, %v3037_v28  ;;  %v13229_v28 = vld [vmem:[#allocation23_spill] sm:$0xff]  ;;  %v2788_v43 = vmul.f32 %v9939_v62, %v13231_v33 }
 0x380   : > { %v3234_v29 = vpop.f32.mrf.mxu0  ;;  %v2859_v42 = vadd.f32 %v13229_v28, %v13228_v25 }
 0x381   : > { %v3235_v24 = vadd.f32 %v3234_v29, %v3038_v11  ;;  %v2982_v11 = vmul.f32 %v9958_v27, %v13220_v51  ;;  %v10312_v29 = vadd.f32 %v10287_v50, %v3233_v1 }
 0x382   : > { %v3238_v10 = vpop.f32.mrf.mxu0 }
 0x383   : > { %v3239_v59 = vadd.f32 %v3238_v10, %v3041_v6  ;;  %13232 = vst [vmem:[#allocation19_spill] sm:$0xff] %v10312_v29  ;;  %v13233_v10 = vld [vmem:[#allocation25_spill] sm:$0xff]  ;;  %v10317_v8 = vadd.f32 %v10287_v50, %v3235_v24  ;;  %v10335_v24 = vmul.f32 %v13227_v2, %v13223_v32  ;;  %v3046_v4 = vadd.f32 %v2982_v11, %v2854_v31  ;;  %v13243_v11 = vld [vmem:[#allocation20_spill] sm:$0xff] }
 0x384   : > { %v3240_v6 = vpop.f32.mrf.mxu0  ;;  %v2858_v25 = vadd.f32 %v13234_v36, %v13233_v10  ;;  %v10331_v10 = vadd.f32 %v13237_v53, %v10154_v41  ;;  %v2852_v36 = vadd.f32 %v2788_v43, %v10186_v38  ;;  %v2980_v53 = vmul.f32 %v10128_v17, %v13223_v32 }
 0x385   : > { %13235 = vst [vmem:[#allocation33_spill] sm:$0xff] %v10317_v8  ;;  %v3241_v28 = vadd.f32 %v3240_v6, %v3042_v48  ;;  %v10327_v1 = vadd.f32 %v10300_v44, %v3239_v59  ;;  %v10339_v6 = vadd.f32 %v2987_v35, %v2859_v42  ;;  %v10348_v2 = vmul.f32 100.0, %v10312_v29  ;;  %v13242_v42 = vld [vmem:[#allocation40_spill] sm:$0xff] }
 0x386   : > { %v3244_v3 = vpop.f32.mrf.mxu0  ;;  %v10351_v51 = vmul.f32 100.0, %v10317_v8  ;;  %v3050_v49 = vadd.f32 %v2986_v57, %v2858_v25  ;;  %v2855_v31 = vadd.f32 %v13242_v42, %v2663_v20  ;;  %v2983_v38 = vmul.f32 %v9958_v27, %v13214_v18  ;;  %v13249_v25 = vld [vmem:[#allocation44_spill] sm:$0xff] }
 0x387   : > { %13236 = vst [vmem:[#allocation24_spill] sm:$0xff] %v10327_v1  ;;  %v3245_v48 = vadd.f32 %v3244_v3, %v3045_v47  ;;  %v10342_v59 = vadd.f32 %v10300_v44, %v3241_v28  ;;  %13239 = vst [vmem:[#allocation16_spill] sm:$0xff] %v10348_v2  ;;  %v10360_v35 = vadd.f32 %v13243_v11, %v2664_v5  ;;  %v10363_v28 = vmul.f32 100.0, %v10327_v1 }
 0x388   : > { %v3246_v41 = vpop.f32.mrf.mxu0  ;;  %13240 = vst [vmem:[#allocation26_spill] sm:$0xff] %v10351_v51  ;;  %v13245_v47 = vmov 6   ;;  %v13246_v29 = vmov 4   ;;  %v2784_v57 = vmul.f32 %v10058_v21, %v13231_v33  ;;  %v10382_v42 = vadd.f32 %v2980_v53, %v2852_v36 }
 0x389   : > { %13238 = vst [vmem:[#allocation28_spill] sm:$0xff] %v10342_v59  ;;  %v10354_v3 = vadd.f32 %v10257_v7, %v3245_v48  ;;  %v3247_v14 = vadd.f32 %v3246_v41, %v3046_v4  ;;  %13244 = vst [vmem:[#allocation30_spill] sm:$0xff] %v10363_v28  ;;  %6374 = vset.pattern.permute.xlu1 %v13245_v47  ;;  %6373 = vset.pattern.permute.xlu0 %v13246_v29  ;;  %v13250_v4 = vld [vmem:[#allocation22_spill] sm:$0xff]  ;;  %v10380_v41 = vmul.f32 100.0, %v10342_v59 }
 0x38a   : > { %v3250_v43 = vpop.f32.mrf.mxu0  ;;  %v2656_v48 = vmul.f32 %v9968_v0, %v13202_v9  ;;  %2966 = vperm.xlu1 %6374, %v13249_v25   ;;  %2650 = vperm.xlu0 %6373, %v13250_v4   ;;  %v3600_v8 = vmin.f32 %v10348_v2, 20.0  ;;  %v3601_v33 = vmin.f32 %v10351_v51, 20.0  ;;  %v3604_v53 = vmin.f32 %v10363_v28, 20.0  ;;  %v13255_v28 = vld [vmem:[#allocation34_spill] sm:$0xff] }
 0x38b   : > { %13241 = vst [vmem:[#allocation35_spill] sm:$0xff] %v10354_v3  ;;  %v10372_v20 = vmul.f32 100.0, %v10354_v3  ;;  %v10375_v5 = vadd.f32 %v10257_v7, %v3247_v14  ;;  %13251 = vst [vmem:[#allocation29_spill] sm:$0xff] %v10380_v41  ;;  %v3251_v11 = vadd.f32 %v3250_v43, %v3049_v40  ;;  %v10389_v14 = vmul.f32 %v9958_v27, %v13223_v32  ;;  %v10403_v43 = vld [vmem:[%s12769_s3 + $0x60] sm:$0xff] }
 0x38c   : > { %v3252_v9 = vpop.f32.mrf.mxu0  ;;  %v10391_v3 = vadd.f32 %v2983_v38, %v2855_v31  ;;  %v2848_v2 = vadd.f32 %v2784_v57, %v2656_v48  ;;  %v2976_v27 = vmul.f32 %v10194_v55, %v13223_v32  ;;  %v13254_v31 = vmov 5  }
 0x38d   : > { %13247 = vst [vmem:[#allocation32_spill] sm:$0xff] %v10372_v20  ;;  %13248 = vst [vmem:[#allocation43_spill] sm:$0xff] %v10375_v5  ;;  %v3608_v1 = vmin.f32 %v10372_v20, 20.0  ;;  %v3253_v25 = vadd.f32 %v3252_v9, %v3050_v49  ;;  %v10394_v4 = vmul.f32 100.0, %v10375_v5  ;;  %v10397_v36 = vadd.f32 %v10243_v46, %v3251_v11 }
 0x38e   : > { %v3256_v40 = vpop.f32.mrf.mxu0  ;;  %6375 = vset.pattern.permute.xlu1 %v13254_v31  ;;  %2635 = vperm.xlu0 %6373, %v10403_v43   ;;  %v3605_v38 = vmin.f32 %v10380_v41, 20.0  ;;  %v3632_v48 = vmul.f32 1.442695, %v3600_v8  ;;  %v3634_v57 = vmul.f32 1.442695, %v3601_v33 }
 0x38f   : > { %13252 = vst [vmem:[#allocation23_spill] sm:$0xff] %v10397_v36  ;;  %v3648_v9 = vmul.f32 1.442695, %v3608_v1  ;;  %v10408_v49 = vadd.f32 %v10243_v46, %v3253_v25  ;;  %v10414_v11 = vmul.f32 100.0, %v10397_v36  ;;  %v3257_v51 = vadd.f32 %v3256_v40, %v10281_v12  ;;  %2766 = vperm.xlu1 %6375, %v10403_v43  }
 0x390   : > { %v3258_v59 = vpop.f32.mrf.mxu0  ;;  %v3609_v32 = vmin.f32 %v10394_v4, 20.0  ;;  %v3640_v12 = vmul.f32 1.442695, %v3604_v53  ;;  %v3040_v40 = vadd.f32 %v2976_v27, %v2848_v2  ;;  %vm3833_vm15 = vcmp.gt.f32.partialorder %v10394_v4, 20.0 }
 0x391   : > { %13253 = vst [vmem:[#allocation42_spill] sm:$0xff] %v10408_v49  ;;  %6474 = vpow2.f32 %v3648_v9  ;;  %v10419_v1 = vmul.f32 100.0, %v10408_v49  ;;  %v3259_v25 = vadd.f32 %v3258_v59, %v10285_v23  ;;  %v3612_v5 = vmin.f32 %v10414_v11, 20.0 }
 0x392   : > { %v10425_v36 = vadd.f32 %v13255_v28, %v3257_v51  ;;  %v3262_v41 = vpop.f32.mrf.mxu0  ;;  %v3642_v49 = vmul.f32 1.442695, %v3605_v38  ;;  %6476 = vpow2.f32 %v3632_v48  ;;  %vm3836_vm10 = vcmp.gt.f32.partialorder %v10414_v11, 20.0 }
 0x393   : > { %v3613_v8 = vmin.f32 %v10419_v1, 20.0  ;;  %v10429_v33 = vadd.f32 %v13255_v28, %v3259_v25  ;;  %v3263_v9 = vadd.f32 %v3262_v41, %v10261_v19  ;;  %v3656_v20 = vmul.f32 1.442695, %v3612_v5  ;;  %6376 = vset.pattern.permute.xlu1 %v13245_v47 }
 0x394   : > { %13256 = vst [vmem:[#allocation25_spill] sm:$0xff] %v10425_v36  ;;  %v10433_v23 = vmul.f32 100.0, %v10425_v36  ;;  %v3264_v59 = vpop.f32.mrf.mxu0  ;;  %v10436_v51 = vpop.f32.mrf.mxu1  ;;  %6478 = vpow2.f32 %v3634_v57  ;;  %2962 = vperm.xlu1 %6376, %v10324_v22   ;;  %v3650_v5 = vmul.f32 1.442695, %v3609_v32  ;;  %vm3837_vm14 = vcmp.gt.f32.partialorder %v10419_v1, 20.0 }
 0x395   : > { %13257 = vst [vmem:[#allocation37_spill] sm:$0xff] %v10429_v33  ;;  %v10439_v2 = vmul.f32 100.0, %v10429_v33  ;;  %v10442_v53 = vadd.f32 %v10192_v30, %v3263_v9  ;;  %v3265_v19 = vadd.f32 %v3264_v59, %v10265_v37  ;;  %v3658_v41 = vmul.f32 1.442695, %v3613_v8  ;;  %v10457_v37 = vld [vmem:[%s12769_s3 + $0x58] sm:$0xff] }
 0x396   : > { %v3616_v27 = vmin.f32 %v10433_v23, 20.0  ;;  %v3268_v38 = vpop.f32.mrf.mxu0  ;;  %6480 = vpow2.f32 %v3640_v12  ;;  %v3395_v48 = vpop.f32.mrf.mxu1  ;;  %2630 = vperm.xlu0 %6373, %v10457_v37   ;;  %vm3840_vm11 = vcmp.gt.f32.partialorder %v10433_v23, 20.0 }
 0x397   : > { %13258 = vst [vmem:[#allocation38_spill] sm:$0xff] %v10439_v2  ;;  %13259 = vst [vmem:[#allocation40_spill] sm:$0xff] %v10442_v53  ;;  %6482 = vpow2.f32 %v3656_v20  ;;  %v3617_v57 = vmin.f32 %v10439_v2, 20.0  ;;  %v10449_v25 = vmul.f32 100.0, %v10442_v53  ;;  %v10452_v9 = vadd.f32 %v10192_v30, %v3265_v19 }
 0x398   : > { %v3396_v32 = vadd.f32 %v3395_v48, %v3040_v40  ;;  %6484 = vpow2.f32 %v3642_v49  ;;  %v3664_v22 = vmul.f32 1.442695, %v3616_v27  ;;  %v3269_v12 = vadd.f32 %v3268_v38, %v10218_v45  ;;  %v3270_v8 = vpop.f32.mrf.mxu0  ;;  %v10461_v20 = vpop.f32.mrf.mxu1  ;;  %6377 = vset.pattern.permute.xlu1 %v13254_v31  ;;  %v13263_v40 = vld [vmem:[#allocation45_spill] sm:$0xff] }
 0x399   : > { %13260 = vst [vmem:[#allocation20_spill] sm:$0xff] %v10449_v25  ;;  %13261 = vst [vmem:[#allocation44_spill] sm:$0xff] %v10452_v9  ;;  %v3666_v59 = vmul.f32 1.442695, %v3617_v57  ;;  %v3620_v36 = vmin.f32 %v10449_v25, 20.0  ;;  %v10465_v19 = vmul.f32 100.0, %v10452_v9  ;;  %v3271_v33 = vadd.f32 %v3270_v8, %v10220_v58  ;;  %2762 = vperm.xlu1 %6377, %v10457_v37  }
 0x39a   : > { %v10470_v49 = vadd.f32 %v10287_v50, %v3396_v32  ;;  %6486 = vpow2.f32 %v3650_v5  ;;  %v3048_v45 = vadd.f32 %v10389_v14, %v10360_v35  ;;  %v10475_v27 = vadd.f32 %v13263_v40, %v3269_v12  ;;  %v3274_v38 = vpop.f32.mrf.mxu0  ;;  %v3401_v48 = vpop.f32.mrf.mxu1 }
 0x39b   : > { %6488 = vpow2.f32 %v3658_v41  ;;  %v3672_v57 = vmul.f32 1.442695, %v3620_v36  ;;  %v3621_v58 = vmin.f32 %v10465_v19, 20.0  ;;  %v10480_v8 = vadd.f32 %v13263_v40, %v3271_v33 }
 0x39c   : > { %13262 = vst [vmem:[#allocation22_spill] sm:$0xff] %v10470_v49  ;;  %v10483_v32 = vmul.f32 100.0, %v10470_v49  ;;  %v3402_v5 = vadd.f32 %v3401_v48, %v10382_v42  ;;  %6490 = vpow2.f32 %v3664_v22  ;;  %v10487_v35 = vmul.f32 100.0, %v10475_v27  ;;  %v3405_v14 = vpop.f32.mrf.mxu1  ;;  %v3276_v53 = vpop.f32.mrf.mxu0 }
 0x39d   : > { %6492 = vpow2.f32 %v3666_v59  ;;  %v3674_v12 = vmul.f32 1.442695, %v3621_v58  ;;  %v10490_v41 = vmul.f32 100.0, %v10480_v8  ;;  %v3275_v36 = vadd.f32 %v3274_v38, %v10158_v16  ;;  %6378 = vset.pattern.permute.xlu1 %v13246_v29  ;;  %v10503_v59 = vld [vmem:[%s12769_s3 + $0x50] sm:$0xff]  ;;  %v13267_v38 = vld [vmem:[#allocation41_spill] sm:$0xff] }
 0x39e   : > { %13264 = vst [vmem:[#allocation34_spill] sm:$0xff] %v10483_v32  ;;  %v6475_v2 = vpop.eup %6474  ;;  %v3603_v33 = vmin.f32 %v10483_v32, 20.0  ;;  %v10495_v49 = vadd.f32 %v10300_v44, %v3402_v5  ;;  %v3406_v42 = vadd.f32 %v3405_v14, %v10391_v3  ;;  %v3624_v22 = vmin.f32 %v10487_v35, 20.0  ;;  %13266 = vst [vmem:[#allocation46_spill] sm:$0xff] %v10503_v59  ;;  %v3407_v58 = vpop.f32.mrf.mxu1  ;;  %2625 = vperm.xlu1 %6378, %v10503_v59  }
 0x39f   : > { %v3704_v48 = vadd.f32 1.0, %v6475_v2  ;;  %6494 = vpow2.f32 %v3672_v57  ;;  %v3625_v16 = vmin.f32 %v10490_v41, 20.0  ;;  %v10507_v32 = vadd.f32 %v13267_v38, %v3275_v36  ;;  %v10516_v25 = vpop.eup %6476 }
 0x3a0   : > { %13265 = vst [vmem:[#allocation45_spill] sm:$0xff] %v10495_v49  ;;  %v3638_v3 = vmul.f32 1.442695, %v3603_v33  ;;  %v10511_v5 = vmul.f32 100.0, %v10495_v49  ;;  %v10514_v14 = vadd.f32 %v10257_v7, %v3406_v42  ;;  %v3408_v29 = vadd.f32 %v3407_v58, %v3048_v45  ;;  %13270 = vst [vmem:[#allocation48_spill] sm:$0xff] %v10516_v25  ;;  %v3411_v2 = vpop.f32.mrf.mxu1 }
 0x3a1   : > { %v3052_v57 = vadd.f32 %v10335_v24, %v10331_v10  ;;  %6496 = vpow2.f32 %v3674_v12  ;;  %v3682_v36 = vmul.f32 1.442695, %v3625_v16  ;;  %v10521_v9 = vmul.f32 100.0, %v10507_v32  ;;  %v10523_v33 = vpop.eup %6478  ;;  %v10535_v10 = vld [vmem:[%s12769_s3 + $0x48] sm:$0xff] }
 0x3a2   : > { %13268 = vst [vmem:[#allocation41_spill] sm:$0xff] %v10511_v5  ;;  %13269 = vst [vmem:[#allocation47_spill] sm:$0xff] %v10514_v14  ;;  %v3607_v49 = vmin.f32 %v10511_v5, 20.0  ;;  %v10527_v42 = vmul.f32 100.0, %v10514_v14  ;;  %v10530_v45 = vadd.f32 %v10257_v7, %v3408_v29  ;;  %v3680_v58 = vmul.f32 1.442695, %v3624_v22  ;;  %v3413_v16 = vpop.f32.mrf.mxu1  ;;  %6379 = vset.pattern.permute.xlu1 %v13254_v31  ;;  %2620 = vperm.xlu0 %6373, %v10535_v10  }
 0x3a3   : > { %13273 = vst [vmem:[#allocation51_spill] sm:$0xff] %v10535_v10  ;;  %v10537_v24 = vpop.eup %6480  ;;  %6498 = vlog2.f32 %v3704_v48  ;;  %v3412_v12 = vadd.f32 %v3411_v2, %v10339_v6  ;;  %v3628_v5 = vmin.f32 %v10521_v9, 20.0  ;;  %v3277_v14 = vadd.f32 %v3276_v53, %v10196_v60  ;;  %2758 = vperm.xlu1 %6379, %v10503_v59  }
 0x3a4   : > { %13271 = vst [vmem:[#allocation49_spill] sm:$0xff] %v10527_v42  ;;  %13272 = vst [vmem:[#allocation50_spill] sm:$0xff] %v10530_v45  ;;  %v6483_v7 = vpop.eup %6482  ;;  %6500 = vpow2.f32 %v3638_v3  ;;  %v3646_v29 = vmul.f32 1.442695, %v3607_v49  ;;  %v3610_v22 = vmin.f32 %v10527_v42, 20.0  ;;  %v10546_v25 = vmul.f32 100.0, %v10530_v45  ;;  %v3417_v53 = vpop.f32.mrf.mxu1 }
 0x3a5   : > { %v10549_v6 = vpop.eup %6484  ;;  %v10552_v48 = vadd.f32 %v10243_v46, %v3412_v12  ;;  %v3414_v60 = vadd.f32 %v3413_v16, %v3052_v57  ;;  %6502 = vpow2.f32 %v3682_v36  ;;  %v3688_v2 = vmul.f32 1.442695, %v3628_v5 }
 0x3a6   : > { %13274 = vst [vmem:[#allocation52_spill] sm:$0xff] %v10546_v25  ;;  %v3611_v31 = vmin.f32 %v10546_v25, 20.0  ;;  %v3418_v49 = vadd.f32 %v3417_v53, %v10283_v15  ;;  %v3056_v3 = vadd.f32 %v10279_v26, %v10275_v56  ;;  %6504 = vpow2.f32 %v3680_v58  ;;  %v3419_v57 = vpop.f32.mrf.mxu1  ;;  %6381 = vset.pattern.permute.xlu0 %v13245_v47  ;;  %v13286_v47 = vld [vmem:[#allocation21_spill] sm:$0xff] }
 0x3a7   : > { %13275 = vst [vmem:[#allocation53_spill] sm:$0xff] %v10552_v48  ;;  %v10558_v42 = vpop.eup %6486  ;;  %v3708_v45 = vadd.f32 1.0, %v6483_v7  ;;  %v10561_v59 = vmul.f32 100.0, %v10552_v48  ;;  %v10564_v12 = vadd.f32 %v10243_v46, %v3414_v60  ;;  %v10567_v5 = vadd.f32 %v13267_v38, %v3277_v14  ;;  %2958 = vperm.xlu0 %6381, %v10403_v43  }
 0x3a8   : > { %v10570_v15 = vpop.eup %6488  ;;  %6506 = vpow2.f32 %v3646_v29  ;;  %v3652_v56 = vmul.f32 1.442695, %v3610_v22  ;;  %v10573_v26 = vadd.f32 %v13255_v28, %v3418_v49  ;;  %v3060_v36 = vadd.f32 %v10269_v34, %v10241_v13  ;;  %v3423_v7 = vpop.f32.mrf.mxu1 }
 0x3a9   : > { %13276 = vst [vmem:[#allocation54_spill] sm:$0xff] %v10561_v59  ;;  %13277 = vst [vmem:[#allocation55_spill] sm:$0xff] %v10564_v12  ;;  %v10578_v46 = vpop.eup %6490  ;;  %v3654_v58 = vmul.f32 1.442695, %v3611_v31  ;;  %v3614_v14 = vmin.f32 %v10561_v59, 20.0  ;;  %v3420_v16 = vadd.f32 %v3419_v57, %v3056_v3  ;;  %6508 = vpow2.f32 %v3688_v2  ;;  %v13282_v2 = vld [vmem:[#allocation31_spill] sm:$0xff] }
 0x3aa   : > { %13278 = vst [vmem:[#allocation56_spill] sm:$0xff] %v10573_v26  ;;  %v10581_v60 = vpop.eup %6492  ;;  %v10584_v29 = vmul.f32 100.0, %v10564_v12  ;;  %v10587_v22 = vmul.f32 100.0, %v10573_v26  ;;  %v3424_v13 = vadd.f32 %v3423_v7, %v10263_v61  ;;  %v10591_v34 = vmul.f32 100.0, %v10567_v5  ;;  %v3425_v53 = vpop.f32.mrf.mxu1 }
 0x3ab   : > { %6510 = vlog2.f32 %v3708_v45  ;;  %v3660_v43 = vmul.f32 1.442695, %v3614_v14  ;;  %v10594_v31 = vadd.f32 %v13255_v28, %v3420_v16  ;;  %v3063_v49 = vadd.f32 %v13282_v2, %v10200_v54  ;;  %2954 = vperm.xlu0 %6381, %v10457_v37  }
 0x3ac   : > { %13279 = vst [vmem:[#allocation57_spill] sm:$0xff] %v10584_v29  ;;  %13280 = vst [vmem:[#allocation58_spill] sm:$0xff] %v10587_v22  ;;  %v6495_v3 = vpop.eup %6494  ;;  %6512 = vpow2.f32 %v3652_v56  ;;  %v3618_v57 = vmin.f32 %v10587_v22, 20.0  ;;  %v10600_v25 = vadd.f32 %v10192_v30, %v3424_v13  ;;  %v3426_v61 = vadd.f32 %v3425_v53, %v3060_v36  ;;  %v3429_v28 = vpop.f32.mrf.mxu1 }
 0x3ad   : > { %13281 = vst [vmem:[#allocation59_spill] sm:$0xff] %v10594_v31  ;;  %6514 = vpow2.f32 %v3654_v58  ;;  %v10604_v45 = vmul.f32 100.0, %v10594_v31  ;;  %v3064_v14 = vadd.f32 %v10212_v52, %v10208_v39  ;;  %v3629_v54 = vmin.f32 %v10591_v34, 20.0 }
 0x3ae   : > { %13283 = vst [vmem:[#allocation31_spill] sm:$0xff] %v10600_v25  ;;  %v10609_v16 = vpop.eup %6496  ;;  %v3615_v56 = vmin.f32 %v10584_v29, 20.0  ;;  %v3668_v7 = vmul.f32 1.442695, %v3618_v57  ;;  %v10613_v13 = vmul.f32 100.0, %v10600_v25  ;;  %v10616_v37 = vadd.f32 %v10192_v30, %v3426_v61  ;;  %v3431_v53 = vpop.f32.mrf.mxu1 }
 0x3af   : > { %13284 = vst [vmem:[#allocation60_spill] sm:$0xff] %v10604_v45  ;;  %6516 = vpow2.f32 %v3660_v43  ;;  %v3619_v36 = vmin.f32 %v10604_v45, 20.0  ;;  %v3430_v58 = vadd.f32 %v3429_v28, %v3063_v49  ;;  %v3690_v2 = vmul.f32 1.442695, %v3629_v54  ;;  %2946 = vperm.xlu0 %6381, %v10535_v10  }
 0x3b0   : > { %13285 = vst [vmem:[#allocation61_spill] sm:$0xff] %v10616_v37  ;;  %v10619_v52 = vpop.eup %6498  ;;  %6518 = vpow2.f32 %v3668_v7  ;;  %v3622_v39 = vmin.f32 %v10613_v13, 20.0  ;;  %v10623_v48 = vmul.f32 100.0, %v10616_v37  ;;  %v3432_v57 = vadd.f32 %v3431_v53, %v3064_v14  ;;  %v3435_v49 = vpop.f32.mrf.mxu1 }
 0x3b1   : > { %v10626_v59 = vpop.eup %6500  ;;  %v3670_v30 = vmul.f32 1.442695, %v3619_v36  ;;  %v3716_v43 = vadd.f32 1.0, %v6495_v3  ;;  %v10629_v61 = vadd.f32 %v13263_v40, %v3430_v58  ;;  %6520 = vpow2.f32 %v3690_v2  ;;  %v13287_v3 = vld [vmem:[#allocation36_spill] sm:$0xff]  ;;  %v13288_v58 = vld [vmem:[#allocation27_spill] sm:$0xff] }
 0x3b2   : > { %v6503_v28 = vpop.eup %6502  ;;  %v3676_v54 = vmul.f32 1.442695, %v3622_v39  ;;  %v3623_v7 = vmin.f32 %v10623_v48, 20.0  ;;  %v10633_v12 = vadd.f32 %v13263_v40, %v3432_v57  ;;  %v3436_v14 = vadd.f32 %v3435_v49, %v13286_v47  ;;  %v3437_v22 = vpop.f32.mrf.mxu1 }
 0x3b3   : > { %v6505_v53 = vpop.eup %6504  ;;  %v3662_v29 = vmul.f32 1.442695, %v3615_v56  ;;  %6522 = vpow2.f32 %v3670_v30  ;;  %v10637_v36 = vmul.f32 100.0, %v10629_v61  ;;  %v3068_v26 = vadd.f32 %v13288_v58, %v13287_v3 }
 0x3b4   : > { %6524 = vpow2.f32 %v3676_v54  ;;  %v3678_v2 = vmul.f32 1.442695, %v3623_v7  ;;  %v10642_v39 = vmul.f32 100.0, %v10633_v12  ;;  %v10645_v40 = vadd.f32 %v13267_v38, %v3436_v14 }
 0x3b5   : > { %v10647_v57 = vpop.eup %6506  ;;  %6526 = vlog2.f32 %v3716_v43  ;;  %v3626_v47 = vmin.f32 %v10637_v36, 20.0  ;;  %v3438_v56 = vadd.f32 %v3437_v22, %v3068_v26  ;;  %v3721_v30 = vadd.f32 1.0, %v6503_v28  ;;  %v13289_v43 = vld [vmem:[#allocation39_spill] sm:$0xff] }
 0x3b6   : > { %v6509_v49 = vpop.eup %6508  ;;  %6528 = vpow2.f32 %v3678_v2  ;;  %v3627_v3 = vmin.f32 %v10642_v39, 20.0  ;;  %v10652_v54 = vmul.f32 100.0, %v10645_v40  ;;  %v2659_v45 = vmul.f32 %v13289_v43, %v13201_v63  ;;  %v13290_v2 = vld [vmem:[#allocation6_spill] sm:$0xff] }
 0x3b7   : > { %6530 = vpow2.f32 %v3662_v29  ;;  %v3684_v7 = vmul.f32 1.442695, %v3626_v47  ;;  %v3724_v58 = vadd.f32 1.0, %v6509_v49  ;;  %v10655_v14 = vadd.f32 %v13267_v38, %v3438_v56 }
 0x3b8   : > { %v10657_v31 = vpop.eup %6510  ;;  %v3686_v26 = vmul.f32 1.442695, %v3627_v3  ;;  %v3630_v22 = vmin.f32 %v10652_v54, 20.0  ;;  %6532 = vlog2.f32 %v3721_v30  ;;  %v2787_v25 = vmul.f32 %v9939_v62, %v13290_v2 }
 0x3b9   : > { %v6513_v28 = vpop.eup %6512  ;;  %v3720_v37 = vadd.f32 1.0, %v6505_v53  ;;  %6534 = vpow2.f32 %v3684_v7  ;;  %v10665_v29 = vmul.f32 100.0, %v10655_v14  ;;  %v2655_v47 = vmul.f32 %v9968_v0, %v13201_v63 }
 0x3ba   : > { %v10667_v38 = vpop.eup %6514  ;;  %v2783_v56 = vmul.f32 %v10058_v21, %v13290_v2  ;;  %6536 = vpow2.f32 %v3686_v26  ;;  %v3692_v49 = vmul.f32 1.442695, %v3630_v22  ;;  %v3712_v62 = vadd.f32 1.0, %v10578_v46 }
 0x3bb   : > { %6538 = vlog2.f32 %v3724_v58  ;;  %v3631_v30 = vmin.f32 %v10665_v29, 20.0  ;;  %v3717_v53 = vadd.f32 1.0, %v10609_v16  ;;  %v2851_v43 = vadd.f32 %v2787_v25, %v2659_v45 }
 0x3bc   : > { %v6517_v3 = vpop.eup %6516  ;;  %6540 = vpow2.f32 %v3692_v49  ;;  %v2979_v10 = vmul.f32 %v10128_v17, %v13214_v18  ;;  %v2847_v21 = vadd.f32 %v2783_v56, %v2655_v47  ;;  %v2975_v58 = vmul.f32 %v10194_v55, %v13214_v18 }
 0x3bd   : > { %v6519_v7 = vpop.eup %6518  ;;  %6542 = vlog2.f32 %v3720_v37  ;;  %v3694_v0 = vmul.f32 1.442695, %v3631_v30  ;;  %v3713_v26 = vadd.f32 1.0, %v10581_v60  ;;  %v3706_v22 = vadd.f32 1.0, %v6513_v28 }
 0x3be   : > { %v6521_v63 = vpop.eup %6520  ;;  %6544 = vlog2.f32 %v3717_v53  ;;  %v3714_v16 = vadd.f32 1.0, %v6519_v7  ;;  %v3709_v17 = vadd.f32 1.0, %v10570_v15  ;;  %v3039_v37 = vadd.f32 %v2975_v58, %v2847_v21 }
 0x3bf   : > { %6546 = vpow2.f32 %v3694_v0  ;;  %v3725_v46 = vadd.f32 1.0, %v6521_v63  ;;  %v3043_v30 = vadd.f32 %v2979_v10, %v2851_v43  ;;  %v3705_v15 = vadd.f32 1.0, %v10558_v42 }
 0x3c0   : > { %v6523_v49 = vpop.eup %6522  ;;  %6548 = vlog2.f32 %v3712_v62  ;;  %v3394_v62 = vadd.f32 %v10436_v51, %v3039_v37  ;;  %vm3853_vm7 = vcmp.gt.f32.partialorder %v10591_v34, 20.0  ;;  %vm3852_vm2 = vcmp.gt.f32.partialorder %v10521_v9, 20.0 }
 0x3c1   : > { %v6525_v25 = vpop.eup %6524  ;;  %6550 = vlog2.f32 %v3725_v46  ;;  %v3715_v47 = vadd.f32 1.0, %v6523_v49  ;;  %v3400_v7 = vadd.f32 %v10461_v20, %v3043_v30  ;;  %vm3849_vm8 = vcmp.gt.f32.partialorder %v10490_v41, 20.0  ;;  %v13293_v41 = vld [vmem:[#allocation20_spill] sm:$0xff] }
 0x3c2   : > { %v6527_v45 = vpop.eup %6526  ;;  %6552 = vlog2.f32 %v3713_v26  ;;  %v3718_v55 = vadd.f32 1.0, %v6525_v25  ;;  %v3710_v26 = vadd.f32 1.0, %v6517_v3  ;;  %v10686_v46 = vadd.f32 %v10287_v50, %v3394_v62 }
 0x3c3   : > { %v6529_v56 = vpop.eup %6528  ;;  %6554 = vlog2.f32 %v3706_v22  ;;  %v10689_v51 = vadd.f32 %v10300_v44, %v3400_v7  ;;  %vm3848_vm6 = vcmp.gt.f32.partialorder %v10487_v35, 20.0  ;;  %vm3845_vm9 = vcmp.gt.f32.partialorder %v10465_v19, 20.0  ;;  %v13297_v19 = vld [vmem:[#allocation37_spill] sm:$0xff] }
 0x3c4   : > { %v6531_v53 = vpop.eup %6530  ;;  %6556 = vlog2.f32 %v3714_v16  ;;  %v3719_v28 = vadd.f32 1.0, %v6529_v56  ;;  %v3707_v56 = vadd.f32 1.0, %v10667_v38  ;;  %v3703_v62 = vadd.f32 1.0, %v10647_v57 }
 0x3c5   : > { %v6533_v60 = vpop.eup %6532  ;;  %6558 = vlog2.f32 %v3709_v17  ;;  %v3711_v42 = vadd.f32 1.0, %v6531_v53  ;;  %v3701_v17 = vadd.f32 1.0, %v10549_v6  ;;  %v3700_v38 = vadd.f32 1.0, %v10537_v24 }
 0x3c6   : > { %v6535_v63 = vpop.eup %6534  ;;  %6560 = vlog2.f32 %v3715_v47  ;;  %v3779_v25 = vmul.f32 0.6931472, %v6533_v60  ;;  %v3769_v60 = vmul.f32 0.6931472, %v6527_v45  ;;  %v3697_v24 = vadd.f32 1.0, %v10523_v33 }
 0x3c7   : > { %v6537_v0 = vpop.eup %6536  ;;  %6562 = vlog2.f32 %v3718_v55  ;;  %v3722_v10 = vadd.f32 1.0, %v6535_v63  ;;  %vm3844_vm0 = vcmp.gt.f32.partialorder %v13293_v41, 20.0  ;;  %vm3855_vm5 = vcmp.gt.f32.partialorder %v10665_v29, 20.0 }
 0x3c8   : > { %v6539_v43 = vpop.eup %6538  ;;  %v3723_v21 = vadd.f32 1.0, %v6537_v0  ;;  %6564 = vlog2.f32 %v3705_v15  ;;  %v3817_v63 = vmul.f32 0.01, %v3779_v25  ;;  %v3745_v25 = vmul.f32 0.6931472, %v10619_v52 }
 0x3c9   : > { %v6541_v58 = vpop.eup %6540  ;;  %6566 = vlog2.f32 %v3719_v28  ;;  %v3785_v3 = vmul.f32 0.6931472, %v6539_v43  ;;  %vm3854_vm1 = vcmp.gt.f32.partialorder %v10652_v54, 20.0  ;;  %vm3851_vm3 = vcmp.gt.f32.partialorder %v10642_v39, 20.0 }
 0x3ca   : > { %v6543_v22 = vpop.eup %6542  ;;  %6568 = vlog2.f32 %v3722_v10  ;;  %v3726_v20 = vadd.f32 1.0, %v6541_v58  ;;  %v10704_v10 = vmul.f32 100.0, %v10689_v51  ;;  %v3699_v4 = vadd.f32 1.0, %v10626_v59 }
 0x3cb   : > { %v6545_v49 = vpop.eup %6544  ;;  %6570 = vlog2.f32 %v3723_v21  ;;  %v3777_v30 = vmul.f32 0.6931472, %v6543_v22  ;;  %v3820_v28 = vmul.f32 0.01, %v3785_v3  ;;  %v3881_v3 = vsel %vm3849_vm8, %v10480_v8, %v3817_v63 }
 0x3cc   : > { %v6547_v16 = vpop.eup %6546  ;;  %6572 = vlog2.f32 %v3726_v20  ;;  %v3771_v47 = vmul.f32 0.6931472, %v6545_v49  ;;  %v3606_v34 = vmin.f32 %v10704_v10, 20.0 }
 0x3cd   : > { %v6549_v50 = vpop.eup %6548  ;;  %6574 = vlog2.f32 %v3710_v26  ;;  %v3727_v37 = vadd.f32 1.0, %v6547_v16  ;;  %v3816_v21 = vmul.f32 0.01, %v3777_v30  ;;  %v3884_v49 = vsel %vm3852_vm2, %v10507_v32, %v3820_v28  ;;  %v13292_v30 = vld [vmem:[#allocation44_spill] sm:$0xff] }
 0x3ce   : > { %v6551_v44 = vpop.eup %6550  ;;  %6576 = vlog2.f32 %v3701_v17  ;;  %v3813_v45 = vmul.f32 0.01, %v3771_v47  ;;  %v3761_v58 = vmul.f32 0.6931472, %v6549_v50  ;;  %v3753_v16 = vmul.f32 0.6931472, %v10657_v31 }
 0x3cf   : > { %v6553_v55 = vpop.eup %6552  ;;  %v3787_v53 = vmul.f32 0.6931472, %v6551_v44  ;;  %6578 = vlog2.f32 %v3727_v37  ;;  %v13291_v17 = vld [vmem:[#allocation32_spill] sm:$0xff]  ;;  %v3880_v32 = vsel %vm3848_vm6, %v10475_v27, %v3816_v21  ;;  %v3644_v37 = vmul.f32 1.442695, %v3606_v34  ;;  %v13294_v47 = vld [vmem:[#allocation29_spill] sm:$0xff] }
 0x3d0   : > { %v10698_v6 = vpop.eup %6554  ;;  %6580 = vlog2.f32 %v3711_v42  ;;  %v3763_v0 = vmul.f32 0.6931472, %v6553_v55  ;;  %v3812_v42 = vmul.f32 0.01, %v3769_v60  ;;  %vm3832_vm13 = vcmp.gt.f32.partialorder %v13291_v17, 20.0  ;;  %v13295_v27 = vld [vmem:[#allocation40_spill] sm:$0xff] }
 0x3d1   : > { %v6557_v7 = vpop.eup %6556  ;;  %v3821_v15 = vmul.f32 0.01, %v3787_v53  ;;  %6582 = vlog2.f32 %v3707_v56  ;;  %v3808_v31 = vmul.f32 0.01, %v3761_v58  ;;  %v3877_v8 = vsel %vm3845_vm9, %v13292_v30, %v3813_v45  ;;  %v13296_v55 = vld [vmem:[#allocation38_spill] sm:$0xff]  ;;  %v13298_v45 = vld [vmem:[#allocation25_spill] sm:$0xff] }
 0x3d2   : > { %v6559_v43 = vpop.eup %6558  ;;  %6584 = vlog2.f32 %v3700_v38  ;;  %v3809_v33 = vmul.f32 0.01, %v3763_v0  ;;  %vm3829_vm4 = vcmp.gt.f32.partialorder %v13294_v47, 20.0  ;;  %v3876_v35 = vsel %vm3844_vm0, %v13295_v27, %v3812_v42  ;;  %v13300_v42 = vld [vmem:[#allocation48_spill] sm:$0xff] }
 0x3d3   : > { %v6561_v26 = vpop.eup %6560  ;;  %v3885_v57 = vsel %vm3853_vm7, %v10567_v5, %v3821_v15  ;;  %v3755_v22 = vmul.f32 0.6931472, %v6559_v43  ;;  %6586 = vlog2.f32 %v3703_v62  ;;  %vm3841_vm12 = vcmp.gt.f32.partialorder %v13296_v55, 20.0  ;;  %v13305_v55 = vld [vmem:[#allocation28_spill] sm:$0xff] }
 0x3d4   : > { %v6563_v20 = vpop.eup %6562  ;;  %3969 = vmatprep.subr.mxu0 %v3885_v57  ;;  %6588 = vlog2.f32 %v3697_v24  ;;  %v3804_v53 = vmul.f32 0.01, %v3753_v16  ;;  %v3873_v28 = vsel %vm3841_vm12, %v13297_v19, %v3809_v33  ;;  %v10736_v63 = vmul.f32 0.6931472, %v6557_v7  ;;  %v13299_v7 = vld [vmem:[#allocation42_spill] sm:$0xff] }
 0x3d5   : > { %v6565_v5 = vpop.eup %6564  ;;  %3970 = vmatpush1.msra.mxu0 %v3884_v49  ;;  %v3805_v52 = vmul.f32 0.01, %v3755_v22  ;;  %6590 = vpow2.f32 %v3644_v37  ;;  %v3800_v15 = vmul.f32 0.01, %v3745_v25  ;;  %v3773_v43 = vmul.f32 0.6931472, %v6563_v20 }
 0x3d6   : > { %v6567_v9 = vpop.eup %6566  ;;  %3971 = vmatprep.subr.mxu0 %v3881_v3  ;;  %v3747_v50 = vmul.f32 0.6931472, %v6565_v5  ;;  %v3767_v21 = vmul.f32 0.6931472, %v6561_v26  ;;  %v3872_v58 = vsel %vm3840_vm11, %v13298_v45, %v3808_v31  ;;  %vm3850_vm7 = vcmp.gt.f32.partialorder %v10637_v36, 20.0  ;;  %v13301_v26 = vld [vmem:[#allocation23_spill] sm:$0xff] }
 0x3d7   : > { %v6569_v44 = vpop.eup %6568  ;;  %3972 = vmatpush1.msra.mxu0 %v3880_v32  ;;  %v3775_v24 = vmul.f32 0.6931472, %v6567_v9  ;;  %v3869_v49 = vsel %vm3837_vm14, %v13299_v7, %v3805_v52  ;;  %v3696_v16 = vadd.f32 1.0, %v13300_v42  ;;  %vm3847_vm2 = vcmp.gt.f32.partialorder %v10623_v48, 20.0  ;;  %v13302_v3 = vld [vmem:[#allocation30_spill] sm:$0xff]  ;;  %v13303_v9 = vld [vmem:[#allocation43_spill] sm:$0xff] }
 0x3d8   : > { %v6571_v56 = vpop.eup %6570  ;;  %3973 = vmatprep.subr.mxu0 %v3877_v8  ;;  %v3801_v62 = vmul.f32 0.01, %v3747_v50  ;;  %v3781_v20 = vmul.f32 0.6931472, %v6569_v44  ;;  %v3868_v23 = vsel %vm3836_vm10, %v13301_v26, %v3804_v53  ;;  %vm3828_vm8 = vcmp.gt.f32.partialorder %v13302_v3, 20.0  ;;  %v13304_v50 = vld [vmem:[#allocation35_spill] sm:$0xff] }
 0x3d9   : > { %v6573_v60 = vpop.eup %6572  ;;  %3974 = vmatpush1.msra.mxu0 %v3876_v35  ;;  %v3783_v22 = vmul.f32 0.6931472, %v6571_v56  ;;  %v10753_v33 = vmul.f32 100.0, %v10686_v46  ;;  %6592 = vlog2.f32 %v3696_v16  ;;  %v3864_v11 = vsel %vm3832_vm13, %v13304_v50, %v3800_v15  ;;  %v6988_v56 = vld [vmem:[%s12769_s3 + $0x38] sm:$0xff]  ;;  %v13310_v16 = vld [vmem:[#allocation24_spill] sm:$0xff]  ;;  %v13314_v3 = vld [vmem:[#allocation58_spill] sm:$0xff] }
 0x3da   : > { %v6575_v0 = vpop.eup %6574  ;;  %v3789_v38 = vmul.f32 0.6931472, %v6573_v60  ;;  %3975 = vmatprep.subr.mxu0 %v3873_v28  ;;  %v3865_v32 = vsel %vm3833_vm15, %v13303_v9, %v3801_v62  ;;  %v7082_v30 = vmov 9   ;;  %vm3846_vm6 = vcmp.gt.f32.partialorder %v10613_v13, 20.0  ;;  %v13306_v60 = vld [vmem:[#allocation26_spill] sm:$0xff]  ;;  %v13308_v7 = vld [vmem:[#allocation51_spill] sm:$0xff] }
 0x3db   : > { %v6577_v57 = vpop.eup %6576  ;;  %3976 = vmatpush1.msra.mxu0 %v3872_v58  ;;  %v3602_v44 = vmin.f32 %v10753_v33, 20.0  ;;  %6380 = vset.pattern.permute.xlu1 %v7082_v30  ;;  %v3819_v52 = vmul.f32 0.01, %v3783_v22  ;;  %v3818_v27 = vmul.f32 0.01, %v3781_v20  ;;  %vm3825_vm9 = vcmp.gt.f32.partialorder %v13306_v60, 20.0 }
 0x3dc   : > { %v6579_v34 = vpop.eup %6578  ;;  %3977 = vmatprep.subr.mxu0 %v3869_v49  ;;  %v3739_v5 = vmul.f32 0.6931472, %v6577_v57  ;;  %v3822_v31 = vmul.f32 0.01, %v3789_v38  ;;  %4786 = vperm.xlu1 %6380, %v6988_v56   ;;  %v3815_v28 = vmul.f32 0.01, %v3775_v24 }
 0x3dd   : > { %v6581_v25 = vpop.eup %6580  ;;  %v3791_v1 = vmul.f32 0.6931472, %v6579_v34  ;;  %3978 = vmatpush1.msra.mxu0 %v3868_v23  ;;  %v3636_v19 = vmul.f32 1.442695, %v3602_v44  ;;  %6386 = vset.pattern.permute.xlu0 %v7082_v30  ;;  %v3757_v62 = vmul.f32 0.6931472, %v6575_v0  ;;  %v3882_v54 = vsel %vm3850_vm7, %v10629_v61, %v3818_v27 }
 0x3de   : > { %3979 = vmatprep.subr.mxu0 %v3865_v32  ;;  %v3797_v37 = vmul.f32 0.01, %v3739_v5  ;;  %v6583_v8 = vpop.eup %6582  ;;  %v3759_v35 = vmul.f32 0.6931472, %v6581_v25  ;;  %v6989_v38 = vld [vmem:[%s12769_s3 + $0x30] sm:$0xff]  ;;  %v3886_v45 = vsel %vm3854_vm1, %v10645_v40, %v3822_v31  ;;  %v13307_v22 = vmov 5  }
 0x3df   : > { %v3823_v41 = vmul.f32 0.01, %v3791_v1  ;;  %3980 = vmatpush1.msra.mxu0 %v3864_v11  ;;  %v6585_v17 = vpop.eup %6584  ;;  %4782 = vperm.xlu0 %6386, %v6989_v38   ;;  %v3814_v58 = vmul.f32 0.01, %v3773_v43  ;;  %v3811_v57 = vmul.f32 0.01, %v3767_v21  ;;  %6594 = vpow2.f32 %v3636_v19 }
 0x3e0   : > { %v3861_v53 = vsel %vm3829_vm4, %v13305_v55, %v3797_v37  ;;  %v3737_v15 = vmul.f32 0.6931472, %v6585_v17  ;;  %v6587_v47 = vpop.eup %6586  ;;  %v3751_v29 = vmul.f32 0.6931472, %v6583_v8  ;;  %6596 = vlog2.f32 %v3699_v4  ;;  %6382 = vset.pattern.permute.xlu1 %v13307_v22  ;;  %v6990_v61 = vld [vmem:[%s12769_s3 + $0x20] sm:$0xff]  ;;  %v13313_v23 = vld [vmem:[#allocation59_spill] sm:$0xff] }
 0x3e1   : > { %v3887_v59 = vsel %vm3855_vm5, %v10655_v14, %v3823_v41  ;;  %3981 = vmatprep.subr.mxu0 %v3861_v53  ;;  %v3883_v14 = vsel %vm3851_vm3, %v10633_v12, %v3819_v52  ;;  %v6589_v24 = vpop.eup %6588  ;;  %v3810_v40 = vmul.f32 0.01, %v10736_v63  ;;  %v3807_v43 = vmul.f32 0.01, %v3759_v35  ;;  %2754 = vperm.xlu1 %6382, %v13308_v7   ;;  %v13309_v12 = vld [vmem:[#allocation61_spill] sm:$0xff]  ;;  %v13312_v20 = vld [vmem:[#allocation60_spill] sm:$0xff] }
 0x3e2   : > { %4082 = vmatprep.subr.mxu1 %v3887_v59  ;;  %v3796_v0 = vmul.f32 0.01, %v3737_v15  ;;  %v3749_v21 = vmul.f32 0.6931472, %v10698_v6  ;;  %v6591_v39 = vpop.eup %6590  ;;  %v3879_v49 = vsel %vm3847_vm2, %v13309_v12, %v3815_v28  ;;  %v3743_v42 = vmul.f32 0.6931472, %v6587_v47 }
 0x3e3   : > { %4083 = vmatpush1.msra.mxu1 %v3886_v45  ;;  %v3731_v36 = vmul.f32 0.6931472, %v6589_v24  ;;  %4774 = vperm.xlu0 %6386, %v6990_v61   ;;  %v13311_v6 = vld [vmem:[#allocation31_spill] sm:$0xff]  ;;  %vm3843_vm11 = vcmp.gt.f32.partialorder %v13312_v20, 20.0  ;;  %v3806_v48 = vmul.f32 0.01, %v3757_v62 }
 0x3e4   : > { %4084 = vmatprep.subr.mxu1 %v3883_v14  ;;  %v3860_v34 = vsel %vm3828_vm8, %v13310_v16, %v3796_v0  ;;  %v3878_v63 = vsel %vm3846_vm6, %v13311_v6, %v3814_v58  ;;  %v3702_v26 = vadd.f32 1.0, %v6591_v39  ;;  %v3875_v5 = vsel %vm3843_vm11, %v13313_v23, %v3811_v57  ;;  %v13315_v9 = vld [vmem:[#allocation56_spill] sm:$0xff]  ;;  %v13316_v31 = vld [vmem:[#allocation57_spill] sm:$0xff]  ;;  %v13318_v11 = vld [vmem:[#allocation55_spill] sm:$0xff] }
 0x3e5   : > { %4085 = vmatpush1.msra.mxu1 %v3882_v54  ;;  %3982 = vmatpush1.msra.mxu0 %v3860_v34  ;;  %vm3842_vm14 = vcmp.gt.f32.partialorder %v13314_v3, 20.0  ;;  %v3803_v25 = vmul.f32 0.01, %v3751_v29  ;;  %v3793_v1 = vmul.f32 0.01, %v3731_v36  ;;  %vm3839_vm10 = vcmp.gt.f32.partialorder %v13316_v31, 20.0 }
 0x3e6   : > { %4086 = vmatprep.subr.mxu1 %v3879_v49  ;;  %v3874_v32 = vsel %vm3842_vm14, %v13315_v9, %v3810_v40  ;;  %v3802_v50 = vmul.f32 0.01, %v3749_v21  ;;  %6598 = vlog2.f32 %v3702_v26  ;;  %v13317_v13 = vmov 6   ;;  %v13319_v44 = vld [vmem:[#allocation54_spill] sm:$0xff]  ;;  %v13320_v41 = vld [vmem:[#allocation33_spill] sm:$0xff]  ;;  %v6593_v56 = vpop.eup %6592  ;;  %v13323_v35 = vld [vmem:[#allocation52_spill] sm:$0xff] }
 0x3e7   : > { %4087 = vmatpush1.msra.mxu1 %v3878_v63  ;;  %6383 = vset.pattern.permute.xlu1 %v13317_v13  ;;  %v3871_v37 = vsel %vm3839_vm10, %v13318_v11, %v3807_v43  ;;  %vm3838_vm15 = vcmp.gt.f32.partialorder %v13319_v44, 20.0  ;;  %v3799_v8 = vmul.f32 0.01, %v3743_v42  ;;  %v3857_v52 = vsel %vm3825_vm9, %v13320_v41, %v3793_v1  ;;  %v13321_v4 = vld [vmem:[#allocation46_spill] sm:$0xff]  ;;  %v13322_v17 = vld [vmem:[#allocation53_spill] sm:$0xff]  ;;  %v2565_v60 = vld [vmem:[%s12769_s3 + $0x40] sm:$0xff]  ;;  %v10910_v1 = vpop.f32.mrf.mxu0  ;;  %v10922_v11 = vpop.f32.mrf.mxu1 }
 0x3e8   : > { %4088 = vmatprep.subr.mxu1 %v3875_v5  ;;  %2950 = vperm.xlu1 %6383, %v13321_v4   ;;  %v3870_v27 = vsel %vm3838_vm15, %v13322_v17, %v3806_v48  ;;  %vm3835_vm13 = vcmp.gt.f32.partialorder %v13323_v35, 20.0  ;;  %v13324_v55 = vld [vmem:[#allocation50_spill] sm:$0xff]  ;;  %v13325_v19 = vld [vmem:[#allocation49_spill] sm:$0xff]  ;;  %v3729_v59 = vmul.f32 0.6931472, %v6593_v56  ;;  %v13326_v62 = vld [vmem:[#allocation47_spill] sm:$0xff] }
 0x3e9   : > { %4089 = vmatpush1.msra.mxu1 %v3874_v32  ;;  %3983 = vmatprep.subr.mxu0 %v3857_v52  ;;  %v3867_v53 = vsel %vm3835_vm13, %v13324_v55, %v3803_v25  ;;  %vm3834_vm0 = vcmp.gt.f32.partialorder %v13325_v19, 20.0  ;;  %v6991_v28 = vld [vmem:[%s12769_s3 + $0x8] sm:$0xff]  ;;  %v13329_v57 = vmov 4   ;;  %v13330_v14 = vld [vmem:[#allocation16_spill] sm:$0xff]  ;;  %vm12969_vm12 = vcmask 523264   ;;  %v13331_v24 = vld [vmem:[#allocation19_spill] sm:$0xff]  ;;  %v10912_v9 = vpop.f32.mrf.mxu0  ;;  %v10926_v44 = vpop.f32.mrf.mxu1 }
 0x3ea   : > { %4090 = vmatprep.subr.mxu1 %v3871_v37  ;;  %4762 = vperm.xlu0 %6386, %v6991_v28   ;;  %v3866_v15 = vsel %vm3834_vm0, %v13326_v62, %v3802_v50  ;;  %v13327_v38 = vld [vmem:[#allocation41_spill] sm:$0xff]  ;;  %v3792_v58 = vmul.f32 0.01, %v3729_v59  ;;  %vm3824_vm5 = vcmp.gt.f32.partialorder %v13330_v14, 20.0  ;;  %v3888_v29 = vld [vmem:[%s12768_s2] sm:$0xff]  ;;  %v13332_v21 = vmov 0.0   ;;  %v10944_v55 = vpop.permute.xlu1 %3925 }
 0x3eb   : > { %4091 = vmatpush1.msra.mxu1 %v3870_v27  ;;  %vm3831_vm4 = vcmp.gt.f32.partialorder %v13327_v38, 20.0  ;;  %v13328_v47 = vld [vmem:[#allocation45_spill] sm:$0xff]  ;;  %v3890_v42 = vld [vmem:[%s12768_s2 + $0x10] sm:$0xff]  ;;  %vm3830_vm1 = vcmp.gt.f32.partialorder %v10704_v10, 20.0  ;;  %v3891_v6 = vld [vmem:[%s12768_s2 + $0x18] sm:$0xff]  ;;  %vm3826_vm7 = vcmp.gt.f32.partialorder %v10753_v33, 20.0  ;;  %v10914_v32 = vpop.f32.mrf.mxu0  ;;  %v10930_v41 = vpop.f32.mrf.mxu1 }
 0x3ec   : > { %4092 = vmatprep.subr.mxu1 %v3867_v53  ;;  %v3863_v45 = vsel %vm3831_vm4, %v13328_v47, %v3799_v8  ;;  %6384 = vset.pattern.permute.xlu1 %v13329_v57  ;;  %v6595_v0 = vpop.eup %6594  ;;  %v3856_v54 = vsel %vm3824_vm5, %v13331_v24, %v3792_v58  ;;  %v3889_v7 = vld [vmem:[%s12768_s2 + $0x8] sm:$0xff]  ;;  %v13333_v61 = vld [vmem:[#allocation34_spill] sm:$0xff]  ;;  %v6993_v5 = vld [vmem:[%s12769_s3 + $0x18] sm:$0xff]  ;;  %13335 = vst [vmem:[#allocation21_spill] sm:$0xff] %v10910_v1 }
 0x3ed   : > { %4093 = vmatpush1.msra.mxu1 %v3866_v15  ;;  %2615 = vperm.xlu1 %6384, %v2565_v60   ;;  %v6597_v40 = vpop.eup %6596  ;;  %v3698_v43 = vadd.f32 1.0, %v6595_v0  ;;  %vm3827_vm3 = vcmp.gt.f32.partialorder %v13333_v61, 20.0  ;;  %v13334_v63 = vld [vmem:[#allocation22_spill] sm:$0xff]  ;;  %v3893_v23 = vld [vmem:[%s12768_s2 + $0x28] sm:$0xff]  ;;  %v6995_v33 = vld [vmem:[%s12769_s3] sm:$0xff]  ;;  %13336 = vst [vmem:[#allocation36_spill] sm:$0xff] %v10912_v9  ;;  %v10916_v31 = vpop.f32.mrf.mxu0 }
 0x3ee   : > { %4094 = vmatprep.subr.mxu1 %v3863_v45  ;;  %3984 = vmatpush1.msra.mxu0 %v3856_v54  ;;  %v3735_v39 = vmul.f32 0.6931472, %v6597_v40  ;;  %v6994_v25 = vld [vmem:[%s12769_s3 + $0x10] sm:$0xff]  ;;  %13337 = vst [vmem:[#allocation27_spill] sm:$0xff] %v10914_v32  ;;  %13338 = vst [vmem:[#allocation39_spill] sm:$0xff] %v10916_v31  ;;  %v10934_v4 = vpop.f32.mrf.mxu1 }
 0x3ef   : > { %6132 = vmatmul.mubr.msk.f32.vlgmr.msra.gmra.mxu0 %vm12969_vm12, %v3888_v29  ;;  %6600 = vlog2.f32 %v3698_v43  ;;  %v10918_v50 = vpop.f32.mrf.mxu0  ;;  %13341 = vst [vmem:[#allocation20_spill] sm:$0xff] %v10922_v11  ;;  %13343 = vst [vmem:[#allocation40_spill] sm:$0xff] %v10926_v44 }
 0x3f0   : > { %4023 = vmatprep.mubr.f32.mxu0 %v13332_v21  ;;  %v3795_v16 = vmul.f32 0.01, %v3735_v39  ;;  %13339 = vst [vmem:[#allocation32_spill] sm:$0xff] %v10918_v50  ;;  %13345 = vst [vmem:[#allocation37_spill] sm:$0xff] %v10930_v41  ;;  %v10938_v17 = vpop.f32.mrf.mxu1 }
 0x3f1   : > { %6385 = vset.pattern.permute.xlu1 %v13307_v22  ;;  %v6992_v22 = vld [vmem:[%s12769_s3 + $0x28] sm:$0xff]  ;;  %13347 = vst [vmem:[#allocation42_spill] sm:$0xff] %v10934_v4  ;;  %13349 = vst [vmem:[#allocation23_spill] sm:$0xff] %v10938_v17 }
 0x3f2   : > { %2750 = vperm.xlu1 %6385, %v2565_v60   ;;  %v3859_v20 = vsel %vm3827_vm3, %v13334_v63, %v3795_v16  ;;  %v10942_v35 = vpop.f32.mrf.mxu1 }
 0x3f3   : > { %v6599_v12 = vpop.eup %6598  ;;  %6133 = vmatmul.mubr.msk.f32.gmra.mxu0 %vm12969_vm12, %v3889_v7  ;;  %13351 = vst [vmem:[#allocation43_spill] sm:$0xff] %v10942_v35 }
 0x3f4   : > { %v3741_v49 = vmul.f32 0.6931472, %v6599_v12  ;;  %4029 = vmatprep.mubr.f32.mxu0 %v13332_v21  ;;  %v10948_v19 = vpop.f32.mrf.mxu1  ;;  %v10978_v12 = vpop.permute.xlu0 %3921 }
 0x3f5   : > { %13353 = vst [vmem:[#allocation28_spill] sm:$0xff] %v10948_v19 }
 0x3f6   : > { %6387 = vset.pattern.permute.xlu1 %v7082_v30  ;;  %v3798_v34 = vmul.f32 0.01, %v3741_v49  ;;  %v10954_v28 = vpop.f32.mrf.mxu1 }
 0x3f7   : > { %4778 = vperm.xlu1 %6387, %v6992_v22   ;;  %6134 = vmatmul.mubr.msk.f32.gmra.mxu0 %vm12969_vm12, %v3890_v42  ;;  %13355 = vst [vmem:[#allocation51_spill] sm:$0xff] %v10954_v28 }
 0x3f8   : > { %v3862_v36 = vsel %vm3830_vm1, %v10689_v51, %v3798_v34  ;;  %4035 = vmatprep.mubr.f32.mxu0 %v13332_v21  ;;  %v3892_v51 = vld [vmem:[%s12768_s2 + $0x20] sm:$0xff]  ;;  %v10958_v15 = vpop.f32.mrf.mxu1 }
 0x3f9   : > { %4095 = vmatpush1.msra.mxu1 %v3862_v36  ;;  %13357 = vst [vmem:[#allocation24_spill] sm:$0xff] %v10958_v15 }
 0x3fa   : > { %4096 = vmatprep.subr.mxu1 %v3859_v20  ;;  %v10964_v45 = vpop.f32.mrf.mxu1 }
 0x3fb   : > { %6388 = vset.pattern.permute.xlu1 %v13317_v13  ;;  %6135 = vmatmul.mubr.msk.f32.gmra.mxu0 %vm12969_vm12, %v3891_v6  ;;  %v10920_v13 = vpop.f32.mrf.mxu0  ;;  %13359 = vst [vmem:[#allocation60_spill] sm:$0xff] %v10964_v45 }
 0x3fc   : > { %2942 = vperm.xlu1 %6388, %v2565_v60   ;;  %4041 = vmatprep.mubr.f32.mxu0 %v13332_v21  ;;  %v6601_v10 = vpop.eup %6600  ;;  %13340 = vst [vmem:[#allocation44_spill] sm:$0xff] %v10920_v13  ;;  %v10952_v60 = vpop.permute.xlu1 %3917 }
 0x3fd   : > { %v3733_v48 = vmul.f32 0.6931472, %v6601_v10  ;;  %v10924_v37 = vpop.f32.mrf.mxu0  ;;  %v10970_v14 = vpop.f32.mrf.mxu1 }
 0x3fe   : > { %13342 = vst [vmem:[#allocation29_spill] sm:$0xff] %v10924_v37  ;;  %13361 = vst [vmem:[#allocation58_spill] sm:$0xff] %v10970_v14 }
 0x3ff   : > { %6136 = vmatmul.mubr.msk.f32.gmra.mxu0 %vm12969_vm12, %v3892_v51  ;;  %v3794_v26 = vmul.f32 0.01, %v3733_v48  ;;  %v10928_v8 = vpop.f32.mrf.mxu0  ;;  %v10972_v24 = vpop.f32.mrf.mxu1 }
 0x400   : > { %6389 = vset.pattern.permute.xlu1 %v7082_v30  ;;  %4047 = vmatprep.mubr.f32.mxu0 %v13332_v21  ;;  %v3894_v30 = vld [vmem:[%s12768_s2 + $0x30] sm:$0xff]  ;;  %13344 = vst [vmem:[#allocation38_spill] sm:$0xff] %v10928_v8  ;;  %v10960_v38 = vpop.permute.xlu1 %3913  ;;  %13362 = vst [vmem:[#allocation56_spill] sm:$0xff] %v10972_v24 }
 0x401   : > { %4770 = vperm.xlu1 %6389, %v6993_v5   ;;  %v3858_v3 = vsel %vm3826_vm7, %v10686_v46, %v3794_v26  ;;  %v3895_v46 = vld [vmem:[%s12768_s2 + $0x38] sm:$0xff]  ;;  %v10932_v52 = vpop.f32.mrf.mxu0  ;;  %v10976_v39 = vpop.f32.mrf.mxu1 }
 0x402   : > { %4097 = vmatpush1.msra.mxu1 %v3858_v3  ;;  %13346 = vst [vmem:[#allocation25_spill] sm:$0xff] %v10932_v52  ;;  %13364 = vst [vmem:[#allocation55_spill] sm:$0xff] %v10976_v39 }
 0x403   : > { %6137 = vmatmul.mubr.msk.f32.gmra.mxu0 %vm12969_vm12, %v3893_v23  ;;  %6140 = vmatmul.mubr.msk.f32.vlgmr.msra.gmra.mxu1 %vm12969_vm12, %v3888_v29  ;;  %v10936_v56 = vpop.f32.mrf.mxu0  ;;  %v10983_v34 = vpop.f32.mrf.mxu1 }
 0x404   : > { %4053 = vmatprep.mubr.f32.mxu0 %v13332_v21  ;;  %4136 = vmatprep.mubr.f32.mxu1 %v13332_v21  ;;  %13348 = vst [vmem:[#allocation48_spill] sm:$0xff] %v10936_v56  ;;  %v10968_v57 = vpop.permute.xlu1 %3905  ;;  %13366 = vst [vmem:[#allocation33_spill] sm:$0xff] %v10983_v34 }
 0x405   : > { %4766 = vperm.xlu1 %6389, %v6994_v25   ;;  %v10940_v27 = vpop.f32.mrf.mxu0  ;;  %v10994_v20 = vpop.f32.mrf.mxu1 }
 0x406   : > { %13350 = vst [vmem:[#allocation30_spill] sm:$0xff] %v10940_v27  ;;  %13369 = vst [vmem:[#allocation52_spill] sm:$0xff] %v10994_v20 }
 0x407   : > { %6138 = vmatmul.mubr.msk.f32.gmra.mxu0 %vm12969_vm12, %v3894_v30  ;;  %6141 = vmatmul.mubr.msk.f32.gmra.mxu1 %vm12969_vm12, %v3889_v7  ;;  %v10946_v53 = vpop.f32.mrf.mxu0  ;;  %v11008_v3 = vpop.f32.mrf.mxu1 }
 0x408   : > { %4059 = vmatprep.mubr.f32.mxu0 %v13332_v21  ;;  %4142 = vmatprep.mubr.f32.mxu1 %v13332_v21  ;;  %13352 = vst [vmem:[#allocation35_spill] sm:$0xff] %v10946_v53  ;;  %v3898_v40 = vpop.permute.xlu1 %3897  ;;  %13370 = vst [vmem:[#allocation50_spill] sm:$0xff] %v11008_v3 }
 0x409   : > { %4758 = vperm.xlu1 %6389, %v6995_v33   ;;  %v10950_v59 = vpop.f32.mrf.mxu0 }
 0x40a   : > { %13354 = vst [vmem:[#allocation26_spill] sm:$0xff] %v10950_v59 }
 0x40b   : > { %6139 = vmatmul.mubr.msk.f32.gmra.mxu0 %vm12969_vm12, %v3895_v46  ;;  %6142 = vmatmul.mubr.msk.f32.gmra.mxu1 %vm12969_vm12, %v3890_v42  ;;  %v10956_v62 = vpop.f32.mrf.mxu0 }
 0x40c   : > { %4595 = vmatprep.mubr.f32.mxu0 %v13332_v21  ;;  %4148 = vmatprep.mubr.f32.mxu1 %v13332_v21  ;;  %13356 = vst [vmem:[#allocation61_spill] sm:$0xff] %v10956_v62 }
 0x40d   : > { %v10962_v47 = vpop.f32.mrf.mxu0 }
 0x40e   : > { %13358 = vst [vmem:[#allocation31_spill] sm:$0xff] %v10962_v47 }
 0x40f   : > { %6143 = vmatmul.mubr.msk.f32.gmra.mxu1 %vm12969_vm12, %v3891_v6  ;;  %v10966_v58 = vpop.f32.mrf.mxu0  ;;  %v10991_v6 = vpop.permute.xlu0 %3909 }
 0x410   : > { %4154 = vmatprep.mubr.f32.mxu1 %v13332_v21  ;;  %13360 = vst [vmem:[#allocation59_spill] sm:$0xff] %v10966_v58 }
 0x413   : > { %6144 = vmatmul.mubr.msk.f32.gmra.mxu1 %vm12969_vm12, %v3892_v51 }
 0x414   : > { %4160 = vmatprep.mubr.f32.mxu1 %v13332_v21 }
 0x417   : > { %6145 = vmatmul.mubr.msk.f32.gmra.mxu1 %vm12969_vm12, %v3893_v23 }
 0x418   : > { %4166 = vmatprep.mubr.f32.mxu1 %v13332_v21 }
 0x41b   : > { %6146 = vmatmul.mubr.msk.f32.gmra.mxu1 %vm12969_vm12, %v3894_v30 }
 0x41c   : > { %4172 = vmatprep.mubr.f32.mxu1 %v13332_v21 }
 0x41f   : > { %6147 = vmatmul.mubr.msk.f32.gmra.mxu1 %vm12969_vm12, %v3895_v46 }
 0x420   : > { %4708 = vmatprep.mubr.f32.mxu1 %v13332_v21 }
 0x4af   : > { %v4019_v29 = vpop.f32.mrf.mxu0 }
 0x4b0   : > { %v10974_v43 = vadd.f32 %v4019_v29, %v3898_v40 }
 0x4b1   : > { %v4021_v0 = vpop.f32.mrf.mxu0 }
 0x4b2   : > { %13363 = vst [vmem:[#allocation57_spill] sm:$0xff] %v10974_v43  ;;  %v10981_v42 = vmul.f32 100.0, %v10974_v43 }
 0x4b3   : > { %v4025_v54 = vpop.f32.mrf.mxu0 }
 0x4b4   : > { %13365 = vst [vmem:[#allocation54_spill] sm:$0xff] %v10981_v42  ;;  %v4211_v63 = vmin.f32 %v10981_v42, 20.0 }
 0x4b5   : > { %v4027_v7 = vpop.f32.mrf.mxu0 }
 0x4b6   : > { %v4243_v23 = vmul.f32 1.442695, %v4211_v63 }
 0x4b7   : > { %v4031_v49 = vpop.f32.mrf.mxu0 }
 0x4b8   : > { %v10986_v22 = vadd.f32 %v4031_v49, %v10968_v57  ;;  %6602 = vpow2.f32 %v4243_v23 }
 0x4b9   : > { %v4033_v16 = vpop.f32.mrf.mxu0 }
 0x4ba   : > { %13367 = vst [vmem:[#allocation46_spill] sm:$0xff] %v10986_v22  ;;  %v10989_v61 = vadd.f32 %v4033_v16, %v10968_v57  ;;  %v11000_v48 = vmul.f32 100.0, %v10986_v22  ;;  %v3902_v16 = vpop.permute.xlu0 %3901 }
 0x4bb   : > { %v4037_v36 = vpop.f32.mrf.mxu0  ;;  %v11021_v41 = vadd.f32 %v4025_v54, %v3902_v16  ;;  %v11023_v44 = vadd.f32 %v4027_v7, %v3902_v16 }
 0x4bc   : > { %13368 = vst [vmem:[#allocation53_spill] sm:$0xff] %v10989_v61  ;;  %v10997_v51 = vadd.f32 %v4037_v36, %v10991_v6  ;;  %v11003_v26 = vmul.f32 100.0, %v10989_v61  ;;  %v4219_v25 = vmin.f32 %v11000_v48, 20.0  ;;  %v11018_v36 = vadd.f32 %v4021_v0, %v3898_v40 }
 0x4bd   : > { %v4039_v10 = vpop.f32.mrf.mxu0  ;;  %13372 = vst [vmem:[#allocation47_spill] sm:$0xff] %v11021_v41  ;;  %13373 = vst [vmem:[#allocation41_spill] sm:$0xff] %v11023_v44  ;;  %v11032_v28 = vmul.f32 100.0, %v11021_v41 }
 0x4be   : > { %v11006_v5 = vadd.f32 %v4039_v10, %v10991_v6  ;;  %v11011_v30 = vmul.f32 100.0, %v10997_v51  ;;  %v4220_v29 = vmin.f32 %v11003_v26, 20.0  ;;  %13371 = vst [vmem:[#allocation49_spill] sm:$0xff] %v11018_v36  ;;  %v4259_v11 = vmul.f32 1.442695, %v4219_v25 }
 0x4bf   : > { %v4043_v46 = vpop.f32.mrf.mxu0  ;;  %v11027_v23 = vmul.f32 100.0, %v11018_v36  ;;  %13376 = vst [vmem:[#allocation19_spill] sm:$0xff] %v11032_v28  ;;  %v11035_v25 = vmul.f32 100.0, %v11023_v44 }
 0x4c0   : > { %v11016_v49 = vmul.f32 100.0, %v11006_v5  ;;  %v4223_v10 = vmin.f32 %v11011_v30, 20.0  ;;  %v4261_v45 = vmul.f32 1.442695, %v4220_v29  ;;  %6604 = vpow2.f32 %v4259_v11 }
 0x4c1   : > { %v4045_v32 = vpop.f32.mrf.mxu0  ;;  %13374 = vst [vmem:[#allocation45_spill] sm:$0xff] %v11027_v23  ;;  %13377 = vst [vmem:[#allocation34_spill] sm:$0xff] %v11035_v25  ;;  %v11038_v29 = vadd.f32 %v4043_v46, %v10960_v38  ;;  %v4215_v46 = vmin.f32 %v11032_v28, 20.0  ;;  %vm4447_vm2 = vcmp.gt.f32.partialorder %v11011_v30, 20.0 }
 0x4c2   : > { %v4224_v56 = vmin.f32 %v11016_v49, 20.0  ;;  %v4267_v52 = vmul.f32 1.442695, %v4223_v10  ;;  %6606 = vpow2.f32 %v4261_v45  ;;  %v11043_v10 = vadd.f32 %v4045_v32, %v10960_v38 }
 0x4c3   : > { %v4132_v33 = vpop.f32.mrf.mxu1  ;;  %v4049_v54 = vpop.f32.mrf.mxu0  ;;  %v11057_v32 = vmul.f32 100.0, %v11038_v29  ;;  %v4251_v3 = vmul.f32 1.442695, %v4215_v46  ;;  %vm4448_vm6 = vcmp.gt.f32.partialorder %v11016_v49, 20.0 }
 0x4c4   : > { %v11029_v0 = vadd.f32 %v4132_v33, %v3898_v40  ;;  %v4269_v19 = vmul.f32 1.442695, %v4224_v56  ;;  %13379 = vst [vmem:[#allocation62_spill] sm:$0xff] %v11043_v10  ;;  %v4212_v33 = vmin.f32 %v11027_v23, 20.0  ;;  %6608 = vpow2.f32 %v4267_v52 }
 0x4c5   : > { %v4134_v63 = vpop.f32.mrf.mxu1  ;;  %v11049_v35 = vadd.f32 %v4049_v54, %v10952_v60  ;;  %v11065_v52 = vmul.f32 100.0, %v11043_v10  ;;  %v6603_v54 = vpop.eup %6602  ;;  %vm4451_vm8 = vcmp.gt.f32.partialorder %v11057_v32, 20.0 }
 0x4c6   : > { %13375 = vst [vmem:[#allocation16_spill] sm:$0xff] %v11029_v0  ;;  %v11040_v8 = vadd.f32 %v4134_v63, %v3898_v40  ;;  %v11052_v45 = vmul.f32 100.0, %v11029_v0  ;;  %v4216_v40 = vmin.f32 %v11035_v25, 20.0  ;;  %6610 = vpow2.f32 %v4269_v19  ;;  %v4051_v31 = vpop.f32.mrf.mxu0 }
 0x4c7   : > { %v4138_v1 = vpop.f32.mrf.mxu1  ;;  %13381 = vst [vmem:[#allocation64_spill] sm:$0xff] %v11049_v35  ;;  %v4245_v13 = vmul.f32 1.442695, %v4212_v33  ;;  %v11071_v4 = vmul.f32 100.0, %v11049_v35  ;;  %v4227_v33 = vmin.f32 %v11057_v32, 20.0  ;;  %v4307_v20 = vadd.f32 1.0, %v6603_v54 }
 0x4c8   : > { %13378 = vst [vmem:[#allocation22_spill] sm:$0xff] %v11040_v8  ;;  %v11046_v37 = vadd.f32 %v4138_v1, %v3902_v16  ;;  %13382 = vst [vmem:[#allocation65_spill] sm:$0xff] %v11052_v45  ;;  %v11060_v63 = vmul.f32 100.0, %v11040_v8  ;;  %v4213_v9 = vmin.f32 %v11052_v45, 20.0  ;;  %v4253_v19 = vmul.f32 1.442695, %v4216_v40  ;;  %v4055_v40 = vpop.f32.mrf.mxu0 }
 0x4c9   : > { %v4140_v15 = vpop.f32.mrf.mxu1  ;;  %v4228_v62 = vmin.f32 %v11065_v52, 20.0  ;;  %6612 = vpow2.f32 %v4245_v13  ;;  %v11097_v59 = vadd.f32 %v4051_v31, %v10952_v60  ;;  %v4275_v53 = vmul.f32 1.442695, %v4227_v33 }
 0x4ca   : > { %13380 = vst [vmem:[#allocation63_spill] sm:$0xff] %v11046_v37  ;;  %13383 = vst [vmem:[#allocation66_spill] sm:$0xff] %v11060_v63  ;;  %v11062_v1 = vadd.f32 %v4140_v15, %v3902_v16  ;;  %v11068_v17 = vmul.f32 100.0, %v11046_v37  ;;  %v4214_v47 = vmin.f32 %v11060_v63, 20.0  ;;  %v4247_v39 = vmul.f32 1.442695, %v4213_v9  ;;  %v4057_v0 = vpop.f32.mrf.mxu0 }
 0x4cb   : > { %v4144_v7 = vpop.f32.mrf.mxu1  ;;  %6614 = vpow2.f32 %v4251_v3  ;;  %13391 = vst [vmem:[#allocation74_spill] sm:$0xff] %v11097_v59  ;;  %v11103_v9 = vmul.f32 1.442695, %v4228_v62  ;;  %v11122_v43 = vadd.f32 %v4055_v40, %v10978_v12  ;;  %vm4455_vm5 = vcmp.gt.f32.partialorder %v11071_v4, 20.0 }
 0x4cc   : > { %13384 = vst [vmem:[#allocation67_spill] sm:$0xff] %v11062_v1  ;;  %13385 = vst [vmem:[#allocation68_spill] sm:$0xff] %v11068_v17  ;;  %v11075_v15 = vadd.f32 %v4144_v7, %v10968_v57  ;;  %v11085_v34 = vmul.f32 100.0, %v11062_v1  ;;  %v4217_v7 = vmin.f32 %v11068_v17, 20.0  ;;  %6616 = vpow2.f32 %v4253_v19 }
 0x4cd   : > { %v4146_v11 = vpop.f32.mrf.mxu1  ;;  %v6605_v24 = vpop.eup %6604  ;;  %6618 = vlog2.f32 %v4307_v20  ;;  %v4249_v27 = vmul.f32 1.442695, %v4214_v47  ;;  %v11115_v20 = vmul.f32 100.0, %v11097_v59  ;;  %v11142_v36 = vmul.f32 100.0, %v11122_v43 }
 0x4ce   : > { %13386 = vst [vmem:[#allocation69_spill] sm:$0xff] %v11075_v15  ;;  %v11078_v16 = vadd.f32 %v4146_v11, %v10968_v57  ;;  %13388 = vst [vmem:[#allocation71_spill] sm:$0xff] %v11085_v34  ;;  %v4231_v11 = vmin.f32 %v11071_v4, 20.0  ;;  %v11094_v54 = vmul.f32 100.0, %v11075_v15  ;;  %v4218_v18 = vmin.f32 %v11085_v34, 20.0 }
 0x4cf   : > { %v4150_v56 = vpop.f32.mrf.mxu1  ;;  %v6607_v14 = vpop.eup %6606  ;;  %v4255_v3 = vmul.f32 1.442695, %v4217_v7  ;;  %6620 = vpow2.f32 %v4247_v39  ;;  %v4315_v8 = vadd.f32 1.0, %v6605_v24  ;;  %v11125_v24 = vadd.f32 %v4057_v0, %v10978_v12 }
 0x4d0   : > { %13387 = vst [vmem:[#allocation70_spill] sm:$0xff] %v11078_v16  ;;  %v11090_v46 = vadd.f32 %v4150_v56, %v10991_v6  ;;  %13390 = vst [vmem:[#allocation73_spill] sm:$0xff] %v11094_v54  ;;  %v11100_v13 = vmul.f32 100.0, %v11078_v16  ;;  %v11111_v19 = vmul.f32 1.442695, %v4231_v11  ;;  %v4221_v47 = vmin.f32 %v11094_v54, 20.0 }
 0x4d1   : > { %v4152_v50 = vpop.f32.mrf.mxu1  ;;  %v6609_v33 = vpop.eup %6608  ;;  %v4316_v62 = vadd.f32 1.0, %v6607_v14  ;;  %6622 = vpow2.f32 %v4275_v53  ;;  %v4257_v11 = vmul.f32 1.442695, %v4218_v18  ;;  %v4232_v18 = vmin.f32 %v11115_v20, 20.0 }
 0x4d2   : > { %13389 = vst [vmem:[#allocation72_spill] sm:$0xff] %v11090_v46  ;;  %13392 = vst [vmem:[#allocation75_spill] sm:$0xff] %v11100_v13  ;;  %v11106_v2 = vmul.f32 100.0, %v11090_v46  ;;  %v4222_v7 = vmin.f32 %v11100_v13, 20.0  ;;  %6624 = vpow2.f32 %v4249_v27  ;;  %v4319_v63 = vadd.f32 1.0, %v6609_v33 }
 0x4d3   : > { %v11081_v58 = vpop.f32.mrf.mxu1  ;;  %v6611_v39 = vpop.eup %6610  ;;  %6626 = vpow2.f32 %v4255_v3  ;;  %v11132_v27 = vadd.f32 %v4152_v50, %v10991_v6  ;;  %vm4459_vm15 = vcmp.gt.f32.partialorder %v11142_v36, 20.0  ;;  %vm4456_vm4 = vcmp.gt.f32.partialorder %v11115_v20, 20.0 }
 0x4d4   : > { %v4225_v14 = vmin.f32 %v11106_v2, 20.0  ;;  %6628 = vlog2.f32 %v4315_v8  ;;  %v4265_v40 = vmul.f32 1.442695, %v4222_v7  ;;  %v4320_v33 = vadd.f32 1.0, %v6611_v39  ;;  %v4061_v50 = vpop.f32.mrf.mxu0 }
 0x4d5   : > { %v4158_v57 = vpop.f32.mrf.mxu1  ;;  %13395 = vst [vmem:[#allocation78_spill] sm:$0xff] %v11132_v27  ;;  %6630 = vlog2.f32 %v4316_v62  ;;  %v11166_v39 = vadd.f32 %v11081_v58, %v10960_v38 }
 0x4d6   : > { %v11109_v31 = vadd.f32 %v4158_v57, %v10960_v38  ;;  %6632 = vpow2.f32 %v4257_v11  ;;  %v4271_v6 = vmul.f32 1.442695, %v4225_v14  ;;  %v11151_v1 = vpop.eup %6612 }
 0x4d7   : > { %v4162_v56 = vpop.f32.mrf.mxu1  ;;  %6634 = vlog2.f32 %v4319_v63  ;;  %13399 = vst [vmem:[#allocation82_spill] sm:$0xff] %v11166_v39 }
 0x4d8   : > { %13393 = vst [vmem:[#allocation76_spill] sm:$0xff] %v11109_v31  ;;  %v11129_v37 = vmul.f32 100.0, %v11109_v31  ;;  %v11157_v11 = vadd.f32 %v4162_v56, %v10952_v60  ;;  %v11162_v63 = vpop.eup %6614  ;;  %v4235_v56 = vmin.f32 %v11142_v36, 20.0 }
 0x4d9   : > { %v4164_v21 = vpop.f32.mrf.mxu1 }
 0x4da   : > { %v11119_v45 = vadd.f32 %v4164_v21, %v10952_v60  ;;  %v4263_v21 = vmul.f32 1.442695, %v4221_v47  ;;  %v4230_v47 = vmin.f32 %v11129_v37, 20.0  ;;  %13398 = vst [vmem:[#allocation81_spill] sm:$0xff] %v11157_v11  ;;  %v4285_v60 = vmul.f32 1.442695, %v4232_v18 }
 0x4db   : > { %v4168_v57 = vpop.f32.mrf.mxu1  ;;  %v11187_v18 = vmul.f32 100.0, %v11157_v11  ;;  %v4291_v16 = vmul.f32 1.442695, %v4235_v56  ;;  %vm4454_vm7 = vcmp.gt.f32.partialorder %v11129_v37, 20.0 }
 0x4dc   : > { %13394 = vst [vmem:[#allocation77_spill] sm:$0xff] %v11119_v45  ;;  %v11136_v0 = vmul.f32 100.0, %v11119_v45  ;;  %v11139_v3 = vadd.f32 %v4168_v57, %v10978_v12  ;;  %6636 = vpow2.f32 %v4263_v21  ;;  %v11154_v57 = vmul.f32 100.0, %v11132_v27  ;;  %v11172_v21 = vpop.eup %6616  ;;  %v13417_v37 = vld [vmem:[#allocation78_spill] sm:$0xff] }
 0x4dd   : > { %v4170_v53 = vpop.f32.mrf.mxu1  ;;  %6638 = vpow2.f32 %v4265_v40  ;;  %v11178_v42 = vpop.eup %6618  ;;  %v4281_v40 = vmul.f32 1.442695, %v4230_v47  ;;  %v4233_v27 = vmin.f32 %v11187_v18, 20.0  ;;  %vm4457_vm12 = vcmp.gt.f32.partialorder %v11187_v18, 20.0 }
 0x4de   : > { %13396 = vst [vmem:[#allocation79_spill] sm:$0xff] %v11139_v3  ;;  %v11145_v8 = vadd.f32 %v4170_v53, %v10978_v12  ;;  %v11149_v62 = vmul.f32 100.0, %v11139_v3  ;;  %v11160_v12 = vmul.f32 100.0, %v11125_v24  ;;  %v4234_v14 = vmin.f32 %v11136_v0, 20.0  ;;  %13400 = vst [vmem:[#allocation83_spill] sm:$0xff] %v11178_v42  ;;  %v11190_v15 = vpop.eup %6620  ;;  %v13415_v18 = vld [vmem:[#allocation82_spill] sm:$0xff] }
 0x4df   : > { %v4174_v7 = vpop.f32.mrf.mxu1  ;;  %v11170_v53 = vadd.f32 %v4061_v50, %v10944_v55  ;;  %6640 = vlog2.f32 %v4320_v33  ;;  %v4063_v50 = vpop.f32.mrf.mxu0  ;;  %v4226_v34 = vmin.f32 %v11154_v57, 20.0  ;;  %vm4458_vm3 = vcmp.gt.f32.partialorder %v11136_v0, 20.0 }
 0x4e0   : > { %13397 = vst [vmem:[#allocation80_spill] sm:$0xff] %v11145_v8  ;;  %v11176_v17 = vmul.f32 100.0, %v11145_v8  ;;  %6642 = vpow2.f32 %v4271_v6  ;;  %v4237_v38 = vmin.f32 %v11149_v62, 20.0  ;;  %v11182_v58 = vadd.f32 %v4174_v7, %v10944_v55  ;;  %v6623_v44 = vpop.eup %6622 }
 0x4e1   : > { %v4176_v41 = vpop.f32.mrf.mxu1  ;;  %6644 = vpow2.f32 %v11103_v9  ;;  %v4236_v33 = vmin.f32 %v11160_v12, 20.0  ;;  %v11193_v6 = vmul.f32 100.0, %v11166_v39  ;;  %v4289_v47 = vmul.f32 1.442695, %v4234_v14  ;;  %v11206_v46 = vpop.eup %6624  ;;  %v13412_v4 = vld [vmem:[#allocation81_spill] sm:$0xff] }
 0x4e2   : > { %6646 = vpow2.f32 %v11111_v19  ;;  %v11197_v7 = vmul.f32 100.0, %v11170_v53  ;;  %v4238_v9 = vmin.f32 %v11176_v17, 20.0  ;;  %v11201_v54 = vadd.f32 %v4063_v50, %v10944_v55  ;;  %v11211_v14 = vpop.eup %6626 }
 0x4e3   : > { %v11204_v22 = vadd.f32 %v4176_v41, %v10944_v55  ;;  %6648 = vpow2.f32 %v4281_v40  ;;  %v4295_v61 = vmul.f32 1.442695, %v4237_v38  ;;  %v11209_v19 = vmul.f32 100.0, %v11182_v58  ;;  %v11217_v50 = vpop.eup %6628 }
 0x4e4   : > { %6650 = vpow2.f32 %v4285_v60  ;;  %v4293_v56 = vmul.f32 1.442695, %v4236_v33  ;;  %v11215_v39 = vmul.f32 100.0, %v11201_v54  ;;  %v4273_v41 = vmul.f32 1.442695, %v4226_v34  ;;  %v11220_v40 = vpop.eup %6630 }
 0x4e5   : > { %6652 = vpow2.f32 %v4289_v47  ;;  %v4239_v55 = vmin.f32 %v11197_v7, 20.0  ;;  %v4229_v38 = vmin.f32 %v11193_v6, 20.0  ;;  %v4297_v31 = vmul.f32 1.442695, %v4238_v9  ;;  %v11226_v60 = vpop.eup %6632 }
 0x4e6   : > { %6654 = vpow2.f32 %v4291_v16  ;;  %v11224_v42 = vmul.f32 100.0, %v11204_v22  ;;  %v4323_v33 = vadd.f32 1.0, %v6623_v44  ;;  %v4241_v11 = vmin.f32 %v11209_v19, 20.0  ;;  %v11229_v10 = vpop.eup %6634 }
 0x4e7   : > { %6656 = vpow2.f32 %v4295_v61  ;;  %v4287_v34 = vmul.f32 1.442695, %v4233_v27  ;;  %v4240_v47 = vmin.f32 %v11215_v39, 20.0  ;;  %v4299_v23 = vmul.f32 1.442695, %v4239_v55 }
 0x4e8   : > { %6658 = vpow2.f32 %v4293_v56  ;;  %v4279_v9 = vmul.f32 1.442695, %v4229_v38  ;;  %v4242_v35 = vmin.f32 %v11224_v42, 20.0  ;;  %v4303_v44 = vmul.f32 1.442695, %v4241_v11 }
 0x4e9   : > { %v6637_v45 = vpop.eup %6636  ;;  %6660 = vpow2.f32 %v4273_v41  ;;  %v4301_v59 = vmul.f32 1.442695, %v4240_v47  ;;  %vm4464_vm9 = vcmp.gt.f32.partialorder %v11215_v39, 20.0  ;;  %vm4463_vm11 = vcmp.gt.f32.partialorder %v11197_v7, 20.0 }
 0x4ea   : > { %v6639_v16 = vpop.eup %6638  ;;  %6662 = vpow2.f32 %v4297_v31  ;;  %v4317_v27 = vadd.f32 1.0, %v6637_v45  ;;  %v4305_v28 = vmul.f32 1.442695, %v4242_v35  ;;  %vm4466_vm14 = vcmp.gt.f32.partialorder %v11224_v42, 20.0 }
 0x4eb   : > { %6664 = vlog2.f32 %v4323_v33  ;;  %v4318_v41 = vadd.f32 1.0, %v6639_v16  ;;  %vm4460_vm10 = vcmp.gt.f32.partialorder %v11160_v12, 20.0  ;;  %vm4465_vm13 = vcmp.gt.f32.partialorder %v11209_v19, 20.0  ;;  %v13403_v12 = vld [vmem:[#allocation19_spill] sm:$0xff] }
 0x4ec   : > { %v11233_v3 = vpop.eup %6640  ;;  %6666 = vpow2.f32 %v4287_v34  ;;  %vm4462_vm0 = vcmp.gt.f32.partialorder %v11176_v17, 20.0  ;;  %vm4461_vm1 = vcmp.gt.f32.partialorder %v11149_v62, 20.0 }
 0x4ed   : > { %v6643_v61 = vpop.eup %6642  ;;  %6668 = vpow2.f32 %v4299_v23 }
 0x4ee   : > { %v6645_v8 = vpop.eup %6644  ;;  %6670 = vpow2.f32 %v4279_v9  ;;  %v4321_v38 = vadd.f32 1.0, %v6643_v61 }
 0x4ef   : > { %v6647_v56 = vpop.eup %6646  ;;  %6672 = vpow2.f32 %v4303_v44  ;;  %v4324_v25 = vadd.f32 1.0, %v6645_v8 }
 0x4f0   : > { %v6649_v55 = vpop.eup %6648  ;;  %6674 = vpow2.f32 %v4301_v59  ;;  %v4327_v33 = vadd.f32 1.0, %v6647_v56 }
 0x4f1   : > { %v6651_v31 = vpop.eup %6650  ;;  %6676 = vlog2.f32 %v4317_v27  ;;  %v4326_v34 = vadd.f32 1.0, %v6649_v55 }
 0x4f2   : > { %v6653_v13 = vpop.eup %6652  ;;  %6678 = vpow2.f32 %v4305_v28  ;;  %v4328_v23 = vadd.f32 1.0, %v6651_v31 }
 0x4f3   : > { %v6655_v11 = vpop.eup %6654  ;;  %6680 = vlog2.f32 %v4318_v41  ;;  %v4330_v35 = vadd.f32 1.0, %v6653_v13 }
 0x4f4   : > { %v6657_v47 = vpop.eup %6656  ;;  %6682 = vlog2.f32 %v4321_v38  ;;  %v4331_v9 = vadd.f32 1.0, %v6655_v11 }
 0x4f5   : > { %v6659_v45 = vpop.eup %6658  ;;  %6684 = vlog2.f32 %v4324_v25  ;;  %v4333_v59 = vadd.f32 1.0, %v6657_v47 }
 0x4f6   : > { %v6661_v16 = vpop.eup %6660  ;;  %6686 = vlog2.f32 %v4327_v33  ;;  %v4332_v8 = vadd.f32 1.0, %v6659_v45 }
 0x4f7   : > { %v6663_v44 = vpop.eup %6662  ;;  %6688 = vlog2.f32 %v4326_v34  ;;  %v4322_v45 = vadd.f32 1.0, %v6661_v16 }
 0x4f8   : > { %v6665_v61 = vpop.eup %6664  ;;  %6690 = vlog2.f32 %v4328_v23  ;;  %v4334_v56 = vadd.f32 1.0, %v6663_v44  ;;  %v4312_v44 = vadd.f32 1.0, %v11172_v21  ;;  %v4366_v21 = vmul.f32 0.6931472, %v11233_v3 }
 0x4f9   : > { %v6667_v27 = vpop.eup %6666  ;;  %6692 = vlog2.f32 %v4330_v35 }
 0x4fa   : > { %v6669_v28 = vpop.eup %6668  ;;  %6694 = vlog2.f32 %v4331_v9  ;;  %v4329_v13 = vadd.f32 1.0, %v6667_v27 }
 0x4fb   : > { %v6671_v41 = vpop.eup %6670  ;;  %6696 = vlog2.f32 %v4333_v59  ;;  %v4335_v55 = vadd.f32 1.0, %v6669_v28  ;;  %v4311_v28 = vadd.f32 1.0, %v11162_v63  ;;  %v4358_v63 = vmul.f32 0.6931472, %v11220_v40 }
 0x4fc   : > { %v6673_v38 = vpop.eup %6672  ;;  %6698 = vlog2.f32 %v4332_v8  ;;  %v4325_v47 = vadd.f32 1.0, %v6671_v41  ;;  %v4314_v8 = vadd.f32 1.0, %v11226_v60  ;;  %v4308_v41 = vadd.f32 1.0, %v11151_v1 }
 0x4fd   : > { %v6675_v25 = vpop.eup %6674  ;;  %6700 = vlog2.f32 %v4335_v55  ;;  %v4337_v31 = vadd.f32 1.0, %v6673_v38  ;;  %v4313_v55 = vadd.f32 1.0, %v11211_v14  ;;  %v4372_v38 = vmul.f32 0.6931472, %v6665_v61 }
 0x4fe   : > { %v6677_v33 = vpop.eup %6676  ;;  %6702 = vlog2.f32 %v4334_v56  ;;  %v4336_v11 = vadd.f32 1.0, %v6675_v25  ;;  %v4364_v25 = vmul.f32 0.6931472, %v11229_v10  ;;  %v4310_v60 = vadd.f32 1.0, %v11206_v46 }
 0x4ff   : > { %v6679_v34 = vpop.eup %6678  ;;  %6704 = vlog2.f32 %v4337_v31  ;;  %v4356_v1 = vmul.f32 0.6931472, %v11217_v50  ;;  %v4419_v46 = vmul.f32 0.01, %v4372_v38  ;;  %v4416_v40 = vmul.f32 0.01, %v4366_v21 }
 0x500   : > { %v6681_v23 = vpop.eup %6680  ;;  %6706 = vlog2.f32 %v4336_v11  ;;  %v4338_v35 = vadd.f32 1.0, %v6679_v34  ;;  %v4309_v11 = vadd.f32 1.0, %v11190_v15  ;;  %v4415_v61 = vmul.f32 0.01, %v4364_v25 }
 0x501   : > { %v6683_v9 = vpop.eup %6682  ;;  %6708 = vlog2.f32 %v4329_v13  ;;  %v11251_v50 = vmul.f32 0.01, %v4358_v63  ;;  %v11253_v34 = vmul.f32 0.6931472, %v6681_v23 }
 0x502   : > { %v6685_v59 = vpop.eup %6684  ;;  %6710 = vlog2.f32 %v4338_v35 }
 0x503   : > { %v6687_v27 = vpop.eup %6686  ;;  %6712 = vlog2.f32 %v4325_v47  ;;  %v4374_v3 = vmul.f32 0.6931472, %v6685_v59  ;;  %v11255_v47 = vmul.f32 0.6931472, %v6677_v33  ;;  %v11261_v59 = vmul.f32 0.01, %v4356_v1 }
 0x504   : > { %v6689_v56 = vpop.eup %6688  ;;  %6714 = vlog2.f32 %v4322_v45 }
 0x505   : > { %v6691_v16 = vpop.eup %6690  ;;  %6716 = vlog2.f32 %v4312_v44  ;;  %v11259_v44 = vmul.f32 0.6931472, %v6683_v9  ;;  %v11265_v33 = vmul.f32 0.01, %v4374_v3  ;;  %v11269_v9 = vmul.f32 0.6931472, %v6689_v56 }
 0x506   : > { %v6693_v13 = vpop.eup %6692  ;;  %6718 = vlog2.f32 %v4314_v8  ;;  %v4382_v63 = vmul.f32 0.6931472, %v6691_v16  ;;  %v11278_v56 = vsel %vm4451_vm8, %v11038_v29, %v4419_v46  ;;  %v11284_v16 = vsel %vm4448_vm6, %v11006_v5, %v4416_v40 }
 0x507   : > { %v6695_v31 = vpop.eup %6694  ;;  %6720 = vlog2.f32 %v4311_v28  ;;  %v4380_v28 = vmul.f32 0.6931472, %v6687_v27  ;;  %v4386_v3 = vmul.f32 0.6931472, %v6693_v13  ;;  %v11290_v29 = vsel %vm4447_vm2, %v10997_v51, %v4415_v61 }
 0x508   : > { %v6697_v14 = vpop.eup %6696  ;;  %6722 = vlog2.f32 %v4308_v41  ;;  %v4388_v38 = vmul.f32 0.6931472, %v6695_v31  ;;  %v4424_v40 = vmul.f32 0.01, %v4382_v63  ;;  %vm4450_vm2 = vcmp.gt.f32.partialorder %v11154_v57, 20.0  ;;  %v13404_v63 = vld [vmem:[#allocation80_spill] sm:$0xff] }
 0x509   : > { %v6699_v10 = vpop.eup %6698  ;;  %6724 = vlog2.f32 %v4313_v55  ;;  %v4392_v1 = vmul.f32 0.6931472, %v6697_v14  ;;  %v4423_v30 = vmul.f32 0.01, %v4380_v28  ;;  %vm4444_vm6 = vcmp.gt.f32.partialorder %v11003_v26, 20.0  ;;  %v13422_v26 = vld [vmem:[#allocation70_spill] sm:$0xff] }
 0x50a   : > { %v6701_v15 = vpop.eup %6700  ;;  %6726 = vlog2.f32 %v4310_v60  ;;  %v4390_v23 = vmul.f32 0.6931472, %v6699_v10  ;;  %vm4443_vm8 = vcmp.gt.f32.partialorder %v11000_v48, 20.0  ;;  %v13425_v48 = vld [vmem:[#allocation71_spill] sm:$0xff] }
 0x50b   : > { %v6703_v45 = vpop.eup %6702  ;;  %6728 = vlog2.f32 %v4309_v11  ;;  %v4396_v35 = vmul.f32 0.6931472, %v6701_v15 }
 0x50c   : > { %v6705_v8 = vpop.eup %6704  ;;  %v4394_v60 = vmul.f32 0.6931472, %v6703_v45  ;;  %v4428_v45 = vmul.f32 0.01, %v4390_v23 }
 0x50d   : > { %v6707_v41 = vpop.eup %6706  ;;  %v4400_v55 = vmul.f32 0.6931472, %v6705_v8  ;;  %v4431_v11 = vmul.f32 0.01, %v4396_v35  ;;  %v4427_v35 = vmul.f32 0.01, %v4388_v38 }
 0x50e   : > { %v6709_v21 = vpop.eup %6708  ;;  %v4398_v25 = vmul.f32 0.6931472, %v6707_v41  ;;  %v4430_v46 = vmul.f32 0.01, %v4394_v60  ;;  %v4492_v39 = vsel %vm4460_vm10, %v11125_v24, %v4428_v45  ;;  %v13402_v60 = vld [vmem:[#allocation34_spill] sm:$0xff]  ;;  %vm4439_vm10 = vcmp.gt.f32.partialorder %v13403_v12, 20.0 }
 0x50f   : > { %v6711_v27 = vpop.eup %6710  ;;  %v4433_v14 = vmul.f32 0.01, %v4400_v55  ;;  %v4384_v8 = vmul.f32 0.6931472, %v6709_v21  ;;  %v4495_v41 = vsel %vm4463_vm11, %v11170_v53, %v4431_v11  ;;  %v4429_v55 = vmul.f32 0.01, %v4392_v1 }
 0x510   : > { %v6713_v31 = vpop.eup %6712  ;;  %v4432_v10 = vmul.f32 0.01, %v4398_v25  ;;  %v4402_v15 = vmul.f32 0.6931472, %v6711_v27  ;;  %v4426_v53 = vmul.f32 0.01, %v4386_v3  ;;  %v4491_v21 = vsel %vm4459_vm15, %v11122_v43, %v4427_v35 }
 0x511   : > { %v6715_v13 = vpop.eup %6714  ;;  %v4376_v51 = vmul.f32 0.6931472, %v6713_v31  ;;  %v4497_v38 = vsel %vm4465_vm13, %v11182_v58, %v4433_v14  ;;  %v4425_v42 = vmul.f32 0.01, %v4384_v8  ;;  %v4494_v19 = vsel %vm4462_vm0, %v13404_v63, %v4430_v46  ;;  %v13405_v58 = vld [vmem:[#allocation74_spill] sm:$0xff]  ;;  %v13406_v1 = vld [vmem:[#allocation79_spill] sm:$0xff] }
 0x512   : > { %v6717_v32 = vpop.eup %6716  ;;  %v4496_v49 = vsel %vm4464_vm9, %v11201_v54, %v4432_v10  ;;  %v4434_v5 = vmul.f32 0.01, %v4402_v15  ;;  %vm4449_vm9 = vcmp.gt.f32.partialorder %v11106_v2, 20.0  ;;  %v4370_v7 = vmul.f32 0.6931472, %v6715_v13  ;;  %v13407_v31 = vld [vmem:[#allocation64_spill] sm:$0xff] }
 0x513   : > { %v6719_v23 = vpop.eup %6718  ;;  %4547 = vmatprep.subr.mxu0 %v4496_v49  ;;  %v4350_v25 = vmul.f32 0.6931472, %v6717_v32  ;;  %v4488_v36 = vsel %vm4456_vm4, %v13405_v58, %v4424_v40  ;;  %v4422_v43 = vmul.f32 0.01, %v11269_v9  ;;  %v4493_v3 = vsel %vm4461_vm1, %v13406_v1, %v4429_v55  ;;  %v13408_v45 = vld [vmem:[#allocation45_spill] sm:$0xff]  ;;  %v13410_v14 = vld [vmem:[#allocation62_spill] sm:$0xff] }
 0x514   : > { %v6721_v61 = vpop.eup %6720  ;;  %v4498_v54 = vsel %vm4466_vm14, %v11204_v22, %v4434_v5  ;;  %4548 = vmatpush1.msra.mxu0 %v4495_v41  ;;  %v13401_v22 = vld [vmem:[#allocation75_spill] sm:$0xff]  ;;  %vm4440_vm14 = vcmp.gt.f32.partialorder %v13402_v60, 20.0  ;;  %v4354_v27 = vmul.f32 0.6931472, %v6719_v23  ;;  %v4487_v17 = vsel %vm4455_vm5, %v13407_v31, %v4423_v30  ;;  %v13409_v13 = vld [vmem:[#allocation77_spill] sm:$0xff]  ;;  %v13414_v40 = vld [vmem:[#allocation76_spill] sm:$0xff] }
 0x515   : > { %v6723_v28 = vpop.eup %6722  ;;  %4660 = vmatprep.subr.mxu1 %v4498_v54  ;;  %4549 = vmatprep.subr.mxu0 %v4492_v39  ;;  %vm4446_vm11 = vcmp.gt.f32.partialorder %v13401_v22, 20.0  ;;  %v4421_v10 = vmul.f32 0.01, %v4376_v51  ;;  %v4348_v15 = vmul.f32 0.6931472, %v6721_v61  ;;  %vm4436_vm15 = vcmp.gt.f32.partialorder %v13408_v45, 20.0 }
 0x516   : > { %v6725_v24 = vpop.eup %6724  ;;  %4661 = vmatpush1.msra.mxu1 %v4497_v38  ;;  %4550 = vmatpush1.msra.mxu0 %v4491_v21  ;;  %v4490_v9 = vsel %vm4458_vm3, %v13409_v13, %v4426_v53  ;;  %vm13411_vm13 = vcmp.gt.f32.partialorder %v11065_v52, 20.0  ;;  %v4418_v35 = vmul.f32 0.01, %v4370_v7  ;;  %v4342_v8 = vmul.f32 0.6931472, %v6723_v28  ;;  %v13413_v46 = vld [vmem:[#allocation83_spill] sm:$0xff] }
 0x517   : > { %v6727_v11 = vpop.eup %6726  ;;  %4662 = vmatprep.subr.mxu1 %v4494_v19  ;;  %4551 = vmatprep.subr.mxu0 %v4488_v36  ;;  %v4484_v62 = vsel %vm13411_vm13, %v13410_v14, %v11265_v33  ;;  %v4489_v32 = vsel %vm4457_vm12, %v13412_v4, %v4425_v42  ;;  %v4417_v49 = vmul.f32 0.01, %v11259_v44  ;;  %v4352_v5 = vmul.f32 0.6931472, %v6725_v24  ;;  %v13420_v39 = vld [vmem:[#allocation46_spill] sm:$0xff]  ;;  %v13421_v7 = vld [vmem:[#allocation73_spill] sm:$0xff] }
 0x518   : > { %v6729_v20 = vpop.eup %6728  ;;  %4663 = vmatpush1.msra.mxu1 %v4493_v3  ;;  %4552 = vmatpush1.msra.mxu0 %v4487_v17  ;;  %v4340_v0 = vmul.f32 0.6931472, %v13413_v46  ;;  %v4486_v23 = vsel %vm4454_vm7, %v13414_v40, %v4422_v43  ;;  %v4414_v52 = vmul.f32 0.01, %v11253_v34  ;;  %v4408_v33 = vmul.f32 0.01, %v4350_v25 }
 0x519   : > { %4664 = vmatprep.subr.mxu1 %v4490_v9  ;;  %4553 = vmatprep.subr.mxu0 %v4484_v62  ;;  %v4346_v41 = vmul.f32 0.6931472, %v6727_v11  ;;  %vm13416_vm12 = vcmp.gt.f32.partialorder %v11193_v6, 20.0  ;;  %v4413_v44 = vmul.f32 0.01, %v11255_v47  ;;  %v13418_v34 = vld [vmem:[#allocation53_spill] sm:$0xff]  ;;  %v4475_v57 = vsel %vm4443_vm8, %v13420_v39, %v11261_v59 }
 0x51a   : > { %4665 = vmatpush1.msra.mxu1 %v4489_v32  ;;  %4554 = vmatpush1.msra.mxu0 %v11278_v56  ;;  %v4485_v55 = vsel %vm13416_vm12, %v13415_v18, %v4421_v10  ;;  %v4407_v30 = vmul.f32 0.01, %v4348_v15  ;;  %v4344_v51 = vmul.f32 0.6931472, %v6729_v20  ;;  %v4482_v56 = vsel %vm4450_vm2, %v13417_v37, %v4418_v35  ;;  %v13423_v28 = vld [vmem:[#allocation41_spill] sm:$0xff]  ;;  %v13426_v59 = vld [vmem:[#allocation47_spill] sm:$0xff]  ;;  %v2779_v32 = vpop.permute.xlu1 %2778 }
 0x51b   : > { %4666 = vmatprep.subr.mxu1 %v4486_v23  ;;  %4555 = vmatprep.subr.mxu0 %v11284_v16  ;;  %v4476_v61 = vsel %vm4444_vm6, %v13418_v34, %v11251_v50  ;;  %v4410_v6 = vmul.f32 0.01, %v4354_v27  ;;  %v4404_v54 = vmul.f32 0.01, %v4342_v8  ;;  %v13419_v16 = vld [vmem:[#allocation72_spill] sm:$0xff]  ;;  %vm4445_vm0 = vcmp.gt.f32.partialorder %v13421_v7, 20.0 }
 0x51c   : > { %4667 = vmatpush1.msra.mxu1 %v4485_v55  ;;  %4556 = vmatpush1.msra.mxu0 %v11290_v29  ;;  %v4481_v47 = vsel %vm4449_vm9, %v13419_v16, %v4417_v49  ;;  %v4409_v53 = vmul.f32 0.01, %v4352_v5  ;;  %v4403_v29 = vmul.f32 0.01, %v4340_v0  ;;  %v4478_v50 = vsel %vm4446_vm11, %v13422_v26, %v4414_v52  ;;  %v13424_v21 = vld [vmem:[#allocation69_spill] sm:$0xff]  ;;  %v13427_v63 = vld [vmem:[#allocation54_spill] sm:$0xff] }
 0x51d   : > { %4668 = vmatprep.subr.mxu1 %v4482_v56  ;;  %4557 = vmatprep.subr.mxu0 %v4476_v61  ;;  %v4472_v2 = vsel %vm4440_vm14, %v13423_v28, %v4408_v33  ;;  %v4406_v38 = vmul.f32 0.01, %v4346_v41  ;;  %v4477_v42 = vsel %vm4445_vm0, %v13424_v21, %v4413_v44  ;;  %vm4442_vm4 = vcmp.gt.f32.partialorder %v13425_v48, 20.0  ;;  %v13428_v22 = vld [vmem:[#allocation68_spill] sm:$0xff]  ;;  %v13429_v19 = vld [vmem:[#allocation67_spill] sm:$0xff]  ;;  %v13430_v58 = vld [vmem:[#allocation49_spill] sm:$0xff]  ;;  %v2775_v41 = vpop.permute.xlu0 %2774 }
 0x51e   : > { %4669 = vmatpush1.msra.mxu1 %v4481_v47  ;;  %4558 = vmatpush1.msra.mxu0 %v4475_v57  ;;  %v4471_v25 = vsel %vm4439_vm10, %v13426_v59, %v4407_v30  ;;  %v4405_v24 = vmul.f32 0.01, %v4344_v51  ;;  %vm4435_vm5 = vcmp.gt.f32.partialorder %v13427_v63, 20.0  ;;  %vm4441_vm1 = vcmp.gt.f32.partialorder %v13428_v22, 20.0  ;;  %v4499_v43 = vld [vmem:[%s12768_s2 + $0x40] sm:$0xff]  ;;  %v13431_v12 = vld [vmem:[#allocation63_spill] sm:$0xff]  ;;  %v2646_v49 = vpop.permute.xlu1 %2645 }
 0x51f   : > { %4670 = vmatprep.subr.mxu1 %v4478_v50  ;;  %4559 = vmatprep.subr.mxu0 %v4472_v2  ;;  %v4474_v60 = vsel %vm4442_vm4, %v13429_v19, %v4410_v6  ;;  %v4468_v36 = vsel %vm4436_vm15, %v13430_v58, %v4404_v54  ;;  %v4473_v27 = vsel %vm4441_vm1, %v13431_v12, %v4409_v53  ;;  %v13432_v11 = vld [vmem:[#allocation66_spill] sm:$0xff]  ;;  %v13433_v1 = vld [vmem:[#allocation57_spill] sm:$0xff]  ;;  %v13436_v15 = vld [vmem:[#allocation16_spill] sm:$0xff]  ;;  %vm13437_vm8 = vcmask 523264  }
 0x520   : > { %4671 = vmatpush1.msra.mxu1 %v4477_v42  ;;  %4560 = vmatpush1.msra.mxu0 %v4471_v25  ;;  %vm4438_vm3 = vcmp.gt.f32.partialorder %v13432_v11, 20.0  ;;  %v4467_v3 = vsel %vm4435_vm5, %v13433_v1, %v4403_v29  ;;  %v13434_v31 = vld [vmem:[#allocation65_spill] sm:$0xff]  ;;  %v13435_v17 = vld [vmem:[#allocation22_spill] sm:$0xff]  ;;  %v13438_v20 = vmov 0.0   ;;  %vm13439_vm2 = vmmov %vm13437_vm8 }
 0x521   : > { %4672 = vmatprep.subr.mxu1 %v4474_v60  ;;  %4561 = vmatprep.subr.mxu0 %v4468_v36  ;;  %vm4437_vm7 = vcmp.gt.f32.partialorder %v13434_v31, 20.0  ;;  %v4470_v10 = vsel %vm4438_vm3, %v13435_v17, %v4406_v38  ;;  %v4500_v13 = vld [vmem:[%s12768_s2 + $0x48] sm:$0xff]  ;;  %vm13440_vm6 = vmmov %vm13439_vm2  ;;  %v4501_v9 = vld [vmem:[%s12768_s2 + $0x50] sm:$0xff]  ;;  %v2771_v55 = vpop.permute.xlu0 %2770 }
 0x522   : > { %4673 = vmatpush1.msra.mxu1 %v4473_v27  ;;  %4562 = vmatpush1.msra.mxu0 %v4467_v3  ;;  %v4469_v45 = vsel %vm4437_vm7, %v13436_v15, %v4405_v24  ;;  %vm13441_vm9 = vmmov %vm13439_vm2  ;;  %v4502_v14 = vld [vmem:[%s12768_s2 + $0x58] sm:$0xff]  ;;  %v4503_v62 = vld [vmem:[%s12768_s2 + $0x60] sm:$0xff]  ;;  %v2971_v5 = vpop.permute.xlu1 %2970 }
 0x523   : > { %4674 = vmatprep.subr.mxu1 %v4470_v10  ;;  %6148 = vmatmul.mubr.msk.f32.vlgmr.msra.gmra.mxu0 %vm13437_vm8, %v4499_v43  ;;  %vm13442_vm11 = vmmov %vm13439_vm2  ;;  %v4504_v35 = vld [vmem:[%s12768_s2 + $0x68] sm:$0xff]  ;;  %v4505_v8 = vld [vmem:[%s12768_s2 + $0x70] sm:$0xff] }
 0x524   : > { %4675 = vmatpush1.msra.mxu1 %v4469_v45  ;;  %4601 = vmatprep.mubr.f32.mxu0 %v13438_v20  ;;  %vm13443_vm14 = vmmov %vm13439_vm2  ;;  %v4506_v4 = vld [vmem:[%s12768_s2 + $0x78] sm:$0xff]  ;;  %v13456_v34 = vld [vmem:[#allocation8_spill] sm:$0xff] }
 0x525   : > { %6156 = vmatmul.mubr.msk.f32.vlgmr.msra.gmra.mxu1 %vm13439_vm2, %v4499_v43  ;;  %vm13444_vm10 = vmmov %vm13439_vm2  ;;  %v2651_v30 = vpop.permute.xlu0 %2650  ;;  %v2709_v61 = vmul.f32 %v2646_v49, %v13456_v34  ;;  %v13457_v6 = vld [vmem:[#allocation7_spill] sm:$0xff]  ;;  %v13458_v16 = vld [vmem:[#allocation12_spill] sm:$0xff] }
 0x526   : > { %4714 = vmatprep.mubr.f32.mxu1 %v13438_v20  ;;  %vm13445_vm15 = vmmov %vm13439_vm2  ;;  %v2641_v46 = vpop.permute.xlu1 %2640  ;;  %v2711_v54 = vmul.f32 %v2646_v49, %v13457_v6  ;;  %v2837_v47 = vmul.f32 %v2775_v41, %v13458_v16  ;;  %v13459_v39 = vld [vmem:[#allocation6_spill] sm:$0xff]  ;;  %v13460_v29 = vld [vmem:[#allocation9_spill] sm:$0xff]  ;;  %v2841_v42 = vmul.f32 %v2779_v32, %v13458_v16  ;;  %v2833_v12 = vmul.f32 %v2771_v55, %v13458_v16 }
 0x527   : > { %6149 = vmatmul.mubr.msk.f32.gmra.mxu0 %vm13440_vm6, %v4500_v13  ;;  %vm13446_vm13 = vmmov %vm13439_vm2  ;;  %v2839_v57 = vmul.f32 %v2775_v41, %v13459_v39  ;;  %v2710_v7 = vmul.f32 %v2646_v49, %v13460_v29  ;;  %v13461_v26 = vld [vmem:[#allocation10_spill] sm:$0xff]  ;;  %v13462_v28 = vld [vmem:[#allocation13_spill] sm:$0xff]  ;;  %v2843_v25 = vmul.f32 %v2779_v32, %v13459_v39  ;;  %v2705_v19 = vmul.f32 %v2641_v46, %v13456_v34 }
 0x528   : > { %4607 = vmatprep.mubr.f32.mxu0 %v13438_v20  ;;  %vm13447_vm12 = vmmov %vm13439_vm2  ;;  %v2712_v50 = vmul.f32 %v2646_v49, %v13461_v26  ;;  %v2838_v2 = vmul.f32 %v2775_v41, %v13462_v28  ;;  %v13463_v38 = vld [vmem:[#allocation14_spill] sm:$0xff]  ;;  %v2842_v48 = vmul.f32 %v2779_v32, %v13462_v28  ;;  %v2901_v63 = vadd.f32 %v2837_v47, %v2709_v61 }
 0x529   : > { %6157 = vmatmul.mubr.msk.f32.gmra.mxu1 %vm13441_vm9, %v4500_v13  ;;  %vm13448_vm0 = vmmov %vm13439_vm2  ;;  %v11463_v37 = vpop.permute.xlu0 %2635  ;;  %v2840_v21 = vmul.f32 %v2775_v41, %v13463_v38  ;;  %v2844_v24 = vmul.f32 %v2779_v32, %v13463_v38  ;;  %v2903_v22 = vadd.f32 %v2839_v57, %v2711_v54  ;;  %v2706_v60 = vmul.f32 %v2641_v46, %v13460_v29  ;;  %v13464_v13 = vld [vmem:[#allocation15_spill] sm:$0xff]  ;;  %v13468_v54 = vld [vmem:[#allocation18_spill] sm:$0xff] }
 0x52a   : > { %4720 = vmatprep.mubr.f32.mxu1 %v13438_v20  ;;  %vm13449_vm4 = vmmov %vm13448_vm0  ;;  %v2967_v0 = vpop.permute.xlu1 %2966  ;;  %v2902_v58 = vadd.f32 %v2838_v2, %v2710_v7  ;;  %v2707_v43 = vmul.f32 %v2641_v46, %v13457_v6  ;;  %v2834_v27 = vmul.f32 %v2771_v55, %v13462_v28  ;;  %v2835_v11 = vmul.f32 %v2771_v55, %v13459_v39 }
 0x52b   : > { %6150 = vmatmul.mubr.msk.f32.gmra.mxu0 %vm13442_vm11, %v4501_v9  ;;  %vm13450_vm5 = vmmov %vm13448_vm0  ;;  %v2904_v36 = vadd.f32 %v2840_v21, %v2712_v50  ;;  %v2708_v3 = vmul.f32 %v2641_v46, %v13461_v26  ;;  %v2836_v31 = vmul.f32 %v2771_v55, %v13463_v38  ;;  %v2713_v17 = vmul.f32 %v2651_v30, %v13456_v34 }
 0x52c   : > { %4613 = vmatprep.mubr.f32.mxu0 %v13438_v20  ;;  %vm13451_vm1 = vmmov %vm13448_vm0  ;;  %v2715_v10 = vmul.f32 %v2651_v30, %v13457_v6  ;;  %v2714_v15 = vmul.f32 %v2651_v30, %v13460_v29  ;;  %v2716_v45 = vmul.f32 %v2651_v30, %v13461_v26  ;;  %v3033_v32 = vmul.f32 %v2971_v5, %v13464_v13 }
 0x52d   : > { %6158 = vmatmul.mubr.msk.f32.gmra.mxu1 %vm13443_vm14, %v4501_v9  ;;  %vm13452_vm3 = vmmov %vm13448_vm0  ;;  %v11471_v53 = vpop.permute.xlu0 %2630  ;;  %v3029_v9 = vmul.f32 %v2967_v0, %v13464_v13  ;;  %v2897_v41 = vadd.f32 %v2833_v12, %v2705_v19  ;;  %v2899_v55 = vadd.f32 %v2835_v11, %v2707_v43  ;;  %v2898_v61 = vadd.f32 %v2834_v27, %v2706_v60 }
 0x52e   : > { %4726 = vmatprep.mubr.f32.mxu1 %v13438_v20  ;;  %vm13453_vm7 = vmmov %vm13448_vm0  ;;  %v11449_v40 = vpop.permute.xlu1 %2766  ;;  %v3036_v47 = vmul.f32 %v2971_v5, %v13468_v54  ;;  %v2900_v30 = vadd.f32 %v2836_v31, %v2708_v3  ;;  %v3032_v57 = vmul.f32 %v2967_v0, %v13468_v54  ;;  %v2905_v7 = vadd.f32 %v2841_v42, %v2713_v17 }
 0x52f   : > { %6151 = vmatmul.mubr.msk.f32.gmra.mxu0 %vm13444_vm10, %v4502_v14  ;;  %v2907_v50 = vadd.f32 %v2843_v25, %v2715_v10  ;;  %v11507_v21 = vadd.f32 %v3029_v9, %v2901_v63  ;;  %v11523_v42 = vmul.f32 %v11463_v37, %v13460_v29  ;;  %v11535_v63 = vmul.f32 %v11449_v40, %v13458_v16 }
 0x530   : > { %4619 = vmatprep.mubr.f32.mxu0 %v13438_v20  ;;  %v11543_v60 = vmul.f32 %v11449_v40, %v13459_v39  ;;  %v3096_v12 = vadd.f32 %v3032_v57, %v2904_v36  ;;  %v11555_v27 = vadd.f32 %v3033_v32, %v2905_v7 }
 0x531   : > { %6159 = vmatmul.mubr.msk.f32.gmra.mxu1 %vm13445_vm15, %v4502_v14  ;;  %v11489_v1 = vpop.permute.xlu0 %2620  ;;  %v13465_v14 = vld [vmem:[#allocation11_spill] sm:$0xff]  ;;  %13469 = vst [vmem:[#allocation80_spill] sm:$0xff] %v11523_v42 }
 0x532   : > { %4732 = vmatprep.mubr.f32.mxu1 %v13438_v20  ;;  %v11451_v23 = vpop.permute.xlu1 %2962  ;;  %v3035_v49 = vmul.f32 %v2971_v5, %v13465_v14  ;;  %v11617_v57 = vmul.f32 %v11489_v1, %v13457_v6 }
 0x533   : > { %6152 = vmatmul.mubr.msk.f32.gmra.mxu0 %vm13446_vm13, %v4503_v62  ;;  %v3025_v19 = vmul.f32 %v11451_v23, %v13464_v13 }
 0x534   : > { %4625 = vmatprep.mubr.f32.mxu0 %v13438_v20  ;;  %v11557_v11 = vadd.f32 %v3035_v49, %v2907_v50  ;;  %13476 = vst [vmem:[#allocation81_spill] sm:$0xff] %v11617_v57 }
 0x535   : > { %6160 = vmatmul.mubr.msk.f32.gmra.mxu1 %vm13447_vm12, %v4503_v62  ;;  %v3031_v62 = vmul.f32 %v2967_v0, %v13465_v14  ;;  %v2959_v2 = vpop.permute.xlu0 %2958  ;;  %v3089_v3 = vadd.f32 %v3025_v19, %v2897_v41 }
 0x536   : > { %4738 = vmatprep.mubr.f32.mxu1 %v13438_v20  ;;  %v11453_v52 = vpop.permute.xlu1 %2762 }
 0x537   : > { %6153 = vmatmul.mubr.msk.f32.gmra.mxu0 %vm13448_vm0, %v4504_v35  ;;  %v11573_v9 = vmul.f32 %v11453_v52, %v13458_v16  ;;  %v11593_v32 = vmul.f32 %v11453_v52, %v13463_v38 }
 0x538   : > { %4631 = vmatprep.mubr.f32.mxu0 %v13438_v20 }
 0x539   : > { %6161 = vmatmul.mubr.msk.f32.gmra.mxu1 %vm13449_vm4, %v4504_v35 }
 0x53a   : > { %4744 = vmatprep.mubr.f32.mxu1 %v13438_v20  ;;  %v11455_v33 = vpop.permute.xlu1 %2625 }
 0x53b   : > { %6154 = vmatmul.mubr.msk.f32.gmra.mxu0 %vm13450_vm5, %v4505_v8  ;;  %v2693_v49 = vmul.f32 %v11455_v33, %v13456_v34  ;;  %v2695_v41 = vmul.f32 %v11455_v33, %v13457_v6 }
 0x53c   : > { %4637 = vmatprep.mubr.f32.mxu0 %v13438_v20 }
 0x53d   : > { %6162 = vmatmul.mubr.msk.f32.gmra.mxu1 %vm13451_vm1, %v4505_v8  ;;  %v13467_v8 = vld [vmem:[#allocation17_spill] sm:$0xff] }
 0x53e   : > { %4750 = vmatprep.mubr.f32.mxu1 %v13438_v20  ;;  %v11457_v18 = vpop.permute.xlu1 %2758  ;;  %v3034_v46 = vmul.f32 %v2971_v5, %v13467_v8  ;;  %v3027_v5 = vmul.f32 %v11451_v23, %v13465_v14  ;;  %v3026_v25 = vmul.f32 %v11451_v23, %v13467_v8 }
 0x53f   : > { %6155 = vmatmul.mubr.msk.f32.gmra.mxu0 %vm13452_vm3, %v4506_v4  ;;  %v2823_v7 = vmul.f32 %v11457_v18, %v13459_v39 }
 0x540   : > { %5269 = vmatprep.mubr.f32.mxu0 %v13438_v20  ;;  %v3091_v31 = vadd.f32 %v3027_v5, %v2899_v55  ;;  %v11605_v55 = vmul.f32 %v11489_v1, %v13456_v34 }
 0x541   : > { %6163 = vmatmul.mubr.msk.f32.gmra.mxu1 %vm13453_vm7, %v4506_v4  ;;  %v3030_v4 = vmul.f32 %v2967_v0, %v13467_v8 }
 0x542   : > { %5382 = vmatprep.mubr.f32.mxu1 %v13438_v20  ;;  %v11459_v44 = vpop.permute.xlu1 %4786  ;;  %v11509_v20 = vadd.f32 %v3031_v62, %v2903_v22  ;;  %v11539_v22 = vmul.f32 %v11449_v40, %v13462_v28  ;;  %v11585_v62 = vmul.f32 %v11471_v53, %v13461_v26  ;;  %13474 = vst [vmem:[#allocation77_spill] sm:$0xff] %v11605_v55 }
 0x543   : > { %13454 = vst [vmem:[#allocation75_spill] sm:$0xff] %v11459_v44  ;;  %v2906_v44 = vadd.f32 %v2842_v48, %v2714_v15  ;;  %v11519_v0 = vadd.f32 %v3030_v4, %v2902_v58  ;;  %v11527_v48 = vmul.f32 %v11463_v37, %v13457_v6  ;;  %v11547_v58 = vmul.f32 %v11463_v37, %v13461_v26 }
 0x544   : > { %13470 = vst [vmem:[#allocation74_spill] sm:$0xff] %v11539_v22  ;;  %v11569_v15 = vmul.f32 %v11471_v53, %v13460_v29  ;;  %v11589_v4 = vmul.f32 %v11453_v52, %v13459_v39  ;;  %v11637_v55 = vmul.f32 %v2959_v2, %v13467_v8 }
 0x545   : > { %13471 = vst [vmem:[#allocation79_spill] sm:$0xff] %v11547_v58  ;;  %v11559_v17 = vadd.f32 %v3034_v46, %v2906_v44  ;;  %v11577_v44 = vmul.f32 %v11453_v52, %v13462_v28  ;;  %v2694_v46 = vmul.f32 %v11455_v33, %v13460_v29  ;;  %v2690_v52 = vmul.f32 %v11489_v1, %v13460_v29 }
 0x546   : > { %v11461_v51 = vpop.permute.xlu1 %2754  ;;  %13479 = vst [vmem:[#allocation76_spill] sm:$0xff] %v11637_v55 }
 0x547   : > { %v2818_v50 = vmul.f32 %v11461_v51, %v13462_v28  ;;  %v2820_v57 = vmul.f32 %v11461_v51, %v13463_v38 }
 0x54a   : > { %v11465_v56 = vpop.permute.xlu1 %2950 }
 0x54b   : > { %13455 = vst [vmem:[#allocation34_spill] sm:$0xff] %v11465_v56  ;;  %v2908_v56 = vadd.f32 %v2844_v24, %v2716_v45  ;;  %v3028_v24 = vmul.f32 %v11451_v23, %v13468_v54  ;;  %v11553_v23 = vmul.f32 %v11449_v40, %v13463_v38  ;;  %v3090_v40 = vadd.f32 %v3026_v25, %v2898_v61  ;;  %v2955_v45 = vpop.permute.xlu0 %2954 }
 0x54c   : > { %v3018_v55 = vmul.f32 %v2955_v45, %v13467_v8 }
 0x54d   : > { %13473 = vst [vmem:[#allocation45_spill] sm:$0xff] %v11553_v23  ;;  %v11561_v10 = vadd.f32 %v3036_v47, %v2908_v56  ;;  %v3092_v36 = vadd.f32 %v3028_v24, %v2900_v30  ;;  %v11581_v56 = vmul.f32 %v11471_v53, %v13457_v6  ;;  %v2821_v47 = vmul.f32 %v11457_v18, %v13458_v16  ;;  %v13480_v23 = vld [vmem:[#allocation30_spill] sm:$0xff] }
 0x54e   : > { %v11479_v59 = vpop.permute.xlu1 %2615  ;;  %v2822_v30 = vmul.f32 %v11457_v18, %v13462_v28  ;;  %v2824_v24 = vmul.f32 %v11457_v18, %v13463_v38  ;;  %v11642_v58 = vadd.f32 %v13480_v23, %v3089_v3  ;;  %v11651_v18 = vmul.f32 %v2959_v2, %v13468_v54 }
 0x54f   : > { %v2686_v19 = vmul.f32 %v11479_v59, %v13460_v29  ;;  %v13482_v29 = vld [vmem:[#allocation58_spill] sm:$0xff]  ;;  %v3019_v38 = vmul.f32 %v2955_v45, %v13465_v14  ;;  %v11659_v23 = vmul.f32 %v2955_v45, %v13468_v54 }
 0x550   : > { %13481 = vst [vmem:[#allocation82_spill] sm:$0xff] %v11642_v58  ;;  %v11645_v22 = vadd.f32 %v13482_v29, %v3091_v31  ;;  %13485 = vst [vmem:[#allocation72_spill] sm:$0xff] %v11651_v18 }
 0x551   : > { %13487 = vst [vmem:[#allocation73_spill] sm:$0xff] %v11659_v23 }
 0x552   : > { %v11499_v35 = vpop.permute.xlu1 %2750  ;;  %13483 = vst [vmem:[#allocation78_spill] sm:$0xff] %v11645_v22  ;;  %v13488_v22 = vld [vmem:[#allocation35_spill] sm:$0xff] }
 0x553   : > { %13466 = vst [vmem:[#allocation19_spill] sm:$0xff] %v11499_v35  ;;  %v11513_v35 = vmul.f32 %v11463_v37, %v13456_v34  ;;  %v11565_v37 = vmul.f32 %v11471_v53, %v13456_v34  ;;  %v2696_v53 = vmul.f32 %v11455_v33, %v13461_v26  ;;  %v2692_v33 = vmul.f32 %v11489_v1, %v13461_v26 }
 0x554   : > { %v11634_v1 = vmul.f32 %v2959_v2, %v13464_v13  ;;  %v11666_v58 = vadd.f32 %v13488_v22, %v3090_v40  ;;  %v13493_v22 = vld [vmem:[#allocation33_spill] sm:$0xff] }
 0x555   : > { %v2884_v39 = vadd.f32 %v2820_v57, %v2692_v33  ;;  %v11686_v40 = vadd.f32 %v13493_v22, %v3096_v12  ;;  %v2885_v33 = vadd.f32 %v2821_v47, %v2693_v49  ;;  %v2888_v49 = vadd.f32 %v2824_v24, %v2696_v53  ;;  %v13499_v24 = vld [vmem:[#allocation36_spill] sm:$0xff] }
 0x556   : > { %v11549_v43 = vpop.permute.xlu1 %4778  ;;  %13478 = vst [vmem:[#allocation83_spill] sm:$0xff] %v11634_v1  ;;  %v3017_v1 = vmul.f32 %v2955_v45, %v13464_v13  ;;  %v13490_v45 = vld [vmem:[#allocation26_spill] sm:$0xff]  ;;  %v2891_v53 = vadd.f32 %v11589_v4, %v11581_v56 }
 0x557   : > { %13472 = vst [vmem:[#allocation64_spill] sm:$0xff] %v11549_v43  ;;  %v11639_v43 = vpop.permute.xlu0 %2946  ;;  %v11675_v23 = vadd.f32 %v13490_v45, %v11507_v21  ;;  %v2887_v21 = vadd.f32 %v2823_v7, %v2695_v41  ;;  %v2886_v45 = vadd.f32 %v2822_v30, %v2694_v46  ;;  %v13496_v41 = vld [vmem:[#allocation52_spill] sm:$0xff]  ;;  %v2889_v30 = vadd.f32 %v11573_v9, %v11565_v37 }
 0x558   : > { %v3010_v31 = vmul.f32 %v11639_v43, %v13467_v8  ;;  %v11706_v47 = vadd.f32 %v13496_v41, %v11557_v11  ;;  %v2890_v11 = vadd.f32 %v11577_v44, %v11569_v15  ;;  %v2685_v37 = vmul.f32 %v11479_v59, %v13456_v34 }
 0x559   : > { %v2892_v15 = vadd.f32 %v11593_v32, %v11585_v62  ;;  %v11739_v44 = vmul.f32 %v11479_v59, %v13457_v6  ;;  %v13503_v32 = vld [vmem:[#allocation23_spill] sm:$0xff]  ;;  %v3083_v6 = vadd.f32 %v3019_v38, %v2891_v53  ;;  %v13510_v53 = vld [vmem:[#allocation73_spill] sm:$0xff] }
 0x55a   : > { %v11609_v61 = vpop.permute.xlu1 %2942  ;;  %v13477_v5 = vld [vmem:[#allocation19_spill] sm:$0xff] }
 0x55b   : > { %13475 = vst [vmem:[#allocation62_spill] sm:$0xff] %v11609_v61  ;;  %v2814_v25 = vmul.f32 %v13477_v5, %v13462_v28  ;;  %v11648_v28 = vmul.f32 %v2959_v2, %v13465_v14  ;;  %v3006_v3 = vmul.f32 %v11609_v61, %v13467_v8  ;;  %v2882_v2 = vadd.f32 %v2818_v50, %v2690_v52  ;;  %v13491_v61 = vld [vmem:[#allocation55_spill] sm:$0xff]  ;;  %v13492_v52 = vld [vmem:[#allocation61_spill] sm:$0xff] }
 0x55c   : > { %v11679_v5 = vadd.f32 %v13491_v61, %v11509_v20  ;;  %v11683_v50 = vadd.f32 %v13492_v52, %v11519_v0  ;;  %v11696_v61 = vpop.permute.xlu0 %4782  ;;  %v13495_v52 = vld [vmem:[#allocation31_spill] sm:$0xff] }
 0x55d   : > { %13484 = vst [vmem:[#allocation53_spill] sm:$0xff] %v11648_v28  ;;  %v2878_v29 = vadd.f32 %v2814_v25, %v2686_v19  ;;  %v3012_v28 = vmul.f32 %v11639_v43, %v13468_v54  ;;  %v3074_v25 = vadd.f32 %v3010_v31, %v2882_v2  ;;  %v11702_v22 = vadd.f32 %v13495_v52, %v11555_v27  ;;  %v13506_v41 = vld [vmem:[#allocation19_spill] sm:$0xff] }
 0x55e   : > { %v11653_v42 = vpop.permute.xlu1 %4770 }
 0x55f   : > { %13486 = vst [vmem:[#allocation46_spill] sm:$0xff] %v11653_v42  ;;  %v13489_v42 = vld [vmem:[#allocation56_spill] sm:$0xff]  ;;  %v3070_v0 = vadd.f32 %v3006_v3, %v2878_v29  ;;  %v13498_v3 = vld [vmem:[#allocation50_spill] sm:$0xff] }
 0x560   : > { %v11669_v18 = vadd.f32 %v13489_v42, %v3092_v36  ;;  %v13494_v42 = vld [vmem:[#allocation34_spill] sm:$0xff]  ;;  %v11714_v46 = vadd.f32 %v13498_v3, %v11561_v10  ;;  %v11747_v34 = vpop.permute.xlu0 %4774 }
 0x561   : > { %v3013_v36 = vmul.f32 %v13494_v42, %v13464_v13  ;;  %v3015_v57 = vmul.f32 %v13494_v42, %v13465_v14  ;;  %v3014_v19 = vmul.f32 %v13494_v42, %v13467_v8  ;;  %v3016_v12 = vmul.f32 %v13494_v42, %v13468_v54  ;;  %v13497_v8 = vld [vmem:[#allocation59_spill] sm:$0xff]  ;;  %v13507_v3 = vld [vmem:[#allocation6_spill] sm:$0xff] }
 0x562   : > { %v11694_v20 = vpop.permute.xlu1 %4766  ;;  %v3076_v14 = vadd.f32 %v3012_v28, %v2884_v39  ;;  %v11710_v7 = vadd.f32 %v13497_v8, %v11559_v17  ;;  %v11726_v17 = vmul.f32 %v11461_v51, %v13458_v16  ;;  %v3283_v10 = vadd.f32 %v13499_v24, %v3070_v0  ;;  %v13500_v28 = vld [vmem:[#allocation39_spill] sm:$0xff]  ;;  %v13511_v24 = vld [vmem:[#allocation14_spill] sm:$0xff] }
 0x563   : > { %v3077_v27 = vadd.f32 %v3013_v36, %v2885_v33  ;;  %v3079_v39 = vadd.f32 %v3015_v57, %v2887_v21  ;;  %v3289_v29 = vadd.f32 %v13500_v28, %v3074_v25  ;;  %v3078_v2 = vadd.f32 %v3014_v19, %v2886_v45  ;;  %v13501_v36 = vld [vmem:[#allocation42_spill] sm:$0xff]  ;;  %v13502_v25 = vld [vmem:[#allocation32_spill] sm:$0xff] }
 0x564   : > { %v3450_v56 = vadd.f32 %v13501_v36, %v3076_v14  ;;  %v3080_v4 = vadd.f32 %v3016_v12, %v2888_v49  ;;  %v11743_v57 = vmul.f32 %v11479_v59, %v13461_v26  ;;  %v3081_v19 = vadd.f32 %v3017_v1, %v2889_v30  ;;  %v13505_v26 = vld [vmem:[#allocation44_spill] sm:$0xff] }
 0x565   : > { %v3293_v62 = vadd.f32 %v13502_v25, %v3077_v27  ;;  %v3454_v45 = vadd.f32 %v13503_v32, %v3079_v39  ;;  %v3082_v12 = vadd.f32 %v3018_v55, %v2890_v11  ;;  %v3295_v59 = vadd.f32 %v13505_v26, %v3078_v2  ;;  %v13509_v27 = vld [vmem:[#allocation43_spill] sm:$0xff]  ;;  %v13519_v26 = vld [vmem:[#allocation45_spill] sm:$0xff] }
 0x566   : > { %v11745_v33 = vpop.permute.xlu1 %4758  ;;  %v2893_v49 = vadd.f32 %v11535_v63, %v11513_v35  ;;  %v2895_v1 = vadd.f32 %v11543_v60, %v11527_v48  ;;  %v2813_v8 = vmul.f32 %v13506_v41, %v13458_v16  ;;  %v11767_v30 = vmul.f32 %v13506_v41, %v13507_v3  ;;  %v13513_v63 = vld [vmem:[#allocation29_spill] sm:$0xff]  ;;  %v13514_v60 = vld [vmem:[#allocation80_spill] sm:$0xff] }
 0x567   : > { %v3456_v39 = vadd.f32 %v13509_v27, %v3080_v4  ;;  %v3084_v11 = vadd.f32 %v13510_v53, %v2892_v15  ;;  %v11775_v35 = vmul.f32 %v13506_v41, %v13511_v24  ;;  %v3299_v16 = vadd.f32 %v13513_v63, %v3081_v19  ;;  %v13517_v4 = vld [vmem:[#allocation38_spill] sm:$0xff]  ;;  %v13518_v15 = vld [vmem:[#allocation79_spill] sm:$0xff]  ;;  %v11788_v53 = vpop.permute.xlu0 %4762  ;;  %v13521_v63 = vld [vmem:[#allocation53_spill] sm:$0xff] }
 0x568   : > { %v3301_v32 = vadd.f32 %v13517_v4, %v3082_v12  ;;  %v2896_v27 = vadd.f32 %v13519_v26, %v13518_v15 }
 0x5e3   : > { %v11718_v31 = vpop.f32.mrf.mxu0 }
 0x5e5   : > { %v11732_v9 = vpop.f32.mrf.mxu1  ;;  %v4599_v42 = vpop.f32.mrf.mxu0 }
 0x5e6   : > { %v4600_v21 = vadd.f32 %v4599_v42, %v3283_v10  ;;  %v13515_v10 = vld [vmem:[#allocation74_spill] sm:$0xff] }
 0x5e7   : > { %v11749_v0 = vpop.f32.mrf.mxu1  ;;  %v11751_v14 = vpop.f32.mrf.mxu0  ;;  %v2894_v28 = vadd.f32 %v13515_v10, %v13514_v60  ;;  %v11792_v60 = vadd.f32 %v2813_v8, %v2685_v37  ;;  %v13523_v10 = vld [vmem:[#allocation51_spill] sm:$0xff]  ;;  %v13528_v8 = vld [vmem:[#allocation72_spill] sm:$0xff] }
 0x5e8   : > { %v11756_v52 = vadd.f32 %v11745_v33, %v4600_v21  ;;  %v13516_v21 = vld [vmem:[#allocation28_spill] sm:$0xff] }
 0x5e9   : > { %v11769_v38 = vpop.f32.mrf.mxu1  ;;  %v4605_v55 = vpop.f32.mrf.mxu0  ;;  %v3460_v25 = vadd.f32 %v13516_v21, %v3083_v6  ;;  %v3462_v21 = vadd.f32 %v13523_v10, %v3084_v11 }
 0x5ea   : > { %13504 = vst [vmem:[#allocation70_spill] sm:$0xff] %v11756_v52  ;;  %13508 = vst [vmem:[#allocation41_spill] sm:$0xff] %v11769_v38  ;;  %v11778_v48 = vmul.f32 100.0, %v11756_v52  ;;  %v4606_v2 = vadd.f32 %v4605_v55, %v3289_v29  ;;  %v13520_v52 = vld [vmem:[#allocation83_spill] sm:$0xff]  ;;  %v3087_v38 = vadd.f32 %v13521_v63, %v2895_v1 }
 0x5eb   : > { %v4718_v42 = vpop.f32.mrf.mxu1  ;;  %v4609_v36 = vpop.f32.mrf.mxu0  ;;  %v3085_v19 = vadd.f32 %v13520_v52, %v2893_v49 }
 0x5ec   : > { %13512 = vst [vmem:[#allocation69_spill] sm:$0xff] %v11778_v48  ;;  %v4854_v41 = vmin.f32 %v11778_v48, 20.0  ;;  %v4719_v24 = vadd.f32 %v4718_v42, %v3450_v56  ;;  %v11795_v29 = vadd.f32 %v11788_v53, %v4606_v2  ;;  %v4610_v6 = vadd.f32 %v4609_v36, %v3293_v62  ;;  %v13525_v56 = vld [vmem:[#allocation76_spill] sm:$0xff] }
 0x5ed   : > { %v4722_v55 = vpop.f32.mrf.mxu1  ;;  %v4611_v12 = vpop.f32.mrf.mxu0  ;;  %v3086_v42 = vadd.f32 %v13525_v56, %v2894_v28  ;;  %v3088_v2 = vadd.f32 %v13528_v8, %v2896_v27  ;;  %v13532_v28 = vld [vmem:[#allocation24_spill] sm:$0xff] }
 0x5ee   : > { %13522 = vst [vmem:[#allocation71_spill] sm:$0xff] %v11795_v29  ;;  %v4887_v4 = vmul.f32 1.442695, %v4854_v41  ;;  %v11799_v15 = vadd.f32 %v11788_v53, %v4719_v24  ;;  %v4723_v26 = vadd.f32 %v4722_v55, %v3454_v45  ;;  %v11803_v52 = vmul.f32 100.0, %v11795_v29  ;;  %v13531_v45 = vld [vmem:[#allocation25_spill] sm:$0xff] }
 0x5ef   : > { %v11806_v37 = vadd.f32 %v11694_v20, %v4610_v6  ;;  %v4612_v49 = vadd.f32 %v4611_v12, %v3295_v59  ;;  %v4724_v1 = vpop.f32.mrf.mxu1  ;;  %v4615_v62 = vpop.f32.mrf.mxu0  ;;  %v3305_v41 = vadd.f32 %v13531_v45, %v3085_v19  ;;  %v3466_v24 = vadd.f32 %v13532_v28, %v3087_v38  ;;  %v13538_v28 = vld [vmem:[#allocation46_spill] sm:$0xff] }
 0x5f0   : > { %13524 = vst [vmem:[#allocation47_spill] sm:$0xff] %v11799_v15  ;;  %13526 = vst [vmem:[#allocation54_spill] sm:$0xff] %v11803_v52  ;;  %v11810_v11 = vmul.f32 100.0, %v11799_v15  ;;  %v11813_v36 = vadd.f32 %v11694_v20, %v4723_v26  ;;  %v4858_v63 = vmin.f32 %v11803_v52, 20.0  ;;  %v4725_v55 = vadd.f32 %v4724_v1, %v3456_v39 }
 0x5f1   : > { %13527 = vst [vmem:[#allocation68_spill] sm:$0xff] %v11806_v37  ;;  %v11819_v6 = vmul.f32 100.0, %v11806_v37  ;;  %v11822_v59 = vadd.f32 %v11694_v20, %v4612_v49  ;;  %v4728_v27 = vpop.f32.mrf.mxu1  ;;  %v4617_v12 = vpop.f32.mrf.mxu0  ;;  %6730 = vpow2.f32 %v4887_v4  ;;  %v4616_v19 = vadd.f32 %v4615_v62, %v3299_v16 }
 0x5f2   : > { %13529 = vst [vmem:[#allocation67_spill] sm:$0xff] %v11810_v11  ;;  %13530 = vst [vmem:[#allocation49_spill] sm:$0xff] %v11813_v36  ;;  %v4860_v10 = vmin.f32 %v11810_v11, 20.0  ;;  %v11826_v26 = vmul.f32 100.0, %v11813_v36  ;;  %v4895_v56 = vmul.f32 1.442695, %v4858_v63  ;;  %v11833_v45 = vadd.f32 %v11694_v20, %v4725_v55 }
 0x5f3   : > { %13533 = vst [vmem:[#allocation63_spill] sm:$0xff] %v11819_v6  ;;  %13534 = vst [vmem:[#allocation66_spill] sm:$0xff] %v11822_v59  ;;  %v4861_v38 = vmin.f32 %v11819_v6, 20.0  ;;  %v11830_v8 = vmul.f32 100.0, %v11822_v59  ;;  %v4730_v49 = vpop.f32.mrf.mxu1  ;;  %v4621_v39 = vpop.f32.mrf.mxu0  ;;  %v11837_v48 = vadd.f32 %v13538_v28, %v4616_v19  ;;  %v4729_v15 = vadd.f32 %v4728_v27, %v3460_v25  ;;  %v13541_v27 = vld [vmem:[#allocation48_spill] sm:$0xff]  ;;  %v13554_v6 = vld [vmem:[#allocation78_spill] sm:$0xff] }
 0x5f4   : > { %13535 = vst [vmem:[#allocation57_spill] sm:$0xff] %v11826_v26  ;;  %13537 = vst [vmem:[#allocation22_spill] sm:$0xff] %v11833_v45  ;;  %v4899_v1 = vmul.f32 1.442695, %v4860_v10  ;;  %v4863_v4 = vmin.f32 %v11826_v26, 20.0  ;;  %6732 = vpow2.f32 %v4895_v56  ;;  %v11841_v63 = vmul.f32 100.0, %v11833_v45 }
 0x5f5   : > { %13536 = vst [vmem:[#allocation65_spill] sm:$0xff] %v11830_v8  ;;  %v4901_v16 = vmul.f32 1.442695, %v4861_v38  ;;  %v4862_v62 = vmin.f32 %v11830_v8, 20.0  ;;  %v4734_v11 = vpop.f32.mrf.mxu1  ;;  %v4623_v29 = vpop.f32.mrf.mxu0  ;;  %v11844_v55 = vmul.f32 100.0, %v11837_v48  ;;  %v11847_v10 = vadd.f32 %v13538_v28, %v4729_v15  ;;  %v13544_v26 = vld [vmem:[#allocation60_spill] sm:$0xff] }
 0x5f6   : > { %13539 = vst [vmem:[#allocation16_spill] sm:$0xff] %v11841_v63  ;;  %6734 = vpow2.f32 %v4899_v1  ;;  %v4905_v20 = vmul.f32 1.442695, %v4863_v4  ;;  %v4618_v25 = vadd.f32 %v4617_v12, %v3301_v32  ;;  %v3307_v56 = vadd.f32 %v13541_v27, %v3086_v42 }
 0x5f7   : > { %13540 = vst [vmem:[#allocation8_spill] sm:$0xff] %v11847_v10  ;;  %6736 = vpow2.f32 %v4901_v16  ;;  %v4903_v19 = vmul.f32 1.442695, %v4862_v62  ;;  %v4736_v38 = vpop.f32.mrf.mxu1  ;;  %v4864_v36 = vmin.f32 %v11841_v63, 20.0  ;;  %v4865_v52 = vmin.f32 %v11844_v55, 20.0  ;;  %v4627_v62 = vpop.f32.mrf.mxu0 }
 0x5f8   : > { %v11853_v45 = vmul.f32 100.0, %v11847_v10  ;;  %v4731_v1 = vadd.f32 %v4730_v49, %v3462_v21  ;;  %6738 = vpow2.f32 %v4905_v20  ;;  %v11856_v4 = vadd.f32 %v13538_v28, %v4618_v25 }
 0x5f9   : > { %v4622_v15 = vadd.f32 %v4621_v39, %v3305_v41  ;;  %v3468_v16 = vadd.f32 %v13544_v26, %v3088_v2  ;;  %v4909_v32 = vmul.f32 1.442695, %v4865_v52  ;;  %v4735_v27 = vadd.f32 %v4734_v11, %v3466_v24  ;;  %v4740_v37 = vpop.f32.mrf.mxu1 }
 0x5fa   : > { %13542 = vst [vmem:[#allocation7_spill] sm:$0xff] %v11853_v45  ;;  %13543 = vst [vmem:[#allocation12_spill] sm:$0xff] %v11856_v4  ;;  %v4867_v42 = vmin.f32 %v11853_v45, 20.0  ;;  %v11861_v12 = vadd.f32 %v13538_v28, %v4731_v1  ;;  %6740 = vpow2.f32 %v4903_v19  ;;  %v11864_v63 = vmul.f32 100.0, %v11856_v4  ;;  %v4629_v28 = vpop.f32.mrf.mxu0  ;;  %v13550_v19 = vld [vmem:[#allocation82_spill] sm:$0xff] }
 0x5fb   : > { %v11867_v21 = vadd.f32 %v11747_v34, %v4622_v15  ;;  %v4624_v49 = vadd.f32 %v4623_v29, %v3307_v56  ;;  %v4907_v41 = vmul.f32 1.442695, %v4864_v36  ;;  %6742 = vpow2.f32 %v4909_v32  ;;  %v4742_v56 = vpop.f32.mrf.mxu1 }
 0x5fc   : > { %13545 = vst [vmem:[#allocation9_spill] sm:$0xff] %v11861_v12  ;;  %13546 = vst [vmem:[#allocation10_spill] sm:$0xff] %v11864_v63  ;;  %v11870_v2 = vmul.f32 100.0, %v11861_v12  ;;  %v11873_v52 = vadd.f32 %v11747_v34, %v4735_v27  ;;  %v4866_v26 = vmin.f32 %v11864_v63, 20.0  ;;  %v4737_v39 = vadd.f32 %v4736_v38, %v3468_v16  ;;  %v4633_v12 = vpop.f32.mrf.mxu0 }
 0x5fd   : > { %v11877_v11 = vmul.f32 100.0, %v11867_v21  ;;  %v11880_v24 = vadd.f32 %v11747_v34, %v4624_v49  ;;  %v4913_v20 = vmul.f32 1.442695, %v4867_v42  ;;  %v4628_v25 = vadd.f32 %v4627_v62, %v13550_v19  ;;  %v13552_v49 = vld [vmem:[#allocation64_spill] sm:$0xff] }
 0x5fe   : > { %13547 = vst [vmem:[#allocation13_spill] sm:$0xff] %v11870_v2  ;;  %13548 = vst [vmem:[#allocation15_spill] sm:$0xff] %v11873_v52  ;;  %v4868_v29 = vmin.f32 %v11870_v2, 20.0  ;;  %v11884_v36 = vmul.f32 100.0, %v11873_v52  ;;  %v11887_v1 = vpop.eup %6730  ;;  %v4911_v15 = vmul.f32 1.442695, %v4866_v26  ;;  %v11894_v38 = vadd.f32 %v11747_v34, %v4737_v39 }
 0x5ff   : > { %13549 = vst [vmem:[#allocation17_spill] sm:$0xff] %v11880_v24  ;;  %v4869_v32 = vmin.f32 %v11877_v11, 20.0  ;;  %v11891_v27 = vmul.f32 100.0, %v11880_v24  ;;  %v11898_v59 = vadd.f32 %v13552_v49, %v4628_v25  ;;  %v4741_v62 = vadd.f32 %v4740_v37, %v13554_v6  ;;  %v4746_v6 = vpop.f32.mrf.mxu1 }
 0x600   : > { %13551 = vst [vmem:[#allocation18_spill] sm:$0xff] %v11894_v38  ;;  %v4915_v16 = vmul.f32 1.442695, %v4868_v29  ;;  %v4871_v42 = vmin.f32 %v11884_v36, 20.0  ;;  %v11903_v19 = vadd.f32 %v11775_v35, %v11743_v57  ;;  %6744 = vpow2.f32 %v4907_v41  ;;  %v13556_v35 = vld [vmem:[#allocation62_spill] sm:$0xff] }
 0x601   : > { %13553 = vst [vmem:[#allocation30_spill] sm:$0xff] %v11898_v59  ;;  %v4917_v26 = vmul.f32 1.442695, %v4869_v32  ;;  %v4870_v8 = vmin.f32 %v11891_v27, 20.0  ;;  %v11906_v4 = vpop.eup %6732  ;;  %6746 = vpow2.f32 %v4913_v20  ;;  %v11909_v34 = vmul.f32 100.0, %v11894_v38 }
 0x602   : > { %v11912_v39 = vmul.f32 100.0, %v11898_v59  ;;  %v11915_v37 = vadd.f32 %v13552_v49, %v4741_v62  ;;  %v11921_v41 = vmul.f32 %v13556_v35, %v13464_v13  ;;  %6748 = vpow2.f32 %v4911_v15 }
 0x603   : > { %v11917_v57 = vpop.eup %6734  ;;  %v4921_v29 = vmul.f32 1.442695, %v4871_v42  ;;  %v4630_v20 = vadd.f32 %v4629_v28, %v11666_v58  ;;  %6750 = vpow2.f32 %v4915_v16  ;;  %v4743_v62 = vadd.f32 %v4742_v56, %v11669_v18  ;;  %v4635_v42 = vpop.f32.mrf.mxu0 }
 0x604   : > { %13555 = vst [vmem:[#allocation58_spill] sm:$0xff] %v11915_v37  ;;  %v6737_v25 = vpop.eup %6736  ;;  %v4873_v32 = vmin.f32 %v11912_v39, 20.0  ;;  %v11926_v10 = vmul.f32 100.0, %v11915_v37  ;;  %v11931_v52 = vmul.f32 %v13556_v35, %v13468_v54  ;;  %6752 = vpow2.f32 %v4917_v26  ;;  %v4748_v18 = vpop.f32.mrf.mxu1 }
 0x605   : > { %v4919_v38 = vmul.f32 1.442695, %v4870_v8  ;;  %v11934_v15 = vadd.f32 %v13552_v49, %v4630_v20  ;;  %v6739_v58 = vpop.eup %6738  ;;  %v4872_v28 = vmin.f32 %v11909_v34, 20.0  ;;  %v11939_v37 = vadd.f32 %v13552_v49, %v4743_v62 }
 0x606   : > { %v4925_v16 = vmul.f32 1.442695, %v4873_v32  ;;  %v4875_v24 = vmin.f32 %v11926_v10, 20.0  ;;  %6754 = vpow2.f32 %v4921_v29  ;;  %v4634_v8 = vadd.f32 %v4633_v12, %v11675_v23 }
 0x607   : > { %13557 = vst [vmem:[#allocation35_spill] sm:$0xff] %v11934_v15  ;;  %13558 = vst [vmem:[#allocation56_spill] sm:$0xff] %v11939_v37  ;;  %v11942_v54 = vmul.f32 100.0, %v11934_v15  ;;  %v4747_v56 = vadd.f32 %v4746_v6, %v11679_v5  ;;  %v11946_v26 = vpop.eup %6740  ;;  %v4957_v20 = vadd.f32 1.0, %v6737_v25  ;;  %v11949_v32 = vmul.f32 100.0, %v11939_v37  ;;  %v4639_v5 = vpop.f32.mrf.mxu0 }
 0x608   : > { %v4929_v59 = vmul.f32 1.442695, %v4875_v24  ;;  %v4636_v2 = vadd.f32 %v4635_v42, %v11683_v50  ;;  %v6743_v49 = vpop.eup %6742  ;;  %6756 = vpow2.f32 %v4919_v38  ;;  %v11954_v62 = vadd.f32 %v11696_v61, %v4634_v8  ;;  %v4752_v25 = vpop.f32.mrf.mxu1 }
 0x609   : > { %v4874_v29 = vmin.f32 %v11942_v54, 20.0  ;;  %v11957_v23 = vadd.f32 %v11696_v61, %v4747_v56  ;;  %v4923_v12 = vmul.f32 1.442695, %v4872_v28  ;;  %6758 = vpow2.f32 %v4925_v16 }
 0x60a   : > { %13559 = vst [vmem:[#allocation26_spill] sm:$0xff] %v11954_v62  ;;  %v4876_v24 = vmin.f32 %v11949_v32, 20.0  ;;  %v11961_v6 = vadd.f32 %v11696_v61, %v4636_v2  ;;  %6760 = vpow2.f32 %v4929_v59  ;;  %v11964_v38 = vmul.f32 100.0, %v11954_v62 }
 0x60b   : > { %13560 = vst [vmem:[#allocation55_spill] sm:$0xff] %v11957_v23  ;;  %v4927_v50 = vmul.f32 1.442695, %v4874_v29  ;;  %v11967_v42 = vmul.f32 100.0, %v11957_v23  ;;  %6762 = vlog2.f32 %v4957_v20  ;;  %v4959_v8 = vadd.f32 1.0, %v6739_v58  ;;  %v4641_v29 = vpop.f32.mrf.mxu0 }
 0x60c   : > { %13561 = vst [vmem:[#allocation61_spill] sm:$0xff] %v11961_v6  ;;  %v4931_v56 = vmul.f32 1.442695, %v4876_v24  ;;  %v11970_v28 = vmul.f32 100.0, %v11961_v6  ;;  %v4877_v16 = vmin.f32 %v11964_v38, 20.0  ;;  %v4749_v59 = vadd.f32 %v4748_v18, %v11686_v40  ;;  %v4754_v24 = vpop.f32.mrf.mxu1  ;;  %v13563_v18 = vld [vmem:[#allocation75_spill] sm:$0xff] }
 0x60d   : > { %6764 = vpow2.f32 %v4927_v50  ;;  %v4879_v2 = vmin.f32 %v11967_v42, 20.0  ;;  %v11975_v37 = vpop.eup %6744  ;;  %v4640_v20 = vadd.f32 %v4639_v5, %v11702_v22  ;;  %v4753_v58 = vadd.f32 %v4752_v25, %v11706_v47 }
 0x60e   : > { %6766 = vpow2.f32 %v4923_v12  ;;  %v4878_v23 = vmin.f32 %v11970_v28, 20.0  ;;  %v6747_v6 = vpop.eup %6746  ;;  %v4933_v50 = vmul.f32 1.442695, %v4877_v16  ;;  %v11981_v63 = vadd.f32 %v11696_v61, %v4749_v59 }
 0x60f   : > { %6768 = vpow2.f32 %v4931_v56  ;;  %v4937_v62 = vmul.f32 1.442695, %v4879_v2  ;;  %v11983_v15 = vpop.eup %6748  ;;  %v4961_v40 = vadd.f32 1.0, %v6743_v49  ;;  %v11986_v45 = vadd.f32 %v13563_v18, %v4640_v20 }
 0x610   : > { %13562 = vst [vmem:[#allocation33_spill] sm:$0xff] %v11981_v63  ;;  %v11989_v12 = vadd.f32 %v13563_v18, %v4753_v58  ;;  %v4642_v22 = vadd.f32 %v4641_v29, %v11710_v7  ;;  %v11992_v47 = vpop.eup %6750  ;;  %6770 = vpow2.f32 %v4933_v50  ;;  %v4935_v5 = vmul.f32 1.442695, %v4878_v23 }
 0x611   : > { %13564 = vst [vmem:[#allocation34_spill] sm:$0xff] %v11986_v45  ;;  %v11995_v25 = vmul.f32 100.0, %v11981_v63  ;;  %v4755_v61 = vadd.f32 %v4754_v24, %v11714_v46  ;;  %v6753_v56 = vpop.eup %6752  ;;  %v4963_v16 = vadd.f32 1.0, %v6747_v6  ;;  %6772 = vpow2.f32 %v4937_v62 }
 0x612   : > { %13565 = vst [vmem:[#allocation31_spill] sm:$0xff] %v11989_v12  ;;  %v11999_v49 = vmul.f32 100.0, %v11986_v45  ;;  %v12002_v2 = vmul.f32 100.0, %v11989_v12  ;;  %6774 = vlog2.f32 %v4959_v8  ;;  %v12006_v59 = vadd.f32 %v13563_v18, %v4642_v22  ;;  %v13568_v12 = vld [vmem:[#allocation77_spill] sm:$0xff] }
 0x613   : > { %v4880_v7 = vmin.f32 %v11995_v25, 20.0  ;;  %v12009_v23 = vadd.f32 %v13563_v18, %v4755_v61  ;;  %v6755_v29 = vpop.eup %6754  ;;  %v3072_v46 = vadd.f32 %v11931_v52, %v11903_v19  ;;  %6776 = vlog2.f32 %v4961_v40 }
 0x614   : > { %13566 = vst [vmem:[#allocation52_spill] sm:$0xff] %v12006_v59  ;;  %v4881_v62 = vmin.f32 %v11999_v49, 20.0  ;;  %v4883_v6 = vmin.f32 %v12002_v2, 20.0  ;;  %6778 = vpow2.f32 %v4935_v5  ;;  %v12016_v8 = vmul.f32 100.0, %v12006_v59  ;;  %v13570_v59 = vld [vmem:[#allocation11_spill] sm:$0xff] }
 0x615   : > { %13567 = vst [vmem:[#allocation59_spill] sm:$0xff] %v12009_v23  ;;  %v4939_v20 = vmul.f32 1.442695, %v4880_v7  ;;  %v12019_v58 = vmul.f32 100.0, %v12009_v23  ;;  %v6757_v24 = vpop.eup %6756  ;;  %6780 = vlog2.f32 %v4963_v16  ;;  %v4965_v50 = vadd.f32 1.0, %v6753_v56 }
 0x616   : > { %v4941_v18 = vmul.f32 1.442695, %v4881_v62  ;;  %v4945_v22 = vmul.f32 1.442695, %v4883_v6  ;;  %v6759_v61 = vpop.eup %6758  ;;  %v4967_v52 = vadd.f32 1.0, %v6755_v29  ;;  %v4882_v19 = vmin.f32 %v12016_v8, 20.0 }
 0x617   : > { %6782 = vpow2.f32 %v4939_v20  ;;  %v4884_v40 = vmin.f32 %v12019_v58, 20.0  ;;  %v6761_v5 = vpop.eup %6760  ;;  %v2819_v7 = vmul.f32 %v11461_v51, %v13507_v3  ;;  %v3009_v63 = vmul.f32 %v11639_v43, %v13464_v13  ;;  %v13569_v62 = vld [vmem:[#allocation40_spill] sm:$0xff] }
 0x618   : > { %v2881_v16 = vadd.f32 %v11726_v17, %v13568_v12  ;;  %6784 = vpow2.f32 %v4941_v18  ;;  %v12029_v56 = vpop.eup %6762  ;;  %v3444_v29 = vadd.f32 %v13569_v62, %v3072_v46  ;;  %v4943_v6 = vmul.f32 1.442695, %v4882_v19 }
 0x619   : > { %6786 = vpow2.f32 %v4945_v22  ;;  %v4947_v20 = vmul.f32 1.442695, %v4884_v40  ;;  %v3069_v23 = vadd.f32 %v11921_v41, %v11792_v60  ;;  %v2879_v51 = vadd.f32 %v11767_v30, %v11739_v44  ;;  %v13571_v30 = vld [vmem:[#allocation21_spill] sm:$0xff] }
 0x61a   : > { %v6765_v45 = vpop.eup %6764  ;;  %6788 = vlog2.f32 %v4965_v50  ;;  %v4969_v13 = vadd.f32 1.0, %v6759_v61  ;;  %v3007_v17 = vmul.f32 %v13556_v35, %v13570_v59  ;;  %v4713_v12 = vadd.f32 %v11749_v0, %v3444_v29  ;;  %v13572_v61 = vld [vmem:[#allocation81_spill] sm:$0xff] }
 0x61b   : > { %v6767_v3 = vpop.eup %6766  ;;  %6790 = vlog2.f32 %v4967_v52  ;;  %v4971_v46 = vadd.f32 1.0, %v6761_v5  ;;  %v3073_v22 = vadd.f32 %v3009_v63, %v2881_v16  ;;  %v4970_v19 = vadd.f32 1.0, %v6765_v45 }
 0x61c   : > { %v6769_v18 = vpop.eup %6768  ;;  %6792 = vpow2.f32 %v4943_v6  ;;  %v3011_v60 = vmul.f32 %v11639_v43, %v13570_v59  ;;  %v3281_v50 = vadd.f32 %v13571_v30, %v3069_v23  ;;  %v2883_v40 = vadd.f32 %v2819_v7, %v13572_v61  ;;  %v13573_v59 = vld [vmem:[#allocation27_spill] sm:$0xff] }
 0x61d   : > { %6794 = vpow2.f32 %v4947_v20  ;;  %v4972_v41 = vadd.f32 1.0, %v6769_v18  ;;  %v6771_v44 = vpop.eup %6770  ;;  %v4966_v35 = vadd.f32 1.0, %v6757_v24  ;;  %v3071_v0 = vadd.f32 %v3007_v17, %v2879_v51  ;;  %v13574_v51 = vld [vmem:[#allocation20_spill] sm:$0xff] }
 0x61e   : > { %6796 = vlog2.f32 %v4969_v13  ;;  %v6773_v62 = vpop.eup %6772  ;;  %v12044_v52 = vadd.f32 %v11745_v33, %v4713_v12  ;;  %v4973_v63 = vadd.f32 1.0, %v6771_v44  ;;  %v4598_v43 = vadd.f32 %v11718_v31, %v3281_v50  ;;  %v13575_v50 = vld [vmem:[#allocation37_spill] sm:$0xff] }
 0x61f   : > { %6798 = vlog2.f32 %v4971_v46  ;;  %v12046_v45 = vpop.eup %6774  ;;  %v3287_v5 = vadd.f32 %v13573_v59, %v3073_v22  ;;  %v4975_v16 = vadd.f32 1.0, %v6773_v62  ;;  %v4968_v7 = vadd.f32 1.0, %v6767_v3 }
 0x620   : > { %6800 = vlog2.f32 %v4970_v19  ;;  %v6777_v23 = vpop.eup %6776  ;;  %v3075_v6 = vadd.f32 %v3011_v60, %v2883_v40  ;;  %v3442_v13 = vadd.f32 %v13574_v51, %v3071_v0  ;;  %v12053_v17 = vmul.f32 100.0, %v12044_v52 }
 0x621   : > { %6802 = vlog2.f32 %v4972_v41  ;;  %v6779_v29 = vpop.eup %6778  ;;  %v4604_v24 = vadd.f32 %v11751_v14, %v3287_v5  ;;  %v12056_v46 = vadd.f32 %v11745_v33, %v4598_v43  ;;  %v4962_v41 = vadd.f32 1.0, %v11983_v15 }
 0x622   : > { %6804 = vlog2.f32 %v4966_v35  ;;  %v6781_v20 = vpop.eup %6780  ;;  %v4974_v31 = vadd.f32 1.0, %v6779_v29  ;;  %v4711_v3 = vadd.f32 %v11732_v9, %v3442_v13  ;;  %v4856_v30 = vmin.f32 %v12053_v17, 20.0 }
 0x623   : > { %6806 = vlog2.f32 %v4973_v63  ;;  %v12060_v19 = vadd.f32 %v11788_v53, %v4604_v24  ;;  %v3448_v61 = vadd.f32 %v13575_v50, %v3075_v6  ;;  %v12066_v9 = vmul.f32 100.0, %v12056_v46  ;;  %v13577_v63 = vld [vmem:[#allocation41_spill] sm:$0xff] }
 0x624   : > { %v6783_v12 = vpop.eup %6782  ;;  %6808 = vlog2.f32 %v4975_v16  ;;  %v12069_v0 = vadd.f32 %v11745_v33, %v4711_v3  ;;  %v4964_v5 = vadd.f32 1.0, %v11992_v47  ;;  %v4891_v29 = vmul.f32 1.442695, %v4856_v30 }
 0x625   : > { %v6785_v18 = vpop.eup %6784  ;;  %v4976_v22 = vadd.f32 1.0, %v6783_v12  ;;  %6810 = vlog2.f32 %v4968_v7  ;;  %v4717_v43 = vadd.f32 %v13577_v63, %v3448_v61  ;;  %v12074_v16 = vmul.f32 100.0, %v12060_v19 }
 0x626   : > { %v6787_v14 = vpop.eup %6786  ;;  %v4977_v60 = vadd.f32 1.0, %v6785_v18  ;;  %6812 = vlog2.f32 %v4974_v31  ;;  %13576 = vst [vmem:[#allocation50_spill] sm:$0xff] %v12069_v0  ;;  %v5006_v51 = vmul.f32 0.6931472, %v6777_v23  ;;  %v4958_v33 = vadd.f32 1.0, %v11946_v26 }
 0x627   : > { %v6789_v44 = vpop.eup %6788  ;;  %v4979_v40 = vadd.f32 1.0, %v6787_v14  ;;  %6814 = vlog2.f32 %v4976_v22  ;;  %v4853_v13 = vmin.f32 %v12066_v9, 20.0  ;;  %v4960_v18 = vadd.f32 1.0, %v11975_v37 }
 0x628   : > { %v6791_v35 = vpop.eup %6790  ;;  %6816 = vlog2.f32 %v4977_v60  ;;  %v5014_v12 = vmul.f32 0.6931472, %v6789_v44  ;;  %v12080_v47 = vmul.f32 100.0, %v12069_v0  ;;  %v12083_v22 = vadd.f32 %v11788_v53, %v4717_v43 }
 0x629   : > { %v6793_v62 = vpop.eup %6792  ;;  %6818 = vlog2.f32 %v4979_v40  ;;  %v4954_v14 = vadd.f32 1.0, %v11906_v4  ;;  %v4857_v23 = vmin.f32 %v12074_v16, 20.0  ;;  %v5018_v60 = vmul.f32 0.6931472, %v6791_v35 }
 0x62a   : > { %v6795_v15 = vpop.eup %6794  ;;  %v4978_v59 = vadd.f32 1.0, %v6793_v62  ;;  %6820 = vlog2.f32 %v4962_v41  ;;  %v5010_v41 = vmul.f32 0.6931472, %v6781_v20  ;;  %v4956_v44 = vadd.f32 1.0, %v11917_v57 }
 0x62b   : > { %v6797_v7 = vpop.eup %6796  ;;  %v4980_v24 = vadd.f32 1.0, %v6795_v15  ;;  %v5057_v50 = vmul.f32 0.01, %v5006_v51  ;;  %v4998_v61 = vmul.f32 0.6931472, %v12029_v56  ;;  %vm5098_vm8 = vcmp.gt.f32.partialorder %v11942_v54, 20.0 }
 0x62c   : > { %v6799_v6 = vpop.eup %6798  ;;  %6822 = vlog2.f32 %v4978_v59  ;;  %v5022_v37 = vmul.f32 0.6931472, %v6797_v7  ;;  %v12089_v63 = vmul.f32 0.01, %v5014_v12  ;;  %v4893_v35 = vmul.f32 1.442695, %v4857_v23 }
 0x62d   : > { %v6801_v31 = vpop.eup %6800  ;;  %6824 = vlog2.f32 %v4980_v24  ;;  %v5026_v62 = vmul.f32 0.6931472, %v6799_v6  ;;  %v12091_v59 = vmul.f32 0.01, %v5018_v60  ;;  %v12093_v57 = vmul.f32 0.01, %v5010_v41 }
 0x62e   : > { %v6803_v3 = vpop.eup %6802  ;;  %6826 = vlog2.f32 %v4964_v5  ;;  %v5024_v53 = vmul.f32 0.6931472, %v6801_v31  ;;  %v12096_v5 = vmul.f32 0.6931472, %v12046_v45  ;;  %v12101_v24 = vmul.f32 0.01, %v4998_v61 }
 0x62f   : > { %v6805_v26 = vpop.eup %6804  ;;  %6828 = vpow2.f32 %v4891_v29  ;;  %v5028_v43 = vmul.f32 0.6931472, %v6803_v3  ;;  %v12099_v29 = vmul.f32 0.01, %v5022_v37  ;;  %vm5106_vm2 = vcmp.gt.f32.partialorder %v12016_v8, 20.0 }
 0x630   : > { %v6807_v30 = vpop.eup %6806  ;;  %6830 = vlog2.f32 %v4958_v33  ;;  %v5016_v15 = vmul.f32 0.6931472, %v6805_v26  ;;  %vm5101_vm6 = vcmp.gt.f32.partialorder %v11964_v38, 20.0  ;;  %v12105_v33 = vmul.f32 0.01, %v5026_v62  ;;  %v13586_v38 = vld [vmem:[#allocation31_spill] sm:$0xff] }
 0x631   : > { %v6809_v40 = vpop.eup %6808  ;;  %6832 = vlog2.f32 %v4960_v18  ;;  %v5030_v7 = vmul.f32 0.6931472, %v6807_v30  ;;  %vm5093_vm9 = vcmp.gt.f32.partialorder %v11877_v11, 20.0  ;;  %v12109_v45 = vmul.f32 100.0, %v12083_v22  ;;  %v13581_v11 = vld [vmem:[#allocation52_spill] sm:$0xff] }
 0x632   : > { %v6811_v4 = vpop.eup %6810  ;;  %6834 = vlog2.f32 %v4954_v14  ;;  %v5034_v51 = vmul.f32 0.6931472, %v6809_v40  ;;  %vm5108_vm11 = vcmp.gt.f32.partialorder %v12019_v58, 20.0  ;;  %vm5105_vm14 = vcmp.gt.f32.partialorder %v11999_v49, 20.0  ;;  %v13588_v49 = vld [vmem:[#allocation33_spill] sm:$0xff] }
 0x633   : > { %v6813_v20 = vpop.eup %6812  ;;  %6836 = vlog2.f32 %v4956_v44  ;;  %v5066_v12 = vmul.f32 0.01, %v5024_v53  ;;  %v12113_v18 = vmul.f32 0.01, %v5028_v43  ;;  %v12115_v3 = vmul.f32 0.01, %v5016_v15 }
 0x634   : > { %v6815_v56 = vpop.eup %6814  ;;  %6838 = vpow2.f32 %v4893_v35  ;;  %vm5107_vm10 = vcmp.gt.f32.partialorder %v12002_v2, 20.0  ;;  %v5032_v26 = vmul.f32 0.6931472, %v6813_v20  ;;  %vm5102_vm15 = vcmp.gt.f32.partialorder %v11970_v28, 20.0 }
 0x635   : > { %v6817_v6 = vpop.eup %6816  ;;  %vm5089_vm13 = vcmp.gt.f32.partialorder %v11844_v55, 20.0  ;;  %v4859_v60 = vmin.f32 %v12109_v45, 20.0  ;;  %v5036_v44 = vmul.f32 0.6931472, %v6815_v56  ;;  %vm5104_vm12 = vcmp.gt.f32.partialorder %v11995_v25, 20.0  ;;  %v13578_v55 = vld [vmem:[#allocation7_spill] sm:$0xff] }
 0x636   : > { %v6819_v31 = vpop.eup %6818  ;;  %v5038_v23 = vmul.f32 0.6931472, %v6817_v6  ;;  %v5069_v30 = vmul.f32 0.01, %v5030_v7  ;;  %vm5103_vm0 = vcmp.gt.f32.partialorder %v11967_v42, 20.0  ;;  %vm5100_vm4 = vcmp.gt.f32.partialorder %v11949_v32, 20.0 }
 0x637   : > { %v6821_v14 = vpop.eup %6820  ;;  %v5042_v41 = vmul.f32 0.6931472, %v6819_v31  ;;  %v5071_v61 = vmul.f32 0.01, %v5034_v51  ;;  %v5020_v40 = vmul.f32 0.6931472, %v6811_v4  ;;  %v12128_v35 = vsel %vm5089_vm13, %v11837_v48, %v5057_v50 }
 0x638   : > { %v4897_v53 = vmul.f32 1.442695, %v4859_v60  ;;  %v5008_v15 = vmul.f32 0.6931472, %v6821_v14  ;;  %v4950_v20 = vadd.f32 1.0, %v11887_v1  ;;  %vm5099_vm1 = vcmp.gt.f32.partialorder %v11926_v10, 20.0 }
 0x639   : > { %v6823_v37 = vpop.eup %6822  ;;  %v5073_v6 = vmul.f32 0.01, %v5038_v23  ;;  %v5070_v51 = vmul.f32 0.01, %v5032_v26  ;;  %v5075_v60 = vmul.f32 0.01, %v5042_v41  ;;  %v5125_v48 = vsel %vm5093_vm9, %v11867_v21, %v12089_v63 }
 0x63a   : > { %v6825_v62 = vpop.eup %6824  ;;  %v5040_v43 = vmul.f32 0.6931472, %v6823_v37  ;;  %6840 = vpow2.f32 %v4897_v53  ;;  %v5072_v14 = vmul.f32 0.01, %v5036_v44  ;;  %vm5096_vm7 = vcmp.gt.f32.partialorder %v11909_v34, 20.0  ;;  %v13579_v23 = vld [vmem:[#allocation35_spill] sm:$0xff] }
 0x63b   : > { %v6827_v56 = vpop.eup %6826  ;;  %v5044_v7 = vmul.f32 0.6931472, %v6825_v62  ;;  %vm5095_vm13 = vcmp.gt.f32.partialorder %v11884_v36, 20.0  ;;  %vm5091_vm5 = vcmp.gt.f32.partialorder %v13578_v55, 20.0  ;;  %v5130_v26 = vsel %vm5098_vm8, %v13579_v23, %v5066_v12  ;;  %v13580_v37 = vld [vmem:[#allocation10_spill] sm:$0xff]  ;;  %v13584_v12 = vld [vmem:[#allocation59_spill] sm:$0xff] }
 0x63c   : > { %v6829_v4 = vpop.eup %6828  ;;  %v5074_v31 = vmul.f32 0.01, %v5040_v43  ;;  %vm5090_vm3 = vcmp.gt.f32.partialorder %v13580_v37, 20.0  ;;  %v4885_v41 = vmul.f32 1.442695, %v4853_v13  ;;  %v4855_v44 = vmin.f32 %v12080_v47, 20.0 }
 0x63d   : > { %v6831_v1 = vpop.eup %6830  ;;  %v5076_v50 = vmul.f32 0.01, %v5044_v7  ;;  %v13582_v63 = vld [vmem:[#allocation26_spill] sm:$0xff]  ;;  %v5012_v43 = vmul.f32 0.6931472, %v6827_v56  ;;  %v13583_v7 = vld [vmem:[#allocation13_spill] sm:$0xff]  ;;  %6842 = vlog2.f32 %v4950_v20 }
 0x63e   : > { %v6833_v53 = vpop.eup %6832  ;;  %v5138_v21 = vsel %vm5106_vm2, %v13581_v11, %v5074_v31  ;;  %v5133_v62 = vsel %vm5101_vm6, %v13582_v63, %v5069_v30  ;;  %vm5092_vm9 = vcmp.gt.f32.partialorder %v13583_v7, 20.0  ;;  %v13585_v23 = vld [vmem:[#allocation34_spill] sm:$0xff]  ;;  %6844 = vpow2.f32 %v4885_v41  ;;  %v13587_v20 = vld [vmem:[#allocation61_spill] sm:$0xff]  ;;  %v13589_v41 = vld [vmem:[#allocation55_spill] sm:$0xff] }
 0x63f   : > { %v6835_v54 = vpop.eup %6834  ;;  %5221 = vmatprep.subr.mxu0 %v5138_v21  ;;  %v5140_v13 = vsel %vm5108_vm11, %v13584_v12, %v5076_v50  ;;  %v5137_v0 = vsel %vm5105_vm14, %v13585_v23, %v5073_v6  ;;  %v4889_v8 = vmul.f32 1.442695, %v4855_v44  ;;  %v5139_v30 = vsel %vm5107_vm10, %v13586_v38, %v5075_v60  ;;  %v13590_v60 = vld [vmem:[#allocation56_spill] sm:$0xff]  ;;  %v13600_v36 = vld [vmem:[#allocation9_spill] sm:$0xff]  ;;  %v13603_v37 = vld [vmem:[#allocation66_spill] sm:$0xff] }
 0x640   : > { %v6837_v31 = vpop.eup %6836  ;;  %5334 = vmatprep.subr.mxu1 %v5140_v13  ;;  %5222 = vmatpush1.msra.mxu0 %v5137_v0  ;;  %v5134_v56 = vsel %vm5102_vm15, %v13587_v20, %v5070_v51  ;;  %v5064_v11 = vmul.f32 0.01, %v5020_v40  ;;  %v5000_v58 = vmul.f32 0.6931472, %v6831_v1  ;;  %v5136_v6 = vsel %vm5104_vm12, %v13588_v49, %v5072_v14  ;;  %v13591_v14 = vld [vmem:[#allocation30_spill] sm:$0xff]  ;;  %v13598_v10 = vld [vmem:[#allocation8_spill] sm:$0xff] }
 0x641   : > { %v6839_v50 = vpop.eup %6838  ;;  %5335 = vmatpush1.msra.mxu1 %v5139_v30  ;;  %5223 = vmatprep.subr.mxu0 %v5134_v56  ;;  %v5135_v0 = vsel %vm5103_vm0, %v13589_v41, %v5071_v61  ;;  %v5004_v44 = vmul.f32 0.6931472, %v6833_v53  ;;  %6846 = vpow2.f32 %v4889_v8  ;;  %v5058_v2 = vmul.f32 0.01, %v5008_v15  ;;  %v13593_v15 = vld [vmem:[#allocation58_spill] sm:$0xff]  ;;  %v13597_v53 = vld [vmem:[#allocation15_spill] sm:$0xff] }
 0x642   : > { %5336 = vmatprep.subr.mxu1 %v5136_v6  ;;  %5224 = vmatpush1.msra.mxu0 %v5133_v62  ;;  %v4992_v28 = vmul.f32 0.6931472, %v6835_v54  ;;  %v4953_v51 = vadd.f32 1.0, %v6839_v50  ;;  %v4952_v40 = vadd.f32 1.0, %v6829_v4  ;;  %v5132_v25 = vsel %vm5100_vm4, %v13590_v60, %v12113_v18  ;;  %v13605_v12 = vld [vmem:[#allocation68_spill] sm:$0xff]  ;;  %v13606_v23 = vld [vmem:[#allocation57_spill] sm:$0xff] }
 0x643   : > { %5337 = vmatpush1.msra.mxu1 %v5135_v0  ;;  %5225 = vmatprep.subr.mxu0 %v5130_v26  ;;  %vm13592_vm8 = vcmp.gt.f32.partialorder %v11912_v39, 20.0  ;;  %v5060_v61 = vmul.f32 0.01, %v5012_v43  ;;  %v4996_v1 = vmul.f32 0.6931472, %v6837_v31  ;;  %v5131_v4 = vsel %vm5099_vm1, %v13593_v15, %v12105_v33  ;;  %v13594_v26 = vld [vmem:[#allocation17_spill] sm:$0xff] }
 0x644   : > { %v5129_v42 = vsel %vm13592_vm8, %v13591_v14, %v12099_v29  ;;  %5338 = vmatprep.subr.mxu1 %v5132_v25  ;;  %vm13595_vm2 = vcmp.gt.f32.partialorder %v11891_v27, 20.0  ;;  %v5054_v18 = vmul.f32 0.01, %v5000_v58  ;;  %6848 = vlog2.f32 %v4953_v51  ;;  %v13596_v39 = vld [vmem:[#allocation18_spill] sm:$0xff]  ;;  %v13601_v43 = vld [vmem:[#allocation65_spill] sm:$0xff]  ;;  %v13610_v20 = vld [vmem:[#allocation71_spill] sm:$0xff] }
 0x645   : > { %5226 = vmatpush1.msra.mxu0 %v5129_v42  ;;  %v5126_v32 = vsel %vm13595_vm2, %v13594_v26, %v12115_v3  ;;  %5339 = vmatpush1.msra.mxu1 %v5131_v4  ;;  %v5128_v29 = vsel %vm5096_vm7, %v13596_v39, %v5064_v11  ;;  %v5127_v21 = vsel %vm5095_vm13, %v13597_v53, %v12091_v59  ;;  %v5056_v27 = vmul.f32 0.01, %v5004_v44  ;;  %v13599_v3 = vld [vmem:[#allocation12_spill] sm:$0xff]  ;;  %v13607_v7 = vld [vmem:[#allocation22_spill] sm:$0xff]  ;;  %v13609_v30 = vld [vmem:[#allocation49_spill] sm:$0xff] }
 0x646   : > { %5227 = vmatprep.subr.mxu0 %v5126_v32  ;;  %v5123_v33 = vsel %vm5091_vm5, %v13598_v10, %v12093_v57  ;;  %5340 = vmatprep.subr.mxu1 %v5128_v29  ;;  %v5122_v63 = vsel %vm5090_vm3, %v13599_v3, %v5058_v2  ;;  %v5055_v34 = vmul.f32 0.01, %v12096_v5  ;;  %v5050_v62 = vmul.f32 0.01, %v4992_v28  ;;  %v13602_v57 = vld [vmem:[#allocation63_spill] sm:$0xff]  ;;  %v13604_v5 = vld [vmem:[#allocation16_spill] sm:$0xff] }
 0x647   : > { %5228 = vmatpush1.msra.mxu0 %v5125_v48  ;;  %6850 = vlog2.f32 %v4952_v40  ;;  %5341 = vmatpush1.msra.mxu1 %v5127_v21  ;;  %v5124_v59 = vsel %vm5092_vm9, %v13600_v36, %v5060_v61  ;;  %vm5086_vm6 = vcmp.gt.f32.partialorder %v13601_v43, 20.0  ;;  %vm5085_vm11 = vcmp.gt.f32.partialorder %v13602_v57, 20.0  ;;  %v6841_v48 = vpop.eup %6840  ;;  %v13608_v31 = vld [vmem:[#allocation54_spill] sm:$0xff]  ;;  %v13611_v11 = vld [vmem:[#allocation67_spill] sm:$0xff]  ;;  %v6998_v60 = vld [vmem:[%s12769_s3 + $0x20] sm:$0xff] }
 0x648   : > { %5229 = vmatprep.subr.mxu0 %v5122_v63  ;;  %v5052_v55 = vmul.f32 0.01, %v4996_v1  ;;  %5342 = vmatprep.subr.mxu1 %v5124_v59  ;;  %v5118_v54 = vsel %vm5086_vm6, %v13603_v37, %v5054_v18  ;;  %vm5088_vm14 = vcmp.gt.f32.partialorder %v13604_v5, 20.0  ;;  %v5117_v13 = vsel %vm5085_vm11, %v13605_v12, %v12101_v24  ;;  %v13612_v24 = vld [vmem:[#allocation47_spill] sm:$0xff]  ;;  %v6997_v2 = vld [vmem:[%s12769_s3 + $0x30] sm:$0xff]  ;;  %v6999_v14 = vld [vmem:[%s12769_s3 + $0x28] sm:$0xff] }
 0x649   : > { %5230 = vmatpush1.msra.mxu0 %v12128_v35  ;;  %vm5087_vm10 = vcmp.gt.f32.partialorder %v13606_v23, 20.0  ;;  %5343 = vmatpush1.msra.mxu1 %v5123_v33  ;;  %v5120_v8 = vsel %vm5088_vm14, %v13607_v7, %v5056_v27  ;;  %vm5082_vm15 = vcmp.gt.f32.partialorder %v13608_v31, 20.0  ;;  %v4955_v38 = vadd.f32 1.0, %v6841_v48  ;;  %v6996_v0 = vld [vmem:[%s12769_s3 + $0x38] sm:$0xff]  ;;  %v7000_v15 = vld [vmem:[%s12769_s3 + $0x10] sm:$0xff]  ;;  %v13613_v26 = vld [vmem:[#allocation69_spill] sm:$0xff] }
 0x64a   : > { %5231 = vmatprep.subr.mxu0 %v5118_v54  ;;  %5344 = vmatprep.subr.mxu1 %v5120_v8  ;;  %v5119_v35 = vsel %vm5087_vm10, %v13609_v30, %v5055_v34  ;;  %v5114_v56 = vsel %vm5082_vm15, %v13610_v20, %v5050_v62  ;;  %vm5084_vm12 = vcmp.gt.f32.partialorder %v13611_v11, 20.0  ;;  %v6843_v58 = vpop.eup %6842  ;;  %v7083_v6 = vmov 10   ;;  %v7001_v18 = vld [vmem:[%s12769_s3 + $0x18] sm:$0xff]  ;;  %v13614_v39 = vld [vmem:[#allocation70_spill] sm:$0xff]  ;;  %v7002_v21 = vld [vmem:[%s12769_s3] sm:$0xff] }
 0x64b   : > { %5232 = vmatpush1.msra.mxu0 %v5117_v13  ;;  %5345 = vmatpush1.msra.mxu1 %v5119_v35  ;;  %v5116_v50 = vsel %vm5084_vm12, %v13612_v24, %v5052_v55  ;;  %6852 = vlog2.f32 %v4955_v38  ;;  %v6845_v49 = vpop.eup %6844  ;;  %v4984_v28 = vmul.f32 0.6931472, %v6843_v58  ;;  %vm5081_vm0 = vcmp.gt.f32.partialorder %v12074_v16, 20.0  ;;  %v7003_v10 = vld [vmem:[%s12769_s3 + $0x8] sm:$0xff]  ;;  %v5141_v43 = vld [vmem:[%s12768_s2 + $0x80] sm:$0xff]  ;;  %v5147_v37 = vld [vmem:[%s12768_s2 + $0xb0] sm:$0xff] }
 0x64c   : > { %5233 = vmatprep.subr.mxu0 %v5114_v56  ;;  %5346 = vmatprep.subr.mxu1 %v5116_v50  ;;  %v4949_v41 = vadd.f32 1.0, %v6845_v49  ;;  %vm5078_vm4 = vcmp.gt.f32.partialorder %v13613_v26, 20.0  ;;  %vm5083_vm5 = vcmp.gt.f32.partialorder %v12109_v45, 20.0  ;;  %vm5080_vm1 = vcmp.gt.f32.partialorder %v12053_v17, 20.0  ;;  %v13615_v17 = vld [vmem:[#allocation50_spill] sm:$0xff]  ;;  %v5145_v55 = vld [vmem:[%s12768_s2 + $0xa0] sm:$0xff] }
 0x64d   : > { %6390 = vset.pattern.permute.xlu0 %v7083_v6  ;;  %6391 = vset.pattern.permute.xlu1 %v7083_v6  ;;  %v5046_v61 = vmul.f32 0.01, %v4984_v28  ;;  %vm5077_vm3 = vcmp.gt.f32.partialorder %v12066_v9, 20.0  ;;  %vm5079_vm7 = vcmp.gt.f32.partialorder %v12080_v47, 20.0  ;;  %vm13616_vm13 = vcmask 523264   ;;  %v5142_v9 = vld [vmem:[%s12768_s2 + $0x88] sm:$0xff] }
 0x64e   : > { %5178 = vperm.xlu0 %6390, %v6996_v0   ;;  %v6847_v44 = vpop.eup %6846  ;;  %5174 = vperm.xlu1 %6391, %v6997_v2   ;;  %6854 = vlog2.f32 %v4949_v41  ;;  %vm13618_vm9 = vmmov %vm13616_vm13  ;;  %v5144_v47 = vld [vmem:[%s12768_s2 + $0x98] sm:$0xff]  ;;  %v5146_v48 = vld [vmem:[%s12768_s2 + $0xa8] sm:$0xff]  ;;  %v7084_v23 = vmov 11  }
 0x64f   : > { %v4951_v51 = vadd.f32 1.0, %v6847_v44  ;;  %v5110_v29 = vsel %vm5078_vm4, %v13614_v39, %v5046_v61  ;;  %vm13619_vm8 = vmmov %vm13618_vm9  ;;  %v5148_v54 = vld [vmem:[%s12768_s2 + $0xb8] sm:$0xff]  ;;  %v5752_v13 = vld [vmem:[%s12769_s3] sm:$0x1] }
 0x650   : > { %vm13620_vm2 = vmmov %vm13619_vm8 }
 0x651   : > { %v6849_v40 = vpop.eup %6848  ;;  %6856 = vlog2.f32 %v4951_v51  ;;  %vm13621_vm6 = vmmov %vm13620_vm2 }
 0x652   : > { %5166 = vperm.xlu0 %6390, %v6998_v60   ;;  %v4990_v25 = vmul.f32 0.6931472, %v6849_v40  ;;  %5170 = vperm.xlu1 %6391, %v6999_v14   ;;  %vm13622_vm11 = vmmov %vm13620_vm2 }
 0x653   : > { %vm13623_vm14 = vmmov %vm13620_vm2 }
 0x654   : > { %v6851_v42 = vpop.eup %6850  ;;  %v5049_v1 = vmul.f32 0.01, %v4990_v25  ;;  %vm13624_vm10 = vmmov %vm13620_vm2 }
 0x655   : > { %v4988_v32 = vmul.f32 0.6931472, %v6851_v42  ;;  %vm13625_vm15 = vmmov %vm13620_vm2 }
 0x656   : > { %5158 = vperm.xlu0 %6390, %v7000_v15   ;;  %v5113_v4 = vsel %vm5081_vm0, %v12060_v19, %v5049_v1  ;;  %5162 = vperm.xlu1 %6391, %v7001_v18   ;;  %vm13626_vm12 = vmmov %vm13620_vm2 }
 0x657   : > { %5234 = vmatpush1.msra.mxu0 %v5113_v4  ;;  %v5048_v19 = vmul.f32 0.01, %v4988_v32  ;;  %vm13627_vm0 = vmmov %vm13620_vm2 }
 0x658   : > { %v6853_v53 = vpop.eup %6852  ;;  %5235 = vmatprep.subr.mxu0 %v5110_v29  ;;  %vm13628_vm4 = vmmov %vm13627_vm0 }
 0x659   : > { %v4994_v16 = vmul.f32 0.6931472, %v6853_v53  ;;  %v5112_v62 = vsel %vm5080_vm1, %v12044_v52, %v5048_v19  ;;  %v13617_v52 = vmov 0.0   ;;  %vm13630_vm1 = vmmov %vm13627_vm0 }
 0x65a   : > { %5150 = vperm.xlu0 %6390, %v7002_v21   ;;  %5154 = vperm.xlu1 %6391, %v7003_v10  }
 0x65b   : > { %v5051_v33 = vmul.f32 0.01, %v4994_v16  ;;  %v6855_v27 = vpop.eup %6854 }
 0x65c   : > { %v4982_v63 = vmul.f32 0.6931472, %v6855_v27 }
 0x65d   : > { %v5115_v3 = vsel %vm5083_vm5, %v12083_v22, %v5051_v33  ;;  %vm13629_vm5 = vmmov %vm13627_vm0 }
 0x65e   : > { %v6857_v34 = vpop.eup %6856  ;;  %5347 = vmatpush1.msra.mxu1 %v5115_v3  ;;  %v5045_v36 = vmul.f32 0.01, %v4982_v63  ;;  %6392 = vset.pattern.permute.xlu1 %v7084_v23 }
 0x65f   : > { %5348 = vmatprep.subr.mxu1 %v5112_v62  ;;  %v4986_v59 = vmul.f32 0.6931472, %v6857_v34  ;;  %6393 = vset.pattern.permute.xlu0 %v7084_v23 }
 0x660   : > { %v5109_v45 = vsel %vm5077_vm3, %v12056_v46, %v5045_v36  ;;  %v5143_v46 = vld [vmem:[%s12768_s2 + $0x90] sm:$0xff]  ;;  %vm13631_vm3 = vmmov %vm13627_vm0  ;;  %5755 = vperm.xlu1 %6392, %v5752_v13  }
 0x661   : > { %v5047_v57 = vmul.f32 0.01, %v4986_v59  ;;  %5236 = vmatpush1.msra.mxu0 %v5109_v45 }
 0x662   : > { %6164 = vmatmul.mubr.msk.f32.vlgmr.msra.gmra.mxu0 %vm13616_vm13, %v5141_v43 }
 0x663   : > { %v5111_v22 = vsel %vm5079_vm7, %v13615_v17, %v5047_v57  ;;  %5275 = vmatprep.mubr.f32.mxu0 %v13617_v52  ;;  %vm13632_vm7 = vmmov %vm13627_vm0 }
 0x664   : > { %5349 = vmatpush1.msra.mxu1 %v5111_v22 }
 0x665   : > { %6172 = vmatmul.mubr.msk.f32.vlgmr.msra.gmra.mxu1 %vm13618_vm9, %v5141_v43 }
 0x666   : > { %5388 = vmatprep.mubr.f32.mxu1 %v13617_v52  ;;  %6165 = vmatmul.mubr.msk.f32.gmra.mxu0 %vm13619_vm8, %v5142_v9 }
 0x667   : > { %5281 = vmatprep.mubr.f32.mxu0 %v13617_v52 }
 0x669   : > { %6173 = vmatmul.mubr.msk.f32.gmra.mxu1 %vm13620_vm2, %v5142_v9 }
 0x66a   : > { %5394 = vmatprep.mubr.f32.mxu1 %v13617_v52  ;;  %6166 = vmatmul.mubr.msk.f32.gmra.mxu0 %vm13621_vm6, %v5143_v46 }
 0x66b   : > { %5287 = vmatprep.mubr.f32.mxu0 %v13617_v52 }
 0x66d   : > { %6174 = vmatmul.mubr.msk.f32.gmra.mxu1 %vm13622_vm11, %v5143_v46 }
 0x66e   : > { %5400 = vmatprep.mubr.f32.mxu1 %v13617_v52  ;;  %6167 = vmatmul.mubr.msk.f32.gmra.mxu0 %vm13623_vm14, %v5144_v47 }
 0x66f   : > { %5293 = vmatprep.mubr.f32.mxu0 %v13617_v52 }
 0x671   : > { %6175 = vmatmul.mubr.msk.f32.gmra.mxu1 %vm13624_vm10, %v5144_v47 }
 0x672   : > { %5406 = vmatprep.mubr.f32.mxu1 %v13617_v52  ;;  %6168 = vmatmul.mubr.msk.f32.gmra.mxu0 %vm13625_vm15, %v5145_v55 }
 0x673   : > { %5299 = vmatprep.mubr.f32.mxu0 %v13617_v52 }
 0x675   : > { %6176 = vmatmul.mubr.msk.f32.gmra.mxu1 %vm13626_vm12, %v5145_v55 }
 0x676   : > { %5412 = vmatprep.mubr.f32.mxu1 %v13617_v52  ;;  %6169 = vmatmul.mubr.msk.f32.gmra.mxu0 %vm13627_vm0, %v5146_v48 }
 0x677   : > { %5305 = vmatprep.mubr.f32.mxu0 %v13617_v52 }
 0x679   : > { %6177 = vmatmul.mubr.msk.f32.gmra.mxu1 %vm13628_vm4, %v5146_v48 }
 0x67a   : > { %5418 = vmatprep.mubr.f32.mxu1 %v13617_v52  ;;  %6170 = vmatmul.mubr.msk.f32.gmra.mxu0 %vm13629_vm5, %v5147_v37 }
 0x67b   : > { %5311 = vmatprep.mubr.f32.mxu0 %v13617_v52 }
 0x67d   : > { %6178 = vmatmul.mubr.msk.f32.gmra.mxu1 %vm13630_vm1, %v5147_v37 }
 0x67e   : > { %5424 = vmatprep.mubr.f32.mxu1 %v13617_v52  ;;  %6171 = vmatmul.mubr.msk.f32.gmra.mxu0 %vm13631_vm3, %v5148_v54 }
 0x67f   : > { %5825 = vmatprep.mubr.f32.mxu0 %v13617_v52 }
 0x681   : > { %6179 = vmatmul.mubr.msk.f32.gmra.mxu1 %vm13632_vm7, %v5148_v54 }
 0x682   : > { %5896 = vmatprep.mubr.f32.mxu1 %v13617_v52 }
 0x6c9   : > { %v12312_v5 = vpop.permute.xlu1 %5174  ;;  %v12319_v7 = vpop.permute.xlu0 %5178 }
 0x6cd   : > { %v12314_v12 = vpop.permute.xlu1 %5170  ;;  %v12323_v35 = vpop.permute.xlu0 %5166 }
 0x6d1   : > { %v12321_v31 = vpop.permute.xlu1 %5162  ;;  %v5159_v6 = vpop.permute.xlu0 %5158 }
 0x6d5   : > { %v5155_v24 = vpop.permute.xlu1 %5154  ;;  %v5151_v4 = vpop.permute.xlu0 %5150 }
 0x722   : > { %v5271_v8 = vpop.f32.mrf.mxu0 }
 0x723   : > { %v12355_v21 = vadd.f32 %v5271_v8, %v5151_v4 }
 0x724   : > { %v5273_v30 = vpop.f32.mrf.mxu0 }
 0x725   : > { %v5384_v38 = vpop.f32.mrf.mxu1  ;;  %13641 = vst [vmem:[#allocation43_spill] sm:$0xff] %v12355_v21  ;;  %v12359_v33 = vadd.f32 %v5273_v30, %v5151_v4  ;;  %v12369_v45 = vmul.f32 100.0, %v12355_v21 }
 0x726   : > { %v5277_v56 = vpop.f32.mrf.mxu0  ;;  %v12357_v10 = vadd.f32 %v5384_v38, %v5151_v4 }
 0x727   : > { %v5386_v20 = vpop.f32.mrf.mxu1  ;;  %13643 = vst [vmem:[#allocation14_spill] sm:$0xff] %v12359_v33  ;;  %13646 = vst [vmem:[#allocation74_spill] sm:$0xff] %v12369_v45  ;;  %v12371_v57 = vadd.f32 %v5277_v56, %v5155_v24  ;;  %v12377_v52 = vmul.f32 100.0, %v12359_v33  ;;  %v5463_v13 = vmin.f32 %v12369_v45, 20.0 }
 0x728   : > { %v5279_v58 = vpop.f32.mrf.mxu0  ;;  %13642 = vst [vmem:[#allocation73_spill] sm:$0xff] %v12357_v10  ;;  %v12365_v36 = vadd.f32 %v5386_v20, %v5151_v4  ;;  %v12374_v22 = vmul.f32 100.0, %v12357_v10 }
 0x729   : > { %v5390_v11 = vpop.f32.mrf.mxu1  ;;  %v12325_v41 = vadd.f32 %v5279_v58, %v5155_v24  ;;  %13647 = vst [vmem:[#allocation28_spill] sm:$0xff] %v12371_v57  ;;  %13649 = vst [vmem:[#allocation79_spill] sm:$0xff] %v12377_v52  ;;  %v12390_v23 = vmul.f32 100.0, %v12371_v57  ;;  %v5464_v30 = vmin.f32 %v12377_v52, 20.0 }
 0x72a   : > { %v5283_v49 = vpop.f32.mrf.mxu0  ;;  %13645 = vst [vmem:[#allocation80_spill] sm:$0xff] %v12365_v36  ;;  %13648 = vst [vmem:[#allocation38_spill] sm:$0xff] %v12374_v22  ;;  %v12379_v9 = vadd.f32 %v5390_v11, %v5155_v24  ;;  %v12383_v48 = vmul.f32 100.0, %v12365_v36  ;;  %v5465_v38 = vmin.f32 %v12374_v22, 20.0 }
 0x72b   : > { %v5392_v50 = vpop.f32.mrf.mxu1  ;;  %13633 = vst [vmem:[#allocation36_spill] sm:$0xff] %v12325_v41  ;;  %v12329_v28 = vadd.f32 %v5283_v49, %v5159_v6  ;;  %v12332_v60 = vmul.f32 100.0, %v12325_v41  ;;  %v5497_v4 = vmul.f32 1.442695, %v5464_v30 }
 0x72c   : > { %v12327_v0 = vadd.f32 %v5392_v50, %v5155_v24  ;;  %v5285_v2 = vpop.f32.mrf.mxu0  ;;  %13650 = vst [vmem:[#allocation45_spill] sm:$0xff] %v12379_v9  ;;  %13651 = vst [vmem:[#allocation83_spill] sm:$0xff] %v12383_v48  ;;  %v12395_v20 = vmul.f32 100.0, %v12379_v9  ;;  %v5466_v50 = vmin.f32 %v12383_v48, 20.0 }
 0x72d   : > { %v5396_v44 = vpop.f32.mrf.mxu1  ;;  %13635 = vst [vmem:[#allocation42_spill] sm:$0xff] %v12329_v28  ;;  %13636 = vst [vmem:[#allocation32_spill] sm:$0xff] %v12332_v60  ;;  %v12340_v61 = vmul.f32 100.0, %v12329_v28  ;;  %v12342_v1 = vadd.f32 %v5285_v2, %v5159_v6  ;;  %v5468_v26 = vmin.f32 %v12332_v60, 20.0  ;;  %v5467_v2 = vmin.f32 %v12390_v23, 20.0 }
 0x72e   : > { %13634 = vst [vmem:[#allocation39_spill] sm:$0xff] %v12327_v0  ;;  %v5289_v40 = vpop.f32.mrf.mxu0  ;;  %v12335_v25 = vmul.f32 100.0, %v12327_v0  ;;  %v12337_v14 = vadd.f32 %v5396_v44, %v5159_v6  ;;  %13652 = vst [vmem:[#allocation53_spill] sm:$0xff] %v12395_v20  ;;  %v5495_v44 = vmul.f32 1.442695, %v5463_v13 }
 0x72f   : > { %v5398_v51 = vpop.f32.mrf.mxu1  ;;  %v5471_v53 = vmin.f32 %v12340_v61, 20.0  ;;  %v12353_v16 = vmul.f32 100.0, %v12342_v1  ;;  %v5505_v27 = vmul.f32 1.442695, %v5468_v26  ;;  %v12386_v54 = vadd.f32 %v5289_v40, %v12321_v31 }
 0x730   : > { %13637 = vst [vmem:[#allocation23_spill] sm:$0xff] %v12335_v25  ;;  %13638 = vst [vmem:[#allocation44_spill] sm:$0xff] %v12337_v14  ;;  %v5291_v42 = vpop.f32.mrf.mxu0  ;;  %v5470_v32 = vmin.f32 %v12335_v25, 20.0  ;;  %v12347_v18 = vmul.f32 100.0, %v12337_v14  ;;  %v12349_v39 = vadd.f32 %v5398_v51, %v5159_v6  ;;  %vm5695_vm1 = vcmp.gt.f32.partialorder %v12340_v61, 20.0 }
 0x731   : > { %v5402_v15 = vpop.f32.mrf.mxu1  ;;  %v5511_v59 = vmul.f32 1.442695, %v5471_v53  ;;  %v5472_v43 = vmin.f32 %v12353_v16, 20.0  ;;  %6858 = vpow2.f32 %v5505_v27  ;;  %v12401_v58 = vadd.f32 %v5291_v42, %v12321_v31 }
 0x732   : > { %13639 = vst [vmem:[#allocation19_spill] sm:$0xff] %v12347_v18  ;;  %13640 = vst [vmem:[#allocation6_spill] sm:$0xff] %v12349_v39  ;;  %v5295_v29 = vpop.f32.mrf.mxu0  ;;  %v5509_v3 = vmul.f32 1.442695, %v5470_v32  ;;  %v5473_v63 = vmin.f32 %v12347_v18, 20.0  ;;  %v12363_v34 = vmul.f32 100.0, %v12349_v39  ;;  %v12398_v11 = vadd.f32 %v5402_v15, %v12321_v31 }
 0x733   : > { %v5404_v19 = vpop.f32.mrf.mxu1  ;;  %v5513_v37 = vmul.f32 1.442695, %v5472_v43  ;;  %13654 = vst [vmem:[#allocation76_spill] sm:$0xff] %v12401_v58  ;;  %v12405_v49 = vmul.f32 100.0, %v12386_v54  ;;  %v12412_v51 = vadd.f32 %v5295_v29, %v12323_v35  ;;  %v5499_v42 = vmul.f32 1.442695, %v5465_v38 }
 0x734   : > { %13644 = vst [vmem:[#allocation29_spill] sm:$0xff] %v12363_v34  ;;  %v5297_v62 = vpop.f32.mrf.mxu0  ;;  %6860 = vpow2.f32 %v5509_v3  ;;  %v5515_v46 = vmul.f32 1.442695, %v5473_v63  ;;  %v5474_v47 = vmin.f32 %v12363_v34, 20.0  ;;  %13653 = vst [vmem:[#allocation51_spill] sm:$0xff] %v12398_v11  ;;  %v12408_v6 = vadd.f32 %v5404_v19, %v12321_v31  ;;  %v13686_v61 = vld [vmem:[#allocation32_spill] sm:$0xff] }
 0x735   : > { %v5408_v17 = vpop.f32.mrf.mxu1  ;;  %6862 = vpow2.f32 %v5511_v59  ;;  %13656 = vst [vmem:[#allocation25_spill] sm:$0xff] %v12412_v51  ;;  %v5469_v15 = vmin.f32 %v12395_v20, 20.0  ;;  %v12418_v26 = vmul.f32 100.0, %v12398_v11  ;;  %v12421_v32 = vmul.f32 100.0, %v12401_v58 }
 0x736   : > { %v5301_v55 = vpop.f32.mrf.mxu0  ;;  %6864 = vpow2.f32 %v5515_v46  ;;  %v5517_v56 = vmul.f32 1.442695, %v5474_v47  ;;  %13655 = vst [vmem:[#allocation72_spill] sm:$0xff] %v12408_v6  ;;  %v5501_v53 = vmul.f32 1.442695, %v5466_v50  ;;  %v5475_v19 = vmin.f32 %v12405_v49, 20.0 }
 0x737   : > { %v5410_v8 = vpop.f32.mrf.mxu1  ;;  %6866 = vpow2.f32 %v5513_v37  ;;  %v12425_v29 = vmul.f32 100.0, %v12408_v6  ;;  %v5503_v27 = vmul.f32 1.442695, %v5467_v2  ;;  %v12428_v3 = vmul.f32 100.0, %v12412_v51 }
 0x738   : > { %v5303_v24 = vpop.f32.mrf.mxu0  ;;  %6868 = vpow2.f32 %v5517_v56  ;;  %v12431_v63 = vadd.f32 %v5408_v17, %v12323_v35  ;;  %v5507_v43 = vmul.f32 1.442695, %v5469_v15  ;;  %v12434_v46 = vadd.f32 %v5297_v62, %v12323_v35 }
 0x739   : > { %v12414_v40 = vpop.f32.mrf.mxu1  ;;  %6870 = vpow2.f32 %v5495_v44  ;;  %v5477_v37 = vmin.f32 %v12418_v26, 20.0  ;;  %v5476_v13 = vmin.f32 %v12421_v32, 20.0  ;;  %v5519_v56 = vmul.f32 1.442695, %v5475_v19 }
 0x73a   : > { %v5307_v31 = vpop.f32.mrf.mxu0  ;;  %13657 = vst [vmem:[#allocation24_spill] sm:$0xff] %v12431_v63  ;;  %6872 = vpow2.f32 %v5499_v42  ;;  %13658 = vst [vmem:[#allocation46_spill] sm:$0xff] %v12434_v46  ;;  %v5478_v50 = vmin.f32 %v12425_v29, 20.0  ;;  %v5479_v44 = vmin.f32 %v12428_v3, 20.0  ;;  %v12441_v2 = vmul.f32 100.0, %v12431_v63 }
 0x73b   : > { %v5416_v59 = vpop.f32.mrf.mxu1  ;;  %6874 = vpow2.f32 %v5497_v4  ;;  %v12444_v62 = vadd.f32 %v5410_v8, %v12323_v35  ;;  %v12447_v4 = vmul.f32 100.0, %v12434_v46  ;;  %v5523_v10 = vmul.f32 1.442695, %v5477_v37 }
 0x73c   : > { %v5309_v38 = vpop.f32.mrf.mxu0  ;;  %6876 = vpow2.f32 %v5501_v53  ;;  %v12450_v53 = vadd.f32 %v5301_v55, %v12314_v12  ;;  %v12453_v36 = vadd.f32 %v5303_v24, %v12314_v12  ;;  %v5525_v35 = vmul.f32 1.442695, %v5478_v50 }
 0x73d   : > { %6878 = vpow2.f32 %v5503_v27  ;;  %13659 = vst [vmem:[#allocation48_spill] sm:$0xff] %v12444_v62  ;;  %v5420_v42 = vpop.f32.mrf.mxu1  ;;  %v5521_v27 = vmul.f32 1.442695, %v5476_v13  ;;  %v12456_v8 = vadd.f32 %v5307_v31, %v12312_v5  ;;  %v12460_v55 = vmul.f32 100.0, %v12444_v62 }
 0x73e   : > { %v6859_v47 = vpop.eup %6858  ;;  %6880 = vpow2.f32 %v5507_v43  ;;  %13660 = vst [vmem:[#allocation60_spill] sm:$0xff] %v12450_v53  ;;  %13661 = vst [vmem:[#allocation82_spill] sm:$0xff] %v12453_v36  ;;  %v5313_v22 = vpop.f32.mrf.mxu0  ;;  %v12463_v37 = vadd.f32 %v5309_v38, %v12312_v5  ;;  %v5480_v13 = vmin.f32 %v12447_v4, 20.0  ;;  %v12473_v50 = vmul.f32 100.0, %v12453_v36 }
 0x73f   : > { %v5564_v15 = vadd.f32 1.0, %v6859_v47  ;;  %6882 = vpow2.f32 %v5519_v56  ;;  %v5527_v47 = vmul.f32 1.442695, %v5479_v44  ;;  %v5422_v24 = vpop.f32.mrf.mxu1  ;;  %v12470_v31 = vadd.f32 %v5313_v22, %v12319_v7 }
 0x740   : > { %v12482_v21 = vadd.f32 %v5422_v24, %v12312_v5  ;;  %v5482_v22 = vmin.f32 %v12460_v55, 20.0  ;;  %v5484_v0 = vmin.f32 %v12473_v50, 20.0  ;;  %v5315_v33 = vpop.f32.mrf.mxu0  ;;  %v5529_v25 = vmul.f32 1.442695, %v5480_v13 }
 0x741   : > { %v6861_v30 = vpop.eup %6860  ;;  %6884 = vlog2.f32 %v5564_v15  ;;  %v12479_v15 = vmul.f32 100.0, %v12456_v8  ;;  %vm5699_vm13 = vcmp.gt.f32.partialorder %v12405_v49, 20.0  ;;  %vm5696_vm9 = vcmp.gt.f32.partialorder %v12353_v16, 20.0 }
 0x742   : > { %v6863_v17 = vpop.eup %6862  ;;  %v5566_v19 = vadd.f32 1.0, %v6861_v30  ;;  %v12467_v30 = vmul.f32 100.0, %v12450_v53  ;;  %13663 = vst [vmem:[#allocation78_spill] sm:$0xff] %v12482_v21  ;;  %vm5708_vm15 = vcmp.gt.f32.partialorder %v12473_v50, 20.0  ;;  %vm5700_vm5 = vcmp.gt.f32.partialorder %v12421_v32, 20.0 }
 0x743   : > { %v6865_v48 = vpop.eup %6864  ;;  %v5567_v9 = vadd.f32 1.0, %v6863_v17  ;;  %v12476_v17 = vadd.f32 %v5420_v42, %v12312_v5  ;;  %v12499_v5 = vmul.f32 100.0, %v12470_v31  ;;  %vm5711_vm11 = vcmp.gt.f32.partialorder %v12479_v15, 20.0 }
 0x744   : > { %v6867_v43 = vpop.eup %6866  ;;  %6886 = vlog2.f32 %v5566_v19  ;;  %v5569_v56 = vadd.f32 1.0, %v6865_v48  ;;  %v12487_v48 = vadd.f32 %v12414_v40, %v12314_v12  ;;  %v12490_v19 = vmul.f32 100.0, %v12463_v37 }
 0x745   : > { %13662 = vst [vmem:[#allocation64_spill] sm:$0xff] %v12476_v17  ;;  %v6869_v38 = vpop.eup %6868  ;;  %6888 = vlog2.f32 %v5567_v9  ;;  %v5568_v44 = vadd.f32 1.0, %v6867_v43  ;;  %v5483_v9 = vmin.f32 %v12467_v30, 20.0  ;;  %v12496_v43 = vadd.f32 %v5416_v59, %v12314_v12 }
 0x746   : > { %6890 = vpow2.f32 %v5523_v10  ;;  %13664 = vst [vmem:[#allocation62_spill] sm:$0xff] %v12487_v48  ;;  %v12492_v42 = vpop.eup %6870  ;;  %v5426_v10 = vpop.f32.mrf.mxu1  ;;  %v5570_v40 = vadd.f32 1.0, %v6869_v38  ;;  %v12505_v20 = vmul.f32 100.0, %v12476_v17  ;;  %v5487_v12 = vmin.f32 %v12479_v15, 20.0 }
 0x747   : > { %6892 = vpow2.f32 %v5521_v27  ;;  %13665 = vst [vmem:[#allocation75_spill] sm:$0xff] %v12496_v43  ;;  %v12501_v24 = vpop.eup %6872  ;;  %v12511_v59 = vmul.f32 100.0, %v12482_v21  ;;  %v5488_v38 = vmin.f32 %v12490_v19, 20.0  ;;  %v12517_v52 = vadd.f32 %v5426_v10, %v12319_v7 }
 0x748   : > { %6894 = vlog2.f32 %v5569_v56  ;;  %v12507_v27 = vpop.eup %6874  ;;  %v5533_v56 = vmul.f32 1.442695, %v5482_v22  ;;  %v5535_v39 = vmul.f32 1.442695, %v5483_v9  ;;  %v5491_v13 = vmin.f32 %v12499_v5, 20.0  ;;  %v5428_v41 = vpop.f32.mrf.mxu1 }
 0x749   : > { %6896 = vlog2.f32 %v5568_v44  ;;  %v12513_v14 = vpop.eup %6876  ;;  %v12523_v44 = vadd.f32 %v5315_v33, %v12319_v7  ;;  %v12528_v22 = vmul.f32 100.0, %v12496_v43  ;;  %v5489_v10 = vmin.f32 %v12505_v20, 20.0 }
 0x74a   : > { %6898 = vpow2.f32 %v5525_v35  ;;  %v12519_v57 = vpop.eup %6878  ;;  %v5537_v35 = vmul.f32 1.442695, %v5484_v0  ;;  %v12532_v11 = vmul.f32 100.0, %v12487_v48  ;;  %v5490_v9 = vmin.f32 %v12511_v59, 20.0 }
 0x74b   : > { %6900 = vpow2.f32 %v5527_v47  ;;  %v12525_v34 = vpop.eup %6880  ;;  %v5543_v47 = vmul.f32 1.442695, %v5487_v12  ;;  %v5545_v33 = vmul.f32 1.442695, %v5488_v38  ;;  %v12536_v6 = vmul.f32 100.0, %v12517_v52 }
 0x74c   : > { %6902 = vlog2.f32 %v5570_v40  ;;  %v6883_v60 = vpop.eup %6882  ;;  %v12539_v0 = vadd.f32 %v5428_v41, %v12319_v7  ;;  %v5551_v40 = vmul.f32 1.442695, %v5491_v13  ;;  %v12542_v63 = vmul.f32 100.0, %v12523_v44 }
 0x74d   : > { %6904 = vpow2.f32 %v5529_v25  ;;  %v5486_v12 = vmin.f32 %v12528_v22, 20.0  ;;  %v5547_v28 = vmul.f32 1.442695, %v5489_v10  ;;  %v5549_v38 = vmul.f32 1.442695, %v5490_v9 }
 0x74e   : > { %6906 = vpow2.f32 %v5533_v56  ;;  %v12544_v25 = vpop.eup %6884  ;;  %v5485_v56 = vmin.f32 %v12532_v11, 20.0  ;;  %v13666_v7 = vmin.f32 %v12441_v2, 20.0  ;;  %v12556_v13 = vmul.f32 100.0, %v12539_v0 }
 0x74f   : > { %6908 = vpow2.f32 %v5535_v39  ;;  %v5493_v39 = vmin.f32 %v12536_v6, 20.0  ;;  %v5571_v48 = vadd.f32 1.0, %v6883_v60  ;;  %v5492_v10 = vmin.f32 %v12542_v63, 20.0 }
 0x750   : > { %6910 = vpow2.f32 %v5537_v35  ;;  %v5531_v41 = vmul.f32 1.442695, %v13666_v7  ;;  %v5541_v43 = vmul.f32 1.442695, %v5486_v12  ;;  %v5539_v9 = vmul.f32 1.442695, %v5485_v56 }
 0x751   : > { %v12547_v62 = vpop.eup %6886  ;;  %6912 = vpow2.f32 %v5543_v47  ;;  %v5494_v7 = vmin.f32 %v12556_v13, 20.0  ;;  %v5553_v45 = vmul.f32 1.442695, %v5492_v10  ;;  %vm5716_vm8 = vcmp.gt.f32.partialorder %v12542_v63, 20.0 }
 0x752   : > { %v12550_v58 = vpop.eup %6888  ;;  %6914 = vpow2.f32 %v5545_v33  ;;  %v5555_v33 = vmul.f32 1.442695, %v5493_v39  ;;  %vm5715_vm2 = vcmp.gt.f32.partialorder %v12499_v5, 20.0  ;;  %vm5712_vm6 = vcmp.gt.f32.partialorder %v12490_v19, 20.0 }
 0x753   : > { %v6891_v35 = vpop.eup %6890  ;;  %6916 = vpow2.f32 %v5551_v40  ;;  %v5557_v56 = vmul.f32 1.442695, %v5494_v7  ;;  %vm5718_vm14 = vcmp.gt.f32.partialorder %v12556_v13, 20.0  ;;  %vm5717_vm10 = vcmp.gt.f32.partialorder %v12536_v6, 20.0 }
 0x754   : > { %v6893_v51 = vpop.eup %6892  ;;  %6918 = vpow2.f32 %v5547_v28  ;;  %v5573_v40 = vadd.f32 1.0, %v6891_v35  ;;  %vm5707_vm12 = vcmp.gt.f32.partialorder %v12467_v30, 20.0  ;;  %vm5714_vm0 = vcmp.gt.f32.partialorder %v12511_v59, 20.0 }
 0x755   : > { %v12559_v47 = vpop.eup %6894  ;;  %6920 = vpow2.f32 %v5549_v38  ;;  %v5572_v12 = vadd.f32 1.0, %v6893_v51  ;;  %vm5713_vm4 = vcmp.gt.f32.partialorder %v12505_v20, 20.0  ;;  %vm5710_vm3 = vcmp.gt.f32.partialorder %v12528_v22, 20.0 }
 0x756   : > { %v12561_v46 = vpop.eup %6896  ;;  %6922 = vpow2.f32 %v5531_v41  ;;  %vm5705_vm7 = vcmp.gt.f32.partialorder %v12441_v2, 20.0  ;;  %v13687_v2 = vld [vmem:[#allocation51_spill] sm:$0xff] }
 0x757   : > { %v6899_v17 = vpop.eup %6898  ;;  %6924 = vlog2.f32 %v5571_v48 }
 0x758   : > { %v6901_v60 = vpop.eup %6900  ;;  %6926 = vpow2.f32 %v5541_v43  ;;  %v5574_v21 = vadd.f32 1.0, %v6899_v17 }
 0x759   : > { %v12564_v53 = vpop.eup %6902  ;;  %6928 = vpow2.f32 %v5539_v9  ;;  %v5575_v39 = vadd.f32 1.0, %v6901_v60 }
 0x75a   : > { %v6905_v28 = vpop.eup %6904  ;;  %6930 = vpow2.f32 %v5555_v33 }
 0x75b   : > { %v6907_v38 = vpop.eup %6906  ;;  %6932 = vpow2.f32 %v5553_v45  ;;  %v5576_v48 = vadd.f32 1.0, %v6905_v28 }
 0x75c   : > { %v6909_v41 = vpop.eup %6908  ;;  %6934 = vlog2.f32 %v5573_v40  ;;  %v5578_v36 = vadd.f32 1.0, %v6907_v38 }
 0x75d   : > { %v6911_v18 = vpop.eup %6910  ;;  %6936 = vlog2.f32 %v5572_v12  ;;  %v5579_v35 = vadd.f32 1.0, %v6909_v41 }
 0x75e   : > { %v6913_v10 = vpop.eup %6912  ;;  %6938 = vpow2.f32 %v5557_v56  ;;  %v5580_v9 = vadd.f32 1.0, %v6911_v18 }
 0x75f   : > { %v6915_v43 = vpop.eup %6914  ;;  %6940 = vlog2.f32 %v5574_v21  ;;  %v5583_v7 = vadd.f32 1.0, %v6913_v10 }
 0x760   : > { %v6917_v51 = vpop.eup %6916  ;;  %6942 = vlog2.f32 %v5575_v39  ;;  %v5584_v60 = vadd.f32 1.0, %v6915_v43 }
 0x761   : > { %v6919_v33 = vpop.eup %6918  ;;  %6944 = vlog2.f32 %v5576_v48  ;;  %v5587_v45 = vadd.f32 1.0, %v6917_v51 }
 0x762   : > { %v6921_v17 = vpop.eup %6920  ;;  %6946 = vlog2.f32 %v5578_v36  ;;  %v5585_v28 = vadd.f32 1.0, %v6919_v33 }
 0x763   : > { %v6923_v40 = vpop.eup %6922  ;;  %6948 = vlog2.f32 %v5579_v35  ;;  %v5586_v56 = vadd.f32 1.0, %v6921_v17 }
 0x764   : > { %v6925_v12 = vpop.eup %6924  ;;  %6950 = vlog2.f32 %v5580_v9  ;;  %v5577_v9 = vadd.f32 1.0, %v6923_v40  ;;  %v5610_v40 = vmul.f32 0.6931472, %v12561_v46 }
 0x765   : > { %v6927_v38 = vpop.eup %6926  ;;  %6952 = vlog2.f32 %v5583_v7 }
 0x766   : > { %v6929_v21 = vpop.eup %6928  ;;  %6954 = vlog2.f32 %v5587_v45  ;;  %v5582_v39 = vadd.f32 1.0, %v6927_v38  ;;  %v5559_v38 = vadd.f32 1.0, %v12492_v42  ;;  %v5602_v42 = vmul.f32 0.6931472, %v12544_v25 }
 0x767   : > { %v6931_v41 = vpop.eup %6930  ;;  %6956 = vlog2.f32 %v5584_v60  ;;  %v5581_v36 = vadd.f32 1.0, %v6929_v21  ;;  %v5563_v60 = vadd.f32 1.0, %v12519_v57  ;;  %v5616_v21 = vmul.f32 0.6931472, %v6925_v12 }
 0x768   : > { %v6933_v18 = vpop.eup %6932  ;;  %6958 = vlog2.f32 %v5585_v28  ;;  %v5589_v48 = vadd.f32 1.0, %v6931_v41  ;;  %v5562_v57 = vadd.f32 1.0, %v12513_v14  ;;  %v5561_v12 = vadd.f32 1.0, %v12501_v24 }
 0x769   : > { %v6935_v10 = vpop.eup %6934  ;;  %6960 = vlog2.f32 %v5586_v56  ;;  %v5588_v51 = vadd.f32 1.0, %v6933_v18  ;;  %v5560_v56 = vadd.f32 1.0, %v12507_v27  ;;  %v5614_v18 = vmul.f32 0.6931472, %v12564_v53 }
 0x76a   : > { %v6937_v35 = vpop.eup %6936  ;;  %6962 = vlog2.f32 %v5589_v48  ;;  %v5667_v46 = vmul.f32 0.01, %v5616_v21  ;;  %v12586_v24 = vmul.f32 0.6931472, %v6935_v10 }
 0x76b   : > { %v6939_v43 = vpop.eup %6938  ;;  %6964 = vlog2.f32 %v5588_v51  ;;  %v12584_v25 = vmul.f32 0.6931472, %v6937_v35 }
 0x76c   : > { %v6941_v33 = vpop.eup %6940  ;;  %6966 = vlog2.f32 %v5582_v39  ;;  %v5590_v7 = vadd.f32 1.0, %v6939_v43  ;;  %v5608_v39 = vmul.f32 0.6931472, %v12550_v58  ;;  %v12579_v58 = vmul.f32 0.01, %v5614_v18 }
 0x76d   : > { %v6943_v17 = vpop.eup %6942  ;;  %6968 = vlog2.f32 %v5581_v36  ;;  %v5565_v36 = vadd.f32 1.0, %v12525_v34  ;;  %v5664_v34 = vmul.f32 0.01, %v5610_v40  ;;  %v5669_v22 = vmul.f32 0.01, %v12586_v24 }
 0x76e   : > { %v6945_v45 = vpop.eup %6944  ;;  %6970 = vlog2.f32 %v5590_v7  ;;  %13667 = vst [vmem:[#allocation77_spill] sm:$0xff] %v12579_v58  ;;  %v12581_v14 = vmul.f32 0.01, %v5608_v39  ;;  %v5624_v35 = vmul.f32 0.6931472, %v6943_v17 }
 0x76f   : > { %v6947_v28 = vpop.eup %6946  ;;  %6972 = vlog2.f32 %v5577_v9  ;;  %v12589_v9 = vmul.f32 0.6931472, %v12559_v47  ;;  %v12599_v47 = vmul.f32 0.6931472, %v6941_v33  ;;  %v5626_v39 = vmul.f32 0.6931472, %v6945_v45 }
 0x770   : > { %v6949_v41 = vpop.eup %6948  ;;  %6974 = vlog2.f32 %v5563_v60  ;;  %v5671_v19 = vmul.f32 0.01, %v5624_v35  ;;  %v13670_v35 = vld [vmem:[#allocation78_spill] sm:$0xff] }
 0x771   : > { %v6951_v48 = vpop.eup %6950  ;;  %6976 = vlog2.f32 %v5560_v56  ;;  %v12595_v56 = vmul.f32 0.6931472, %v12547_v62  ;;  %v5670_v20 = vmul.f32 0.01, %v12599_v47  ;;  %v13683_v47 = vld [vmem:[#allocation42_spill] sm:$0xff] }
 0x772   : > { %v6953_v51 = vpop.eup %6952  ;;  %6978 = vlog2.f32 %v5559_v38  ;;  %v12592_v38 = vmul.f32 0.01, %v5602_v42  ;;  %v5665_v24 = vmul.f32 0.01, %v12589_v9  ;;  %v13688_v9 = vld [vmem:[#allocation29_spill] sm:$0xff] }
 0x773   : > { %v6955_v27 = vpop.eup %6954  ;;  %6980 = vlog2.f32 %v5565_v36  ;;  %v5640_v18 = vmul.f32 0.6931472, %v6953_v51  ;;  %v12603_v36 = vmul.f32 0.6931472, %v6947_v28 }
 0x774   : > { %v6957_v53 = vpop.eup %6956  ;;  %6982 = vlog2.f32 %v5562_v57  ;;  %v5648_v60 = vmul.f32 0.6931472, %v6955_v27  ;;  %v5634_v27 = vmul.f32 0.6931472, %v6951_v48  ;;  %v12614_v48 = vsel %vm5699_vm13, %v12386_v54, %v5667_v46 }
 0x775   : > { %v6959_v43 = vpop.eup %6958  ;;  %6984 = vlog2.f32 %v5561_v12  ;;  %v5642_v10 = vmul.f32 0.6931472, %v6957_v53  ;;  %v5632_v53 = vmul.f32 0.6931472, %v6949_v41  ;;  %v5679_v41 = vmul.f32 0.01, %v5640_v18 }
 0x776   : > { %v6961_v7 = vpop.eup %6960  ;;  %v5683_v33 = vmul.f32 0.01, %v5648_v60  ;;  %v5644_v58 = vmul.f32 0.6931472, %v6959_v43  ;;  %v5676_v46 = vmul.f32 0.01, %v5634_v27 }
 0x777   : > { %v6963_v21 = vpop.eup %6962  ;;  %v5646_v12 = vmul.f32 0.6931472, %v6961_v7  ;;  %v5680_v28 = vmul.f32 0.01, %v5642_v10  ;;  %v12621_v10 = vsel %vm5696_vm9, %v12342_v1, %v5664_v34  ;;  %vm5706_vm13 = vcmp.gt.f32.partialorder %v12460_v55, 20.0 }
 0x778   : > { %v6965_v40 = vpop.eup %6964  ;;  %v5652_v42 = vmul.f32 0.6931472, %v6963_v21  ;;  %v5747_v1 = vsel %vm5715_vm2, %v12470_v31, %v5683_v33  ;;  %v5675_v34 = vmul.f32 0.01, %v5632_v53  ;;  %vm5702_vm9 = vcmp.gt.f32.partialorder %v12425_v29, 20.0 }
 0x779   : > { %v6967_v62 = vpop.eup %6966  ;;  %v5650_v57 = vmul.f32 0.6931472, %v6965_v40  ;;  %v5682_v16 = vmul.f32 0.01, %v5646_v12  ;;  %v5744_v63 = vsel %vm5712_vm6, %v12463_v37, %v5680_v28  ;;  %v5743_v5 = vsel %vm5711_vm11, %v12456_v8, %v5679_v41  ;;  %v13669_v8 = vld [vmem:[#allocation19_spill] sm:$0xff]  ;;  %v13671_v12 = vld [vmem:[#allocation60_spill] sm:$0xff] }
 0x77a   : > { %v6969_v17 = vpop.eup %6968  ;;  %v5638_v60 = vmul.f32 0.6931472, %v6967_v62  ;;  %v5685_v49 = vmul.f32 0.01, %v5652_v42  ;;  %v5672_v62 = vmul.f32 0.01, %v5626_v39 }
 0x77b   : > { %v6971_v51 = vpop.eup %6970  ;;  %v5684_v45 = vmul.f32 0.01, %v5650_v57  ;;  %v5636_v43 = vmul.f32 0.6931472, %v6969_v17  ;;  %vm5691_vm2 = vcmp.gt.f32.partialorder %v12390_v23, 20.0  ;;  %v13668_v39 = vld [vmem:[#allocation82_spill] sm:$0xff]  ;;  %v5746_v33 = vsel %vm5714_vm0, %v13670_v35, %v5682_v16 }
 0x77c   : > { %v6973_v21 = vpop.eup %6972  ;;  %v5654_v7 = vmul.f32 0.6931472, %v6971_v51  ;;  %v5678_v27 = vmul.f32 0.01, %v5638_v60  ;;  %v5668_v17 = vmul.f32 0.01, %v12584_v25 }
 0x77d   : > { %v5748_v54 = vsel %vm5716_vm8, %v12523_v44, %v5684_v45  ;;  %v6975_v18 = vpop.eup %6974  ;;  %v5681_v44 = vmul.f32 0.01, %v5644_v58  ;;  %v5628_v57 = vmul.f32 0.6931472, %v6973_v21  ;;  %vm5701_vm8 = vcmp.gt.f32.partialorder %v12418_v26, 20.0  ;;  %v13672_v51 = vld [vmem:[#allocation74_spill] sm:$0xff] }
 0x77e   : > { %5777 = vmatprep.subr.mxu0 %v5748_v54  ;;  %v5686_v40 = vmul.f32 0.01, %v5654_v7  ;;  %v6977_v42 = vpop.eup %6976  ;;  %v5749_v58 = vsel %vm5717_vm10, %v12517_v52, %v5685_v49  ;;  %v5677_v13 = vmul.f32 0.01, %v5636_v43  ;;  %vm5697_vm6 = vcmp.gt.f32.partialorder %v13669_v8, 20.0  ;;  %v13673_v25 = vld [vmem:[#allocation64_spill] sm:$0xff] }
 0x77f   : > { %5778 = vmatpush1.msra.mxu0 %v5747_v1  ;;  %v6979_v37 = vpop.eup %6978  ;;  %v5739_v52 = vsel %vm5707_vm12, %v13671_v12, %v5675_v34  ;;  %v5674_v6 = vmul.f32 0.01, %v12603_v36  ;;  %v5600_v50 = vmul.f32 0.6931472, %v6975_v18  ;;  %vm5687_vm11 = vcmp.gt.f32.partialorder %v13672_v51, 20.0  ;;  %v13674_v28 = vld [vmem:[#allocation46_spill] sm:$0xff] }
 0x780   : > { %v5750_v31 = vsel %vm5718_vm14, %v12539_v0, %v5686_v40  ;;  %5779 = vmatprep.subr.mxu0 %v5744_v63  ;;  %v5740_v0 = vsel %vm5708_vm15, %v13668_v39, %v5676_v46  ;;  %v6981_v15 = vpop.eup %6980  ;;  %v5745_v45 = vsel %vm5713_vm4, %v13673_v25, %v5681_v44  ;;  %vm13675_vm14 = vcmp.gt.f32.partialorder %v12447_v4, 20.0  ;;  %v13676_v41 = vld [vmem:[#allocation75_spill] sm:$0xff]  ;;  %v13677_v60 = vld [vmem:[#allocation25_spill] sm:$0xff]  ;;  %v13679_v46 = vld [vmem:[#allocation62_spill] sm:$0xff] }
 0x781   : > { %5848 = vmatprep.subr.mxu1 %v5750_v31  ;;  %5780 = vmatpush1.msra.mxu0 %v5743_v5  ;;  %v6983_v53 = vpop.eup %6982  ;;  %v5736_v59 = vsel %vm13675_vm14, %v13674_v28, %v5672_v62  ;;  %v5673_v21 = vmul.f32 0.01, %v5628_v57  ;;  %v5594_v7 = vmul.f32 0.6931472, %v6977_v42  ;;  %v5742_v36 = vsel %vm5710_vm3, %v13676_v41, %v5678_v27  ;;  %v13681_v43 = vld [vmem:[#allocation76_spill] sm:$0xff]  ;;  %v13690_v27 = vld [vmem:[#allocation77_spill] sm:$0xff]  ;;  %v5756_v41 = vpop.permute.xlu1 %5755 }
 0x782   : > { %5849 = vmatpush1.msra.mxu1 %v5749_v58  ;;  %5781 = vmatprep.subr.mxu0 %v5740_v0  ;;  %v6985_v30 = vpop.eup %6984  ;;  %vm13678_vm10 = vcmp.gt.f32.partialorder %v12428_v3, 20.0  ;;  %v5592_v49 = vmul.f32 0.6931472, %v6979_v37  ;;  %vm13680_vm15 = vcmp.gt.f32.partialorder %v12532_v11, 20.0  ;;  %v5732_v40 = vsel %vm5700_vm5, %v13681_v43, %v5668_v17  ;;  %v13682_v16 = vld [vmem:[#allocation48_spill] sm:$0xff]  ;;  %v13693_v58 = vld [vmem:[#allocation79_spill] sm:$0xff] }
 0x783   : > { %5850 = vmatprep.subr.mxu1 %v5746_v33  ;;  %5782 = vmatpush1.msra.mxu0 %v5739_v52  ;;  %v5735_v54 = vsel %vm13678_vm10, %v13677_v60, %v5671_v19  ;;  %v5741_v4 = vsel %vm13680_vm15, %v13679_v46, %v5677_v13  ;;  %v5604_v1 = vmul.f32 0.6931472, %v6981_v15  ;;  %v5738_v3 = vsel %vm5706_vm13, %v13682_v16, %v5674_v6  ;;  %v13684_v63 = vld [vmem:[#allocation24_spill] sm:$0xff]  ;;  %v13695_v13 = vld [vmem:[#allocation23_spill] sm:$0xff]  ;;  %v13697_v23 = vld [vmem:[#allocation53_spill] sm:$0xff] }
 0x784   : > { %5851 = vmatpush1.msra.mxu1 %v5745_v45  ;;  %5783 = vmatprep.subr.mxu0 %v5736_v59  ;;  %v5727_v11 = vsel %vm5695_vm1, %v13683_v47, %v12581_v14  ;;  %v5659_v34 = vmul.f32 0.01, %v5600_v50  ;;  %v5598_v18 = vmul.f32 0.6931472, %v6983_v53  ;;  %v5737_v32 = vsel %vm5705_vm7, %v13684_v63, %v5673_v21  ;;  %v13685_v62 = vld [vmem:[#allocation72_spill] sm:$0xff]  ;;  %v13698_v33 = vld [vmem:[#allocation39_spill] sm:$0xff] }
 0x785   : > { %5852 = vmatprep.subr.mxu1 %v5742_v36  ;;  %5784 = vmatpush1.msra.mxu0 %v5735_v54  ;;  %v5656_v44 = vmul.f32 0.01, %v5594_v7  ;;  %v5596_v55 = vmul.f32 0.6931472, %v6985_v30  ;;  %v5734_v57 = vsel %vm5702_vm9, %v13685_v62, %v5670_v20  ;;  %vm5692_vm12 = vcmp.gt.f32.partialorder %v13686_v61, 20.0  ;;  %v13689_v31 = vld [vmem:[#allocation36_spill] sm:$0xff] }
 0x786   : > { %5853 = vmatpush1.msra.mxu1 %v5741_v4  ;;  %5785 = vmatprep.subr.mxu0 %v5732_v40  ;;  %v5662_v14 = vmul.f32 0.01, %v12595_v56  ;;  %v5655_v42 = vmul.f32 0.01, %v5592_v49  ;;  %vm5698_vm0 = vcmp.gt.f32.partialorder %v13688_v9, 20.0  ;;  %v5724_v5 = vsel %vm5692_vm12, %v13689_v31, %v12592_v38  ;;  %v13692_v37 = vld [vmem:[#allocation28_spill] sm:$0xff] }
 0x787   : > { %5854 = vmatprep.subr.mxu1 %v5738_v3  ;;  %5786 = vmatpush1.msra.mxu0 %v12614_v48  ;;  %v5733_v48 = vsel %vm5701_vm8, %v13687_v2, %v5669_v22  ;;  %v5661_v29 = vmul.f32 0.01, %v5604_v1  ;;  %v5723_v56 = vsel %vm5691_vm2, %v13692_v37, %v5659_v34  ;;  %vm5688_vm4 = vcmp.gt.f32.partialorder %v13693_v58, 20.0  ;;  %v13694_v39 = vld [vmem:[#allocation44_spill] sm:$0xff]  ;;  %v13696_v38 = vld [vmem:[#allocation14_spill] sm:$0xff]  ;;  %v13699_v52 = vld [vmem:[#allocation43_spill] sm:$0xff] }
 0x788   : > { %5855 = vmatpush1.msra.mxu1 %v5737_v32  ;;  %5787 = vmatprep.subr.mxu0 %v12621_v10  ;;  %v13691_v10 = vld [vmem:[#allocation6_spill] sm:$0xff]  ;;  %v5658_v26 = vmul.f32 0.01, %v5598_v18  ;;  %v5729_v0 = vsel %vm5697_vm6, %v13694_v39, %v5665_v24  ;;  %vm5694_vm5 = vcmp.gt.f32.partialorder %v13695_v13, 20.0  ;;  %v5720_v17 = vsel %vm5688_vm4, %v13696_v38, %v5656_v44  ;;  %v5751_v35 = vld [vmem:[%s12768_s2 + $0xc0] sm:$0x1] }
 0x789   : > { %5856 = vmatprep.subr.mxu1 %v5734_v57  ;;  %5788 = vmatpush1.msra.mxu0 %v5727_v11  ;;  %v5730_v19 = vsel %vm5698_vm0, %v13691_v10, %v13690_v27  ;;  %v5657_v15 = vmul.f32 0.01, %v5596_v55  ;;  %vm5693_vm1 = vcmp.gt.f32.partialorder %v13697_v23, 20.0  ;;  %v5726_v12 = vsel %vm5694_vm5, %v13698_v33, %v5662_v14  ;;  %v13700_v6 = vld [vmem:[#allocation45_spill] sm:$0xff]  ;;  %v13701_v53 = vld [vmem:[#allocation83_spill] sm:$0xff]  ;;  %v13702_v25 = vld [vmem:[#allocation38_spill] sm:$0xff] }
 0x78a   : > { %5857 = vmatpush1.msra.mxu1 %v5733_v48  ;;  %5789 = vmatprep.subr.mxu0 %v5724_v5  ;;  %v5719_v8 = vsel %vm5687_vm11, %v13699_v52, %v5655_v42  ;;  %v5725_v50 = vsel %vm5693_vm1, %v13700_v6, %v5661_v29  ;;  %vm5690_vm3 = vcmp.gt.f32.partialorder %v13701_v53, 20.0  ;;  %vm5689_vm7 = vcmp.gt.f32.partialorder %v13702_v25, 20.0  ;;  %v13703_v45 = vld [vmem:[#allocation80_spill] sm:$0xff]  ;;  %v13705_v59 = vld [vmem:[#allocation73_spill] sm:$0xff] }
 0x78b   : > { %5858 = vmatprep.subr.mxu1 %v5730_v19  ;;  %5790 = vmatpush1.msra.mxu0 %v5723_v56  ;;  %v5722_v28 = vsel %vm5690_vm3, %v13703_v45, %v5658_v26  ;;  %vm13704_vm13 = vcmask 523264   ;;  %v5721_v21 = vsel %vm5689_vm7, %v13705_v59, %v5657_v15  ;;  %v7085_v51 = vmov 1966171168   ;;  %v13707_v46 = vld [vmem:[#allocation5_spill] sm:$0xff] }
 0x78c   : > { %5859 = vmatpush1.msra.mxu1 %v5729_v0  ;;  %5791 = vmatprep.subr.mxu0 %v5720_v17  ;;  %vm13706_vm9 = vmmov %vm13704_vm13  ;;  %v5910_v7 = vunpack.c.l.s4 %v7085_v51  ;;  %v13708_v34 = vlaneseq }
 0x78d   : > { %5860 = vmatprep.subr.mxu1 %v5726_v12  ;;  %5792 = vmatpush1.msra.mxu0 %v5719_v8 }
 0x78e   : > { %5861 = vmatpush1.msra.mxu1 %v5725_v50  ;;  %6180 = vmatmul.mubr.msk.f32.vlgmr.msra.gmra.mxu0 %vm13704_vm13, %v5751_v35  ;;  %v5911_v36 = vunpack.c.0.s8 %v5910_v7  ;;  %vm5934_vm8 = vcmp.lt.s32.totalorder %v13708_v34, 512 }
 0x78f   : > { %5862 = vmatprep.subr.mxu1 %v5722_v28 }
 0x790   : > { %5863 = vmatpush1.msra.mxu1 %v5721_v21  ;;  %v5914_v4 = vsub.s32 %v5911_v36, %v13707_v46 }
 0x791   : > { %6181 = vmatmul.mubr.msk.f32.vlgmr.msra.gmra.mxu1 %vm13706_vm9, %v5751_v35 }
 0x84e   : > { %v5827_v30 = vpop.f32.mrf.mxu0 }
 0x84f   : > { %v5828_v20 = vadd.f32 %v5827_v30, %v5756_v41 }
 0x850   : > { %v5829_v60 = vpop.f32.mrf.mxu0 }
 0x851   : > { %v5898_v54 = vpop.f32.mrf.mxu1  ;;  %v5830_v49 = vadd.f32 %v5829_v60, %v5756_v41 }
 0x852   : > { %v5899_v22 = vadd.f32 %v5898_v54, %v5756_v41 }
 0x853   : > { %v5907_v43 = vcombine.low %v5828_v20, %v5830_v49  ;;  %v5900_v40 = vpop.f32.mrf.mxu1 }
 0x854   : > { %v5901_v1 = vadd.f32 %v5900_v40, %v5756_v41 }
 0x855   : > { %v5915_v16 = vrot.slane %v5907_v43, %v5914_v4 }
 0x856   : > { %v5908_v3 = vcombine.low %v5899_v22, %v5901_v1 }
 0x858   : > { %v5922_v47 = vrot.slane %v5908_v3, %v5914_v4 }
 0x85a   : > { %v5923_v11 = vcombine.low %v5915_v16, %v5922_v47 }
 0x85c   : > { %v5930_v18 = vrot.slane %v5923_v11, %v5914_v4 }
 0x85e   : > { %5936 = vst.msk [vmem:[%s191_s5] sm:$0xf] %vm5934_vm8, %v5930_v18 }
 0x85f   : > { %7017 = shalt.err (!%p7014_p3)
}
 0x860   : > { %s7018_s14 = scalar_lea.hbm %s5950_s9, 64  ;;  %s7022_s23 = scalar_lea.hbm %s12770_s4, 256 }
 0x861   : > { %p7019_p4 = scmp.ne.s32.totalorder %s5950_s9, %s7018_s14  ;;  %p7023_p9 = scmp.lt.s32.totalorder %s5950_s9, %s12770_s4 }
 0x862   : > { %p7024_p10 = scmp.lt.s32.totalorder %s7022_s23, %s7018_s14 }
 0x863   : > { %p7020_p7 = pnand %p7019_p4, %p7150_p5 }
 0x864   : > { %p7025_p11 = por %p7024_p10, %p7023_p9 }
 0x865   : > { %p7021_p8 = pneg %p7020_p7 }
 0x867   : > { %p7026_p12 = pnand %p7025_p11, %p7021_p8 }
 0x869   : > { %7029 = shalt.err (!%p7026_p12)
}
 0x86a   : > { %6268 = dma.vmem_to_hbm [thread:$0]  (%p7150_p5), %s5953_s6, 64, %s5950_s9, %s5938_s10  }
 0x86b PF: > { %p6274_p13 = scmp.ge.s32.totalorder %s7064_s18, 2  ;;  %s5964_s29 = sand.u32 1, %s7052_s15  }
 0x86c   : > { %s5965_s30 = scalar_lea.sflag [#allocation3], %s5964_s29 }
 0x86d   : > { %p6271_p0 = pnand %p6274_p13, %p7154_p6 }
 0x86f   : > { %p6272_p1 = pneg %p6271_p0 }
 0x871   : > { %7047 = dma.done.wait (%p6272_p1), %s5965_s30, 64  }
 0x872   : > { %7049 = vsyncadd (%p6272_p1), %s5965_s30, 4294967232  ;;  %p14_p2 = scmp.ge.s32.totalorder %s7137_s21, 6   ;;  %s13709_s15 = smov %s7056_s16 }
 0x873   : > { %s13710_s16 = smov %s7060_s17  ;;  %s13711_s17 = smov %s7148_s24 }
 0x874   : > { %s13712_s18 = smov %s7137_s21  ;;  %16 = sbr.rel (!%p14_p2) target bundleno = 3 (0x3), region = 73 }
 0x879   :  { %5970 = vsyncpa [#allocation3], 1 }
 0x87a   :  { %5972 = vsyncpa [#allocation3 + $0x1], 1 }

</bundles_post_ra>
